<compile_context>
chip_gen: v7x
topology: tpu7x:2x2x1
jax: 0.10.0
libtpu: 0.0.40
codegen_flags: <defaults>
</compile_context>

<pallas_src>
import functools
from typing import NamedTuple

import jax
import jax.numpy as jnp
from jax.experimental import pallas as pl
from jax.experimental.pallas import tpu as pltpu

_LAYER_BLOCKS = (3, 4, 6, 3)          # resnet34
_LAYER_WIDTHS = (64, 128, 256, 512)
_BN_EPS = 1e-5

_VMEM_SPEC = pl.BlockSpec(memory_space=pltpu.MemorySpace.VMEM)


def _round_up(x, m):
    return (x + m - 1) // m * m


@functools.lru_cache(maxsize=1)
def _device_kind():
    try:
        return jax.devices()[0].device_kind.lower()
    except Exception:
        return ""


def _is_v5e():
    return "v5" in _device_kind()


def _is_v7():
    return "v7" in _device_kind()


@functools.lru_cache(maxsize=1)
def _vmem_limit():
    """Generation-aware scoped VMEM limit, queried lazily (not at import time)."""
    try:
        cap = int(pltpu.get_tpu_info().vmem_capacity_bytes)
        if cap:
            return int(min(cap * 3 // 4, 96 << 20))
    except Exception:
        pass
    return (40 << 20) if _is_v7() else (48 << 20)


def _mxu_k_tile():
    # v5e MXU is 4x(128x128) -> 128-deep contraction already fills it;
    # v6e/v7x are 2x(256x256) -> use 256-deep K tiles.
    return 128 if _is_v5e() else 256


class Act(NamedTuple):
    """Activation in persistent (rows, channels) layout: (N*H*W, Cp) bf16."""
    data: jax.Array
    n: int
    h: int
    w: int
    c: int            # logical channels; data.shape[1] may be padded to 128


# ----------------------------- Pallas kernels -----------------------------

def _bn_epilogue(x, g_ref, bb_ref, r_ref, o_ref, *, inv_m, relu, eps):
    """BatchNorm (training-mode batch stats) + optional residual add + optional ReLU.

    Stats use sum/sum-of-squares divided by the true row count so zero row-padding
    never corrupts them.  Padded output channels (gamma = beta = 0) stay exactly 0.
    """
    s1 = jnp.sum(x, axis=0, keepdims=True)
    mean = s1 * inv_m
    var = jnp.sum(x * x, axis=0, keepdims=True) * inv_m - mean * mean
    var = jnp.maximum(var, 0.0)
    y = (x - mean) * jax.lax.rsqrt(var + eps) * g_ref[...] + bb_ref[...]
    if r_ref is not None:
        y = y + r_ref[...].astype(jnp.float32)
    if relu:
        y = jnp.maximum(y, 0.0)
    o_ref[...] = y.astype(o_ref.dtype)


def _make_conv_bn_kernel(nsteps, m_true, relu, has_residual, eps):
    """Conv-as-matmul with fused BN(+add)(+ReLU) epilogue.  Grid = (N_tiles, K_steps)."""
    epi = functools.partial(_bn_epilogue, inv_m=1.0 / float(m_true), relu=relu, eps=eps)

    if nsteps == 1:
        # Single K step: no accumulator scratch, no zero/accumulate round trip.
        if has_residual:
            def kernel(a_ref, b_ref, g_ref, bb_ref, r_ref, o_ref):
                x = jnp.dot(a_ref[...], b_ref[...], preferred_element_type=jnp.float32)
                epi(x, g_ref, bb_ref, r_ref, o_ref)
        else:
            def kernel(a_ref, b_ref, g_ref, bb_ref, o_ref):
                x = jnp.dot(a_ref[...], b_ref[...], preferred_element_type=jnp.float32)
                epi(x, g_ref, bb_ref, None, o_ref)
        return kernel

    def _accumulate(a_ref, b_ref, acc_ref):
        k = pl.program_id(1)

        @pl.when(k == 0)
        def _():
            acc_ref[...] = jnp.zeros_like(acc_ref)

        acc_ref[...] += jnp.dot(a_ref[...], b_ref[...],
                                preferred_element_type=jnp.float32)
        return k

    if has_residual:
        def kernel(a_ref, b_ref, g_ref, bb_ref, r_ref, o_ref, acc_ref):
            k = _accumulate(a_ref, b_ref, acc_ref)

            @pl.when(k == nsteps - 1)
            def _():
                epi(acc_ref[...], g_ref, bb_ref, r_ref, o_ref)
    else:
        def kernel(a_ref, b_ref, g_ref, bb_ref, o_ref, acc_ref):
            k = _accumulate(a_ref, b_ref, acc_ref)

            @pl.when(k == nsteps - 1)
            def _():
                epi(acc_ref[...], g_ref, bb_ref, None, o_ref)
    return kernel


def _max9_kernel(*refs):
    o_ref = refs[-1]
    m = refs[0][...]
    for r in refs[1:-1]:
        m = jnp.maximum(m, r[...])
    o_ref[...] = m


def _fc_logsoftmax_kernel(x_ref, w_ref, b_ref, o_ref):
    logits = jnp.dot(x_ref[...], w_ref[...],
                     preferred_element_type=jnp.float32) + b_ref[...]
    m = jnp.max(logits, axis=-1, keepdims=True)
    s = logits - m
    lse = jnp.log(jnp.sum(jnp.exp(s), axis=-1, keepdims=True))
    o_ref[...] = (s - lse).astype(o_ref.dtype)


# ----------------------------- fused conv wrapper -----------------------------

def fused_conv_bn(patches, w_km, gamma, beta, *, relu, residual=None):
    """(M,K) @ (K,Cout) conv-as-matmul with BN(+residual)(+ReLU) fused as the epilogue.

    Returns (M, round_up(Cout, 128)) bf16; padded output channels are exact zeros.
    """
    M, K = patches.shape
    Cout = w_km.shape[1]
    Np = _round_up(Cout, 128)
    if residual is not None:
        assert residual.shape == (M, Np), (residual.shape, (M, Np))

    # K tiling: whole-K block when it comfortably fits VMEM, else MXU-depth tiles.
    if K <= 2048:
        tk = _round_up(K, 128)
    else:
        tk = _mxu_k_tile()
    Kp = _round_up(K, tk)
    nsteps = Kp // tk

    # Output-channel tiling: give v7x's two TensorCores >= 2 parallel tiles.
    tn = Np // 2 if (_is_v7() and Np >= 256) else Np
    ncol = Np // tn

    Mp = _round_up(max(M, 8), 8)

    a = patches.astype(jnp.bfloat16)
    if (Mp, Kp) != (M, K):
        a = jnp.pad(a, ((0, Mp - M), (0, Kp - K)))
    b = w_km.astype(jnp.bfloat16)
    if (Kp, Np) != (K, Cout):
        b = jnp.pad(b, ((0, Kp - K), (0, Np - Cout)))
    g = gamma.reshape(1, -1).astype(jnp.float32)
    bb = beta.reshape(1, -1).astype(jnp.float32)
    if Np != Cout:
        # zero gamma/beta keep the padded channels exactly zero after BN.
        g = jnp.pad(g, ((0, 0), (0, Np - Cout)))
        bb = jnp.pad(bb, ((0, 0), (0, Np - Cout)))

    args = [a, b, g, bb]
    in_specs = [
        pl.BlockSpec((Mp, tk), lambda n, k: (0, k)),
        pl.BlockSpec((tk, tn), lambda n, k: (k, n)),
        pl.BlockSpec((1, tn), lambda n, k: (0, n)),
        pl.BlockSpec((1, tn), lambda n, k: (0, n)),
    ]
    if residual is not None:
        r = residual.astype(jnp.bfloat16)
        if Mp != M:
            r = jnp.pad(r, ((0, Mp - M), (0, 0)))
        args.append(r)
        in_specs.append(pl.BlockSpec((Mp, tn), lambda n, k: (0, n)))

    scratch = [pltpu.VMEM((Mp, tn), jnp.float32)] if nsteps > 1 else []
    kernel = _make_conv_bn_kernel(nsteps, M, relu, residual is not None, _BN_EPS)

    out = pl.pallas_call(
        kernel,
        out_shape=jax.ShapeDtypeStruct((Mp, Np), jnp.bfloat16),
        grid_spec=pltpu.PrefetchScalarGridSpec(
            num_scalar_prefetch=0,
            grid=(ncol, nsteps),
            in_specs=in_specs,
            out_specs=pl.BlockSpec((Mp, tn), lambda n, k: (0, n)),
            scratch_shapes=scratch,
        ),
        compiler_params=pltpu.CompilerParams(
            dimension_semantics=("parallel", "arbitrary"),
            vmem_limit_bytes=_vmem_limit(),
        ),
    )(*args)
    if Mp != M:
        out = out[:M]
    return out


# ----------------------------- layout / im2col glue -----------------------------

def _im2col(act, kh, kw, stride, padding):
    """(M, Cp) activation -> ((N*Ho*Wo, C*kh*kw) bf16 patch matrix, Ho, Wo).

    Column order is tap-major / cin-minor and matches _weight_km below.
    """
    # TODO(synk): still XLA-side im2col (kh*kw-fold HBM expansion); replace with an
    # in-kernel shifted-window (implicit GEMM) conv for large inputs.
    x = act.data.reshape(act.n, act.h, act.w, -1)
    if x.shape[-1] != act.c:
        x = x[..., :act.c]                    # drop (zero) channel padding from K
    Ho = (act.h + 2 * padding - kh) // stride + 1
    Wo = (act.w + 2 * padding - kw) // stride + 1
    if padding:
        x = jnp.pad(x, ((0, 0), (padding, padding), (padding, padding), (0, 0)))
    taps = [x[:, i:i + stride * Ho:stride, j:j + stride * Wo:stride, :]
            for i in range(kh) for j in range(kw)]
    patches = taps[0] if len(taps) == 1 else jnp.concatenate(taps, axis=-1)
    return patches.reshape(act.n * Ho * Wo, act.c * kh * kw), Ho, Wo


def _weight_km(w):
    """(Cout, Cin, kh, kw) -> (kh*kw*Cin, Cout) matching _im2col column order."""
    cout, cin, kh, kw = w.shape
    return w.transpose(2, 3, 1, 0).reshape(kh * kw * cin, cout)


def conv_bn_act(act, w, gamma, beta, *, stride, padding, relu, residual=None):
    patches, ho, wo = _im2col(act, w.shape[2], w.shape[3], stride, padding)
    out = fused_conv_bn(patches, _weight_km(w), gamma, beta,
                        relu=relu, residual=residual)
    return Act(out, act.n, ho, wo, w.shape[0])


def maxpool_3x3_s2(act):
    """3x3 / stride-2 / pad-1 max pool in (M, Cp) layout.  9 shifted slices (no
    (9,M,C) stack in HBM) feed a single Pallas max-tree kernel."""
    n, h, w, c = act.n, act.h, act.w, act.c
    cp = act.data.shape[1]
    ho = (h + 2 - 3) // 2 + 1
    wo = (w + 2 - 3) // 2 + 1
    x = act.data.reshape(n, h, w, cp)
    xp = jnp.pad(x, ((0, 0), (1, 1), (1, 1), (0, 0)), constant_values=-jnp.inf)
    mo = n * ho * wo
    taps = [xp[:, i:i + 2 * ho:2, j:j + 2 * wo:2, :].reshape(mo, cp)
            for i in range(3) for j in range(3)]

    mp = _round_up(max(mo, 8), 8)
    if mp <= 1024:
        tm = mp
    else:
        tm = 512
        mp = _round_up(mo, tm)
    if mp != mo:
        taps = [jnp.pad(t, ((0, mp - mo), (0, 0))) for t in taps]

    y = pl.pallas_call(
        _max9_kernel,
        out_shape=jax.ShapeDtypeStruct((mp, cp), act.data.dtype),
        grid_spec=pltpu.PrefetchScalarGridSpec(
            num_scalar_prefetch=0,
            grid=(mp // tm,),
            in_specs=[pl.BlockSpec((tm, cp), lambda i: (i, 0))] * 9,
            out_specs=pl.BlockSpec((tm, cp), lambda i: (i, 0)),
        ),
        compiler_params=pltpu.CompilerParams(
            dimension_semantics=("parallel",),
            vmem_limit_bytes=_vmem_limit(),
        ),
    )(*taps)
    if mp != mo:
        y = y[:mo]
    return Act(y, n, ho, wo, c)


def fc_log_softmax(feats, w, b):
    """Fused Linear (feats @ W.T + b) + log_softmax; bf16 MXU operands, f32 math."""
    B, _ = feats.shape
    nc = w.shape[0]
    Bp = _round_up(max(B, 8), 8)
    Ncp = _round_up(nc, 128)
    x = feats.astype(jnp.bfloat16)
    if Bp != B:
        x = jnp.pad(x, ((0, Bp - B), (0, 0)))
    w_t = w.T.astype(jnp.bfloat16)
    bias = b.astype(jnp.float32).reshape(1, -1)
    if Ncp != nc:
        # zero weight columns + very negative bias -> exp() underflows for pad classes.
        w_t = jnp.pad(w_t, ((0, 0), (0, Ncp - nc)))
        bias = jnp.pad(bias, ((0, 0), (0, Ncp - nc)), constant_values=-1e30)
    out = pl.pallas_call(
        _fc_logsoftmax_kernel,
        out_shape=jax.ShapeDtypeStruct((Bp, Ncp), jnp.float32),
        in_specs=[_VMEM_SPEC] * 3,
        out_specs=_VMEM_SPEC,
        compiler_params=pltpu.CompilerParams(vmem_limit_bytes=_vmem_limit()),
    )(x, w_t, bias)
    return out[:B, :nc]


# ----------------------------- resnet34 forward -----------------------------

def basic_block(act, p, stride):
    out1 = conv_bn_act(act, p['conv1'], p['bn1_g'], p['bn1_b'],
                       stride=stride, padding=1, relu=True)
    if 'down_conv' in p:
        identity = conv_bn_act(act, p['down_conv'], p['down_g'], p['down_b'],
                               stride=stride, padding=0, relu=False)
    else:
        identity = act
    # conv2 + BN + residual add + ReLU fused in one pallas_call.
    return conv_bn_act(out1, p['conv2'], p['bn2_g'], p['bn2_b'],
                       stride=1, padding=1, relu=True, residual=identity.data)


def birdnet_forward(params, x):
    n, cin, h, w = x.shape
    # Single layout conversion at the model boundary (NCHW -> (M, C)).
    data = x.transpose(0, 2, 3, 1).reshape(n * h * w, cin).astype(jnp.bfloat16)
    act = Act(data, n, h, w, cin)

    act = conv_bn_act(act, params['conv1'], params['bn1_g'], params['bn1_b'],
                      stride=2, padding=3, relu=True)
    act = maxpool_3x3_s2(act)

    for li, blocks in enumerate(params['layers']):
        for bi, bp in enumerate(blocks):
            stride = 2 if (li > 0 and bi == 0) else 1
            act = basic_block(act, bp, stride)

    # TODO(synk): AdaptiveAvgPool2d((1,1)) kept as XLA glue (tiny reduction).
    feats = (act.data.astype(jnp.float32)
             .reshape(act.n, act.h * act.w, -1)[:, :, :act.c].mean(axis=1))
    return fc_log_softmax(feats, params['fc_w'], params['fc_b'])


# ----------------------------- deterministic init -----------------------------

def init_params(key, num_classes):
    keys = iter(jax.random.split(key, 64))

    def conv_w(cout, cin, k):
        fan_in = cin * k * k
        return jax.random.normal(next(keys), (cout, cin, k, k), jnp.float32) * (2.0 / fan_in) ** 0.5

    def bn(c):
        return jnp.ones((1, c), jnp.float32), jnp.zeros((1, c), jnp.float32)

    params = {'conv1': conv_w(64, 3, 7)}
    params['bn1_g'], params['bn1_b'] = bn(64)

    layers = []
    inplanes = 64
    for planes, nblocks in zip(_LAYER_WIDTHS, _LAYER_BLOCKS):
        blocks = []
        for bi in range(nblocks):
            stride = 2 if (bi == 0 and planes != 64) else 1
            bp = {'conv1': conv_w(planes, inplanes, 3),
                  'conv2': conv_w(planes, planes, 3)}
            bp['bn1_g'], bp['bn1_b'] = bn(planes)
            bp['bn2_g'], bp['bn2_b'] = bn(planes)
            if stride != 1 or inplanes != planes:
                bp['down_conv'] = conv_w(planes, inplanes, 1)
                bp['down_g'], bp['down_b'] = bn(planes)
            blocks.append(bp)
            inplanes = planes
        layers.append(blocks)
    params['layers'] = layers

    params['fc_w'] = jax.random.normal(next(keys), (num_classes, 512), jnp.float32) * 0.02
    params['fc_b'] = jnp.zeros((num_classes,), jnp.float32)
    return params


if __name__ == "__main__":
    key = jax.random.PRNGKey(0)
    pkey, xkey = jax.random.split(key)
    num_classes = 10
    params = init_params(pkey, num_classes)
    x = jax.random.normal(xkey, (2, 3, 32, 32), jnp.float32)   # small NCHW image batch

    fwd = jax.jit(birdnet_forward)
    out = jax.block_until_ready(fwd(params, x))

    assert out.shape == (2, num_classes), out.shape
    # log-softmax rows must exponentiate to a probability distribution
    assert bool(jnp.allclose(jnp.sum(jnp.exp(out), axis=1), 1.0, atol=1e-3))
    print("KERNEL_OK")
</pallas_src>

<mosaic_0001>
module attributes {stable_mosaic.version = 11 : i64} {
  func.func @kernel(%arg0: i32, %arg1: i32, %arg2: memref<512x256xbf16, #tpu.memory_space<vmem>>, %arg3: memref<256x128xbf16, #tpu.memory_space<vmem>>, %arg4: memref<1x128xf32, #tpu.memory_space<vmem>>, %arg5: memref<1x128xf32, #tpu.memory_space<vmem>>, %arg6: memref<512x128xbf16, #tpu.memory_space<vmem>>) attributes {dimension_semantics = [#tpu.dimension_semantics<parallel>, #tpu.dimension_semantics<arbitrary>], iteration_bounds = array<i64: 1, 1>, scalar_prefetch = 0 : i64, scratch_operands = 0 : i64, tpu.core_type = #tpu.core_type<tc>, window_params = [{transform_indices = @transform_0, window_bounds = array<i64: 512, 256>}, {transform_indices = @transform_1, window_bounds = array<i64: 256, 128>}, {transform_indices = @transform_2, window_bounds = array<i64: 1, 128>}, {transform_indices = @transform_3, window_bounds = array<i64: 1, 128>}, {transform_indices = @transform_4, window_bounds = array<i64: 512, 128>}]} {
    %c0 = arith.constant 0 : index
    %c0_0 = arith.constant 0 : index
    %0 = vector.load %arg2[%c0, %c0_0] : memref<512x256xbf16, #tpu.memory_space<vmem>>, vector<512x256xbf16>
    %c0_1 = arith.constant 0 : index
    %c0_2 = arith.constant 0 : index
    %1 = vector.load %arg3[%c0_1, %c0_2] : memref<256x128xbf16, #tpu.memory_space<vmem>>, vector<256x128xbf16>
    %cst = arith.constant dense<0.000000e+00> : vector<512x128xf32>
    %2 = tpu.matmul %0, %1, %cst {dimension_numbers = #tpu.dot_dimension_numbers<[1], [0], [0], [1], [0, 0, 1, 1], [], []>} : vector<512x256xbf16>, vector<256x128xbf16>, vector<512x128xf32> -> vector<512x128xf32>
    %cst_3 = arith.constant dense<0.000000e+00> : vector<128xf32>
    %3 = vector.multi_reduction <add>, %2, %cst_3 [0] : vector<512x128xf32> to vector<128xf32>
    %4 = vector.shape_cast %3 : vector<128xf32> to vector<1x128xf32>
    %cst_4 = arith.constant 0.001953125 : f32
    %5 = vector.broadcast %cst_4 : f32 to vector<1x128xf32>
    %6 = arith.mulf %4, %5 : vector<1x128xf32>
    %7 = arith.mulf %2, %2 : vector<512x128xf32>
    %cst_5 = arith.constant dense<0.000000e+00> : vector<128xf32>
    %8 = vector.multi_reduction <add>, %7, %cst_5 [0] : vector<512x128xf32> to vector<128xf32>
    %9 = vector.shape_cast %8 : vector<128xf32> to vector<1x128xf32>
    %cst_6 = arith.constant 0.001953125 : f32
    %10 = vector.broadcast %cst_6 : f32 to vector<1x128xf32>
    %11 = arith.mulf %9, %10 : vector<1x128xf32>
    %12 = arith.mulf %6, %6 : vector<1x128xf32>
    %13 = arith.subf %11, %12 : vector<1x128xf32>
    %cst_7 = arith.constant 0.000000e+00 : f32
    %14 = vector.broadcast %cst_7 : f32 to vector<1x128xf32>
    %15 = arith.maximumf %13, %14 : vector<1x128xf32>
    %16 = vector.broadcast %6 : vector<1x128xf32> to vector<512x128xf32>
    %17 = arith.subf %2, %16 : vector<512x128xf32>
    %cst_8 = arith.constant 9.99999974E-6 : f32
    %18 = vector.broadcast %cst_8 : f32 to vector<1x128xf32>
    %19 = arith.addf %15, %18 : vector<1x128xf32>
    %20 = math.rsqrt %19 : vector<1x128xf32>
    %21 = vector.broadcast %20 : vector<1x128xf32> to vector<512x128xf32>
    %22 = arith.mulf %17, %21 : vector<512x128xf32>
    %c0_9 = arith.constant 0 : index
    %c0_10 = arith.constant 0 : index
    %23 = vector.load %arg4[%c0_9, %c0_10] : memref<1x128xf32, #tpu.memory_space<vmem>>, vector<1x128xf32>
    %24 = vector.broadcast %23 : vector<1x128xf32> to vector<512x128xf32>
    %25 = arith.mulf %22, %24 : vector<512x128xf32>
    %c0_11 = arith.constant 0 : index
    %c0_12 = arith.constant 0 : index
    %26 = vector.load %arg5[%c0_11, %c0_12] : memref<1x128xf32, #tpu.memory_space<vmem>>, vector<1x128xf32>
    %27 = vector.broadcast %26 : vector<1x128xf32> to vector<512x128xf32>
    %28 = arith.addf %25, %27 : vector<512x128xf32>
    %cst_13 = arith.constant 0.000000e+00 : f32
    %29 = vector.broadcast %cst_13 : f32 to vector<512x128xf32>
    %30 = arith.maximumf %28, %29 : vector<512x128xf32>
    %31 = arith.truncf %30 : vector<512x128xf32> to vector<512x128xbf16>
    %c0_14 = arith.constant 0 : index
    %c0_15 = arith.constant 0 : index
    %32 = vector.load %arg6[%c0_14, %c0_15] : memref<512x128xbf16, #tpu.memory_space<vmem>>, vector<512x128xbf16>
    tpu.vector_store %arg6[%c0_14, %c0_15], %31 {strides = array<i32>} : memref<512x128xbf16, #tpu.memory_space<vmem>>, vector<512x128xbf16>,
    return
  }
  func.func @transform_0(%arg0: i32, %arg1: i32) -> (i32, i32) {
    %c0_i32 = arith.constant 0 : i32
    %c0_i32_0 = arith.constant 0 : i32
    return %c0_i32, %arg1 : i32, i32
  }
  func.func @transform_1(%arg0: i32, %arg1: i32) -> (i32, i32) {
    %c0_i32 = arith.constant 0 : i32
    return %arg1, %arg0 : i32, i32
  }
  func.func @transform_2(%arg0: i32, %arg1: i32) -> (i32, i32) {
    %c0_i32 = arith.constant 0 : i32
    %c0_i32_0 = arith.constant 0 : i32
    return %c0_i32, %arg0 : i32, i32
  }
  func.func @transform_3(%arg0: i32, %arg1: i32) -> (i32, i32) {
    %c0_i32 = arith.constant 0 : i32
    %c0_i32_0 = arith.constant 0 : i32
    return %c0_i32, %arg0 : i32, i32
  }
  func.func @transform_4(%arg0: i32, %arg1: i32) -> (i32, i32) {
    %c0_i32 = arith.constant 0 : i32
    %c0_i32_0 = arith.constant 0 : i32
    return %c0_i32, %arg0 : i32, i32
  }
}

module attributes {stable_mosaic.version = 11 : i64} {
  func.func @_max9_kernel(%arg0: i32, %arg1: memref<128x128xbf16, #tpu.memory_space<vmem>>, %arg2: memref<128x128xbf16, #tpu.memory_space<vmem>>, %arg3: memref<128x128xbf16, #tpu.memory_space<vmem>>, %arg4: memref<128x128xbf16, #tpu.memory_space<vmem>>, %arg5: memref<128x128xbf16, #tpu.memory_space<vmem>>, %arg6: memref<128x128xbf16, #tpu.memory_space<vmem>>, %arg7: memref<128x128xbf16, #tpu.memory_space<vmem>>, %arg8: memref<128x128xbf16, #tpu.memory_space<vmem>>, %arg9: memref<128x128xbf16, #tpu.memory_space<vmem>>, %arg10: memref<128x128xbf16, #tpu.memory_space<vmem>>) attributes {dimension_semantics = [#tpu.dimension_semantics<parallel>], iteration_bounds = array<i64: 1>, scalar_prefetch = 0 : i64, scratch_operands = 0 : i64, tpu.core_type = #tpu.core_type<tc>, window_params = [{transform_indices = @transform_0, window_bounds = array<i64: 128, 128>}, {transform_indices = @transform_1, window_bounds = array<i64: 128, 128>}, {transform_indices = @transform_2, window_bounds = array<i64: 128, 128>}, {transform_indices = @transform_3, window_bounds = array<i64: 128, 128>}, {transform_indices = @transform_4, window_bounds = array<i64: 128, 128>}, {transform_indices = @transform_5, window_bounds = array<i64: 128, 128>}, {transform_indices = @transform_6, window_bounds = array<i64: 128, 128>}, {transform_indices = @transform_7, window_bounds = array<i64: 128, 128>}, {transform_indices = @transform_8, window_bounds = array<i64: 128, 128>}, {transform_indices = @transform_9, window_bounds = array<i64: 128, 128>}]} {
    %c0 = arith.constant 0 : index
    %c0_0 = arith.constant 0 : index
    %0 = vector.load %arg1[%c0, %c0_0] : memref<128x128xbf16, #tpu.memory_space<vmem>>, vector<128x128xbf16>
    %c0_1 = arith.constant 0 : index
    %c0_2 = arith.constant 0 : index
    %1 = vector.load %arg2[%c0_1, %c0_2] : memref<128x128xbf16, #tpu.memory_space<vmem>>, vector<128x128xbf16>
    %2 = arith.maximumf %0, %1 : vector<128x128xbf16>
    %c0_3 = arith.constant 0 : index
    %c0_4 = arith.constant 0 : index
    %3 = vector.load %arg3[%c0_3, %c0_4] : memref<128x128xbf16, #tpu.memory_space<vmem>>, vector<128x128xbf16>
    %4 = arith.maximumf %2, %3 : vector<128x128xbf16>
    %c0_5 = arith.constant 0 : index
    %c0_6 = arith.constant 0 : index
    %5 = vector.load %arg4[%c0_5, %c0_6] : memref<128x128xbf16, #tpu.memory_space<vmem>>, vector<128x128xbf16>
    %6 = arith.maximumf %4, %5 : vector<128x128xbf16>
    %c0_7 = arith.constant 0 : index
    %c0_8 = arith.constant 0 : index
    %7 = vector.load %arg5[%c0_7, %c0_8] : memref<128x128xbf16, #tpu.memory_space<vmem>>, vector<128x128xbf16>
    %8 = arith.maximumf %6, %7 : vector<128x128xbf16>
    %c0_9 = arith.constant 0 : index
    %c0_10 = arith.constant 0 : index
    %9 = vector.load %arg6[%c0_9, %c0_10] : memref<128x128xbf16, #tpu.memory_space<vmem>>, vector<128x128xbf16>
    %10 = arith.maximumf %8, %9 : vector<128x128xbf16>
    %c0_11 = arith.constant 0 : index
    %c0_12 = arith.constant 0 : index
    %11 = vector.load %arg7[%c0_11, %c0_12] : memref<128x128xbf16, #tpu.memory_space<vmem>>, vector<128x128xbf16>
    %12 = arith.maximumf %10, %11 : vector<128x128xbf16>
    %c0_13 = arith.constant 0 : index
    %c0_14 = arith.constant 0 : index
    %13 = vector.load %arg8[%c0_13, %c0_14] : memref<128x128xbf16, #tpu.memory_space<vmem>>, vector<128x128xbf16>
    %14 = arith.maximumf %12, %13 : vector<128x128xbf16>
    %c0_15 = arith.constant 0 : index
    %c0_16 = arith.constant 0 : index
    %15 = vector.load %arg9[%c0_15, %c0_16] : memref<128x128xbf16, #tpu.memory_space<vmem>>, vector<128x128xbf16>
    %16 = arith.maximumf %14, %15 : vector<128x128xbf16>
    %c0_17 = arith.constant 0 : index
    %c0_18 = arith.constant 0 : index
    %17 = vector.load %arg10[%c0_17, %c0_18] : memref<128x128xbf16, #tpu.memory_space<vmem>>, vector<128x128xbf16>
    tpu.vector_store %arg10[%c0_17, %c0_18], %16 {strides = array<i32>} : memref<128x128xbf16, #tpu.memory_space<vmem>>, vector<128x128xbf16>,
    return
  }
  func.func @transform_0(%arg0: i32) -> (i32, i32) {
    %c0_i32 = arith.constant 0 : i32
    %c0_i32_0 = arith.constant 0 : i32
    return %arg0, %c0_i32 : i32, i32
  }
  func.func @transform_1(%arg0: i32) -> (i32, i32) {
    %c0_i32 = arith.constant 0 : i32
    %c0_i32_0 = arith.constant 0 : i32
    return %arg0, %c0_i32 : i32, i32
  }
  func.func @transform_2(%arg0: i32) -> (i32, i32) {
    %c0_i32 = arith.constant 0 : i32
    %c0_i32_0 = arith.constant 0 : i32
    return %arg0, %c0_i32 : i32, i32
  }
  func.func @transform_3(%arg0: i32) -> (i32, i32) {
    %c0_i32 = arith.constant 0 : i32
    %c0_i32_0 = arith.constant 0 : i32
    return %arg0, %c0_i32 : i32, i32
  }
  func.func @transform_4(%arg0: i32) -> (i32, i32) {
    %c0_i32 = arith.constant 0 : i32
    %c0_i32_0 = arith.constant 0 : i32
    return %arg0, %c0_i32 : i32, i32
  }
  func.func @transform_5(%arg0: i32) -> (i32, i32) {
    %c0_i32 = arith.constant 0 : i32
    %c0_i32_0 = arith.constant 0 : i32
    return %arg0, %c0_i32 : i32, i32
  }
  func.func @transform_6(%arg0: i32) -> (i32, i32) {
    %c0_i32 = arith.constant 0 : i32
    %c0_i32_0 = arith.constant 0 : i32
    return %arg0, %c0_i32 : i32, i32
  }
  func.func @transform_7(%arg0: i32) -> (i32, i32) {
    %c0_i32 = arith.constant 0 : i32
    %c0_i32_0 = arith.constant 0 : i32
    return %arg0, %c0_i32 : i32, i32
  }
  func.func @transform_8(%arg0: i32) -> (i32, i32) {
    %c0_i32 = arith.constant 0 : i32
    %c0_i32_0 = arith.constant 0 : i32
    return %arg0, %c0_i32 : i32, i32
  }
  func.func @transform_9(%arg0: i32) -> (i32, i32) {
    %c0_i32 = arith.constant 0 : i32
    %c0_i32_0 = arith.constant 0 : i32
    return %arg0, %c0_i32 : i32, i32
  }
}

module attributes {stable_mosaic.version = 11 : i64} {
  func.func @kernel(%arg0: i32, %arg1: i32, %arg2: memref<128x640xbf16, #tpu.memory_space<vmem>>, %arg3: memref<640x128xbf16, #tpu.memory_space<vmem>>, %arg4: memref<1x128xf32, #tpu.memory_space<vmem>>, %arg5: memref<1x128xf32, #tpu.memory_space<vmem>>, %arg6: memref<128x128xbf16, #tpu.memory_space<vmem>>, %arg7: memref<128x128xbf16, #tpu.memory_space<vmem>>) attributes {dimension_semantics = [#tpu.dimension_semantics<parallel>, #tpu.dimension_semantics<arbitrary>], iteration_bounds = array<i64: 1, 1>, scalar_prefetch = 0 : i64, scratch_operands = 0 : i64, tpu.core_type = #tpu.core_type<tc>, window_params = [{transform_indices = @transform_0, window_bounds = array<i64: 128, 640>}, {transform_indices = @transform_1, window_bounds = array<i64: 640, 128>}, {transform_indices = @transform_2, window_bounds = array<i64: 1, 128>}, {transform_indices = @transform_3, window_bounds = array<i64: 1, 128>}, {transform_indices = @transform_4, window_bounds = array<i64: 128, 128>}, {transform_indices = @transform_5, window_bounds = array<i64: 128, 128>}]} {
    %c0 = arith.constant 0 : index
    %c0_0 = arith.constant 0 : index
    %0 = vector.load %arg2[%c0, %c0_0] : memref<128x640xbf16, #tpu.memory_space<vmem>>, vector<128x640xbf16>
    %c0_1 = arith.constant 0 : index
    %c0_2 = arith.constant 0 : index
    %1 = vector.load %arg3[%c0_1, %c0_2] : memref<640x128xbf16, #tpu.memory_space<vmem>>, vector<640x128xbf16>
    %cst = arith.constant dense<0.000000e+00> : vector<128x128xf32>
    %2 = tpu.matmul %0, %1, %cst {dimension_numbers = #tpu.dot_dimension_numbers<[1], [0], [0], [1], [0, 0, 1, 1], [], []>} : vector<128x640xbf16>, vector<640x128xbf16>, vector<128x128xf32> -> vector<128x128xf32>
    %cst_3 = arith.constant dense<0.000000e+00> : vector<128xf32>
    %3 = vector.multi_reduction <add>, %2, %cst_3 [0] : vector<128x128xf32> to vector<128xf32>
    %4 = vector.shape_cast %3 : vector<128xf32> to vector<1x128xf32>
    %cst_4 = arith.constant 7.812500e-03 : f32
    %5 = vector.broadcast %cst_4 : f32 to vector<1x128xf32>
    %6 = arith.mulf %4, %5 : vector<1x128xf32>
    %7 = arith.mulf %2, %2 : vector<128x128xf32>
    %cst_5 = arith.constant dense<0.000000e+00> : vector<128xf32>
    %8 = vector.multi_reduction <add>, %7, %cst_5 [0] : vector<128x128xf32> to vector<128xf32>
    %9 = vector.shape_cast %8 : vector<128xf32> to vector<1x128xf32>
    %cst_6 = arith.constant 7.812500e-03 : f32
    %10 = vector.broadcast %cst_6 : f32 to vector<1x128xf32>
    %11 = arith.mulf %9, %10 : vector<1x128xf32>
    %12 = arith.mulf %6, %6 : vector<1x128xf32>
    %13 = arith.subf %11, %12 : vector<1x128xf32>
    %cst_7 = arith.constant 0.000000e+00 : f32
    %14 = vector.broadcast %cst_7 : f32 to vector<1x128xf32>
    %15 = arith.maximumf %13, %14 : vector<1x128xf32>
    %16 = vector.broadcast %6 : vector<1x128xf32> to vector<128x128xf32>
    %17 = arith.subf %2, %16 : vector<128x128xf32>
    %cst_8 = arith.constant 9.99999974E-6 : f32
    %18 = vector.broadcast %cst_8 : f32 to vector<1x128xf32>
    %19 = arith.addf %15, %18 : vector<1x128xf32>
    %20 = math.rsqrt %19 : vector<1x128xf32>
    %21 = vector.broadcast %20 : vector<1x128xf32> to vector<128x128xf32>
    %22 = arith.mulf %17, %21 : vector<128x128xf32>
    %c0_9 = arith.constant 0 : index
    %c0_10 = arith.constant 0 : index
    %23 = vector.load %arg4[%c0_9, %c0_10] : memref<1x128xf32, #tpu.memory_space<vmem>>, vector<1x128xf32>
    %24 = vector.broadcast %23 : vector<1x128xf32> to vector<128x128xf32>
    %25 = arith.mulf %22, %24 : vector<128x128xf32>
    %c0_11 = arith.constant 0 : index
    %c0_12 = arith.constant 0 : index
    %26 = vector.load %arg5[%c0_11, %c0_12] : memref<1x128xf32, #tpu.memory_space<vmem>>, vector<1x128xf32>
    %27 = vector.broadcast %26 : vector<1x128xf32> to vector<128x128xf32>
    %28 = arith.addf %25, %27 : vector<128x128xf32>
    %c0_13 = arith.constant 0 : index
    %c0_14 = arith.constant 0 : index
    %29 = vector.load %arg6[%c0_13, %c0_14] : memref<128x128xbf16, #tpu.memory_space<vmem>>, vector<128x128xbf16>
    %30 = arith.extf %29 : vector<128x128xbf16> to vector<128x128xf32>
    %31 = arith.addf %28, %30 : vector<128x128xf32>
    %cst_15 = arith.constant 0.000000e+00 : f32
    %32 = vector.broadcast %cst_15 : f32 to vector<128x128xf32>
    %33 = arith.maximumf %31, %32 : vector<128x128xf32>
    %34 = arith.truncf %33 : vector<128x128xf32> to vector<128x128xbf16>
    %c0_16 = arith.constant 0 : index
    %c0_17 = arith.constant 0 : index
    %35 = vector.load %arg7[%c0_16, %c0_17] : memref<128x128xbf16, #tpu.memory_space<vmem>>, vector<128x128xbf16>
    tpu.vector_store %arg7[%c0_16, %c0_17], %34 {strides = array<i32>} : memref<128x128xbf16, #tpu.memory_space<vmem>>, vector<128x128xbf16>,
    return
  }
  func.func @transform_0(%arg0: i32, %arg1: i32) -> (i32, i32) {
    %c0_i32 = arith.constant 0 : i32
    %c0_i32_0 = arith.constant 0 : i32
    return %c0_i32, %arg1 : i32, i32
  }
  func.func @transform_1(%arg0: i32, %arg1: i32) -> (i32, i32) {
    %c0_i32 = arith.constant 0 : i32
    return %arg1, %arg0 : i32, i32
  }
  func.func @transform_2(%arg0: i32, %arg1: i32) -> (i32, i32) {
    %c0_i32 = arith.constant 0 : i32
    %c0_i32_0 = arith.constant 0 : i32
    return %c0_i32, %arg0 : i32, i32
  }
  func.func @transform_3(%arg0: i32, %arg1: i32) -> (i32, i32) {
    %c0_i32 = arith.constant 0 : i32
    %c0_i32_0 = arith.constant 0 : i32
    return %c0_i32, %arg0 : i32, i32
  }
  func.func @transform_4(%arg0: i32, %arg1: i32) -> (i32, i32) {
    %c0_i32 = arith.constant 0 : i32
    %c0_i32_0 = arith.constant 0 : i32
    return %c0_i32, %arg0 : i32, i32
  }
  func.func @transform_5(%arg0: i32, %arg1: i32) -> (i32, i32) {
    %c0_i32 = arith.constant 0 : i32
    %c0_i32_0 = arith.constant 0 : i32
    return %c0_i32, %arg0 : i32, i32
  }
}

module attributes {stable_mosaic.version = 11 : i64} {
  func.func @kernel(%arg0: i32, %arg1: i32, %arg2: memref<128x640xbf16, #tpu.memory_space<vmem>>, %arg3: memref<640x128xbf16, #tpu.memory_space<vmem>>, %arg4: memref<1x128xf32, #tpu.memory_space<vmem>>, %arg5: memref<1x128xf32, #tpu.memory_space<vmem>>, %arg6: memref<128x128xbf16, #tpu.memory_space<vmem>>) attributes {dimension_semantics = [#tpu.dimension_semantics<parallel>, #tpu.dimension_semantics<arbitrary>], iteration_bounds = array<i64: 1, 1>, scalar_prefetch = 0 : i64, scratch_operands = 0 : i64, tpu.core_type = #tpu.core_type<tc>, window_params = [{transform_indices = @transform_0, window_bounds = array<i64: 128, 640>}, {transform_indices = @transform_1, window_bounds = array<i64: 640, 128>}, {transform_indices = @transform_2, window_bounds = array<i64: 1, 128>}, {transform_indices = @transform_3, window_bounds = array<i64: 1, 128>}, {transform_indices = @transform_4, window_bounds = array<i64: 128, 128>}]} {
    %c0 = arith.constant 0 : index
    %c0_0 = arith.constant 0 : index
    %0 = vector.load %arg2[%c0, %c0_0] : memref<128x640xbf16, #tpu.memory_space<vmem>>, vector<128x640xbf16>
    %c0_1 = arith.constant 0 : index
    %c0_2 = arith.constant 0 : index
    %1 = vector.load %arg3[%c0_1, %c0_2] : memref<640x128xbf16, #tpu.memory_space<vmem>>, vector<640x128xbf16>
    %cst = arith.constant dense<0.000000e+00> : vector<128x128xf32>
    %2 = tpu.matmul %0, %1, %cst {dimension_numbers = #tpu.dot_dimension_numbers<[1], [0], [0], [1], [0, 0, 1, 1], [], []>} : vector<128x640xbf16>, vector<640x128xbf16>, vector<128x128xf32> -> vector<128x128xf32>
    %cst_3 = arith.constant dense<0.000000e+00> : vector<128xf32>
    %3 = vector.multi_reduction <add>, %2, %cst_3 [0] : vector<128x128xf32> to vector<128xf32>
    %4 = vector.shape_cast %3 : vector<128xf32> to vector<1x128xf32>
    %cst_4 = arith.constant 7.812500e-03 : f32
    %5 = vector.broadcast %cst_4 : f32 to vector<1x128xf32>
    %6 = arith.mulf %4, %5 : vector<1x128xf32>
    %7 = arith.mulf %2, %2 : vector<128x128xf32>
    %cst_5 = arith.constant dense<0.000000e+00> : vector<128xf32>
    %8 = vector.multi_reduction <add>, %7, %cst_5 [0] : vector<128x128xf32> to vector<128xf32>
    %9 = vector.shape_cast %8 : vector<128xf32> to vector<1x128xf32>
    %cst_6 = arith.constant 7.812500e-03 : f32
    %10 = vector.broadcast %cst_6 : f32 to vector<1x128xf32>
    %11 = arith.mulf %9, %10 : vector<1x128xf32>
    %12 = arith.mulf %6, %6 : vector<1x128xf32>
    %13 = arith.subf %11, %12 : vector<1x128xf32>
    %cst_7 = arith.constant 0.000000e+00 : f32
    %14 = vector.broadcast %cst_7 : f32 to vector<1x128xf32>
    %15 = arith.maximumf %13, %14 : vector<1x128xf32>
    %16 = vector.broadcast %6 : vector<1x128xf32> to vector<128x128xf32>
    %17 = arith.subf %2, %16 : vector<128x128xf32>
    %cst_8 = arith.constant 9.99999974E-6 : f32
    %18 = vector.broadcast %cst_8 : f32 to vector<1x128xf32>
    %19 = arith.addf %15, %18 : vector<1x128xf32>
    %20 = math.rsqrt %19 : vector<1x128xf32>
    %21 = vector.broadcast %20 : vector<1x128xf32> to vector<128x128xf32>
    %22 = arith.mulf %17, %21 : vector<128x128xf32>
    %c0_9 = arith.constant 0 : index
    %c0_10 = arith.constant 0 : index
    %23 = vector.load %arg4[%c0_9, %c0_10] : memref<1x128xf32, #tpu.memory_space<vmem>>, vector<1x128xf32>
    %24 = vector.broadcast %23 : vector<1x128xf32> to vector<128x128xf32>
    %25 = arith.mulf %22, %24 : vector<128x128xf32>
    %c0_11 = arith.constant 0 : index
    %c0_12 = arith.constant 0 : index
    %26 = vector.load %arg5[%c0_11, %c0_12] : memref<1x128xf32, #tpu.memory_space<vmem>>, vector<1x128xf32>
    %27 = vector.broadcast %26 : vector<1x128xf32> to vector<128x128xf32>
    %28 = arith.addf %25, %27 : vector<128x128xf32>
    %cst_13 = arith.constant 0.000000e+00 : f32
    %29 = vector.broadcast %cst_13 : f32 to vector<128x128xf32>
    %30 = arith.maximumf %28, %29 : vector<128x128xf32>
    %31 = arith.truncf %30 : vector<128x128xf32> to vector<128x128xbf16>
    %c0_14 = arith.constant 0 : index
    %c0_15 = arith.constant 0 : index
    %32 = vector.load %arg6[%c0_14, %c0_15] : memref<128x128xbf16, #tpu.memory_space<vmem>>, vector<128x128xbf16>
    tpu.vector_store %arg6[%c0_14, %c0_15], %31 {strides = array<i32>} : memref<128x128xbf16, #tpu.memory_space<vmem>>, vector<128x128xbf16>,
    return
  }
  func.func @transform_0(%arg0: i32, %arg1: i32) -> (i32, i32) {
    %c0_i32 = arith.constant 0 : i32
    %c0_i32_0 = arith.constant 0 : i32
    return %c0_i32, %arg1 : i32, i32
  }
  func.func @transform_1(%arg0: i32, %arg1: i32) -> (i32, i32) {
    %c0_i32 = arith.constant 0 : i32
    return %arg1, %arg0 : i32, i32
  }
  func.func @transform_2(%arg0: i32, %arg1: i32) -> (i32, i32) {
    %c0_i32 = arith.constant 0 : i32
    %c0_i32_0 = arith.constant 0 : i32
    return %c0_i32, %arg0 : i32, i32
  }
  func.func @transform_3(%arg0: i32, %arg1: i32) -> (i32, i32) {
    %c0_i32 = arith.constant 0 : i32
    %c0_i32_0 = arith.constant 0 : i32
    return %c0_i32, %arg0 : i32, i32
  }
  func.func @transform_4(%arg0: i32, %arg1: i32) -> (i32, i32) {
    %c0_i32 = arith.constant 0 : i32
    %c0_i32_0 = arith.constant 0 : i32
    return %c0_i32, %arg0 : i32, i32
  }
}

module attributes {stable_mosaic.version = 11 : i64} {
  func.func @kernel(%arg0: i32, %arg1: i32, %arg2: memref<32x640xbf16, #tpu.memory_space<vmem>>, %arg3: memref<640x128xbf16, #tpu.memory_space<vmem>>, %arg4: memref<1x128xf32, #tpu.memory_space<vmem>>, %arg5: memref<1x128xf32, #tpu.memory_space<vmem>>, %arg6: memref<32x128xbf16, #tpu.memory_space<vmem>>) attributes {dimension_semantics = [#tpu.dimension_semantics<parallel>, #tpu.dimension_semantics<arbitrary>], iteration_bounds = array<i64: 1, 1>, scalar_prefetch = 0 : i64, scratch_operands = 0 : i64, tpu.core_type = #tpu.core_type<tc>, window_params = [{transform_indices = @transform_0, window_bounds = array<i64: 32, 640>}, {transform_indices = @transform_1, window_bounds = array<i64: 640, 128>}, {transform_indices = @transform_2, window_bounds = array<i64: 1, 128>}, {transform_indices = @transform_3, window_bounds = array<i64: 1, 128>}, {transform_indices = @transform_4, window_bounds = array<i64: 32, 128>}]} {
    %c0 = arith.constant 0 : index
    %c0_0 = arith.constant 0 : index
    %0 = vector.load %arg2[%c0, %c0_0] : memref<32x640xbf16, #tpu.memory_space<vmem>>, vector<32x640xbf16>
    %c0_1 = arith.constant 0 : index
    %c0_2 = arith.constant 0 : index
    %1 = vector.load %arg3[%c0_1, %c0_2] : memref<640x128xbf16, #tpu.memory_space<vmem>>, vector<640x128xbf16>
    %cst = arith.constant dense<0.000000e+00> : vector<32x128xf32>
    %2 = tpu.matmul %0, %1, %cst {dimension_numbers = #tpu.dot_dimension_numbers<[1], [0], [0], [1], [0, 0, 1, 1], [], []>} : vector<32x640xbf16>, vector<640x128xbf16>, vector<32x128xf32> -> vector<32x128xf32>
    %cst_3 = arith.constant dense<0.000000e+00> : vector<128xf32>
    %3 = vector.multi_reduction <add>, %2, %cst_3 [0] : vector<32x128xf32> to vector<128xf32>
    %4 = vector.shape_cast %3 : vector<128xf32> to vector<1x128xf32>
    %cst_4 = arith.constant 3.125000e-02 : f32
    %5 = vector.broadcast %cst_4 : f32 to vector<1x128xf32>
    %6 = arith.mulf %4, %5 : vector<1x128xf32>
    %7 = arith.mulf %2, %2 : vector<32x128xf32>
    %cst_5 = arith.constant dense<0.000000e+00> : vector<128xf32>
    %8 = vector.multi_reduction <add>, %7, %cst_5 [0] : vector<32x128xf32> to vector<128xf32>
    %9 = vector.shape_cast %8 : vector<128xf32> to vector<1x128xf32>
    %cst_6 = arith.constant 3.125000e-02 : f32
    %10 = vector.broadcast %cst_6 : f32 to vector<1x128xf32>
    %11 = arith.mulf %9, %10 : vector<1x128xf32>
    %12 = arith.mulf %6, %6 : vector<1x128xf32>
    %13 = arith.subf %11, %12 : vector<1x128xf32>
    %cst_7 = arith.constant 0.000000e+00 : f32
    %14 = vector.broadcast %cst_7 : f32 to vector<1x128xf32>
    %15 = arith.maximumf %13, %14 : vector<1x128xf32>
    %16 = vector.broadcast %6 : vector<1x128xf32> to vector<32x128xf32>
    %17 = arith.subf %2, %16 : vector<32x128xf32>
    %cst_8 = arith.constant 9.99999974E-6 : f32
    %18 = vector.broadcast %cst_8 : f32 to vector<1x128xf32>
    %19 = arith.addf %15, %18 : vector<1x128xf32>
    %20 = math.rsqrt %19 : vector<1x128xf32>
    %21 = vector.broadcast %20 : vector<1x128xf32> to vector<32x128xf32>
    %22 = arith.mulf %17, %21 : vector<32x128xf32>
    %c0_9 = arith.constant 0 : index
    %c0_10 = arith.constant 0 : index
    %23 = vector.load %arg4[%c0_9, %c0_10] : memref<1x128xf32, #tpu.memory_space<vmem>>, vector<1x128xf32>
    %24 = vector.broadcast %23 : vector<1x128xf32> to vector<32x128xf32>
    %25 = arith.mulf %22, %24 : vector<32x128xf32>
    %c0_11 = arith.constant 0 : index
    %c0_12 = arith.constant 0 : index
    %26 = vector.load %arg5[%c0_11, %c0_12] : memref<1x128xf32, #tpu.memory_space<vmem>>, vector<1x128xf32>
    %27 = vector.broadcast %26 : vector<1x128xf32> to vector<32x128xf32>
    %28 = arith.addf %25, %27 : vector<32x128xf32>
    %cst_13 = arith.constant 0.000000e+00 : f32
    %29 = vector.broadcast %cst_13 : f32 to vector<32x128xf32>
    %30 = arith.maximumf %28, %29 : vector<32x128xf32>
    %31 = arith.truncf %30 : vector<32x128xf32> to vector<32x128xbf16>
    %c0_14 = arith.constant 0 : index
    %c0_15 = arith.constant 0 : index
    %32 = vector.load %arg6[%c0_14, %c0_15] : memref<32x128xbf16, #tpu.memory_space<vmem>>, vector<32x128xbf16>
    tpu.vector_store %arg6[%c0_14, %c0_15], %31 {strides = array<i32>} : memref<32x128xbf16, #tpu.memory_space<vmem>>, vector<32x128xbf16>,
    return
  }
  func.func @transform_0(%arg0: i32, %arg1: i32) -> (i32, i32) {
    %c0_i32 = arith.constant 0 : i32
    %c0_i32_0 = arith.constant 0 : i32
    return %c0_i32, %arg1 : i32, i32
  }
  func.func @transform_1(%arg0: i32, %arg1: i32) -> (i32, i32) {
    %c0_i32 = arith.constant 0 : i32
    return %arg1, %arg0 : i32, i32
  }
  func.func @transform_2(%arg0: i32, %arg1: i32) -> (i32, i32) {
    %c0_i32 = arith.constant 0 : i32
    %c0_i32_0 = arith.constant 0 : i32
    return %c0_i32, %arg0 : i32, i32
  }
  func.func @transform_3(%arg0: i32, %arg1: i32) -> (i32, i32) {
    %c0_i32 = arith.constant 0 : i32
    %c0_i32_0 = arith.constant 0 : i32
    return %c0_i32, %arg0 : i32, i32
  }
  func.func @transform_4(%arg0: i32, %arg1: i32) -> (i32, i32) {
    %c0_i32 = arith.constant 0 : i32
    %c0_i32_0 = arith.constant 0 : i32
    return %c0_i32, %arg0 : i32, i32
  }
}

module attributes {stable_mosaic.version = 11 : i64} {
  func.func @kernel(%arg0: i32, %arg1: i32, %arg2: memref<32x128xbf16, #tpu.memory_space<vmem>>, %arg3: memref<128x128xbf16, #tpu.memory_space<vmem>>, %arg4: memref<1x128xf32, #tpu.memory_space<vmem>>, %arg5: memref<1x128xf32, #tpu.memory_space<vmem>>, %arg6: memref<32x128xbf16, #tpu.memory_space<vmem>>) attributes {dimension_semantics = [#tpu.dimension_semantics<parallel>, #tpu.dimension_semantics<arbitrary>], iteration_bounds = array<i64: 1, 1>, scalar_prefetch = 0 : i64, scratch_operands = 0 : i64, tpu.core_type = #tpu.core_type<tc>, window_params = [{transform_indices = @transform_0, window_bounds = array<i64: 32, 128>}, {transform_indices = @transform_1, window_bounds = array<i64: 128, 128>}, {transform_indices = @transform_2, window_bounds = array<i64: 1, 128>}, {transform_indices = @transform_3, window_bounds = array<i64: 1, 128>}, {transform_indices = @transform_4, window_bounds = array<i64: 32, 128>}]} {
    %c0 = arith.constant 0 : index
    %c0_0 = arith.constant 0 : index
    %0 = vector.load %arg2[%c0, %c0_0] : memref<32x128xbf16, #tpu.memory_space<vmem>>, vector<32x128xbf16>
    %c0_1 = arith.constant 0 : index
    %c0_2 = arith.constant 0 : index
    %1 = vector.load %arg3[%c0_1, %c0_2] : memref<128x128xbf16, #tpu.memory_space<vmem>>, vector<128x128xbf16>
    %cst = arith.constant dense<0.000000e+00> : vector<32x128xf32>
    %2 = tpu.matmul %0, %1, %cst {dimension_numbers = #tpu.dot_dimension_numbers<[1], [0], [0], [1], [0, 0, 1, 1], [], []>} : vector<32x128xbf16>, vector<128x128xbf16>, vector<32x128xf32> -> vector<32x128xf32>
    %cst_3 = arith.constant dense<0.000000e+00> : vector<128xf32>
    %3 = vector.multi_reduction <add>, %2, %cst_3 [0] : vector<32x128xf32> to vector<128xf32>
    %4 = vector.shape_cast %3 : vector<128xf32> to vector<1x128xf32>
    %cst_4 = arith.constant 3.125000e-02 : f32
    %5 = vector.broadcast %cst_4 : f32 to vector<1x128xf32>
    %6 = arith.mulf %4, %5 : vector<1x128xf32>
    %7 = arith.mulf %2, %2 : vector<32x128xf32>
    %cst_5 = arith.constant dense<0.000000e+00> : vector<128xf32>
    %8 = vector.multi_reduction <add>, %7, %cst_5 [0] : vector<32x128xf32> to vector<128xf32>
    %9 = vector.shape_cast %8 : vector<128xf32> to vector<1x128xf32>
    %cst_6 = arith.constant 3.125000e-02 : f32
    %10 = vector.broadcast %cst_6 : f32 to vector<1x128xf32>
    %11 = arith.mulf %9, %10 : vector<1x128xf32>
    %12 = arith.mulf %6, %6 : vector<1x128xf32>
    %13 = arith.subf %11, %12 : vector<1x128xf32>
    %cst_7 = arith.constant 0.000000e+00 : f32
    %14 = vector.broadcast %cst_7 : f32 to vector<1x128xf32>
    %15 = arith.maximumf %13, %14 : vector<1x128xf32>
    %16 = vector.broadcast %6 : vector<1x128xf32> to vector<32x128xf32>
    %17 = arith.subf %2, %16 : vector<32x128xf32>
    %cst_8 = arith.constant 9.99999974E-6 : f32
    %18 = vector.broadcast %cst_8 : f32 to vector<1x128xf32>
    %19 = arith.addf %15, %18 : vector<1x128xf32>
    %20 = math.rsqrt %19 : vector<1x128xf32>
    %21 = vector.broadcast %20 : vector<1x128xf32> to vector<32x128xf32>
    %22 = arith.mulf %17, %21 : vector<32x128xf32>
    %c0_9 = arith.constant 0 : index
    %c0_10 = arith.constant 0 : index
    %23 = vector.load %arg4[%c0_9, %c0_10] : memref<1x128xf32, #tpu.memory_space<vmem>>, vector<1x128xf32>
    %24 = vector.broadcast %23 : vector<1x128xf32> to vector<32x128xf32>
    %25 = arith.mulf %22, %24 : vector<32x128xf32>
    %c0_11 = arith.constant 0 : index
    %c0_12 = arith.constant 0 : index
    %26 = vector.load %arg5[%c0_11, %c0_12] : memref<1x128xf32, #tpu.memory_space<vmem>>, vector<1x128xf32>
    %27 = vector.broadcast %26 : vector<1x128xf32> to vector<32x128xf32>
    %28 = arith.addf %25, %27 : vector<32x128xf32>
    %29 = arith.truncf %28 : vector<32x128xf32> to vector<32x128xbf16>
    %c0_13 = arith.constant 0 : index
    %c0_14 = arith.constant 0 : index
    %30 = vector.load %arg6[%c0_13, %c0_14] : memref<32x128xbf16, #tpu.memory_space<vmem>>, vector<32x128xbf16>
    tpu.vector_store %arg6[%c0_13, %c0_14], %29 {strides = array<i32>} : memref<32x128xbf16, #tpu.memory_space<vmem>>, vector<32x128xbf16>,
    return
  }
  func.func @transform_0(%arg0: i32, %arg1: i32) -> (i32, i32) {
    %c0_i32 = arith.constant 0 : i32
    %c0_i32_0 = arith.constant 0 : i32
    return %c0_i32, %arg1 : i32, i32
  }
  func.func @transform_1(%arg0: i32, %arg1: i32) -> (i32, i32) {
    %c0_i32 = arith.constant 0 : i32
    return %arg1, %arg0 : i32, i32
  }
  func.func @transform_2(%arg0: i32, %arg1: i32) -> (i32, i32) {
    %c0_i32 = arith.constant 0 : i32
    %c0_i32_0 = arith.constant 0 : i32
    return %c0_i32, %arg0 : i32, i32
  }
  func.func @transform_3(%arg0: i32, %arg1: i32) -> (i32, i32) {
    %c0_i32 = arith.constant 0 : i32
    %c0_i32_0 = arith.constant 0 : i32
    return %c0_i32, %arg0 : i32, i32
  }
  func.func @transform_4(%arg0: i32, %arg1: i32) -> (i32, i32) {
    %c0_i32 = arith.constant 0 : i32
    %c0_i32_0 = arith.constant 0 : i32
    return %c0_i32, %arg0 : i32, i32
  }
}

module attributes {stable_mosaic.version = 11 : i64} {
  func.func @kernel(%arg0: i32, %arg1: i32, %arg2: memref<32x1152xbf16, #tpu.memory_space<vmem>>, %arg3: memref<1152x128xbf16, #tpu.memory_space<vmem>>, %arg4: memref<1x128xf32, #tpu.memory_space<vmem>>, %arg5: memref<1x128xf32, #tpu.memory_space<vmem>>, %arg6: memref<32x128xbf16, #tpu.memory_space<vmem>>, %arg7: memref<32x128xbf16, #tpu.memory_space<vmem>>) attributes {dimension_semantics = [#tpu.dimension_semantics<parallel>, #tpu.dimension_semantics<arbitrary>], iteration_bounds = array<i64: 1, 1>, scalar_prefetch = 0 : i64, scratch_operands = 0 : i64, tpu.core_type = #tpu.core_type<tc>, window_params = [{transform_indices = @transform_0, window_bounds = array<i64: 32, 1152>}, {transform_indices = @transform_1, window_bounds = array<i64: 1152, 128>}, {transform_indices = @transform_2, window_bounds = array<i64: 1, 128>}, {transform_indices = @transform_3, window_bounds = array<i64: 1, 128>}, {transform_indices = @transform_4, window_bounds = array<i64: 32, 128>}, {transform_indices = @transform_5, window_bounds = array<i64: 32, 128>}]} {
    %c0 = arith.constant 0 : index
    %c0_0 = arith.constant 0 : index
    %0 = vector.load %arg2[%c0, %c0_0] : memref<32x1152xbf16, #tpu.memory_space<vmem>>, vector<32x1152xbf16>
    %c0_1 = arith.constant 0 : index
    %c0_2 = arith.constant 0 : index
    %1 = vector.load %arg3[%c0_1, %c0_2] : memref<1152x128xbf16, #tpu.memory_space<vmem>>, vector<1152x128xbf16>
    %cst = arith.constant dense<0.000000e+00> : vector<32x128xf32>
    %2 = tpu.matmul %0, %1, %cst {dimension_numbers = #tpu.dot_dimension_numbers<[1], [0], [0], [1], [0, 0, 1, 1], [], []>} : vector<32x1152xbf16>, vector<1152x128xbf16>, vector<32x128xf32> -> vector<32x128xf32>
    %cst_3 = arith.constant dense<0.000000e+00> : vector<128xf32>
    %3 = vector.multi_reduction <add>, %2, %cst_3 [0] : vector<32x128xf32> to vector<128xf32>
    %4 = vector.shape_cast %3 : vector<128xf32> to vector<1x128xf32>
    %cst_4 = arith.constant 3.125000e-02 : f32
    %5 = vector.broadcast %cst_4 : f32 to vector<1x128xf32>
    %6 = arith.mulf %4, %5 : vector<1x128xf32>
    %7 = arith.mulf %2, %2 : vector<32x128xf32>
    %cst_5 = arith.constant dense<0.000000e+00> : vector<128xf32>
    %8 = vector.multi_reduction <add>, %7, %cst_5 [0] : vector<32x128xf32> to vector<128xf32>
    %9 = vector.shape_cast %8 : vector<128xf32> to vector<1x128xf32>
    %cst_6 = arith.constant 3.125000e-02 : f32
    %10 = vector.broadcast %cst_6 : f32 to vector<1x128xf32>
    %11 = arith.mulf %9, %10 : vector<1x128xf32>
    %12 = arith.mulf %6, %6 : vector<1x128xf32>
    %13 = arith.subf %11, %12 : vector<1x128xf32>
    %cst_7 = arith.constant 0.000000e+00 : f32
    %14 = vector.broadcast %cst_7 : f32 to vector<1x128xf32>
    %15 = arith.maximumf %13, %14 : vector<1x128xf32>
    %16 = vector.broadcast %6 : vector<1x128xf32> to vector<32x128xf32>
    %17 = arith.subf %2, %16 : vector<32x128xf32>
    %cst_8 = arith.constant 9.99999974E-6 : f32
    %18 = vector.broadcast %cst_8 : f32 to vector<1x128xf32>
    %19 = arith.addf %15, %18 : vector<1x128xf32>
    %20 = math.rsqrt %19 : vector<1x128xf32>
    %21 = vector.broadcast %20 : vector<1x128xf32> to vector<32x128xf32>
    %22 = arith.mulf %17, %21 : vector<32x128xf32>
    %c0_9 = arith.constant 0 : index
    %c0_10 = arith.constant 0 : index
    %23 = vector.load %arg4[%c0_9, %c0_10] : memref<1x128xf32, #tpu.memory_space<vmem>>, vector<1x128xf32>
    %24 = vector.broadcast %23 : vector<1x128xf32> to vector<32x128xf32>
    %25 = arith.mulf %22, %24 : vector<32x128xf32>
    %c0_11 = arith.constant 0 : index
    %c0_12 = arith.constant 0 : index
    %26 = vector.load %arg5[%c0_11, %c0_12] : memref<1x128xf32, #tpu.memory_space<vmem>>, vector<1x128xf32>
    %27 = vector.broadcast %26 : vector<1x128xf32> to vector<32x128xf32>
    %28 = arith.addf %25, %27 : vector<32x128xf32>
    %c0_13 = arith.constant 0 : index
    %c0_14 = arith.constant 0 : index
    %29 = vector.load %arg6[%c0_13, %c0_14] : memref<32x128xbf16, #tpu.memory_space<vmem>>, vector<32x128xbf16>
    %30 = arith.extf %29 : vector<32x128xbf16> to vector<32x128xf32>
    %31 = arith.addf %28, %30 : vector<32x128xf32>
    %cst_15 = arith.constant 0.000000e+00 : f32
    %32 = vector.broadcast %cst_15 : f32 to vector<32x128xf32>
    %33 = arith.maximumf %31, %32 : vector<32x128xf32>
    %34 = arith.truncf %33 : vector<32x128xf32> to vector<32x128xbf16>
    %c0_16 = arith.constant 0 : index
    %c0_17 = arith.constant 0 : index
    %35 = vector.load %arg7[%c0_16, %c0_17] : memref<32x128xbf16, #tpu.memory_space<vmem>>, vector<32x128xbf16>
    tpu.vector_store %arg7[%c0_16, %c0_17], %34 {strides = array<i32>} : memref<32x128xbf16, #tpu.memory_space<vmem>>, vector<32x128xbf16>,
    return
  }
  func.func @transform_0(%arg0: i32, %arg1: i32) -> (i32, i32) {
    %c0_i32 = arith.constant 0 : i32
    %c0_i32_0 = arith.constant 0 : i32
    return %c0_i32, %arg1 : i32, i32
  }
  func.func @transform_1(%arg0: i32, %arg1: i32) -> (i32, i32) {
    %c0_i32 = arith.constant 0 : i32
    return %arg1, %arg0 : i32, i32
  }
  func.func @transform_2(%arg0: i32, %arg1: i32) -> (i32, i32) {
    %c0_i32 = arith.constant 0 : i32
    %c0_i32_0 = arith.constant 0 : i32
    return %c0_i32, %arg0 : i32, i32
  }
  func.func @transform_3(%arg0: i32, %arg1: i32) -> (i32, i32) {
    %c0_i32 = arith.constant 0 : i32
    %c0_i32_0 = arith.constant 0 : i32
    return %c0_i32, %arg0 : i32, i32
  }
  func.func @transform_4(%arg0: i32, %arg1: i32) -> (i32, i32) {
    %c0_i32 = arith.constant 0 : i32
    %c0_i32_0 = arith.constant 0 : i32
    return %c0_i32, %arg0 : i32, i32
  }
  func.func @transform_5(%arg0: i32, %arg1: i32) -> (i32, i32) {
    %c0_i32 = arith.constant 0 : i32
    %c0_i32_0 = arith.constant 0 : i32
    return %c0_i32, %arg0 : i32, i32
  }
}

module attributes {stable_mosaic.version = 11 : i64} {
  func.func @kernel(%arg0: i32, %arg1: i32, %arg2: memref<32x1152xbf16, #tpu.memory_space<vmem>>, %arg3: memref<1152x128xbf16, #tpu.memory_space<vmem>>, %arg4: memref<1x128xf32, #tpu.memory_space<vmem>>, %arg5: memref<1x128xf32, #tpu.memory_space<vmem>>, %arg6: memref<32x128xbf16, #tpu.memory_space<vmem>>) attributes {dimension_semantics = [#tpu.dimension_semantics<parallel>, #tpu.dimension_semantics<arbitrary>], iteration_bounds = array<i64: 1, 1>, scalar_prefetch = 0 : i64, scratch_operands = 0 : i64, tpu.core_type = #tpu.core_type<tc>, window_params = [{transform_indices = @transform_0, window_bounds = array<i64: 32, 1152>}, {transform_indices = @transform_1, window_bounds = array<i64: 1152, 128>}, {transform_indices = @transform_2, window_bounds = array<i64: 1, 128>}, {transform_indices = @transform_3, window_bounds = array<i64: 1, 128>}, {transform_indices = @transform_4, window_bounds = array<i64: 32, 128>}]} {
    %c0 = arith.constant 0 : index
    %c0_0 = arith.constant 0 : index
    %0 = vector.load %arg2[%c0, %c0_0] : memref<32x1152xbf16, #tpu.memory_space<vmem>>, vector<32x1152xbf16>
    %c0_1 = arith.constant 0 : index
    %c0_2 = arith.constant 0 : index
    %1 = vector.load %arg3[%c0_1, %c0_2] : memref<1152x128xbf16, #tpu.memory_space<vmem>>, vector<1152x128xbf16>
    %cst = arith.constant dense<0.000000e+00> : vector<32x128xf32>
    %2 = tpu.matmul %0, %1, %cst {dimension_numbers = #tpu.dot_dimension_numbers<[1], [0], [0], [1], [0, 0, 1, 1], [], []>} : vector<32x1152xbf16>, vector<1152x128xbf16>, vector<32x128xf32> -> vector<32x128xf32>
    %cst_3 = arith.constant dense<0.000000e+00> : vector<128xf32>
    %3 = vector.multi_reduction <add>, %2, %cst_3 [0] : vector<32x128xf32> to vector<128xf32>
    %4 = vector.shape_cast %3 : vector<128xf32> to vector<1x128xf32>
    %cst_4 = arith.constant 3.125000e-02 : f32
    %5 = vector.broadcast %cst_4 : f32 to vector<1x128xf32>
    %6 = arith.mulf %4, %5 : vector<1x128xf32>
    %7 = arith.mulf %2, %2 : vector<32x128xf32>
    %cst_5 = arith.constant dense<0.000000e+00> : vector<128xf32>
    %8 = vector.multi_reduction <add>, %7, %cst_5 [0] : vector<32x128xf32> to vector<128xf32>
    %9 = vector.shape_cast %8 : vector<128xf32> to vector<1x128xf32>
    %cst_6 = arith.constant 3.125000e-02 : f32
    %10 = vector.broadcast %cst_6 : f32 to vector<1x128xf32>
    %11 = arith.mulf %9, %10 : vector<1x128xf32>
    %12 = arith.mulf %6, %6 : vector<1x128xf32>
    %13 = arith.subf %11, %12 : vector<1x128xf32>
    %cst_7 = arith.constant 0.000000e+00 : f32
    %14 = vector.broadcast %cst_7 : f32 to vector<1x128xf32>
    %15 = arith.maximumf %13, %14 : vector<1x128xf32>
    %16 = vector.broadcast %6 : vector<1x128xf32> to vector<32x128xf32>
    %17 = arith.subf %2, %16 : vector<32x128xf32>
    %cst_8 = arith.constant 9.99999974E-6 : f32
    %18 = vector.broadcast %cst_8 : f32 to vector<1x128xf32>
    %19 = arith.addf %15, %18 : vector<1x128xf32>
    %20 = math.rsqrt %19 : vector<1x128xf32>
    %21 = vector.broadcast %20 : vector<1x128xf32> to vector<32x128xf32>
    %22 = arith.mulf %17, %21 : vector<32x128xf32>
    %c0_9 = arith.constant 0 : index
    %c0_10 = arith.constant 0 : index
    %23 = vector.load %arg4[%c0_9, %c0_10] : memref<1x128xf32, #tpu.memory_space<vmem>>, vector<1x128xf32>
    %24 = vector.broadcast %23 : vector<1x128xf32> to vector<32x128xf32>
    %25 = arith.mulf %22, %24 : vector<32x128xf32>
    %c0_11 = arith.constant 0 : index
    %c0_12 = arith.constant 0 : index
    %26 = vector.load %arg5[%c0_11, %c0_12] : memref<1x128xf32, #tpu.memory_space<vmem>>, vector<1x128xf32>
    %27 = vector.broadcast %26 : vector<1x128xf32> to vector<32x128xf32>
    %28 = arith.addf %25, %27 : vector<32x128xf32>
    %cst_13 = arith.constant 0.000000e+00 : f32
    %29 = vector.broadcast %cst_13 : f32 to vector<32x128xf32>
    %30 = arith.maximumf %28, %29 : vector<32x128xf32>
    %31 = arith.truncf %30 : vector<32x128xf32> to vector<32x128xbf16>
    %c0_14 = arith.constant 0 : index
    %c0_15 = arith.constant 0 : index
    %32 = vector.load %arg6[%c0_14, %c0_15] : memref<32x128xbf16, #tpu.memory_space<vmem>>, vector<32x128xbf16>
    tpu.vector_store %arg6[%c0_14, %c0_15], %31 {strides = array<i32>} : memref<32x128xbf16, #tpu.memory_space<vmem>>, vector<32x128xbf16>,
    return
  }
  func.func @transform_0(%arg0: i32, %arg1: i32) -> (i32, i32) {
    %c0_i32 = arith.constant 0 : i32
    %c0_i32_0 = arith.constant 0 : i32
    return %c0_i32, %arg1 : i32, i32
  }
  func.func @transform_1(%arg0: i32, %arg1: i32) -> (i32, i32) {
    %c0_i32 = arith.constant 0 : i32
    return %arg1, %arg0 : i32, i32
  }
  func.func @transform_2(%arg0: i32, %arg1: i32) -> (i32, i32) {
    %c0_i32 = arith.constant 0 : i32
    %c0_i32_0 = arith.constant 0 : i32
    return %c0_i32, %arg0 : i32, i32
  }
  func.func @transform_3(%arg0: i32, %arg1: i32) -> (i32, i32) {
    %c0_i32 = arith.constant 0 : i32
    %c0_i32_0 = arith.constant 0 : i32
    return %c0_i32, %arg0 : i32, i32
  }
  func.func @transform_4(%arg0: i32, %arg1: i32) -> (i32, i32) {
    %c0_i32 = arith.constant 0 : i32
    %c0_i32_0 = arith.constant 0 : i32
    return %c0_i32, %arg0 : i32, i32
  }
}

module attributes {stable_mosaic.version = 11 : i64} {
  func.func @kernel(%arg0: i32, %arg1: i32, %arg2: memref<8x1152xbf16, #tpu.memory_space<vmem>>, %arg3: memref<1152x256xbf16, #tpu.memory_space<vmem>>, %arg4: memref<1x256xf32, #tpu.memory_space<vmem>>, %arg5: memref<1x256xf32, #tpu.memory_space<vmem>>, %arg6: memref<8x256xbf16, #tpu.memory_space<vmem>>) attributes {dimension_semantics = [#tpu.dimension_semantics<parallel>, #tpu.dimension_semantics<arbitrary>], iteration_bounds = array<i64: 1, 1>, scalar_prefetch = 0 : i64, scratch_operands = 0 : i64, tpu.core_type = #tpu.core_type<tc>, window_params = [{transform_indices = @transform_0, window_bounds = array<i64: 8, 1152>}, {transform_indices = @transform_1, window_bounds = array<i64: 1152, 256>}, {transform_indices = @transform_2, window_bounds = array<i64: 1, 256>}, {transform_indices = @transform_3, window_bounds = array<i64: 1, 256>}, {transform_indices = @transform_4, window_bounds = array<i64: 8, 256>}]} {
    %c0 = arith.constant 0 : index
    %c0_0 = arith.constant 0 : index
    %0 = vector.load %arg2[%c0, %c0_0] : memref<8x1152xbf16, #tpu.memory_space<vmem>>, vector<8x1152xbf16>
    %c0_1 = arith.constant 0 : index
    %c0_2 = arith.constant 0 : index
    %1 = vector.load %arg3[%c0_1, %c0_2] : memref<1152x256xbf16, #tpu.memory_space<vmem>>, vector<1152x256xbf16>
    %cst = arith.constant dense<0.000000e+00> : vector<8x256xf32>
    %2 = tpu.matmul %0, %1, %cst {dimension_numbers = #tpu.dot_dimension_numbers<[1], [0], [0], [1], [0, 0, 1, 1], [], []>} : vector<8x1152xbf16>, vector<1152x256xbf16>, vector<8x256xf32> -> vector<8x256xf32>
    %cst_3 = arith.constant dense<0.000000e+00> : vector<256xf32>
    %3 = vector.multi_reduction <add>, %2, %cst_3 [0] : vector<8x256xf32> to vector<256xf32>
    %4 = vector.shape_cast %3 : vector<256xf32> to vector<1x256xf32>
    %cst_4 = arith.constant 1.250000e-01 : f32
    %5 = vector.broadcast %cst_4 : f32 to vector<1x256xf32>
    %6 = arith.mulf %4, %5 : vector<1x256xf32>
    %7 = arith.mulf %2, %2 : vector<8x256xf32>
    %cst_5 = arith.constant dense<0.000000e+00> : vector<256xf32>
    %8 = vector.multi_reduction <add>, %7, %cst_5 [0] : vector<8x256xf32> to vector<256xf32>
    %9 = vector.shape_cast %8 : vector<256xf32> to vector<1x256xf32>
    %cst_6 = arith.constant 1.250000e-01 : f32
    %10 = vector.broadcast %cst_6 : f32 to vector<1x256xf32>
    %11 = arith.mulf %9, %10 : vector<1x256xf32>
    %12 = arith.mulf %6, %6 : vector<1x256xf32>
    %13 = arith.subf %11, %12 : vector<1x256xf32>
    %cst_7 = arith.constant 0.000000e+00 : f32
    %14 = vector.broadcast %cst_7 : f32 to vector<1x256xf32>
    %15 = arith.maximumf %13, %14 : vector<1x256xf32>
    %16 = vector.broadcast %6 : vector<1x256xf32> to vector<8x256xf32>
    %17 = arith.subf %2, %16 : vector<8x256xf32>
    %cst_8 = arith.constant 9.99999974E-6 : f32
    %18 = vector.broadcast %cst_8 : f32 to vector<1x256xf32>
    %19 = arith.addf %15, %18 : vector<1x256xf32>
    %20 = math.rsqrt %19 : vector<1x256xf32>
    %21 = vector.broadcast %20 : vector<1x256xf32> to vector<8x256xf32>
    %22 = arith.mulf %17, %21 : vector<8x256xf32>
    %c0_9 = arith.constant 0 : index
    %c0_10 = arith.constant 0 : index
    %23 = vector.load %arg4[%c0_9, %c0_10] : memref<1x256xf32, #tpu.memory_space<vmem>>, vector<1x256xf32>
    %24 = vector.broadcast %23 : vector<1x256xf32> to vector<8x256xf32>
    %25 = arith.mulf %22, %24 : vector<8x256xf32>
    %c0_11 = arith.constant 0 : index
    %c0_12 = arith.constant 0 : index
    %26 = vector.load %arg5[%c0_11, %c0_12] : memref<1x256xf32, #tpu.memory_space<vmem>>, vector<1x256xf32>
    %27 = vector.broadcast %26 : vector<1x256xf32> to vector<8x256xf32>
    %28 = arith.addf %25, %27 : vector<8x256xf32>
    %cst_13 = arith.constant 0.000000e+00 : f32
    %29 = vector.broadcast %cst_13 : f32 to vector<8x256xf32>
    %30 = arith.maximumf %28, %29 : vector<8x256xf32>
    %31 = arith.truncf %30 : vector<8x256xf32> to vector<8x256xbf16>
    %c0_14 = arith.constant 0 : index
    %c0_15 = arith.constant 0 : index
    %32 = vector.load %arg6[%c0_14, %c0_15] : memref<8x256xbf16, #tpu.memory_space<vmem>>, vector<8x256xbf16>
    tpu.vector_store %arg6[%c0_14, %c0_15], %31 {strides = array<i32>} : memref<8x256xbf16, #tpu.memory_space<vmem>>, vector<8x256xbf16>,
    return
  }
  func.func @transform_0(%arg0: i32, %arg1: i32) -> (i32, i32) {
    %c0_i32 = arith.constant 0 : i32
    %c0_i32_0 = arith.constant 0 : i32
    return %c0_i32, %arg1 : i32, i32
  }
  func.func @transform_1(%arg0: i32, %arg1: i32) -> (i32, i32) {
    %c0_i32 = arith.constant 0 : i32
    return %arg1, %arg0 : i32, i32
  }
  func.func @transform_2(%arg0: i32, %arg1: i32) -> (i32, i32) {
    %c0_i32 = arith.constant 0 : i32
    %c0_i32_0 = arith.constant 0 : i32
    return %c0_i32, %arg0 : i32, i32
  }
  func.func @transform_3(%arg0: i32, %arg1: i32) -> (i32, i32) {
    %c0_i32 = arith.constant 0 : i32
    %c0_i32_0 = arith.constant 0 : i32
    return %c0_i32, %arg0 : i32, i32
  }
  func.func @transform_4(%arg0: i32, %arg1: i32) -> (i32, i32) {
    %c0_i32 = arith.constant 0 : i32
    %c0_i32_0 = arith.constant 0 : i32
    return %c0_i32, %arg0 : i32, i32
  }
}

module attributes {stable_mosaic.version = 11 : i64} {
  func.func @kernel(%arg0: i32, %arg1: i32, %arg2: memref<8x128xbf16, #tpu.memory_space<vmem>>, %arg3: memref<128x256xbf16, #tpu.memory_space<vmem>>, %arg4: memref<1x256xf32, #tpu.memory_space<vmem>>, %arg5: memref<1x256xf32, #tpu.memory_space<vmem>>, %arg6: memref<8x256xbf16, #tpu.memory_space<vmem>>) attributes {dimension_semantics = [#tpu.dimension_semantics<parallel>, #tpu.dimension_semantics<arbitrary>], iteration_bounds = array<i64: 1, 1>, scalar_prefetch = 0 : i64, scratch_operands = 0 : i64, tpu.core_type = #tpu.core_type<tc>, window_params = [{transform_indices = @transform_0, window_bounds = array<i64: 8, 128>}, {transform_indices = @transform_1, window_bounds = array<i64: 128, 256>}, {transform_indices = @transform_2, window_bounds = array<i64: 1, 256>}, {transform_indices = @transform_3, window_bounds = array<i64: 1, 256>}, {transform_indices = @transform_4, window_bounds = array<i64: 8, 256>}]} {
    %c0 = arith.constant 0 : index
    %c0_0 = arith.constant 0 : index
    %0 = vector.load %arg2[%c0, %c0_0] : memref<8x128xbf16, #tpu.memory_space<vmem>>, vector<8x128xbf16>
    %c0_1 = arith.constant 0 : index
    %c0_2 = arith.constant 0 : index
    %1 = vector.load %arg3[%c0_1, %c0_2] : memref<128x256xbf16, #tpu.memory_space<vmem>>, vector<128x256xbf16>
    %cst = arith.constant dense<0.000000e+00> : vector<8x256xf32>
    %2 = tpu.matmul %0, %1, %cst {dimension_numbers = #tpu.dot_dimension_numbers<[1], [0], [0], [1], [0, 0, 1, 1], [], []>} : vector<8x128xbf16>, vector<128x256xbf16>, vector<8x256xf32> -> vector<8x256xf32>
    %cst_3 = arith.constant dense<0.000000e+00> : vector<256xf32>
    %3 = vector.multi_reduction <add>, %2, %cst_3 [0] : vector<8x256xf32> to vector<256xf32>
    %4 = vector.shape_cast %3 : vector<256xf32> to vector<1x256xf32>
    %cst_4 = arith.constant 1.250000e-01 : f32
    %5 = vector.broadcast %cst_4 : f32 to vector<1x256xf32>
    %6 = arith.mulf %4, %5 : vector<1x256xf32>
    %7 = arith.mulf %2, %2 : vector<8x256xf32>
    %cst_5 = arith.constant dense<0.000000e+00> : vector<256xf32>
    %8 = vector.multi_reduction <add>, %7, %cst_5 [0] : vector<8x256xf32> to vector<256xf32>
    %9 = vector.shape_cast %8 : vector<256xf32> to vector<1x256xf32>
    %cst_6 = arith.constant 1.250000e-01 : f32
    %10 = vector.broadcast %cst_6 : f32 to vector<1x256xf32>
    %11 = arith.mulf %9, %10 : vector<1x256xf32>
    %12 = arith.mulf %6, %6 : vector<1x256xf32>
    %13 = arith.subf %11, %12 : vector<1x256xf32>
    %cst_7 = arith.constant 0.000000e+00 : f32
    %14 = vector.broadcast %cst_7 : f32 to vector<1x256xf32>
    %15 = arith.maximumf %13, %14 : vector<1x256xf32>
    %16 = vector.broadcast %6 : vector<1x256xf32> to vector<8x256xf32>
    %17 = arith.subf %2, %16 : vector<8x256xf32>
    %cst_8 = arith.constant 9.99999974E-6 : f32
    %18 = vector.broadcast %cst_8 : f32 to vector<1x256xf32>
    %19 = arith.addf %15, %18 : vector<1x256xf32>
    %20 = math.rsqrt %19 : vector<1x256xf32>
    %21 = vector.broadcast %20 : vector<1x256xf32> to vector<8x256xf32>
    %22 = arith.mulf %17, %21 : vector<8x256xf32>
    %c0_9 = arith.constant 0 : index
    %c0_10 = arith.constant 0 : index
    %23 = vector.load %arg4[%c0_9, %c0_10] : memref<1x256xf32, #tpu.memory_space<vmem>>, vector<1x256xf32>
    %24 = vector.broadcast %23 : vector<1x256xf32> to vector<8x256xf32>
    %25 = arith.mulf %22, %24 : vector<8x256xf32>
    %c0_11 = arith.constant 0 : index
    %c0_12 = arith.constant 0 : index
    %26 = vector.load %arg5[%c0_11, %c0_12] : memref<1x256xf32, #tpu.memory_space<vmem>>, vector<1x256xf32>
    %27 = vector.broadcast %26 : vector<1x256xf32> to vector<8x256xf32>
    %28 = arith.addf %25, %27 : vector<8x256xf32>
    %29 = arith.truncf %28 : vector<8x256xf32> to vector<8x256xbf16>
    %c0_13 = arith.constant 0 : index
    %c0_14 = arith.constant 0 : index
    %30 = vector.load %arg6[%c0_13, %c0_14] : memref<8x256xbf16, #tpu.memory_space<vmem>>, vector<8x256xbf16>
    tpu.vector_store %arg6[%c0_13, %c0_14], %29 {strides = array<i32>} : memref<8x256xbf16, #tpu.memory_space<vmem>>, vector<8x256xbf16>,
    return
  }
  func.func @transform_0(%arg0: i32, %arg1: i32) -> (i32, i32) {
    %c0_i32 = arith.constant 0 : i32
    %c0_i32_0 = arith.constant 0 : i32
    return %c0_i32, %arg1 : i32, i32
  }
  func.func @transform_1(%arg0: i32, %arg1: i32) -> (i32, i32) {
    %c0_i32 = arith.constant 0 : i32
    return %arg1, %arg0 : i32, i32
  }
  func.func @transform_2(%arg0: i32, %arg1: i32) -> (i32, i32) {
    %c0_i32 = arith.constant 0 : i32
    %c0_i32_0 = arith.constant 0 : i32
    return %c0_i32, %arg0 : i32, i32
  }
  func.func @transform_3(%arg0: i32, %arg1: i32) -> (i32, i32) {
    %c0_i32 = arith.constant 0 : i32
    %c0_i32_0 = arith.constant 0 : i32
    return %c0_i32, %arg0 : i32, i32
  }
  func.func @transform_4(%arg0: i32, %arg1: i32) -> (i32, i32) {
    %c0_i32 = arith.constant 0 : i32
    %c0_i32_0 = arith.constant 0 : i32
    return %c0_i32, %arg0 : i32, i32
  }
}

module attributes {stable_mosaic.version = 11 : i64} {
  func.func @kernel(%arg0: i32, %arg1: i32, %arg2: memref<8x256xbf16, #tpu.memory_space<vmem>>, %arg3: memref<256x256xbf16, #tpu.memory_space<vmem>>, %arg4: memref<1x256xf32, #tpu.memory_space<vmem>>, %arg5: memref<1x256xf32, #tpu.memory_space<vmem>>, %arg6: memref<8x256xbf16, #tpu.memory_space<vmem>>, %arg7: memref<8x256xbf16, #tpu.memory_space<vmem>>, %arg8: memref<8x256xf32, #tpu.memory_space<vmem>>) attributes {dimension_semantics = [#tpu.dimension_semantics<parallel>, #tpu.dimension_semantics<arbitrary>], iteration_bounds = array<i64: 1, 9>, scalar_prefetch = 0 : i64, scratch_operands = 1 : i64, tpu.core_type = #tpu.core_type<tc>, window_params = [{transform_indices = @transform_0, window_bounds = array<i64: 8, 256>}, {transform_indices = @transform_1, window_bounds = array<i64: 256, 256>}, {transform_indices = @transform_2, window_bounds = array<i64: 1, 256>}, {transform_indices = @transform_3, window_bounds = array<i64: 1, 256>}, {transform_indices = @transform_4, window_bounds = array<i64: 8, 256>}, {transform_indices = @transform_5, window_bounds = array<i64: 8, 256>}]} {
    %c0_i32 = arith.constant 0 : i32
    %0 = arith.cmpi eq, %arg1, %c0_i32 : i32
    %1 = arith.extui %0 : i1 to i32
    %c0_i32_0 = arith.constant 0 : i32
    %2 = arith.cmpi ne, %1, %c0_i32_0 : i32
    scf.if %2 {
      %cst_9 = arith.constant 0.000000e+00 : f32
      %12 = vector.broadcast %cst_9 : f32 to vector<8x256xf32>
      %c0_10 = arith.constant 0 : index
      %c0_11 = arith.constant 0 : index
      %13 = vector.load %arg8[%c0_10, %c0_11] : memref<8x256xf32, #tpu.memory_space<vmem>>, vector<8x256xf32>
      tpu.vector_store %arg8[%c0_10, %c0_11], %12 {strides = array<i32>} : memref<8x256xf32, #tpu.memory_space<vmem>>, vector<8x256xf32>,
    } else {
    }
    %c0 = arith.constant 0 : index
    %c0_1 = arith.constant 0 : index
    %3 = vector.load %arg8[%c0, %c0_1] : memref<8x256xf32, #tpu.memory_space<vmem>>, vector<8x256xf32>
    %c0_2 = arith.constant 0 : index
    %c0_3 = arith.constant 0 : index
    %4 = vector.load %arg2[%c0_2, %c0_3] : memref<8x256xbf16, #tpu.memory_space<vmem>>, vector<8x256xbf16>
    %c0_4 = arith.constant 0 : index
    %c0_5 = arith.constant 0 : index
    %5 = vector.load %arg3[%c0_4, %c0_5] : memref<256x256xbf16, #tpu.memory_space<vmem>>, vector<256x256xbf16>
    %cst = arith.constant dense<0.000000e+00> : vector<8x256xf32>
    %6 = tpu.matmul %4, %5, %cst {dimension_numbers = #tpu.dot_dimension_numbers<[1], [0], [0], [1], [0, 0, 1, 1], [], []>} : vector<8x256xbf16>, vector<256x256xbf16>, vector<8x256xf32> -> vector<8x256xf32>
    %7 = arith.addf %3, %6 : vector<8x256xf32>
    %c0_6 = arith.constant 0 : index
    %c0_7 = arith.constant 0 : index
    %8 = vector.load %arg8[%c0_6, %c0_7] : memref<8x256xf32, #tpu.memory_space<vmem>>, vector<8x256xf32>
    tpu.vector_store %arg8[%c0_6, %c0_7], %7 {strides = array<i32>} : memref<8x256xf32, #tpu.memory_space<vmem>>, vector<8x256xf32>,
    %c8_i32 = arith.constant 8 : i32
    %9 = arith.cmpi eq, %arg1, %c8_i32 : i32
    %10 = arith.extui %9 : i1 to i32
    %c0_i32_8 = arith.constant 0 : i32
    %11 = arith.cmpi ne, %10, %c0_i32_8 : i32
    scf.if %11 {
      %c0_9 = arith.constant 0 : index
      %c0_10 = arith.constant 0 : index
      %12 = vector.load %arg8[%c0_9, %c0_10] : memref<8x256xf32, #tpu.memory_space<vmem>>, vector<8x256xf32>
      %cst_11 = arith.constant dense<0.000000e+00> : vector<256xf32>
      %13 = vector.multi_reduction <add>, %12, %cst_11 [0] : vector<8x256xf32> to vector<256xf32>
      %14 = vector.shape_cast %13 : vector<256xf32> to vector<1x256xf32>
      %cst_12 = arith.constant 1.250000e-01 : f32
      %15 = vector.broadcast %cst_12 : f32 to vector<1x256xf32>
      %16 = arith.mulf %14, %15 : vector<1x256xf32>
      %17 = arith.mulf %12, %12 : vector<8x256xf32>
      %cst_13 = arith.constant dense<0.000000e+00> : vector<256xf32>
      %18 = vector.multi_reduction <add>, %17, %cst_13 [0] : vector<8x256xf32> to vector<256xf32>
      %19 = vector.shape_cast %18 : vector<256xf32> to vector<1x256xf32>
      %cst_14 = arith.constant 1.250000e-01 : f32
      %20 = vector.broadcast %cst_14 : f32 to vector<1x256xf32>
      %21 = arith.mulf %19, %20 : vector<1x256xf32>
      %22 = arith.mulf %16, %16 : vector<1x256xf32>
      %23 = arith.subf %21, %22 : vector<1x256xf32>
      %cst_15 = arith.constant 0.000000e+00 : f32
      %24 = vector.broadcast %cst_15 : f32 to vector<1x256xf32>
      %25 = arith.maximumf %23, %24 : vector<1x256xf32>
      %26 = vector.broadcast %16 : vector<1x256xf32> to vector<8x256xf32>
      %27 = arith.subf %12, %26 : vector<8x256xf32>
      %cst_16 = arith.constant 9.99999974E-6 : f32
      %28 = vector.broadcast %cst_16 : f32 to vector<1x256xf32>
      %29 = arith.addf %25, %28 : vector<1x256xf32>
      %30 = math.rsqrt %29 : vector<1x256xf32>
      %31 = vector.broadcast %30 : vector<1x256xf32> to vector<8x256xf32>
      %32 = arith.mulf %27, %31 : vector<8x256xf32>
      %c0_17 = arith.constant 0 : index
      %c0_18 = arith.constant 0 : index
      %33 = vector.load %arg4[%c0_17, %c0_18] : memref<1x256xf32, #tpu.memory_space<vmem>>, vector<1x256xf32>
      %34 = vector.broadcast %33 : vector<1x256xf32> to vector<8x256xf32>
      %35 = arith.mulf %32, %34 : vector<8x256xf32>
      %c0_19 = arith.constant 0 : index
      %c0_20 = arith.constant 0 : index
      %36 = vector.load %arg5[%c0_19, %c0_20] : memref<1x256xf32, #tpu.memory_space<vmem>>, vector<1x256xf32>
      %37 = vector.broadcast %36 : vector<1x256xf32> to vector<8x256xf32>
      %38 = arith.addf %35, %37 : vector<8x256xf32>
      %c0_21 = arith.constant 0 : index
      %c0_22 = arith.constant 0 : index
      %39 = vector.load %arg6[%c0_21, %c0_22] : memref<8x256xbf16, #tpu.memory_space<vmem>>, vector<8x256xbf16>
      %40 = arith.extf %39 : vector<8x256xbf16> to vector<8x256xf32>
      %41 = arith.addf %38, %40 : vector<8x256xf32>
      %cst_23 = arith.constant 0.000000e+00 : f32
      %42 = vector.broadcast %cst_23 : f32 to vector<8x256xf32>
      %43 = arith.maximumf %41, %42 : vector<8x256xf32>
      %44 = arith.truncf %43 : vector<8x256xf32> to vector<8x256xbf16>
      %c0_24 = arith.constant 0 : index
      %c0_25 = arith.constant 0 : index
      %45 = vector.load %arg7[%c0_24, %c0_25] : memref<8x256xbf16, #tpu.memory_space<vmem>>, vector<8x256xbf16>
      tpu.vector_store %arg7[%c0_24, %c0_25], %44 {strides = array<i32>} : memref<8x256xbf16, #tpu.memory_space<vmem>>, vector<8x256xbf16>,
    } else {
    }
    return
  }
  func.func @transform_0(%arg0: i32, %arg1: i32) -> (i32, i32) {
    %c0_i32 = arith.constant 0 : i32
    %c0_i32_0 = arith.constant 0 : i32
    return %c0_i32, %arg1 : i32, i32
  }
  func.func @transform_1(%arg0: i32, %arg1: i32) -> (i32, i32) {
    %c0_i32 = arith.constant 0 : i32
    return %arg1, %arg0 : i32, i32
  }
  func.func @transform_2(%arg0: i32, %arg1: i32) -> (i32, i32) {
    %c0_i32 = arith.constant 0 : i32
    %c0_i32_0 = arith.constant 0 : i32
    return %c0_i32, %arg0 : i32, i32
  }
  func.func @transform_3(%arg0: i32, %arg1: i32) -> (i32, i32) {
    %c0_i32 = arith.constant 0 : i32
    %c0_i32_0 = arith.constant 0 : i32
    return %c0_i32, %arg0 : i32, i32
  }
  func.func @transform_4(%arg0: i32, %arg1: i32) -> (i32, i32) {
    %c0_i32 = arith.constant 0 : i32
    %c0_i32_0 = arith.constant 0 : i32
    return %c0_i32, %arg0 : i32, i32
  }
  func.func @transform_5(%arg0: i32, %arg1: i32) -> (i32, i32) {
    %c0_i32 = arith.constant 0 : i32
    %c0_i32_0 = arith.constant 0 : i32
    return %c0_i32, %arg0 : i32, i32
  }
}

module attributes {stable_mosaic.version = 11 : i64} {
  func.func @kernel(%arg0: i32, %arg1: i32, %arg2: memref<8x256xbf16, #tpu.memory_space<vmem>>, %arg3: memref<256x256xbf16, #tpu.memory_space<vmem>>, %arg4: memref<1x256xf32, #tpu.memory_space<vmem>>, %arg5: memref<1x256xf32, #tpu.memory_space<vmem>>, %arg6: memref<8x256xbf16, #tpu.memory_space<vmem>>, %arg7: memref<8x256xf32, #tpu.memory_space<vmem>>) attributes {dimension_semantics = [#tpu.dimension_semantics<parallel>, #tpu.dimension_semantics<arbitrary>], iteration_bounds = array<i64: 1, 9>, scalar_prefetch = 0 : i64, scratch_operands = 1 : i64, tpu.core_type = #tpu.core_type<tc>, window_params = [{transform_indices = @transform_0, window_bounds = array<i64: 8, 256>}, {transform_indices = @transform_1, window_bounds = array<i64: 256, 256>}, {transform_indices = @transform_2, window_bounds = array<i64: 1, 256>}, {transform_indices = @transform_3, window_bounds = array<i64: 1, 256>}, {transform_indices = @transform_4, window_bounds = array<i64: 8, 256>}]} {
    %c0_i32 = arith.constant 0 : i32
    %0 = arith.cmpi eq, %arg1, %c0_i32 : i32
    %1 = arith.extui %0 : i1 to i32
    %c0_i32_0 = arith.constant 0 : i32
    %2 = arith.cmpi ne, %1, %c0_i32_0 : i32
    scf.if %2 {
      %cst_9 = arith.constant 0.000000e+00 : f32
      %12 = vector.broadcast %cst_9 : f32 to vector<8x256xf32>
      %c0_10 = arith.constant 0 : index
      %c0_11 = arith.constant 0 : index
      %13 = vector.load %arg7[%c0_10, %c0_11] : memref<8x256xf32, #tpu.memory_space<vmem>>, vector<8x256xf32>
      tpu.vector_store %arg7[%c0_10, %c0_11], %12 {strides = array<i32>} : memref<8x256xf32, #tpu.memory_space<vmem>>, vector<8x256xf32>,
    } else {
    }
    %c0 = arith.constant 0 : index
    %c0_1 = arith.constant 0 : index
    %3 = vector.load %arg7[%c0, %c0_1] : memref<8x256xf32, #tpu.memory_space<vmem>>, vector<8x256xf32>
    %c0_2 = arith.constant 0 : index
    %c0_3 = arith.constant 0 : index
    %4 = vector.load %arg2[%c0_2, %c0_3] : memref<8x256xbf16, #tpu.memory_space<vmem>>, vector<8x256xbf16>
    %c0_4 = arith.constant 0 : index
    %c0_5 = arith.constant 0 : index
    %5 = vector.load %arg3[%c0_4, %c0_5] : memref<256x256xbf16, #tpu.memory_space<vmem>>, vector<256x256xbf16>
    %cst = arith.constant dense<0.000000e+00> : vector<8x256xf32>
    %6 = tpu.matmul %4, %5, %cst {dimension_numbers = #tpu.dot_dimension_numbers<[1], [0], [0], [1], [0, 0, 1, 1], [], []>} : vector<8x256xbf16>, vector<256x256xbf16>, vector<8x256xf32> -> vector<8x256xf32>
    %7 = arith.addf %3, %6 : vector<8x256xf32>
    %c0_6 = arith.constant 0 : index
    %c0_7 = arith.constant 0 : index
    %8 = vector.load %arg7[%c0_6, %c0_7] : memref<8x256xf32, #tpu.memory_space<vmem>>, vector<8x256xf32>
    tpu.vector_store %arg7[%c0_6, %c0_7], %7 {strides = array<i32>} : memref<8x256xf32, #tpu.memory_space<vmem>>, vector<8x256xf32>,
    %c8_i32 = arith.constant 8 : i32
    %9 = arith.cmpi eq, %arg1, %c8_i32 : i32
    %10 = arith.extui %9 : i1 to i32
    %c0_i32_8 = arith.constant 0 : i32
    %11 = arith.cmpi ne, %10, %c0_i32_8 : i32
    scf.if %11 {
      %c0_9 = arith.constant 0 : index
      %c0_10 = arith.constant 0 : index
      %12 = vector.load %arg7[%c0_9, %c0_10] : memref<8x256xf32, #tpu.memory_space<vmem>>, vector<8x256xf32>
      %cst_11 = arith.constant dense<0.000000e+00> : vector<256xf32>
      %13 = vector.multi_reduction <add>, %12, %cst_11 [0] : vector<8x256xf32> to vector<256xf32>
      %14 = vector.shape_cast %13 : vector<256xf32> to vector<1x256xf32>
      %cst_12 = arith.constant 1.250000e-01 : f32
      %15 = vector.broadcast %cst_12 : f32 to vector<1x256xf32>
      %16 = arith.mulf %14, %15 : vector<1x256xf32>
      %17 = arith.mulf %12, %12 : vector<8x256xf32>
      %cst_13 = arith.constant dense<0.000000e+00> : vector<256xf32>
      %18 = vector.multi_reduction <add>, %17, %cst_13 [0] : vector<8x256xf32> to vector<256xf32>
      %19 = vector.shape_cast %18 : vector<256xf32> to vector<1x256xf32>
      %cst_14 = arith.constant 1.250000e-01 : f32
      %20 = vector.broadcast %cst_14 : f32 to vector<1x256xf32>
      %21 = arith.mulf %19, %20 : vector<1x256xf32>
      %22 = arith.mulf %16, %16 : vector<1x256xf32>
      %23 = arith.subf %21, %22 : vector<1x256xf32>
      %cst_15 = arith.constant 0.000000e+00 : f32
      %24 = vector.broadcast %cst_15 : f32 to vector<1x256xf32>
      %25 = arith.maximumf %23, %24 : vector<1x256xf32>
      %26 = vector.broadcast %16 : vector<1x256xf32> to vector<8x256xf32>
      %27 = arith.subf %12, %26 : vector<8x256xf32>
      %cst_16 = arith.constant 9.99999974E-6 : f32
      %28 = vector.broadcast %cst_16 : f32 to vector<1x256xf32>
      %29 = arith.addf %25, %28 : vector<1x256xf32>
      %30 = math.rsqrt %29 : vector<1x256xf32>
      %31 = vector.broadcast %30 : vector<1x256xf32> to vector<8x256xf32>
      %32 = arith.mulf %27, %31 : vector<8x256xf32>
      %c0_17 = arith.constant 0 : index
      %c0_18 = arith.constant 0 : index
      %33 = vector.load %arg4[%c0_17, %c0_18] : memref<1x256xf32, #tpu.memory_space<vmem>>, vector<1x256xf32>
      %34 = vector.broadcast %33 : vector<1x256xf32> to vector<8x256xf32>
      %35 = arith.mulf %32, %34 : vector<8x256xf32>
      %c0_19 = arith.constant 0 : index
      %c0_20 = arith.constant 0 : index
      %36 = vector.load %arg5[%c0_19, %c0_20] : memref<1x256xf32, #tpu.memory_space<vmem>>, vector<1x256xf32>
      %37 = vector.broadcast %36 : vector<1x256xf32> to vector<8x256xf32>
      %38 = arith.addf %35, %37 : vector<8x256xf32>
      %cst_21 = arith.constant 0.000000e+00 : f32
      %39 = vector.broadcast %cst_21 : f32 to vector<8x256xf32>
      %40 = arith.maximumf %38, %39 : vector<8x256xf32>
      %41 = arith.truncf %40 : vector<8x256xf32> to vector<8x256xbf16>
      %c0_22 = arith.constant 0 : index
      %c0_23 = arith.constant 0 : index
      %42 = vector.load %arg6[%c0_22, %c0_23] : memref<8x256xbf16, #tpu.memory_space<vmem>>, vector<8x256xbf16>
      tpu.vector_store %arg6[%c0_22, %c0_23], %41 {strides = array<i32>} : memref<8x256xbf16, #tpu.memory_space<vmem>>, vector<8x256xbf16>,
    } else {
    }
    return
  }
  func.func @transform_0(%arg0: i32, %arg1: i32) -> (i32, i32) {
    %c0_i32 = arith.constant 0 : i32
    %c0_i32_0 = arith.constant 0 : i32
    return %c0_i32, %arg1 : i32, i32
  }
  func.func @transform_1(%arg0: i32, %arg1: i32) -> (i32, i32) {
    %c0_i32 = arith.constant 0 : i32
    return %arg1, %arg0 : i32, i32
  }
  func.func @transform_2(%arg0: i32, %arg1: i32) -> (i32, i32) {
    %c0_i32 = arith.constant 0 : i32
    %c0_i32_0 = arith.constant 0 : i32
    return %c0_i32, %arg0 : i32, i32
  }
  func.func @transform_3(%arg0: i32, %arg1: i32) -> (i32, i32) {
    %c0_i32 = arith.constant 0 : i32
    %c0_i32_0 = arith.constant 0 : i32
    return %c0_i32, %arg0 : i32, i32
  }
  func.func @transform_4(%arg0: i32, %arg1: i32) -> (i32, i32) {
    %c0_i32 = arith.constant 0 : i32
    %c0_i32_0 = arith.constant 0 : i32
    return %c0_i32, %arg0 : i32, i32
  }
}

module attributes {stable_mosaic.version = 11 : i64} {
  func.func @kernel(%arg0: i32, %arg1: i32, %arg2: memref<8x256xbf16, #tpu.memory_space<vmem>>, %arg3: memref<256x512xbf16, #tpu.memory_space<vmem>>, %arg4: memref<1x512xf32, #tpu.memory_space<vmem>>, %arg5: memref<1x512xf32, #tpu.memory_space<vmem>>, %arg6: memref<8x512xbf16, #tpu.memory_space<vmem>>, %arg7: memref<8x512xf32, #tpu.memory_space<vmem>>) attributes {dimension_semantics = [#tpu.dimension_semantics<parallel>, #tpu.dimension_semantics<arbitrary>], iteration_bounds = array<i64: 1, 9>, scalar_prefetch = 0 : i64, scratch_operands = 1 : i64, tpu.core_type = #tpu.core_type<tc>, window_params = [{transform_indices = @transform_0, window_bounds = array<i64: 8, 256>}, {transform_indices = @transform_1, window_bounds = array<i64: 256, 512>}, {transform_indices = @transform_2, window_bounds = array<i64: 1, 512>}, {transform_indices = @transform_3, window_bounds = array<i64: 1, 512>}, {transform_indices = @transform_4, window_bounds = array<i64: 8, 512>}]} {
    %c0_i32 = arith.constant 0 : i32
    %0 = arith.cmpi eq, %arg1, %c0_i32 : i32
    %1 = arith.extui %0 : i1 to i32
    %c0_i32_0 = arith.constant 0 : i32
    %2 = arith.cmpi ne, %1, %c0_i32_0 : i32
    scf.if %2 {
      %cst_9 = arith.constant 0.000000e+00 : f32
      %12 = vector.broadcast %cst_9 : f32 to vector<8x512xf32>
      %c0_10 = arith.constant 0 : index
      %c0_11 = arith.constant 0 : index
      %13 = vector.load %arg7[%c0_10, %c0_11] : memref<8x512xf32, #tpu.memory_space<vmem>>, vector<8x512xf32>
      tpu.vector_store %arg7[%c0_10, %c0_11], %12 {strides = array<i32>} : memref<8x512xf32, #tpu.memory_space<vmem>>, vector<8x512xf32>,
    } else {
    }
    %c0 = arith.constant 0 : index
    %c0_1 = arith.constant 0 : index
    %3 = vector.load %arg7[%c0, %c0_1] : memref<8x512xf32, #tpu.memory_space<vmem>>, vector<8x512xf32>
    %c0_2 = arith.constant 0 : index
    %c0_3 = arith.constant 0 : index
    %4 = vector.load %arg2[%c0_2, %c0_3] : memref<8x256xbf16, #tpu.memory_space<vmem>>, vector<8x256xbf16>
    %c0_4 = arith.constant 0 : index
    %c0_5 = arith.constant 0 : index
    %5 = vector.load %arg3[%c0_4, %c0_5] : memref<256x512xbf16, #tpu.memory_space<vmem>>, vector<256x512xbf16>
    %cst = arith.constant dense<0.000000e+00> : vector<8x512xf32>
    %6 = tpu.matmul %4, %5, %cst {dimension_numbers = #tpu.dot_dimension_numbers<[1], [0], [0], [1], [0, 0, 1, 1], [], []>} : vector<8x256xbf16>, vector<256x512xbf16>, vector<8x512xf32> -> vector<8x512xf32>
    %7 = arith.addf %3, %6 : vector<8x512xf32>
    %c0_6 = arith.constant 0 : index
    %c0_7 = arith.constant 0 : index
    %8 = vector.load %arg7[%c0_6, %c0_7] : memref<8x512xf32, #tpu.memory_space<vmem>>, vector<8x512xf32>
    tpu.vector_store %arg7[%c0_6, %c0_7], %7 {strides = array<i32>} : memref<8x512xf32, #tpu.memory_space<vmem>>, vector<8x512xf32>,
    %c8_i32 = arith.constant 8 : i32
    %9 = arith.cmpi eq, %arg1, %c8_i32 : i32
    %10 = arith.extui %9 : i1 to i32
    %c0_i32_8 = arith.constant 0 : i32
    %11 = arith.cmpi ne, %10, %c0_i32_8 : i32
    scf.if %11 {
      %c0_9 = arith.constant 0 : index
      %c0_10 = arith.constant 0 : index
      %12 = vector.load %arg7[%c0_9, %c0_10] : memref<8x512xf32, #tpu.memory_space<vmem>>, vector<8x512xf32>
      %cst_11 = arith.constant dense<0.000000e+00> : vector<512xf32>
      %13 = vector.multi_reduction <add>, %12, %cst_11 [0] : vector<8x512xf32> to vector<512xf32>
      %14 = vector.shape_cast %13 : vector<512xf32> to vector<1x512xf32>
      %cst_12 = arith.constant 5.000000e-01 : f32
      %15 = vector.broadcast %cst_12 : f32 to vector<1x512xf32>
      %16 = arith.mulf %14, %15 : vector<1x512xf32>
      %17 = arith.mulf %12, %12 : vector<8x512xf32>
      %cst_13 = arith.constant dense<0.000000e+00> : vector<512xf32>
      %18 = vector.multi_reduction <add>, %17, %cst_13 [0] : vector<8x512xf32> to vector<512xf32>
      %19 = vector.shape_cast %18 : vector<512xf32> to vector<1x512xf32>
      %cst_14 = arith.constant 5.000000e-01 : f32
      %20 = vector.broadcast %cst_14 : f32 to vector<1x512xf32>
      %21 = arith.mulf %19, %20 : vector<1x512xf32>
      %22 = arith.mulf %16, %16 : vector<1x512xf32>
      %23 = arith.subf %21, %22 : vector<1x512xf32>
      %cst_15 = arith.constant 0.000000e+00 : f32
      %24 = vector.broadcast %cst_15 : f32 to vector<1x512xf32>
      %25 = arith.maximumf %23, %24 : vector<1x512xf32>
      %26 = vector.broadcast %16 : vector<1x512xf32> to vector<8x512xf32>
      %27 = arith.subf %12, %26 : vector<8x512xf32>
      %cst_16 = arith.constant 9.99999974E-6 : f32
      %28 = vector.broadcast %cst_16 : f32 to vector<1x512xf32>
      %29 = arith.addf %25, %28 : vector<1x512xf32>
      %30 = math.rsqrt %29 : vector<1x512xf32>
      %31 = vector.broadcast %30 : vector<1x512xf32> to vector<8x512xf32>
      %32 = arith.mulf %27, %31 : vector<8x512xf32>
      %c0_17 = arith.constant 0 : index
      %c0_18 = arith.constant 0 : index
      %33 = vector.load %arg4[%c0_17, %c0_18] : memref<1x512xf32, #tpu.memory_space<vmem>>, vector<1x512xf32>
      %34 = vector.broadcast %33 : vector<1x512xf32> to vector<8x512xf32>
      %35 = arith.mulf %32, %34 : vector<8x512xf32>
      %c0_19 = arith.constant 0 : index
      %c0_20 = arith.constant 0 : index
      %36 = vector.load %arg5[%c0_19, %c0_20] : memref<1x512xf32, #tpu.memory_space<vmem>>, vector<1x512xf32>
      %37 = vector.broadcast %36 : vector<1x512xf32> to vector<8x512xf32>
      %38 = arith.addf %35, %37 : vector<8x512xf32>
      %cst_21 = arith.constant 0.000000e+00 : f32
      %39 = vector.broadcast %cst_21 : f32 to vector<8x512xf32>
      %40 = arith.maximumf %38, %39 : vector<8x512xf32>
      %41 = arith.truncf %40 : vector<8x512xf32> to vector<8x512xbf16>
      %c0_22 = arith.constant 0 : index
      %c0_23 = arith.constant 0 : index
      %42 = vector.load %arg6[%c0_22, %c0_23] : memref<8x512xbf16, #tpu.memory_space<vmem>>, vector<8x512xbf16>
      tpu.vector_store %arg6[%c0_22, %c0_23], %41 {strides = array<i32>} : memref<8x512xbf16, #tpu.memory_space<vmem>>, vector<8x512xbf16>,
    } else {
    }
    return
  }
  func.func @transform_0(%arg0: i32, %arg1: i32) -> (i32, i32) {
    %c0_i32 = arith.constant 0 : i32
    %c0_i32_0 = arith.constant 0 : i32
    return %c0_i32, %arg1 : i32, i32
  }
  func.func @transform_1(%arg0: i32, %arg1: i32) -> (i32, i32) {
    %c0_i32 = arith.constant 0 : i32
    return %arg1, %arg0 : i32, i32
  }
  func.func @transform_2(%arg0: i32, %arg1: i32) -> (i32, i32) {
    %c0_i32 = arith.constant 0 : i32
    %c0_i32_0 = arith.constant 0 : i32
    return %c0_i32, %arg0 : i32, i32
  }
  func.func @transform_3(%arg0: i32, %arg1: i32) -> (i32, i32) {
    %c0_i32 = arith.constant 0 : i32
    %c0_i32_0 = arith.constant 0 : i32
    return %c0_i32, %arg0 : i32, i32
  }
  func.func @transform_4(%arg0: i32, %arg1: i32) -> (i32, i32) {
    %c0_i32 = arith.constant 0 : i32
    %c0_i32_0 = arith.constant 0 : i32
    return %c0_i32, %arg0 : i32, i32
  }
}

module attributes {stable_mosaic.version = 11 : i64} {
  func.func @kernel(%arg0: i32, %arg1: i32, %arg2: memref<8x256xbf16, #tpu.memory_space<vmem>>, %arg3: memref<256x512xbf16, #tpu.memory_space<vmem>>, %arg4: memref<1x512xf32, #tpu.memory_space<vmem>>, %arg5: memref<1x512xf32, #tpu.memory_space<vmem>>, %arg6: memref<8x512xbf16, #tpu.memory_space<vmem>>) attributes {dimension_semantics = [#tpu.dimension_semantics<parallel>, #tpu.dimension_semantics<arbitrary>], iteration_bounds = array<i64: 1, 1>, scalar_prefetch = 0 : i64, scratch_operands = 0 : i64, tpu.core_type = #tpu.core_type<tc>, window_params = [{transform_indices = @transform_0, window_bounds = array<i64: 8, 256>}, {transform_indices = @transform_1, window_bounds = array<i64: 256, 512>}, {transform_indices = @transform_2, window_bounds = array<i64: 1, 512>}, {transform_indices = @transform_3, window_bounds = array<i64: 1, 512>}, {transform_indices = @transform_4, window_bounds = array<i64: 8, 512>}]} {
    %c0 = arith.constant 0 : index
    %c0_0 = arith.constant 0 : index
    %0 = vector.load %arg2[%c0, %c0_0] : memref<8x256xbf16, #tpu.memory_space<vmem>>, vector<8x256xbf16>
    %c0_1 = arith.constant 0 : index
    %c0_2 = arith.constant 0 : index
    %1 = vector.load %arg3[%c0_1, %c0_2] : memref<256x512xbf16, #tpu.memory_space<vmem>>, vector<256x512xbf16>
    %cst = arith.constant dense<0.000000e+00> : vector<8x512xf32>
    %2 = tpu.matmul %0, %1, %cst {dimension_numbers = #tpu.dot_dimension_numbers<[1], [0], [0], [1], [0, 0, 1, 1], [], []>} : vector<8x256xbf16>, vector<256x512xbf16>, vector<8x512xf32> -> vector<8x512xf32>
    %cst_3 = arith.constant dense<0.000000e+00> : vector<512xf32>
    %3 = vector.multi_reduction <add>, %2, %cst_3 [0] : vector<8x512xf32> to vector<512xf32>
    %4 = vector.shape_cast %3 : vector<512xf32> to vector<1x512xf32>
    %cst_4 = arith.constant 5.000000e-01 : f32
    %5 = vector.broadcast %cst_4 : f32 to vector<1x512xf32>
    %6 = arith.mulf %4, %5 : vector<1x512xf32>
    %7 = arith.mulf %2, %2 : vector<8x512xf32>
    %cst_5 = arith.constant dense<0.000000e+00> : vector<512xf32>
    %8 = vector.multi_reduction <add>, %7, %cst_5 [0] : vector<8x512xf32> to vector<512xf32>
    %9 = vector.shape_cast %8 : vector<512xf32> to vector<1x512xf32>
    %cst_6 = arith.constant 5.000000e-01 : f32
    %10 = vector.broadcast %cst_6 : f32 to vector<1x512xf32>
    %11 = arith.mulf %9, %10 : vector<1x512xf32>
    %12 = arith.mulf %6, %6 : vector<1x512xf32>
    %13 = arith.subf %11, %12 : vector<1x512xf32>
    %cst_7 = arith.constant 0.000000e+00 : f32
    %14 = vector.broadcast %cst_7 : f32 to vector<1x512xf32>
    %15 = arith.maximumf %13, %14 : vector<1x512xf32>
    %16 = vector.broadcast %6 : vector<1x512xf32> to vector<8x512xf32>
    %17 = arith.subf %2, %16 : vector<8x512xf32>
    %cst_8 = arith.constant 9.99999974E-6 : f32
    %18 = vector.broadcast %cst_8 : f32 to vector<1x512xf32>
    %19 = arith.addf %15, %18 : vector<1x512xf32>
    %20 = math.rsqrt %19 : vector<1x512xf32>
    %21 = vector.broadcast %20 : vector<1x512xf32> to vector<8x512xf32>
    %22 = arith.mulf %17, %21 : vector<8x512xf32>
    %c0_9 = arith.constant 0 : index
    %c0_10 = arith.constant 0 : index
    %23 = vector.load %arg4[%c0_9, %c0_10] : memref<1x512xf32, #tpu.memory_space<vmem>>, vector<1x512xf32>
    %24 = vector.broadcast %23 : vector<1x512xf32> to vector<8x512xf32>
    %25 = arith.mulf %22, %24 : vector<8x512xf32>
    %c0_11 = arith.constant 0 : index
    %c0_12 = arith.constant 0 : index
    %26 = vector.load %arg5[%c0_11, %c0_12] : memref<1x512xf32, #tpu.memory_space<vmem>>, vector<1x512xf32>
    %27 = vector.broadcast %26 : vector<1x512xf32> to vector<8x512xf32>
    %28 = arith.addf %25, %27 : vector<8x512xf32>
    %29 = arith.truncf %28 : vector<8x512xf32> to vector<8x512xbf16>
    %c0_13 = arith.constant 0 : index
    %c0_14 = arith.constant 0 : index
    %30 = vector.load %arg6[%c0_13, %c0_14] : memref<8x512xbf16, #tpu.memory_space<vmem>>, vector<8x512xbf16>
    tpu.vector_store %arg6[%c0_13, %c0_14], %29 {strides = array<i32>} : memref<8x512xbf16, #tpu.memory_space<vmem>>, vector<8x512xbf16>,
    return
  }
  func.func @transform_0(%arg0: i32, %arg1: i32) -> (i32, i32) {
    %c0_i32 = arith.constant 0 : i32
    %c0_i32_0 = arith.constant 0 : i32
    return %c0_i32, %arg1 : i32, i32
  }
  func.func @transform_1(%arg0: i32, %arg1: i32) -> (i32, i32) {
    %c0_i32 = arith.constant 0 : i32
    return %arg1, %arg0 : i32, i32
  }
  func.func @transform_2(%arg0: i32, %arg1: i32) -> (i32, i32) {
    %c0_i32 = arith.constant 0 : i32
    %c0_i32_0 = arith.constant 0 : i32
    return %c0_i32, %arg0 : i32, i32
  }
  func.func @transform_3(%arg0: i32, %arg1: i32) -> (i32, i32) {
    %c0_i32 = arith.constant 0 : i32
    %c0_i32_0 = arith.constant 0 : i32
    return %c0_i32, %arg0 : i32, i32
  }
  func.func @transform_4(%arg0: i32, %arg1: i32) -> (i32, i32) {
    %c0_i32 = arith.constant 0 : i32
    %c0_i32_0 = arith.constant 0 : i32
    return %c0_i32, %arg0 : i32, i32
  }
}

module attributes {stable_mosaic.version = 11 : i64} {
  func.func @kernel(%arg0: i32, %arg1: i32, %arg2: memref<8x256xbf16, #tpu.memory_space<vmem>>, %arg3: memref<256x512xbf16, #tpu.memory_space<vmem>>, %arg4: memref<1x512xf32, #tpu.memory_space<vmem>>, %arg5: memref<1x512xf32, #tpu.memory_space<vmem>>, %arg6: memref<8x512xbf16, #tpu.memory_space<vmem>>, %arg7: memref<8x512xbf16, #tpu.memory_space<vmem>>, %arg8: memref<8x512xf32, #tpu.memory_space<vmem>>) attributes {dimension_semantics = [#tpu.dimension_semantics<parallel>, #tpu.dimension_semantics<arbitrary>], iteration_bounds = array<i64: 1, 18>, scalar_prefetch = 0 : i64, scratch_operands = 1 : i64, tpu.core_type = #tpu.core_type<tc>, window_params = [{transform_indices = @transform_0, window_bounds = array<i64: 8, 256>}, {transform_indices = @transform_1, window_bounds = array<i64: 256, 512>}, {transform_indices = @transform_2, window_bounds = array<i64: 1, 512>}, {transform_indices = @transform_3, window_bounds = array<i64: 1, 512>}, {transform_indices = @transform_4, window_bounds = array<i64: 8, 512>}, {transform_indices = @transform_5, window_bounds = array<i64: 8, 512>}]} {
    %c0_i32 = arith.constant 0 : i32
    %0 = arith.cmpi eq, %arg1, %c0_i32 : i32
    %1 = arith.extui %0 : i1 to i32
    %c0_i32_0 = arith.constant 0 : i32
    %2 = arith.cmpi ne, %1, %c0_i32_0 : i32
    scf.if %2 {
      %cst_9 = arith.constant 0.000000e+00 : f32
      %12 = vector.broadcast %cst_9 : f32 to vector<8x512xf32>
      %c0_10 = arith.constant 0 : index
      %c0_11 = arith.constant 0 : index
      %13 = vector.load %arg8[%c0_10, %c0_11] : memref<8x512xf32, #tpu.memory_space<vmem>>, vector<8x512xf32>
      tpu.vector_store %arg8[%c0_10, %c0_11], %12 {strides = array<i32>} : memref<8x512xf32, #tpu.memory_space<vmem>>, vector<8x512xf32>,
    } else {
    }
    %c0 = arith.constant 0 : index
    %c0_1 = arith.constant 0 : index
    %3 = vector.load %arg8[%c0, %c0_1] : memref<8x512xf32, #tpu.memory_space<vmem>>, vector<8x512xf32>
    %c0_2 = arith.constant 0 : index
    %c0_3 = arith.constant 0 : index
    %4 = vector.load %arg2[%c0_2, %c0_3] : memref<8x256xbf16, #tpu.memory_space<vmem>>, vector<8x256xbf16>
    %c0_4 = arith.constant 0 : index
    %c0_5 = arith.constant 0 : index
    %5 = vector.load %arg3[%c0_4, %c0_5] : memref<256x512xbf16, #tpu.memory_space<vmem>>, vector<256x512xbf16>
    %cst = arith.constant dense<0.000000e+00> : vector<8x512xf32>
    %6 = tpu.matmul %4, %5, %cst {dimension_numbers = #tpu.dot_dimension_numbers<[1], [0], [0], [1], [0, 0, 1, 1], [], []>} : vector<8x256xbf16>, vector<256x512xbf16>, vector<8x512xf32> -> vector<8x512xf32>
    %7 = arith.addf %3, %6 : vector<8x512xf32>
    %c0_6 = arith.constant 0 : index
    %c0_7 = arith.constant 0 : index
    %8 = vector.load %arg8[%c0_6, %c0_7] : memref<8x512xf32, #tpu.memory_space<vmem>>, vector<8x512xf32>
    tpu.vector_store %arg8[%c0_6, %c0_7], %7 {strides = array<i32>} : memref<8x512xf32, #tpu.memory_space<vmem>>, vector<8x512xf32>,
    %c17_i32 = arith.constant 17 : i32
    %9 = arith.cmpi eq, %arg1, %c17_i32 : i32
    %10 = arith.extui %9 : i1 to i32
    %c0_i32_8 = arith.constant 0 : i32
    %11 = arith.cmpi ne, %10, %c0_i32_8 : i32
    scf.if %11 {
      %c0_9 = arith.constant 0 : index
      %c0_10 = arith.constant 0 : index
      %12 = vector.load %arg8[%c0_9, %c0_10] : memref<8x512xf32, #tpu.memory_space<vmem>>, vector<8x512xf32>
      %cst_11 = arith.constant dense<0.000000e+00> : vector<512xf32>
      %13 = vector.multi_reduction <add>, %12, %cst_11 [0] : vector<8x512xf32> to vector<512xf32>
      %14 = vector.shape_cast %13 : vector<512xf32> to vector<1x512xf32>
      %cst_12 = arith.constant 5.000000e-01 : f32
      %15 = vector.broadcast %cst_12 : f32 to vector<1x512xf32>
      %16 = arith.mulf %14, %15 : vector<1x512xf32>
      %17 = arith.mulf %12, %12 : vector<8x512xf32>
      %cst_13 = arith.constant dense<0.000000e+00> : vector<512xf32>
      %18 = vector.multi_reduction <add>, %17, %cst_13 [0] : vector<8x512xf32> to vector<512xf32>
      %19 = vector.shape_cast %18 : vector<512xf32> to vector<1x512xf32>
      %cst_14 = arith.constant 5.000000e-01 : f32
      %20 = vector.broadcast %cst_14 : f32 to vector<1x512xf32>
      %21 = arith.mulf %19, %20 : vector<1x512xf32>
      %22 = arith.mulf %16, %16 : vector<1x512xf32>
      %23 = arith.subf %21, %22 : vector<1x512xf32>
      %cst_15 = arith.constant 0.000000e+00 : f32
      %24 = vector.broadcast %cst_15 : f32 to vector<1x512xf32>
      %25 = arith.maximumf %23, %24 : vector<1x512xf32>
      %26 = vector.broadcast %16 : vector<1x512xf32> to vector<8x512xf32>
      %27 = arith.subf %12, %26 : vector<8x512xf32>
      %cst_16 = arith.constant 9.99999974E-6 : f32
      %28 = vector.broadcast %cst_16 : f32 to vector<1x512xf32>
      %29 = arith.addf %25, %28 : vector<1x512xf32>
      %30 = math.rsqrt %29 : vector<1x512xf32>
      %31 = vector.broadcast %30 : vector<1x512xf32> to vector<8x512xf32>
      %32 = arith.mulf %27, %31 : vector<8x512xf32>
      %c0_17 = arith.constant 0 : index
      %c0_18 = arith.constant 0 : index
      %33 = vector.load %arg4[%c0_17, %c0_18] : memref<1x512xf32, #tpu.memory_space<vmem>>, vector<1x512xf32>
      %34 = vector.broadcast %33 : vector<1x512xf32> to vector<8x512xf32>
      %35 = arith.mulf %32, %34 : vector<8x512xf32>
      %c0_19 = arith.constant 0 : index
      %c0_20 = arith.constant 0 : index
      %36 = vector.load %arg5[%c0_19, %c0_20] : memref<1x512xf32, #tpu.memory_space<vmem>>, vector<1x512xf32>
      %37 = vector.broadcast %36 : vector<1x512xf32> to vector<8x512xf32>
      %38 = arith.addf %35, %37 : vector<8x512xf32>
      %c0_21 = arith.constant 0 : index
      %c0_22 = arith.constant 0 : index
      %39 = vector.load %arg6[%c0_21, %c0_22] : memref<8x512xbf16, #tpu.memory_space<vmem>>, vector<8x512xbf16>
      %40 = arith.extf %39 : vector<8x512xbf16> to vector<8x512xf32>
      %41 = arith.addf %38, %40 : vector<8x512xf32>
      %cst_23 = arith.constant 0.000000e+00 : f32
      %42 = vector.broadcast %cst_23 : f32 to vector<8x512xf32>
      %43 = arith.maximumf %41, %42 : vector<8x512xf32>
      %44 = arith.truncf %43 : vector<8x512xf32> to vector<8x512xbf16>
      %c0_24 = arith.constant 0 : index
      %c0_25 = arith.constant 0 : index
      %45 = vector.load %arg7[%c0_24, %c0_25] : memref<8x512xbf16, #tpu.memory_space<vmem>>, vector<8x512xbf16>
      tpu.vector_store %arg7[%c0_24, %c0_25], %44 {strides = array<i32>} : memref<8x512xbf16, #tpu.memory_space<vmem>>, vector<8x512xbf16>,
    } else {
    }
    return
  }
  func.func @transform_0(%arg0: i32, %arg1: i32) -> (i32, i32) {
    %c0_i32 = arith.constant 0 : i32
    %c0_i32_0 = arith.constant 0 : i32
    return %c0_i32, %arg1 : i32, i32
  }
  func.func @transform_1(%arg0: i32, %arg1: i32) -> (i32, i32) {
    %c0_i32 = arith.constant 0 : i32
    return %arg1, %arg0 : i32, i32
  }
  func.func @transform_2(%arg0: i32, %arg1: i32) -> (i32, i32) {
    %c0_i32 = arith.constant 0 : i32
    %c0_i32_0 = arith.constant 0 : i32
    return %c0_i32, %arg0 : i32, i32
  }
  func.func @transform_3(%arg0: i32, %arg1: i32) -> (i32, i32) {
    %c0_i32 = arith.constant 0 : i32
    %c0_i32_0 = arith.constant 0 : i32
    return %c0_i32, %arg0 : i32, i32
  }
  func.func @transform_4(%arg0: i32, %arg1: i32) -> (i32, i32) {
    %c0_i32 = arith.constant 0 : i32
    %c0_i32_0 = arith.constant 0 : i32
    return %c0_i32, %arg0 : i32, i32
  }
  func.func @transform_5(%arg0: i32, %arg1: i32) -> (i32, i32) {
    %c0_i32 = arith.constant 0 : i32
    %c0_i32_0 = arith.constant 0 : i32
    return %c0_i32, %arg0 : i32, i32
  }
}

module attributes {stable_mosaic.version = 11 : i64} {
  func.func @kernel(%arg0: i32, %arg1: i32, %arg2: memref<8x256xbf16, #tpu.memory_space<vmem>>, %arg3: memref<256x512xbf16, #tpu.memory_space<vmem>>, %arg4: memref<1x512xf32, #tpu.memory_space<vmem>>, %arg5: memref<1x512xf32, #tpu.memory_space<vmem>>, %arg6: memref<8x512xbf16, #tpu.memory_space<vmem>>, %arg7: memref<8x512xf32, #tpu.memory_space<vmem>>) attributes {dimension_semantics = [#tpu.dimension_semantics<parallel>, #tpu.dimension_semantics<arbitrary>], iteration_bounds = array<i64: 1, 18>, scalar_prefetch = 0 : i64, scratch_operands = 1 : i64, tpu.core_type = #tpu.core_type<tc>, window_params = [{transform_indices = @transform_0, window_bounds = array<i64: 8, 256>}, {transform_indices = @transform_1, window_bounds = array<i64: 256, 512>}, {transform_indices = @transform_2, window_bounds = array<i64: 1, 512>}, {transform_indices = @transform_3, window_bounds = array<i64: 1, 512>}, {transform_indices = @transform_4, window_bounds = array<i64: 8, 512>}]} {
    %c0_i32 = arith.constant 0 : i32
    %0 = arith.cmpi eq, %arg1, %c0_i32 : i32
    %1 = arith.extui %0 : i1 to i32
    %c0_i32_0 = arith.constant 0 : i32
    %2 = arith.cmpi ne, %1, %c0_i32_0 : i32
    scf.if %2 {
      %cst_9 = arith.constant 0.000000e+00 : f32
      %12 = vector.broadcast %cst_9 : f32 to vector<8x512xf32>
      %c0_10 = arith.constant 0 : index
      %c0_11 = arith.constant 0 : index
      %13 = vector.load %arg7[%c0_10, %c0_11] : memref<8x512xf32, #tpu.memory_space<vmem>>, vector<8x512xf32>
      tpu.vector_store %arg7[%c0_10, %c0_11], %12 {strides = array<i32>} : memref<8x512xf32, #tpu.memory_space<vmem>>, vector<8x512xf32>,
    } else {
    }
    %c0 = arith.constant 0 : index
    %c0_1 = arith.constant 0 : index
    %3 = vector.load %arg7[%c0, %c0_1] : memref<8x512xf32, #tpu.memory_space<vmem>>, vector<8x512xf32>
    %c0_2 = arith.constant 0 : index
    %c0_3 = arith.constant 0 : index
    %4 = vector.load %arg2[%c0_2, %c0_3] : memref<8x256xbf16, #tpu.memory_space<vmem>>, vector<8x256xbf16>
    %c0_4 = arith.constant 0 : index
    %c0_5 = arith.constant 0 : index
    %5 = vector.load %arg3[%c0_4, %c0_5] : memref<256x512xbf16, #tpu.memory_space<vmem>>, vector<256x512xbf16>
    %cst = arith.constant dense<0.000000e+00> : vector<8x512xf32>
    %6 = tpu.matmul %4, %5, %cst {dimension_numbers = #tpu.dot_dimension_numbers<[1], [0], [0], [1], [0, 0, 1, 1], [], []>} : vector<8x256xbf16>, vector<256x512xbf16>, vector<8x512xf32> -> vector<8x512xf32>
    %7 = arith.addf %3, %6 : vector<8x512xf32>
    %c0_6 = arith.constant 0 : index
    %c0_7 = arith.constant 0 : index
    %8 = vector.load %arg7[%c0_6, %c0_7] : memref<8x512xf32, #tpu.memory_space<vmem>>, vector<8x512xf32>
    tpu.vector_store %arg7[%c0_6, %c0_7], %7 {strides = array<i32>} : memref<8x512xf32, #tpu.memory_space<vmem>>, vector<8x512xf32>,
    %c17_i32 = arith.constant 17 : i32
    %9 = arith.cmpi eq, %arg1, %c17_i32 : i32
    %10 = arith.extui %9 : i1 to i32
    %c0_i32_8 = arith.constant 0 : i32
    %11 = arith.cmpi ne, %10, %c0_i32_8 : i32
    scf.if %11 {
      %c0_9 = arith.constant 0 : index
      %c0_10 = arith.constant 0 : index
      %12 = vector.load %arg7[%c0_9, %c0_10] : memref<8x512xf32, #tpu.memory_space<vmem>>, vector<8x512xf32>
      %cst_11 = arith.constant dense<0.000000e+00> : vector<512xf32>
      %13 = vector.multi_reduction <add>, %12, %cst_11 [0] : vector<8x512xf32> to vector<512xf32>
      %14 = vector.shape_cast %13 : vector<512xf32> to vector<1x512xf32>
      %cst_12 = arith.constant 5.000000e-01 : f32
      %15 = vector.broadcast %cst_12 : f32 to vector<1x512xf32>
      %16 = arith.mulf %14, %15 : vector<1x512xf32>
      %17 = arith.mulf %12, %12 : vector<8x512xf32>
      %cst_13 = arith.constant dense<0.000000e+00> : vector<512xf32>
      %18 = vector.multi_reduction <add>, %17, %cst_13 [0] : vector<8x512xf32> to vector<512xf32>
      %19 = vector.shape_cast %18 : vector<512xf32> to vector<1x512xf32>
      %cst_14 = arith.constant 5.000000e-01 : f32
      %20 = vector.broadcast %cst_14 : f32 to vector<1x512xf32>
      %21 = arith.mulf %19, %20 : vector<1x512xf32>
      %22 = arith.mulf %16, %16 : vector<1x512xf32>
      %23 = arith.subf %21, %22 : vector<1x512xf32>
      %cst_15 = arith.constant 0.000000e+00 : f32
      %24 = vector.broadcast %cst_15 : f32 to vector<1x512xf32>
      %25 = arith.maximumf %23, %24 : vector<1x512xf32>
      %26 = vector.broadcast %16 : vector<1x512xf32> to vector<8x512xf32>
      %27 = arith.subf %12, %26 : vector<8x512xf32>
      %cst_16 = arith.constant 9.99999974E-6 : f32
      %28 = vector.broadcast %cst_16 : f32 to vector<1x512xf32>
      %29 = arith.addf %25, %28 : vector<1x512xf32>
      %30 = math.rsqrt %29 : vector<1x512xf32>
      %31 = vector.broadcast %30 : vector<1x512xf32> to vector<8x512xf32>
      %32 = arith.mulf %27, %31 : vector<8x512xf32>
      %c0_17 = arith.constant 0 : index
      %c0_18 = arith.constant 0 : index
      %33 = vector.load %arg4[%c0_17, %c0_18] : memref<1x512xf32, #tpu.memory_space<vmem>>, vector<1x512xf32>
      %34 = vector.broadcast %33 : vector<1x512xf32> to vector<8x512xf32>
      %35 = arith.mulf %32, %34 : vector<8x512xf32>
      %c0_19 = arith.constant 0 : index
      %c0_20 = arith.constant 0 : index
      %36 = vector.load %arg5[%c0_19, %c0_20] : memref<1x512xf32, #tpu.memory_space<vmem>>, vector<1x512xf32>
      %37 = vector.broadcast %36 : vector<1x512xf32> to vector<8x512xf32>
      %38 = arith.addf %35, %37 : vector<8x512xf32>
      %cst_21 = arith.constant 0.000000e+00 : f32
      %39 = vector.broadcast %cst_21 : f32 to vector<8x512xf32>
      %40 = arith.maximumf %38, %39 : vector<8x512xf32>
      %41 = arith.truncf %40 : vector<8x512xf32> to vector<8x512xbf16>
      %c0_22 = arith.constant 0 : index
      %c0_23 = arith.constant 0 : index
      %42 = vector.load %arg6[%c0_22, %c0_23] : memref<8x512xbf16, #tpu.memory_space<vmem>>, vector<8x512xbf16>
      tpu.vector_store %arg6[%c0_22, %c0_23], %41 {strides = array<i32>} : memref<8x512xbf16, #tpu.memory_space<vmem>>, vector<8x512xbf16>,
    } else {
    }
    return
  }
  func.func @transform_0(%arg0: i32, %arg1: i32) -> (i32, i32) {
    %c0_i32 = arith.constant 0 : i32
    %c0_i32_0 = arith.constant 0 : i32
    return %c0_i32, %arg1 : i32, i32
  }
  func.func @transform_1(%arg0: i32, %arg1: i32) -> (i32, i32) {
    %c0_i32 = arith.constant 0 : i32
    return %arg1, %arg0 : i32, i32
  }
  func.func @transform_2(%arg0: i32, %arg1: i32) -> (i32, i32) {
    %c0_i32 = arith.constant 0 : i32
    %c0_i32_0 = arith.constant 0 : i32
    return %c0_i32, %arg0 : i32, i32
  }
  func.func @transform_3(%arg0: i32, %arg1: i32) -> (i32, i32) {
    %c0_i32 = arith.constant 0 : i32
    %c0_i32_0 = arith.constant 0 : i32
    return %c0_i32, %arg0 : i32, i32
  }
  func.func @transform_4(%arg0: i32, %arg1: i32) -> (i32, i32) {
    %c0_i32 = arith.constant 0 : i32
    %c0_i32_0 = arith.constant 0 : i32
    return %c0_i32, %arg0 : i32, i32
  }
}

module attributes {stable_mosaic.version = 11 : i64} {
  func.func @_fc_logsoftmax_kernel(%arg0: memref<8x512xbf16, #tpu.memory_space<vmem>>, %arg1: memref<512x128xbf16, #tpu.memory_space<vmem>>, %arg2: memref<1x128xf32, #tpu.memory_space<vmem>>, %arg3: memref<8x128xf32, #tpu.memory_space<vmem>>) attributes {dimension_semantics = [], scalar_prefetch = 0 : i64, scratch_operands = 0 : i64, tpu.core_type = #tpu.core_type<tc>} {
    %c0 = arith.constant 0 : index
    %c0_0 = arith.constant 0 : index
    %0 = vector.load %arg0[%c0, %c0_0] : memref<8x512xbf16, #tpu.memory_space<vmem>>, vector<8x512xbf16>
    %c0_1 = arith.constant 0 : index
    %c0_2 = arith.constant 0 : index
    %1 = vector.load %arg1[%c0_1, %c0_2] : memref<512x128xbf16, #tpu.memory_space<vmem>>, vector<512x128xbf16>
    %cst = arith.constant dense<0.000000e+00> : vector<8x128xf32>
    %2 = tpu.matmul %0, %1, %cst {dimension_numbers = #tpu.dot_dimension_numbers<[1], [0], [0], [1], [0, 0, 1, 1], [], []>} : vector<8x512xbf16>, vector<512x128xbf16>, vector<8x128xf32> -> vector<8x128xf32>
    %c0_3 = arith.constant 0 : index
    %c0_4 = arith.constant 0 : index
    %3 = vector.load %arg2[%c0_3, %c0_4] : memref<1x128xf32, #tpu.memory_space<vmem>>, vector<1x128xf32>
    %4 = vector.broadcast %3 : vector<1x128xf32> to vector<8x128xf32>
    %5 = arith.addf %2, %4 : vector<8x128xf32>
    %cst_5 = arith.constant dense<0xFF800000> : vector<8xf32>
    %6 = vector.multi_reduction <maximumf>, %5, %cst_5 [1] : vector<8x128xf32> to vector<8xf32>
    %7 = vector.shape_cast %6 : vector<8xf32> to vector<8x1xf32>
    %8 = vector.broadcast %7 : vector<8x1xf32> to vector<8x128xf32>
    %9 = arith.subf %5, %8 : vector<8x128xf32>
    %10 = math.exp %9 : vector<8x128xf32>
    %cst_6 = arith.constant dense<0.000000e+00> : vector<8xf32>
    %11 = vector.multi_reduction <add>, %10, %cst_6 [1] : vector<8x128xf32> to vector<8xf32>
    %12 = vector.shape_cast %11 : vector<8xf32> to vector<8x1xf32>
    %13 = math.log %12 : vector<8x1xf32>
    %14 = vector.broadcast %13 : vector<8x1xf32> to vector<8x128xf32>
    %15 = arith.subf %9, %14 : vector<8x128xf32>
    %c0_7 = arith.constant 0 : index
    %c0_8 = arith.constant 0 : index
    %16 = vector.load %arg3[%c0_7, %c0_8] : memref<8x128xf32, #tpu.memory_space<vmem>>, vector<8x128xf32>
    tpu.vector_store %arg3[%c0_7, %c0_8], %15 {strides = array<i32>} : memref<8x128xf32, #tpu.memory_space<vmem>>, vector<8x128xf32>,
    return
  }
}

</mosaic_0001>

<bundles_post_ra>
// kernel: birdnet_forward.39
= control target key start
LH: loop header
LB: loop body
LE: loop exit
PB: predicated region body
PF: predicated region fallthrough
CT: control target
= control target key end

     0   :  { %s885_s0 = inlined_call_operand.vmem [shape: bf16[128,128], index: 0, kind: input, shape index: {}]   ;;  %s886_s1 = inlined_call_operand.vmem [shape: bf16[128,128], index: 1, kind: input, shape index: {}]   ;;  %s887_s2 = inlined_call_operand.vmem [shape: bf16[128,128], index: 2, kind: input, shape index: {}]   ;;  %s888_s3 = inlined_call_operand.vmem [shape: bf16[128,128], index: 3, kind: input, shape index: {}]   ;;  %s889_s4 = inlined_call_operand.vmem [shape: bf16[128,128], index: 4, kind: input, shape index: {}]   ;;  %s890_s5 = inlined_call_operand.vmem [shape: bf16[128,128], index: 5, kind: input, shape index: {}]   ;;  %s891_s6 = inlined_call_operand.vmem [shape: bf16[128,128], index: 6, kind: input, shape index: {}]   ;;  %s892_s7 = inlined_call_operand.vmem [shape: bf16[128,128], index: 7, kind: input, shape index: {}]   ;;  %s893_s8 = inlined_call_operand.vmem [shape: bf16[128,128], index: 8, kind: input, shape index: {}]   ;;  %s894_s9 = inlined_call_operand.vmem [shape: bf16[128,128], index: 9, kind: output, shape index: {}]  }
   0x1   :  { %v32_v0 = vld [vmem:[%s885_s0] sm:$0xf]  ;;  %v33_v1 = vld [vmem:[%s885_s0 + $0x4] sm:$0xf]  ;;  %v34_v18 = vld [vmem:[%s885_s0 + $0x8] sm:$0xf] }
   0x2   :  { %v48_v2 = vld [vmem:[%s886_s1] sm:$0xf]  ;;  %v49_v3 = vld [vmem:[%s886_s1 + $0x4] sm:$0xf]  ;;  %v35_v19 = vld [vmem:[%s885_s0 + $0xc] sm:$0xf] }
   0x3   :  { %v64_v4 = vmax.bf16 %v48_v2, %v32_v0  ;;  %v80_v5 = vld [vmem:[%s887_s2] sm:$0xf]  ;;  %v81_v6 = vld [vmem:[%s887_s2 + $0x4] sm:$0xf]  ;;  %v65_v7 = vmax.bf16 %v49_v3, %v33_v1  ;;  %v50_v20 = vld [vmem:[%s886_s1 + $0x8] sm:$0xf] }
   0x4   :  { %v112_v8 = vld [vmem:[%s888_s3] sm:$0xf]  ;;  %v113_v10 = vld [vmem:[%s888_s3 + $0x4] sm:$0xf]  ;;  %v51_v22 = vld [vmem:[%s886_s1 + $0xc] sm:$0xf]  ;;  %v66_v23 = vmax.bf16 %v50_v20, %v34_v18 }
   0x5   :  { %v96_v9 = vmax.bf16 %v80_v5, %v64_v4  ;;  %v97_v11 = vmax.bf16 %v81_v6, %v65_v7  ;;  %v144_v12 = vld [vmem:[%s889_s4] sm:$0xf]  ;;  %v145_v14 = vld [vmem:[%s889_s4 + $0x4] sm:$0xf]  ;;  %v82_v24 = vld [vmem:[%s887_s2 + $0x8] sm:$0xf]  ;;  %v67_v28 = vmax.bf16 %v51_v22, %v35_v19 }
   0x6   :  { %v176_v15 = vld [vmem:[%s890_s5] sm:$0xf]  ;;  %v177_v16 = vld [vmem:[%s890_s5 + $0x4] sm:$0xf]  ;;  %v83_v25 = vld [vmem:[%s887_s2 + $0xc] sm:$0xf]  ;;  %v98_v33 = vmax.bf16 %v82_v24, %v66_v23 }
   0x7   :  { %v128_v13 = vmax.bf16 %v112_v8, %v96_v9  ;;  %v129_v17 = vmax.bf16 %v113_v10, %v97_v11  ;;  %v208_v27 = vld [vmem:[%s891_s6] sm:$0xf]  ;;  %v114_v29 = vld [vmem:[%s888_s3 + $0x8] sm:$0xf]  ;;  %v209_v31 = vld [vmem:[%s891_s6 + $0x4] sm:$0xf]  ;;  %v99_v38 = vmax.bf16 %v83_v25, %v67_v28 }
   0x8   :  { %v240_v32 = vld [vmem:[%s892_s7] sm:$0xf]  ;;  %v115_v34 = vld [vmem:[%s888_s3 + $0xc] sm:$0xf]  ;;  %v241_v36 = vld [vmem:[%s892_s7 + $0x4] sm:$0xf]  ;;  %v130_v42 = vmax.bf16 %v114_v29, %v98_v33 }
   0x9   :  { %v160_v21 = vmax.bf16 %v144_v12, %v128_v13  ;;  %v161_v26 = vmax.bf16 %v145_v14, %v129_v17  ;;  %v272_v37 = vld [vmem:[%s893_s8] sm:$0xf]  ;;  %v146_v39 = vld [vmem:[%s889_s4 + $0x8] sm:$0xf]  ;;  %v273_v41 = vld [vmem:[%s893_s8 + $0x4] sm:$0xf]  ;;  %v131_v47 = vmax.bf16 %v115_v34, %v99_v38 }
   0xa   :  { %v147_v43 = vld [vmem:[%s889_s4 + $0xc] sm:$0xf]  ;;  %v178_v44 = vld [vmem:[%s890_s5 + $0x8] sm:$0xf]  ;;  %v36_v48 = vld [vmem:[%s885_s0 + $0x10] sm:$0xf]  ;;  %v162_v52 = vmax.bf16 %v146_v39, %v130_v42 }
   0xb   :  { %v192_v30 = vmax.bf16 %v176_v15, %v160_v21  ;;  %v193_v35 = vmax.bf16 %v177_v16, %v161_v26  ;;  %v179_v45 = vld [vmem:[%s890_s5 + $0xc] sm:$0xf]  ;;  %v37_v49 = vld [vmem:[%s885_s0 + $0x14] sm:$0xf]  ;;  %v52_v50 = vld [vmem:[%s886_s1 + $0x10] sm:$0xf]  ;;  %v163_v58 = vmax.bf16 %v147_v43, %v131_v47 }
   0xc   :  { %v53_v53 = vld [vmem:[%s886_s1 + $0x14] sm:$0xf]  ;;  %v68_v54 = vmax.bf16 %v52_v50, %v36_v48  ;;  %v84_v55 = vld [vmem:[%s887_s2 + $0x10] sm:$0xf]  ;;  %v210_v59 = vld [vmem:[%s891_s6 + $0x8] sm:$0xf]  ;;  %v194_v63 = vmax.bf16 %v178_v44, %v162_v52 }
   0xd   :  { %v224_v40 = vmax.bf16 %v208_v27, %v192_v30  ;;  %v225_v46 = vmax.bf16 %v209_v31, %v193_v35  ;;  %v85_v56 = vld [vmem:[%s887_s2 + $0x14] sm:$0xf]  ;;  %v69_v60 = vmax.bf16 %v53_v53, %v37_v49  ;;  %v116_v61 = vld [vmem:[%s888_s3 + $0x10] sm:$0xf]  ;;  %v211_v0 = vld [vmem:[%s891_s6 + $0xc] sm:$0xf]  ;;  %v195_v5 = vmax.bf16 %v179_v45, %v163_v58 }
   0xe   :  { %v242_v1 = vld [vmem:[%s892_s7 + $0x8] sm:$0xf]  ;;  %v100_v2 = vmax.bf16 %v84_v55, %v68_v54  ;;  %v117_v3 = vld [vmem:[%s888_s3 + $0x14] sm:$0xf]  ;;  %v243_v6 = vld [vmem:[%s892_s7 + $0xc] sm:$0xf]  ;;  %v226_v10 = vmax.bf16 %v210_v59, %v194_v63 }
   0xf   :  { %v256_v51 = vmax.bf16 %v240_v32, %v224_v40  ;;  %v257_v57 = vmax.bf16 %v241_v36, %v225_v46  ;;  %v274_v7 = vld [vmem:[%s893_s8 + $0x8] sm:$0xf]  ;;  %v101_v8 = vmax.bf16 %v85_v56, %v69_v60  ;;  %v148_v9 = vld [vmem:[%s889_s4 + $0x10] sm:$0xf]  ;;  %v275_v11 = vld [vmem:[%s893_s8 + $0xc] sm:$0xf]  ;;  %v227_v17 = vmax.bf16 %v211_v0, %v195_v5 }
  0x10   :  { %v132_v12 = vmax.bf16 %v116_v61, %v100_v2  ;;  %v149_v13 = vld [vmem:[%s889_s4 + $0x14] sm:$0xf]  ;;  %v180_v14 = vld [vmem:[%s890_s5 + $0x10] sm:$0xf]  ;;  %v38_v19 = vld [vmem:[%s885_s0 + $0x18] sm:$0xf]  ;;  %v258_v22 = vmax.bf16 %v242_v1, %v226_v10 }
  0x11   :  { %v288_v62 = vmax.bf16 %v272_v37, %v256_v51  ;;  %v289_v4 = vmax.bf16 %v273_v41, %v257_v57  ;;  %v181_v15 = vld [vmem:[%s890_s5 + $0x14] sm:$0xf]  ;;  %v133_v18 = vmax.bf16 %v117_v3, %v101_v8  ;;  %v39_v20 = vld [vmem:[%s885_s0 + $0x1c] sm:$0xf]  ;;  %v54_v21 = vld [vmem:[%s886_s1 + $0x18] sm:$0xf]  ;;  %v259_v28 = vmax.bf16 %v243_v6, %v227_v17 }
  0x12   :  { %v164_v23 = vmax.bf16 %v148_v9, %v132_v12  ;;  %v55_v24 = vld [vmem:[%s886_s1 + $0x1c] sm:$0xf]  ;;  %v70_v25 = vmax.bf16 %v54_v21, %v38_v19  ;;  %v86_v26 = vld [vmem:[%s887_s2 + $0x18] sm:$0xf]  ;;  %v212_v30 = vld [vmem:[%s891_s6 + $0x10] sm:$0xf]  ;;  %v290_v33 = vmax.bf16 %v274_v7, %v258_v22 }
  0x13   :  { %v364_v16 = vcombine.low %v288_v62, %v289_v4  ;;  %v87_v27 = vld [vmem:[%s887_s2 + $0x1c] sm:$0xf]  ;;  %v165_v29 = vmax.bf16 %v149_v13, %v133_v18  ;;  %v71_v31 = vmax.bf16 %v55_v24, %v39_v20  ;;  %v118_v32 = vld [vmem:[%s888_s3 + $0x18] sm:$0xf]  ;;  %v213_v35 = vld [vmem:[%s891_s6 + $0x14] sm:$0xf]  ;;  %v291_v39 = vmax.bf16 %v275_v11, %v259_v28 }
  0x14   :  { %v196_v34 = vmax.bf16 %v180_v14, %v164_v23  ;;  %v244_v36 = vld [vmem:[%s892_s7 + $0x10] sm:$0xf]  ;;  %v102_v37 = vmax.bf16 %v86_v26, %v70_v25  ;;  %v119_v38 = vld [vmem:[%s888_s3 + $0x1c] sm:$0xf]  ;;  %v245_v41 = vld [vmem:[%s892_s7 + $0x14] sm:$0xf] }
  0x15   :  { %328 = vst [vmem:[%s894_s9] sm:$0xff] %v364_v16   ;;  %v197_v40 = vmax.bf16 %v181_v15, %v165_v29  ;;  %v276_v42 = vld [vmem:[%s893_s8 + $0x10] sm:$0xf]  ;;  %v103_v43 = vmax.bf16 %v87_v27, %v71_v31  ;;  %v150_v44 = vld [vmem:[%s889_s4 + $0x18] sm:$0xf]  ;;  %v277_v46 = vld [vmem:[%s893_s8 + $0x14] sm:$0xf]  ;;  %v365_v51 = vcombine.low %v290_v33, %v291_v39 }
  0x16   :  { %v228_v45 = vmax.bf16 %v212_v30, %v196_v34  ;;  %v134_v47 = vmax.bf16 %v118_v32, %v102_v37  ;;  %v151_v48 = vld [vmem:[%s889_s4 + $0x1c] sm:$0xf]  ;;  %v182_v49 = vld [vmem:[%s890_s5 + $0x18] sm:$0xf]  ;;  %v40_v54 = vld [vmem:[%s885_s0 + $0x20] sm:$0xf] }
  0x17   :  { %v183_v50 = vld [vmem:[%s890_s5 + $0x1c] sm:$0xf]  ;;  %v229_v52 = vmax.bf16 %v213_v35, %v197_v40  ;;  %v135_v53 = vmax.bf16 %v119_v38, %v103_v43  ;;  %v41_v55 = vld [vmem:[%s885_s0 + $0x24] sm:$0xf]  ;;  %v56_v56 = vld [vmem:[%s886_s1 + $0x20] sm:$0xf] }
  0x18   :  { %v260_v57 = vmax.bf16 %v244_v36, %v228_v45  ;;  %v166_v58 = vmax.bf16 %v150_v44, %v134_v47  ;;  %v57_v59 = vld [vmem:[%s886_s1 + $0x24] sm:$0xf]  ;;  %v72_v60 = vmax.bf16 %v56_v56, %v40_v54  ;;  %v88_v61 = vld [vmem:[%s887_s2 + $0x20] sm:$0xf]  ;;  %366 = vst [vmem:[%s894_s9 + $0x8] sm:$0xff] %v365_v51  }
  0x19   :  { %v89_v62 = vld [vmem:[%s887_s2 + $0x24] sm:$0xf]  ;;  %v261_v63 = vmax.bf16 %v245_v41, %v229_v52  ;;  %v167_v0 = vmax.bf16 %v151_v48, %v135_v53  ;;  %v214_v1 = vld [vmem:[%s891_s6 + $0x18] sm:$0xf]  ;;  %v73_v2 = vmax.bf16 %v57_v59, %v41_v55  ;;  %v120_v3 = vld [vmem:[%s888_s3 + $0x20] sm:$0xf] }
  0x1a   :  { %v292_v4 = vmax.bf16 %v276_v42, %v260_v57  ;;  %v198_v5 = vmax.bf16 %v182_v49, %v166_v58  ;;  %v215_v6 = vld [vmem:[%s891_s6 + $0x1c] sm:$0xf]  ;;  %v246_v7 = vld [vmem:[%s892_s7 + $0x18] sm:$0xf]  ;;  %v104_v8 = vmax.bf16 %v88_v61, %v72_v60  ;;  %v121_v9 = vld [vmem:[%s888_s3 + $0x24] sm:$0xf] }
  0x1b   :  { %v293_v10 = vmax.bf16 %v277_v46, %v261_v63  ;;  %v199_v11 = vmax.bf16 %v183_v50, %v167_v0  ;;  %v247_v12 = vld [vmem:[%s892_s7 + $0x1c] sm:$0xf]  ;;  %v278_v13 = vld [vmem:[%s893_s8 + $0x18] sm:$0xf]  ;;  %v105_v14 = vmax.bf16 %v89_v62, %v73_v2  ;;  %v152_v15 = vld [vmem:[%s889_s4 + $0x20] sm:$0xf] }
  0x1c   :  { %v230_v16 = vmax.bf16 %v214_v1, %v198_v5  ;;  %v279_v17 = vld [vmem:[%s893_s8 + $0x1c] sm:$0xf]  ;;  %v136_v18 = vmax.bf16 %v120_v3, %v104_v8  ;;  %v153_v19 = vld [vmem:[%s889_s4 + $0x24] sm:$0xf]  ;;  %v184_v20 = vld [vmem:[%s890_s5 + $0x20] sm:$0xf] }
  0x1d   :  { %v185_v21 = vld [vmem:[%s890_s5 + $0x24] sm:$0xf]  ;;  %v367_v22 = vcombine.low %v292_v4, %v293_v10  ;;  %v231_v23 = vmax.bf16 %v215_v6, %v199_v11  ;;  %v137_v24 = vmax.bf16 %v121_v9, %v105_v14  ;;  %v42_v25 = vld [vmem:[%s885_s0 + $0x28] sm:$0xf]  ;;  %v43_v26 = vld [vmem:[%s885_s0 + $0x2c] sm:$0xf] }
  0x1e   :  { %v58_v27 = vld [vmem:[%s886_s1 + $0x28] sm:$0xf]  ;;  %v262_v28 = vmax.bf16 %v246_v7, %v230_v16  ;;  %v168_v29 = vmax.bf16 %v152_v15, %v136_v18  ;;  %v59_v30 = vld [vmem:[%s886_s1 + $0x2c] sm:$0xf]  ;;  %v216_v36 = vld [vmem:[%s891_s6 + $0x20] sm:$0xf] }
  0x1f   :  { %v74_v31 = vmax.bf16 %v58_v27, %v42_v25  ;;  %v90_v32 = vld [vmem:[%s887_s2 + $0x28] sm:$0xf]  ;;  %v91_v33 = vld [vmem:[%s887_s2 + $0x2c] sm:$0xf]  ;;  %368 = vst [vmem:[%s894_s9 + $0x10] sm:$0xff] %v367_v22   ;;  %v263_v34 = vmax.bf16 %v247_v12, %v231_v23  ;;  %v169_v35 = vmax.bf16 %v153_v19, %v137_v24  ;;  %v75_v37 = vmax.bf16 %v59_v30, %v43_v26 }
  0x20   :  { %v122_v38 = vld [vmem:[%s888_s3 + $0x28] sm:$0xf]  ;;  %v294_v39 = vmax.bf16 %v278_v13, %v262_v28  ;;  %v200_v40 = vmax.bf16 %v184_v20, %v168_v29  ;;  %v217_v41 = vld [vmem:[%s891_s6 + $0x24] sm:$0xf]  ;;  %v248_v42 = vld [vmem:[%s892_s7 + $0x20] sm:$0xf] }
  0x21   :  { %v106_v43 = vmax.bf16 %v90_v32, %v74_v31  ;;  %v123_v44 = vld [vmem:[%s888_s3 + $0x2c] sm:$0xf]  ;;  %v295_v45 = vmax.bf16 %v279_v17, %v263_v34  ;;  %v201_v46 = vmax.bf16 %v185_v21, %v169_v35  ;;  %v249_v47 = vld [vmem:[%s892_s7 + $0x24] sm:$0xf]  ;;  %v280_v48 = vld [vmem:[%s893_s8 + $0x20] sm:$0xf]  ;;  %v107_v49 = vmax.bf16 %v91_v33, %v75_v37 }
  0x22   :  { %v154_v50 = vld [vmem:[%s889_s4 + $0x28] sm:$0xf]  ;;  %v232_v51 = vmax.bf16 %v216_v36, %v200_v40  ;;  %v281_v52 = vld [vmem:[%s893_s8 + $0x24] sm:$0xf]  ;;  %v155_v54 = vld [vmem:[%s889_s4 + $0x2c] sm:$0xf] }
  0x23   :  { %v138_v53 = vmax.bf16 %v122_v38, %v106_v43  ;;  %v186_v55 = vld [vmem:[%s890_s5 + $0x28] sm:$0xf]  ;;  %v187_v56 = vld [vmem:[%s890_s5 + $0x2c] sm:$0xf]  ;;  %v369_v57 = vcombine.low %v294_v39, %v295_v45  ;;  %v233_v58 = vmax.bf16 %v217_v41, %v201_v46  ;;  %v139_v59 = vmax.bf16 %v123_v44, %v107_v49  ;;  %v44_v60 = vld [vmem:[%s885_s0 + $0x30] sm:$0xf] }
  0x24   :  { %v45_v61 = vld [vmem:[%s885_s0 + $0x34] sm:$0xf]  ;;  %v60_v62 = vld [vmem:[%s886_s1 + $0x30] sm:$0xf]  ;;  %v264_v63 = vmax.bf16 %v248_v42, %v232_v51  ;;  %v218_v7 = vld [vmem:[%s891_s6 + $0x28] sm:$0xf] }
  0x25   :  { %v170_v0 = vmax.bf16 %v154_v50, %v138_v53  ;;  %v61_v1 = vld [vmem:[%s886_s1 + $0x34] sm:$0xf]  ;;  %v76_v2 = vmax.bf16 %v60_v62, %v44_v60  ;;  %v92_v3 = vld [vmem:[%s887_s2 + $0x30] sm:$0xf]  ;;  %370 = vst [vmem:[%s894_s9 + $0x18] sm:$0xff] %v369_v57   ;;  %v265_v5 = vmax.bf16 %v249_v47, %v233_v58  ;;  %v171_v6 = vmax.bf16 %v155_v54, %v139_v59 }
  0x26   :  { %v93_v4 = vld [vmem:[%s887_s2 + $0x34] sm:$0xf]  ;;  %v77_v8 = vmax.bf16 %v61_v1, %v45_v61  ;;  %v124_v9 = vld [vmem:[%s888_s3 + $0x30] sm:$0xf]  ;;  %v296_v10 = vmax.bf16 %v280_v48, %v264_v63  ;;  %v219_v12 = vld [vmem:[%s891_s6 + $0x2c] sm:$0xf] }
  0x27   :  { %v202_v11 = vmax.bf16 %v186_v55, %v170_v0  ;;  %v250_v13 = vld [vmem:[%s892_s7 + $0x28] sm:$0xf]  ;;  %v108_v14 = vmax.bf16 %v92_v3, %v76_v2  ;;  %v125_v15 = vld [vmem:[%s888_s3 + $0x34] sm:$0xf]  ;;  %v297_v16 = vmax.bf16 %v281_v52, %v265_v5  ;;  %v203_v17 = vmax.bf16 %v187_v56, %v171_v6  ;;  %v251_v18 = vld [vmem:[%s892_s7 + $0x2c] sm:$0xf] }
  0x28   :  { %v282_v19 = vld [vmem:[%s893_s8 + $0x28] sm:$0xf]  ;;  %v109_v20 = vmax.bf16 %v93_v4, %v77_v8  ;;  %v156_v21 = vld [vmem:[%s889_s4 + $0x30] sm:$0xf]  ;;  %v283_v23 = vld [vmem:[%s893_s8 + $0x2c] sm:$0xf] }
  0x29   :  { %v234_v22 = vmax.bf16 %v218_v7, %v202_v11  ;;  %v140_v24 = vmax.bf16 %v124_v9, %v108_v14  ;;  %v157_v25 = vld [vmem:[%s889_s4 + $0x34] sm:$0xf]  ;;  %v188_v26 = vld [vmem:[%s890_s5 + $0x30] sm:$0xf]  ;;  %v371_v28 = vcombine.low %v296_v10, %v297_v16  ;;  %v235_v29 = vmax.bf16 %v219_v12, %v203_v17  ;;  %v46_v31 = vld [vmem:[%s885_s0 + $0x38] sm:$0xf] }
  0x2a   :  { %v189_v27 = vld [vmem:[%s890_s5 + $0x34] sm:$0xf]  ;;  %v141_v30 = vmax.bf16 %v125_v15, %v109_v20  ;;  %v47_v32 = vld [vmem:[%s885_s0 + $0x3c] sm:$0xf]  ;;  %v62_v33 = vld [vmem:[%s886_s1 + $0x38] sm:$0xf] }
  0x2b   :  { %v266_v34 = vmax.bf16 %v250_v13, %v234_v22  ;;  %v172_v35 = vmax.bf16 %v156_v21, %v140_v24  ;;  %v63_v36 = vld [vmem:[%s886_s1 + $0x3c] sm:$0xf]  ;;  %v78_v37 = vmax.bf16 %v62_v33, %v46_v31  ;;  %v94_v38 = vld [vmem:[%s887_s2 + $0x38] sm:$0xf]  ;;  %372 = vst [vmem:[%s894_s9 + $0x20] sm:$0xff] %v371_v28   ;;  %v267_v40 = vmax.bf16 %v251_v18, %v235_v29 }
  0x2c   :  { %v95_v39 = vld [vmem:[%s887_s2 + $0x3c] sm:$0xf]  ;;  %v173_v41 = vmax.bf16 %v157_v25, %v141_v30  ;;  %v220_v42 = vld [vmem:[%s891_s6 + $0x30] sm:$0xf]  ;;  %v79_v43 = vmax.bf16 %v63_v36, %v47_v32  ;;  %v126_v44 = vld [vmem:[%s888_s3 + $0x38] sm:$0xf] }
  0x2d   :  { %v298_v45 = vmax.bf16 %v282_v19, %v266_v34  ;;  %v204_v46 = vmax.bf16 %v188_v26, %v172_v35  ;;  %v221_v47 = vld [vmem:[%s891_s6 + $0x34] sm:$0xf]  ;;  %v110_v48 = vmax.bf16 %v94_v38, %v78_v37  ;;  %v127_v49 = vld [vmem:[%s888_s3 + $0x3c] sm:$0xf]  ;;  %v299_v50 = vmax.bf16 %v283_v23, %v267_v40  ;;  %v252_v52 = vld [vmem:[%s892_s7 + $0x30] sm:$0xf] }
  0x2e   :  { %v205_v51 = vmax.bf16 %v189_v27, %v173_v41  ;;  %v111_v53 = vmax.bf16 %v95_v39, %v79_v43  ;;  %v158_v54 = vld [vmem:[%s889_s4 + $0x38] sm:$0xf]  ;;  %v253_v56 = vld [vmem:[%s892_s7 + $0x34] sm:$0xf]  ;;  %v159_v58 = vld [vmem:[%s889_s4 + $0x3c] sm:$0xf] }
  0x2f   :  { %v236_v55 = vmax.bf16 %v220_v42, %v204_v46  ;;  %v142_v57 = vmax.bf16 %v126_v44, %v110_v48  ;;  %v373_v59 = vcombine.low %v298_v45, %v299_v50  ;;  %v284_v61 = vld [vmem:[%s893_s8 + $0x30] sm:$0xf]  ;;  %v190_v63 = vld [vmem:[%s890_s5 + $0x38] sm:$0xf]  ;;  %v285_v1 = vld [vmem:[%s893_s8 + $0x34] sm:$0xf] }
  0x30   :  { %v237_v60 = vmax.bf16 %v221_v47, %v205_v51  ;;  %v143_v62 = vmax.bf16 %v127_v49, %v111_v53  ;;  %v191_v3 = vld [vmem:[%s890_s5 + $0x3c] sm:$0xf]  ;;  %v222_v6 = vld [vmem:[%s891_s6 + $0x38] sm:$0xf] }
  0x31   :  { %v268_v0 = vmax.bf16 %v252_v52, %v236_v55  ;;  %v174_v2 = vmax.bf16 %v158_v54, %v142_v57  ;;  %374 = vst [vmem:[%s894_s9 + $0x28] sm:$0xff] %v373_v59   ;;  %v223_v9 = vld [vmem:[%s891_s6 + $0x3c] sm:$0xf]  ;;  %v254_v12 = vld [vmem:[%s892_s7 + $0x38] sm:$0xf] }
  0x32   :  { %v269_v4 = vmax.bf16 %v253_v56, %v237_v60  ;;  %v175_v5 = vmax.bf16 %v159_v58, %v143_v62  ;;  %v255_v14 = vld [vmem:[%s892_s7 + $0x3c] sm:$0xf]  ;;  %v286_v17 = vld [vmem:[%s893_s8 + $0x38] sm:$0xf] }
  0x33   :  { %v300_v7 = vmax.bf16 %v284_v61, %v268_v0  ;;  %v206_v8 = vmax.bf16 %v190_v63, %v174_v2  ;;  %v287_v19 = vld [vmem:[%s893_s8 + $0x3c] sm:$0xf] }
  0x34   :  { %v301_v10 = vmax.bf16 %v285_v1, %v269_v4  ;;  %v207_v11 = vmax.bf16 %v191_v3, %v175_v5 }
  0x35   :  { %v238_v13 = vmax.bf16 %v222_v6, %v206_v8 }
  0x36   :  { %v375_v15 = vcombine.low %v300_v7, %v301_v10  ;;  %v239_v16 = vmax.bf16 %v223_v9, %v207_v11 }
  0x37   :  { %v270_v18 = vmax.bf16 %v254_v12, %v238_v13 }
  0x38   :  { %376 = vst [vmem:[%s894_s9 + $0x30] sm:$0xff] %v375_v15   ;;  %v271_v20 = vmax.bf16 %v255_v14, %v239_v16 }
  0x39   :  { %v302_v21 = vmax.bf16 %v286_v17, %v270_v18 }
  0x3a   :  { %v303_v22 = vmax.bf16 %v287_v19, %v271_v20 }
  0x3c   :  { %v377_v23 = vcombine.low %v302_v21, %v303_v22 }
  0x3e   :  { %378 = vst [vmem:[%s894_s9 + $0x38] sm:$0xff] %v377_v23  }

// kernel: birdnet_forward.38
= control target key start
LH: loop header
LB: loop body
LE: loop exit
PB: predicated region body
PF: predicated region fallthrough
CT: control target
= control target key end

     0   :  { %v2234_v0 = vmov 0   ;;  %s4062_s1 = inlined_call_operand.vmem [shape: bf16[256,128], index: 1, kind: input, shape index: {}]   ;;  %s4063_s0 = inlined_call_operand.vmem [shape: bf16[512,256], index: 0, kind: input, shape index: {}]   ;;  %s4064_s2 = inlined_call_operand.vmem [shape: f32[1,128], index: 2, kind: input, shape index: {}]   ;;  %s4065_s3 = inlined_call_operand.vmem [shape: f32[1,128], index: 3, kind: input, shape index: {}]   ;;  %s4066_s4 = inlined_call_operand.vmem [shape: bf16[512,128], index: 4, kind: output, shape index: {}]  }
   0x1   :  { %530 = vmatprep.subr.bf16.mxu0 %v2234_v0  ;;  %v2120_v1 = vld [vmem:[%s4062_s1] sm:$0xff]   ;;  %2087 = vmatprep.subr.bf16.mxu1 %v2234_v0  ;;  %v2121_v2 = vld [vmem:[%s4062_s1 + $0x8] sm:$0xff]   ;;  %v2122_v3 = vld [vmem:[%s4062_s1 + $0x10] sm:$0xff]  }
   0x2   :  { %531 = vmatpush1.bf16.msra.mxu0 %v2120_v1  ;;  %2103 = vmatpush1.bf16.msra.mxu1 %v2120_v1  ;;  %v2123_v4 = vld [vmem:[%s4062_s1 + $0x18] sm:$0xff]   ;;  %v2124_v5 = vld [vmem:[%s4062_s1 + $0x20] sm:$0xff]   ;;  %v2125_v7 = vld [vmem:[%s4062_s1 + $0x28] sm:$0xff]  }
   0x3   :  { %532 = vmatprep.subr.bf16.mxu0 %v2234_v0  ;;  %2088 = vmatprep.subr.bf16.mxu1 %v2234_v0  ;;  %v2138_v6 = vld [vmem:[%s4063_s0 + $0x4] ss:$8 sps:$4 sm:$0xff]   ;;  %v2126_v8 = vld [vmem:[%s4062_s1 + $0x30] sm:$0xff]   ;;  %v2127_v9 = vld [vmem:[%s4062_s1 + $0x38] sm:$0xff]  }
   0x4   :  { %562 = vmatprep.mubr.bf16.mxu0 %v2138_v6  ;;  %v2162_v10 = vld [vmem:[%s4063_s0 + $0x104] ss:$8 sps:$4 sm:$0xff]   ;;  %v2130_v13 = vld [vmem:[%s4062_s1 + $0x50] sm:$0xff]   ;;  %v2131_v14 = vld [vmem:[%s4062_s1 + $0x58] sm:$0xff]  }
   0x5   :  { %690 = vmatprep.mubr.bf16.mxu1 %v2162_v10  ;;  %v2128_v11 = vld [vmem:[%s4062_s1 + $0x40] sm:$0xff]   ;;  %v2129_v12 = vld [vmem:[%s4062_s1 + $0x48] sm:$0xff]   ;;  %v2134_v17 = vld [vmem:[%s4062_s1 + $0x70] sm:$0xff]  }
   0x6   :  { %533 = vmatpush1.bf16.msra.mxu0 %v2121_v2  ;;  %2104 = vmatpush1.bf16.msra.mxu1 %v2121_v2  ;;  %v2132_v15 = vld [vmem:[%s4062_s1 + $0x60] sm:$0xff]   ;;  %v2133_v16 = vld [vmem:[%s4062_s1 + $0x68] sm:$0xff]   ;;  %v2135_v18 = vld [vmem:[%s4062_s1 + $0x78] sm:$0xff]  }
   0x7   :  { %534 = vmatprep.subr.bf16.mxu0 %v2234_v0  ;;  %2089 = vmatprep.subr.bf16.mxu1 %v2234_v0  ;;  %v2136_v19 = vld [vmem:[%s4063_s0] ss:$8 sps:$4 sm:$0xff]   ;;  %v2139_v21 = vld [vmem:[%s4063_s0 + $0x14] ss:$8 sps:$4 sm:$0xff]   ;;  %v2141_v23 = vld [vmem:[%s4063_s0 + $0x10] ss:$8 sps:$4 sm:$0xff]  }
   0x8   :  { %v2160_v20 = vld [vmem:[%s4063_s0 + $0x100] ss:$8 sps:$4 sm:$0xff]   ;;  %v2166_v22 = vld [vmem:[%s4063_s0 + $0x114] ss:$8 sps:$4 sm:$0xff]   ;;  %v2168_v24 = vld [vmem:[%s4063_s0 + $0x110] ss:$8 sps:$4 sm:$0xff]  }
   0x9   :  { %v2142_v25 = vld [vmem:[%s4063_s0 + $0x24] ss:$8 sps:$4 sm:$0xff]   ;;  %v2144_v27 = vld [vmem:[%s4063_s0 + $0x20] ss:$8 sps:$4 sm:$0xff]   ;;  %v2145_v29 = vld [vmem:[%s4063_s0 + $0x34] ss:$8 sps:$4 sm:$0xff]  }
   0xa   :  { %535 = vmatpush1.bf16.msra.mxu0 %v2122_v3  ;;  %2105 = vmatpush1.bf16.msra.mxu1 %v2122_v3  ;;  %v2172_v26 = vld [vmem:[%s4063_s0 + $0x124] ss:$8 sps:$4 sm:$0xff]   ;;  %v2174_v28 = vld [vmem:[%s4063_s0 + $0x120] ss:$8 sps:$4 sm:$0xff]   ;;  %v2178_v30 = vld [vmem:[%s4063_s0 + $0x134] ss:$8 sps:$4 sm:$0xff]  }
   0xb   :  { %536 = vmatprep.subr.bf16.mxu0 %v2234_v0  ;;  %2090 = vmatprep.subr.bf16.mxu1 %v2234_v0  ;;  %v2147_v31 = vld [vmem:[%s4063_s0 + $0x30] ss:$8 sps:$4 sm:$0xff]   ;;  %v2148_v33 = vld [vmem:[%s4063_s0 + $0x44] ss:$8 sps:$4 sm:$0xff]   ;;  %v2150_v35 = vld [vmem:[%s4063_s0 + $0x40] ss:$8 sps:$4 sm:$0xff]  }
   0xc   :  { %v2180_v32 = vld [vmem:[%s4063_s0 + $0x130] ss:$8 sps:$4 sm:$0xff]   ;;  %v2184_v34 = vld [vmem:[%s4063_s0 + $0x144] ss:$8 sps:$4 sm:$0xff]   ;;  %v2186_v36 = vld [vmem:[%s4063_s0 + $0x140] ss:$8 sps:$4 sm:$0xff]  }
   0xd   :  { %v2151_v37 = vld [vmem:[%s4063_s0 + $0x54] ss:$8 sps:$4 sm:$0xff]   ;;  %v2153_v39 = vld [vmem:[%s4063_s0 + $0x50] ss:$8 sps:$4 sm:$0xff]   ;;  %v2154_v41 = vld [vmem:[%s4063_s0 + $0x64] ss:$8 sps:$4 sm:$0xff]  }
   0xe   :  { %537 = vmatpush1.bf16.msra.mxu0 %v2123_v4  ;;  %2106 = vmatpush1.bf16.msra.mxu1 %v2123_v4  ;;  %v2190_v38 = vld [vmem:[%s4063_s0 + $0x154] ss:$8 sps:$4 sm:$0xff]   ;;  %v2192_v40 = vld [vmem:[%s4063_s0 + $0x150] ss:$8 sps:$4 sm:$0xff]   ;;  %v2196_v42 = vld [vmem:[%s4063_s0 + $0x164] ss:$8 sps:$4 sm:$0xff]  }
   0xf   :  { %538 = vmatprep.subr.bf16.mxu0 %v2234_v0  ;;  %2091 = vmatprep.subr.bf16.mxu1 %v2234_v0  ;;  %v2156_v43 = vld [vmem:[%s4063_s0 + $0x60] ss:$8 sps:$4 sm:$0xff]   ;;  %v2157_v45 = vld [vmem:[%s4063_s0 + $0x74] ss:$8 sps:$4 sm:$0xff]   ;;  %v2159_v47 = vld [vmem:[%s4063_s0 + $0x70] ss:$8 sps:$4 sm:$0xff]  }
  0x10   :  { %v2198_v44 = vld [vmem:[%s4063_s0 + $0x160] ss:$8 sps:$4 sm:$0xff]   ;;  %v2202_v46 = vld [vmem:[%s4063_s0 + $0x174] ss:$8 sps:$4 sm:$0xff]   ;;  %v2204_v48 = vld [vmem:[%s4063_s0 + $0x170] ss:$8 sps:$4 sm:$0xff]  }
  0x11   :  { %v2163_v49 = vld [vmem:[%s4063_s0 + $0x84] ss:$8 sps:$4 sm:$0xff]   ;;  %v2165_v51 = vld [vmem:[%s4063_s0 + $0x80] ss:$8 sps:$4 sm:$0xff]   ;;  %v2169_v53 = vld [vmem:[%s4063_s0 + $0x94] ss:$8 sps:$4 sm:$0xff]  }
  0x12   :  { %539 = vmatpush1.bf16.msra.mxu0 %v2124_v5  ;;  %2107 = vmatpush1.bf16.msra.mxu1 %v2124_v5  ;;  %v2208_v50 = vld [vmem:[%s4063_s0 + $0x184] ss:$8 sps:$4 sm:$0xff]   ;;  %v2210_v52 = vld [vmem:[%s4063_s0 + $0x180] ss:$8 sps:$4 sm:$0xff]   ;;  %v2211_v54 = vld [vmem:[%s4063_s0 + $0x194] ss:$8 sps:$4 sm:$0xff]  }
  0x13   :  { %540 = vmatprep.subr.bf16.mxu0 %v2234_v0  ;;  %2092 = vmatprep.subr.bf16.mxu1 %v2234_v0  ;;  %v2171_v55 = vld [vmem:[%s4063_s0 + $0x90] ss:$8 sps:$4 sm:$0xff]   ;;  %v2175_v57 = vld [vmem:[%s4063_s0 + $0xa4] ss:$8 sps:$4 sm:$0xff]   ;;  %v2177_v59 = vld [vmem:[%s4063_s0 + $0xa0] ss:$8 sps:$4 sm:$0xff]  }
  0x14   :  { %v2213_v56 = vld [vmem:[%s4063_s0 + $0x190] ss:$8 sps:$4 sm:$0xff]   ;;  %v2214_v58 = vld [vmem:[%s4063_s0 + $0x1a4] ss:$8 sps:$4 sm:$0xff]   ;;  %v2216_v60 = vld [vmem:[%s4063_s0 + $0x1a0] ss:$8 sps:$4 sm:$0xff]  }
  0x15   :  { %v2181_v61 = vld [vmem:[%s4063_s0 + $0xb4] ss:$8 sps:$4 sm:$0xff]   ;;  %v2183_v63 = vld [vmem:[%s4063_s0 + $0xb0] ss:$8 sps:$4 sm:$0xff]   ;;  %v2187_v1 = vld [vmem:[%s4063_s0 + $0xc4] ss:$8 sps:$4 sm:$0xff]  }
  0x16   :  { %541 = vmatpush1.bf16.msra.mxu0 %v2125_v7  ;;  %2108 = vmatpush1.bf16.msra.mxu1 %v2125_v7  ;;  %v2217_v62 = vld [vmem:[%s4063_s0 + $0x1b4] ss:$8 sps:$4 sm:$0xff]   ;;  %v2220_v2 = vld [vmem:[%s4063_s0 + $0x1c4] ss:$8 sps:$4 sm:$0xff]   ;;  %v2189_v3 = vld [vmem:[%s4063_s0 + $0xc0] ss:$8 sps:$4 sm:$0xff]  }
  0x17   :  { %542 = vmatprep.subr.bf16.mxu0 %v2234_v0  ;;  %2093 = vmatprep.subr.bf16.mxu1 %v2234_v0  ;;  %v2222_v4 = vld [vmem:[%s4063_s0 + $0x1c0] ss:$8 sps:$4 sm:$0xff]   ;;  %v2193_v5 = vld [vmem:[%s4063_s0 + $0xd4] ss:$8 sps:$4 sm:$0xff]   ;;  %v2195_v7 = vld [vmem:[%s4063_s0 + $0xd0] ss:$8 sps:$4 sm:$0xff]  }
  0x18   :  { %v2223_v6 = vld [vmem:[%s4063_s0 + $0x1d4] ss:$8 sps:$4 sm:$0xff]   ;;  %v2226_v10 = vld [vmem:[%s4063_s0 + $0x1e4] ss:$8 sps:$4 sm:$0xff]  }
  0x1a   :  { %543 = vmatpush1.bf16.msra.mxu0 %v2126_v8  ;;  %2109 = vmatpush1.bf16.msra.mxu1 %v2126_v8  ;;  %v2225_v8 = vld [vmem:[%s4063_s0 + $0x1d0] ss:$8 sps:$4 sm:$0xff]  }
  0x1b   :  { %544 = vmatprep.subr.bf16.mxu0 %v2234_v0  ;;  %2094 = vmatprep.subr.bf16.mxu1 %v2234_v0 }
  0x1e   :  { %545 = vmatpush1.bf16.msra.mxu0 %v2127_v9  ;;  %2110 = vmatpush1.bf16.msra.mxu1 %v2127_v9  ;;  %v2199_v9 = vld [vmem:[%s4063_s0 + $0xe4] ss:$8 sps:$4 sm:$0xff]  }
  0x1f   :  { %546 = vmatprep.subr.bf16.mxu0 %v2234_v0  ;;  %2095 = vmatprep.subr.bf16.mxu1 %v2234_v0 }
  0x22   :  { %547 = vmatpush1.bf16.msra.mxu0 %v2128_v11  ;;  %2111 = vmatpush1.bf16.msra.mxu1 %v2128_v11  ;;  %v2201_v11 = vld [vmem:[%s4063_s0 + $0xe0] ss:$8 sps:$4 sm:$0xff]  }
  0x23   :  { %548 = vmatprep.subr.bf16.mxu0 %v2234_v0  ;;  %2096 = vmatprep.subr.bf16.mxu1 %v2234_v0 }
  0x26   :  { %549 = vmatpush1.bf16.msra.mxu0 %v2129_v12  ;;  %2112 = vmatpush1.bf16.msra.mxu1 %v2129_v12  ;;  %v2228_v12 = vld [vmem:[%s4063_s0 + $0x1e0] ss:$8 sps:$4 sm:$0xff]  }
  0x27   :  { %550 = vmatprep.subr.bf16.mxu0 %v2234_v0  ;;  %2097 = vmatprep.subr.bf16.mxu1 %v2234_v0 }
  0x2a   :  { %551 = vmatpush1.bf16.msra.mxu0 %v2130_v13  ;;  %2113 = vmatpush1.bf16.msra.mxu1 %v2130_v13  ;;  %v2205_v13 = vld [vmem:[%s4063_s0 + $0xf4] ss:$8 sps:$4 sm:$0xff]  }
  0x2b   :  { %552 = vmatprep.subr.bf16.mxu0 %v2234_v0  ;;  %2098 = vmatprep.subr.bf16.mxu1 %v2234_v0 }
  0x2e   :  { %553 = vmatpush1.bf16.msra.mxu0 %v2131_v14  ;;  %2114 = vmatpush1.bf16.msra.mxu1 %v2131_v14  ;;  %v2229_v14 = vld [vmem:[%s4063_s0 + $0x1f4] ss:$8 sps:$4 sm:$0xff]  }
  0x2f   :  { %554 = vmatprep.subr.bf16.mxu0 %v2234_v0  ;;  %2099 = vmatprep.subr.bf16.mxu1 %v2234_v0 }
  0x32   :  { %555 = vmatpush1.bf16.msra.mxu0 %v2132_v15  ;;  %2115 = vmatpush1.bf16.msra.mxu1 %v2132_v15  ;;  %v2207_v15 = vld [vmem:[%s4063_s0 + $0xf0] ss:$8 sps:$4 sm:$0xff]  }
  0x33   :  { %556 = vmatprep.subr.bf16.mxu0 %v2234_v0  ;;  %2100 = vmatprep.subr.bf16.mxu1 %v2234_v0 }
  0x36   :  { %557 = vmatpush1.bf16.msra.mxu0 %v2133_v16  ;;  %2116 = vmatpush1.bf16.msra.mxu1 %v2133_v16  ;;  %v2231_v16 = vld [vmem:[%s4063_s0 + $0x1f0] ss:$8 sps:$4 sm:$0xff]  }
  0x37   :  { %558 = vmatprep.subr.bf16.mxu0 %v2234_v0  ;;  %2101 = vmatprep.subr.bf16.mxu1 %v2234_v0 }
  0x3a   :  { %559 = vmatpush1.bf16.msra.mxu0 %v2134_v17  ;;  %2117 = vmatpush1.bf16.msra.mxu1 %v2134_v17 }
  0x3b   :  { %560 = vmatprep.subr.bf16.mxu0 %v2234_v0  ;;  %2102 = vmatprep.subr.bf16.mxu1 %v2234_v0  ;;  %v2219_v0 = vld [vmem:[%s4063_s0 + $0x1b0] ss:$8 sps:$4 sm:$0xff]  }
  0x3e   :  { %561 = vmatpush1.bf16.msra.mxu0 %v2135_v18  ;;  %2118 = vmatpush1.bf16.msra.mxu1 %v2135_v18 }
  0x41   :  { %563 = vmatmul.mubr.bf16.vlgmr.msra.gmra.mrb[0].mxu0 %v2136_v19  ;;  %691 = vmatmul.mubr.bf16.vlgmr.msra.gmra.mrb[0].mxu1 %v2160_v20 }
  0x42   :  { %570 = vmatprep.mubr.bf16.mxu0 %v2139_v21  ;;  %698 = vmatprep.mubr.bf16.mxu1 %v2166_v22 }
  0x49   :  { %571 = vmatmul.mubr.bf16.gmra.mrb[4].mxu0 %v2141_v23  ;;  %699 = vmatmul.mubr.bf16.gmra.mrb[4].mxu1 %v2168_v24 }
  0x4a   :  { %578 = vmatprep.mubr.bf16.mxu0 %v2142_v25  ;;  %706 = vmatprep.mubr.bf16.mxu1 %v2172_v26 }
  0x51   :  { %579 = vmatmul.mubr.bf16.gmra.mrb[8].mxu0 %v2144_v27  ;;  %707 = vmatmul.mubr.bf16.gmra.mrb[8].mxu1 %v2174_v28 }
  0x52   :  { %586 = vmatprep.mubr.bf16.mxu0 %v2145_v29  ;;  %714 = vmatprep.mubr.bf16.mxu1 %v2178_v30 }
  0x59   :  { %587 = vmatmul.mubr.bf16.gmra.mrb[12].mxu0 %v2147_v31  ;;  %715 = vmatmul.mubr.bf16.gmra.mrb[12].mxu1 %v2180_v32 }
  0x5a   :  { %594 = vmatprep.mubr.bf16.mxu0 %v2148_v33  ;;  %722 = vmatprep.mubr.bf16.mxu1 %v2184_v34 }
  0x61   :  { %595 = vmatmul.mubr.bf16.gmra.mrb[16].mxu0 %v2150_v35  ;;  %723 = vmatmul.mubr.bf16.gmra.mrb[16].mxu1 %v2186_v36 }
  0x62   :  { %602 = vmatprep.mubr.bf16.mxu0 %v2151_v37  ;;  %730 = vmatprep.mubr.bf16.mxu1 %v2190_v38 }
  0x69   :  { %603 = vmatmul.mubr.bf16.gmra.mrb[20].mxu0 %v2153_v39  ;;  %731 = vmatmul.mubr.bf16.gmra.mrb[20].mxu1 %v2192_v40 }
  0x6a   :  { %610 = vmatprep.mubr.bf16.mxu0 %v2154_v41  ;;  %738 = vmatprep.mubr.bf16.mxu1 %v2196_v42 }
  0x71   :  { %611 = vmatmul.mubr.bf16.gmra.mrb[24].mxu0 %v2156_v43  ;;  %739 = vmatmul.mubr.bf16.gmra.mrb[24].mxu1 %v2198_v44 }
  0x72   :  { %618 = vmatprep.mubr.bf16.mxu0 %v2157_v45  ;;  %746 = vmatprep.mubr.bf16.mxu1 %v2202_v46 }
  0x79   :  { %619 = vmatmul.mubr.bf16.gmra.mrb[28].mxu0 %v2159_v47  ;;  %747 = vmatmul.mubr.bf16.gmra.mrb[28].mxu1 %v2204_v48 }
  0x7a   :  { %626 = vmatprep.mubr.bf16.mxu0 %v2163_v49  ;;  %754 = vmatprep.mubr.bf16.mxu1 %v2208_v50 }
  0x81   :  { %627 = vmatmul.mubr.bf16.gmra.mrb[32].mxu0 %v2165_v51  ;;  %755 = vmatmul.mubr.bf16.gmra.mrb[32].mxu1 %v2210_v52 }
  0x82   :  { %634 = vmatprep.mubr.bf16.mxu0 %v2169_v53  ;;  %762 = vmatprep.mubr.bf16.mxu1 %v2211_v54 }
  0x89   :  { %635 = vmatmul.mubr.bf16.gmra.mrb[36].mxu0 %v2171_v55  ;;  %763 = vmatmul.mubr.bf16.gmra.mrb[36].mxu1 %v2213_v56 }
  0x8a   :  { %642 = vmatprep.mubr.bf16.mxu0 %v2175_v57  ;;  %770 = vmatprep.mubr.bf16.mxu1 %v2214_v58 }
  0x91   :  { %643 = vmatmul.mubr.bf16.gmra.mrb[40].mxu0 %v2177_v59  ;;  %771 = vmatmul.mubr.bf16.gmra.mrb[40].mxu1 %v2216_v60 }
  0x92   :  { %650 = vmatprep.mubr.bf16.mxu0 %v2181_v61  ;;  %778 = vmatprep.mubr.bf16.mxu1 %v2217_v62 }
  0x99   :  { %651 = vmatmul.mubr.bf16.gmra.mrb[44].mxu0 %v2183_v63  ;;  %779 = vmatmul.mubr.bf16.gmra.mrb[44].mxu1 %v2219_v0 }
  0x9a   :  { %658 = vmatprep.mubr.bf16.mxu0 %v2187_v1  ;;  %786 = vmatprep.mubr.bf16.mxu1 %v2220_v2 }
  0xa1   :  { %659 = vmatmul.mubr.bf16.gmra.mrb[48].mxu0 %v2189_v3  ;;  %787 = vmatmul.mubr.bf16.gmra.mrb[48].mxu1 %v2222_v4 }
  0xa2   :  { %666 = vmatprep.mubr.bf16.mxu0 %v2193_v5  ;;  %794 = vmatprep.mubr.bf16.mxu1 %v2223_v6 }
  0xa9   :  { %667 = vmatmul.mubr.bf16.gmra.mrb[52].mxu0 %v2195_v7  ;;  %795 = vmatmul.mubr.bf16.gmra.mrb[52].mxu1 %v2225_v8 }
  0xaa   :  { %674 = vmatprep.mubr.bf16.mxu0 %v2199_v9  ;;  %802 = vmatprep.mubr.bf16.mxu1 %v2226_v10 }
  0xb1   :  { %675 = vmatmul.mubr.bf16.gmra.mrb[56].mxu0 %v2201_v11  ;;  %803 = vmatmul.mubr.bf16.gmra.mrb[56].mxu1 %v2228_v12 }
  0xb2   :  { %682 = vmatprep.mubr.bf16.mxu0 %v2205_v13  ;;  %810 = vmatprep.mubr.bf16.mxu1 %v2229_v14 }
  0xb9   :  { %683 = vmatmul.mubr.bf16.gmra.mrb[60].mxu0 %v2207_v15  ;;  %811 = vmatmul.mubr.bf16.gmra.mrb[60].mxu1 %v2231_v16 }
 0x114   :  { %v2532_v17 = vpop.f32.mrb[0].mxu0  ;;  %v2534_v18 = vpop.f32.mrb[0].mxu1 }
 0x115   :  { %v566_v19 = vpop.f32.mrb[1].mxu0  ;;  %v694_v20 = vpop.f32.mrb[1].mxu1  ;;  %v889_v23 = vmul.f32 %v2532_v17, %v2532_v17 }
 0x116   :  { %v2536_v21 = vpop.f32.mrb[2].mxu0  ;;  %v2538_v22 = vpop.f32.mrb[2].mxu1 }
 0x117   :  { %v819_v24 = vadd.f32 %v2536_v21, %v2532_v17  ;;  %v890_v25 = vmul.f32 %v2536_v21, %v2536_v21  ;;  %v569_v26 = vpop.f32.mrb[3].mxu0  ;;  %v697_v27 = vpop.f32.mrb[3].mxu1 }
 0x119   :  { %v953_v28 = vadd.f32 %v890_v25, %v889_v23 }
 0x11c   :  { %v2546_v29 = vpop.f32.mrb[4].mxu0  ;;  %v2548_v30 = vpop.f32.mrb[4].mxu1 }
 0x11d   :  { %v820_v31 = vadd.f32 %v819_v24, %v2546_v29  ;;  %v891_v32 = vmul.f32 %v2546_v29, %v2546_v29  ;;  %v574_v33 = vpop.f32.mrb[5].mxu0  ;;  %v702_v34 = vpop.f32.mrb[5].mxu1 }
 0x11e   :  { %v2553_v35 = vpop.f32.mrb[6].mxu0  ;;  %v2555_v36 = vpop.f32.mrb[6].mxu1 }
 0x11f   :  { %v954_v37 = vadd.f32 %v953_v28, %v891_v32  ;;  %v821_v38 = vadd.f32 %v820_v31, %v2553_v35  ;;  %v892_v39 = vmul.f32 %v2553_v35, %v2553_v35  ;;  %v577_v40 = vpop.f32.mrb[7].mxu0  ;;  %v705_v41 = vpop.f32.mrb[7].mxu1 }
 0x121   :  { %v955_v42 = vadd.f32 %v954_v37, %v892_v39 }
 0x124   :  { %v2560_v43 = vpop.f32.mrb[8].mxu0  ;;  %v2562_v44 = vpop.f32.mrb[8].mxu1 }
 0x125   :  { %v822_v45 = vadd.f32 %v821_v38, %v2560_v43  ;;  %v893_v46 = vmul.f32 %v2560_v43, %v2560_v43  ;;  %v582_v47 = vpop.f32.mrb[9].mxu0  ;;  %v710_v48 = vpop.f32.mrb[9].mxu1 }
 0x126   :  { %v2567_v49 = vpop.f32.mrb[10].mxu0  ;;  %v2569_v50 = vpop.f32.mrb[10].mxu1 }
 0x127   :  { %v956_v51 = vadd.f32 %v955_v42, %v893_v46  ;;  %v823_v52 = vadd.f32 %v822_v45, %v2567_v49  ;;  %v894_v53 = vmul.f32 %v2567_v49, %v2567_v49  ;;  %v585_v54 = vpop.f32.mrb[11].mxu0  ;;  %v713_v55 = vpop.f32.mrb[11].mxu1 }
 0x129   :  { %v957_v56 = vadd.f32 %v956_v51, %v894_v53 }
 0x12c   :  { %v2574_v57 = vpop.f32.mrb[12].mxu0  ;;  %v2576_v58 = vpop.f32.mrb[12].mxu1 }
 0x12d   :  { %v824_v59 = vadd.f32 %v823_v52, %v2574_v57  ;;  %v895_v60 = vmul.f32 %v2574_v57, %v2574_v57  ;;  %v590_v61 = vpop.f32.mrb[13].mxu0  ;;  %v718_v62 = vpop.f32.mrb[13].mxu1 }
 0x12e   :  { %v2581_v63 = vpop.f32.mrb[14].mxu0  ;;  %v2583_v0 = vpop.f32.mrb[14].mxu1 }
 0x12f   :  { %v958_v1 = vadd.f32 %v957_v56, %v895_v60  ;;  %v825_v2 = vadd.f32 %v824_v59, %v2581_v63  ;;  %v896_v3 = vmul.f32 %v2581_v63, %v2581_v63  ;;  %v593_v4 = vpop.f32.mrb[15].mxu0  ;;  %v721_v5 = vpop.f32.mrb[15].mxu1 }
 0x131   :  { %v959_v6 = vadd.f32 %v958_v1, %v896_v3 }
 0x134   :  { %v2588_v7 = vpop.f32.mrb[16].mxu0  ;;  %v2590_v8 = vpop.f32.mrb[16].mxu1 }
 0x135   :  { %v826_v9 = vadd.f32 %v825_v2, %v2588_v7  ;;  %v897_v10 = vmul.f32 %v2588_v7, %v2588_v7  ;;  %v598_v11 = vpop.f32.mrb[17].mxu0  ;;  %v726_v12 = vpop.f32.mrb[17].mxu1 }
 0x136   :  { %v2595_v13 = vpop.f32.mrb[18].mxu0  ;;  %v2597_v14 = vpop.f32.mrb[18].mxu1 }
 0x137   :  { %v960_v15 = vadd.f32 %v959_v6, %v897_v10  ;;  %v827_v16 = vadd.f32 %v826_v9, %v2595_v13  ;;  %v898_v19 = vmul.f32 %v2595_v13, %v2595_v13  ;;  %v601_v20 = vpop.f32.mrb[19].mxu0  ;;  %v729_v23 = vpop.f32.mrb[19].mxu1 }
 0x139   :  { %v961_v24 = vadd.f32 %v960_v15, %v898_v19 }
 0x13c   :  { %v2602_v25 = vpop.f32.mrb[20].mxu0  ;;  %v2604_v26 = vpop.f32.mrb[20].mxu1 }
 0x13d   :  { %v828_v27 = vadd.f32 %v827_v16, %v2602_v25  ;;  %v899_v28 = vmul.f32 %v2602_v25, %v2602_v25  ;;  %v606_v31 = vpop.f32.mrb[21].mxu0  ;;  %v734_v32 = vpop.f32.mrb[21].mxu1 }
 0x13e   :  { %v2609_v33 = vpop.f32.mrb[22].mxu0  ;;  %v2611_v34 = vpop.f32.mrb[22].mxu1 }
 0x13f   :  { %v962_v37 = vadd.f32 %v961_v24, %v899_v28  ;;  %v829_v38 = vadd.f32 %v828_v27, %v2609_v33  ;;  %v900_v39 = vmul.f32 %v2609_v33, %v2609_v33  ;;  %v609_v40 = vpop.f32.mrb[23].mxu0  ;;  %v737_v41 = vpop.f32.mrb[23].mxu1 }
 0x141   :  { %v963_v42 = vadd.f32 %v962_v37, %v900_v39 }
 0x144   :  { %v2616_v45 = vpop.f32.mrb[24].mxu0  ;;  %v2618_v46 = vpop.f32.mrb[24].mxu1 }
 0x145   :  { %v830_v47 = vadd.f32 %v829_v38, %v2616_v45  ;;  %v901_v48 = vmul.f32 %v2616_v45, %v2616_v45  ;;  %v614_v51 = vpop.f32.mrb[25].mxu0  ;;  %v742_v52 = vpop.f32.mrb[25].mxu1 }
 0x146   :  { %v2623_v53 = vpop.f32.mrb[26].mxu0  ;;  %v2625_v54 = vpop.f32.mrb[26].mxu1 }
 0x147   :  { %v964_v55 = vadd.f32 %v963_v42, %v901_v48  ;;  %v831_v56 = vadd.f32 %v830_v47, %v2623_v53  ;;  %v902_v59 = vmul.f32 %v2623_v53, %v2623_v53  ;;  %v617_v60 = vpop.f32.mrb[27].mxu0  ;;  %v745_v61 = vpop.f32.mrb[27].mxu1 }
 0x149   :  { %v965_v62 = vadd.f32 %v964_v55, %v902_v59 }
 0x14c   :  { %v2630_v1 = vpop.f32.mrb[28].mxu0  ;;  %v2632_v2 = vpop.f32.mrb[28].mxu1 }
 0x14d   :  { %v832_v3 = vadd.f32 %v831_v56, %v2630_v1  ;;  %v903_v4 = vmul.f32 %v2630_v1, %v2630_v1  ;;  %v622_v5 = vpop.f32.mrb[29].mxu0  ;;  %v750_v6 = vpop.f32.mrb[29].mxu1 }
 0x14e   :  { %v2637_v9 = vpop.f32.mrb[30].mxu0  ;;  %v2639_v10 = vpop.f32.mrb[30].mxu1 }
 0x14f   :  { %v966_v11 = vadd.f32 %v965_v62, %v903_v4  ;;  %v833_v12 = vadd.f32 %v832_v3, %v2637_v9  ;;  %v904_v15 = vmul.f32 %v2637_v9, %v2637_v9  ;;  %v625_v16 = vpop.f32.mrb[31].mxu0  ;;  %v753_v19 = vpop.f32.mrb[31].mxu1 }
 0x151   :  { %v967_v20 = vadd.f32 %v966_v11, %v904_v15 }
 0x154   :  { %v2644_v23 = vpop.f32.mrb[32].mxu0  ;;  %v2646_v24 = vpop.f32.mrb[32].mxu1 }
 0x155   :  { %v834_v27 = vadd.f32 %v833_v12, %v2644_v23  ;;  %v905_v28 = vmul.f32 %v2644_v23, %v2644_v23  ;;  %v630_v31 = vpop.f32.mrb[33].mxu0  ;;  %v758_v32 = vpop.f32.mrb[33].mxu1 }
 0x156   :  { %v2651_v37 = vpop.f32.mrb[34].mxu0  ;;  %v2653_v38 = vpop.f32.mrb[34].mxu1 }
 0x157   :  { %4118 = vst [vmem:[#allocation2_spill] sm:$0xff] %v2651_v37  ;;  %v968_v39 = vadd.f32 %v967_v20, %v905_v28  ;;  %v835_v40 = vadd.f32 %v834_v27, %v2651_v37  ;;  %v906_v41 = vmul.f32 %v2651_v37, %v2651_v37  ;;  %v633_v42 = vpop.f32.mrb[35].mxu0  ;;  %v761_v47 = vpop.f32.mrb[35].mxu1 }
 0x159   :  { %v969_v48 = vadd.f32 %v968_v39, %v906_v41 }
 0x15c   :  { %v2658_v51 = vpop.f32.mrb[36].mxu0  ;;  %v2660_v52 = vpop.f32.mrb[36].mxu1 }
 0x15d   :  { %4119 = vst [vmem:[#allocation3_spill] sm:$0xff] %v2658_v51  ;;  %4120 = vst [vmem:[#allocation4_spill] sm:$0xff] %v2660_v52  ;;  %v836_v55 = vadd.f32 %v835_v40, %v2658_v51  ;;  %v907_v56 = vmul.f32 %v2658_v51, %v2658_v51  ;;  %v638_v59 = vpop.f32.mrb[37].mxu0  ;;  %v766_v60 = vpop.f32.mrb[37].mxu1 }
 0x15e   :  { %v2665_v61 = vpop.f32.mrb[38].mxu0  ;;  %v2667_v62 = vpop.f32.mrb[38].mxu1 }
 0x15f   :  { %4121 = vst [vmem:[#allocation5_spill] sm:$0xff] %v2665_v61  ;;  %4122 = vst [vmem:[#allocation6_spill] sm:$0xff] %v2667_v62  ;;  %v970_v3 = vadd.f32 %v969_v48, %v907_v56  ;;  %v837_v4 = vadd.f32 %v836_v55, %v2665_v61  ;;  %v908_v5 = vmul.f32 %v2665_v61, %v2665_v61  ;;  %v641_v6 = vpop.f32.mrb[39].mxu0  ;;  %v769_v11 = vpop.f32.mrb[39].mxu1 }
 0x161   :  { %v971_v12 = vadd.f32 %v970_v3, %v908_v5 }
 0x164   :  { %v2672_v15 = vpop.f32.mrb[40].mxu0  ;;  %v2674_v16 = vpop.f32.mrb[40].mxu1 }
 0x165   :  { %4123 = vst [vmem:[#allocation7_spill] sm:$0xff] %v2672_v15  ;;  %4124 = vst [vmem:[#allocation8_spill] sm:$0xff] %v2674_v16  ;;  %v838_v19 = vadd.f32 %v837_v4, %v2672_v15  ;;  %v909_v20 = vmul.f32 %v2672_v15, %v2672_v15  ;;  %v646_v27 = vpop.f32.mrb[41].mxu0  ;;  %v774_v28 = vpop.f32.mrb[41].mxu1 }
 0x166   :  { %v2679_v31 = vpop.f32.mrb[42].mxu0  ;;  %v2681_v32 = vpop.f32.mrb[42].mxu1 }
 0x167   :  { %4125 = vst [vmem:[#allocation9_spill] sm:$0xff] %v2679_v31  ;;  %4126 = vst [vmem:[#allocation10_spill] sm:$0xff] %v2681_v32  ;;  %v972_v39 = vadd.f32 %v971_v12, %v909_v20  ;;  %v839_v40 = vadd.f32 %v838_v19, %v2679_v31  ;;  %v910_v41 = vmul.f32 %v2679_v31, %v2679_v31  ;;  %v649_v42 = vpop.f32.mrb[43].mxu0  ;;  %v777_v47 = vpop.f32.mrb[43].mxu1 }
 0x169   :  { %v973_v48 = vadd.f32 %v972_v39, %v910_v41 }
 0x16c   :  { %v2686_v55 = vpop.f32.mrb[44].mxu0  ;;  %v2688_v56 = vpop.f32.mrb[44].mxu1 }
 0x16d   :  { %4127 = vst [vmem:[#allocation11_spill] sm:$0xff] %v2686_v55  ;;  %4128 = vst [vmem:[#allocation12_spill] sm:$0xff] %v2688_v56  ;;  %v840_v59 = vadd.f32 %v839_v40, %v2686_v55  ;;  %v911_v60 = vmul.f32 %v2686_v55, %v2686_v55  ;;  %v654_v3 = vpop.f32.mrb[45].mxu0  ;;  %v782_v4 = vpop.f32.mrb[45].mxu1 }
 0x16e   :  { %v2693_v5 = vpop.f32.mrb[46].mxu0  ;;  %v2695_v6 = vpop.f32.mrb[46].mxu1 }
 0x16f   :  { %4129 = vst [vmem:[#allocation13_spill] sm:$0xff] %v2693_v5  ;;  %v974_v11 = vadd.f32 %v973_v48, %v911_v60  ;;  %v841_v12 = vadd.f32 %v840_v59, %v2693_v5  ;;  %v912_v19 = vmul.f32 %v2693_v5, %v2693_v5  ;;  %v657_v20 = vpop.f32.mrb[47].mxu0  ;;  %v785_v27 = vpop.f32.mrb[47].mxu1 }
 0x171   :  { %v975_v28 = vadd.f32 %v974_v11, %v912_v19 }
 0x174   :  { %v2700_v39 = vpop.f32.mrb[48].mxu0  ;;  %v2702_v40 = vpop.f32.mrb[48].mxu1 }
 0x175   :  { %4130 = vst [vmem:[#allocation14_spill] sm:$0xff] %v2700_v39  ;;  %4131 = vst [vmem:[#allocation15_spill] sm:$0xff] %v2702_v40  ;;  %v842_v41 = vadd.f32 %v841_v12, %v2700_v39  ;;  %v913_v42 = vmul.f32 %v2700_v39, %v2700_v39  ;;  %v662_v47 = vpop.f32.mrb[49].mxu0  ;;  %v790_v3 = vpop.f32.mrb[49].mxu1 }
 0x176   :  { %v2707_v48 = vpop.f32.mrb[50].mxu0  ;;  %v2709_v59 = vpop.f32.mrb[50].mxu1 }
 0x177   :  { %4132 = vst [vmem:[#allocation16_spill] sm:$0xff] %v2707_v48  ;;  %4133 = vst [vmem:[#allocation17_spill] sm:$0xff] %v2709_v59  ;;  %v976_v60 = vadd.f32 %v975_v28, %v913_v42  ;;  %v843_v4 = vadd.f32 %v842_v41, %v2707_v48  ;;  %v914_v11 = vmul.f32 %v2707_v48, %v2707_v48  ;;  %v665_v19 = vpop.f32.mrb[51].mxu0  ;;  %v793_v20 = vpop.f32.mrb[51].mxu1 }
 0x179   :  { %v977_v27 = vadd.f32 %v976_v60, %v914_v11 }
 0x17c   :  { %v2714_v5 = vpop.f32.mrb[52].mxu0  ;;  %v2716_v12 = vpop.f32.mrb[52].mxu1 }
 0x17d   :  { %4134 = vst [vmem:[#allocation18_spill] sm:$0xff] %v2714_v5  ;;  %4135 = vst [vmem:[#allocation19_spill] sm:$0xff] %v2716_v12  ;;  %v844_v47 = vadd.f32 %v843_v4, %v2714_v5  ;;  %v915_v3 = vmul.f32 %v2714_v5, %v2714_v5  ;;  %v670_v39 = vpop.f32.mrb[53].mxu0  ;;  %v798_v55 = vpop.f32.mrb[53].mxu1 }
 0x17e   :  { %v2721_v28 = vpop.f32.mrb[54].mxu0  ;;  %v2723_v41 = vpop.f32.mrb[54].mxu1 }
 0x17f   :  { %4136 = vst [vmem:[#allocation20_spill] sm:$0xff] %v2721_v28  ;;  %4137 = vst [vmem:[#allocation21_spill] sm:$0xff] %v2723_v41  ;;  %v978_v42 = vadd.f32 %v977_v27, %v915_v3  ;;  %v845_v19 = vadd.f32 %v844_v47, %v2721_v28  ;;  %v916_v60 = vmul.f32 %v2721_v28, %v2721_v28  ;;  %v673_v11 = vpop.f32.mrb[55].mxu0  ;;  %v801_v20 = vpop.f32.mrb[55].mxu1 }
 0x181   :  { %v979_v48 = vadd.f32 %v978_v42, %v916_v60 }
 0x184   :  { %v2728_v31 = vpop.f32.mrb[56].mxu0  ;;  %v2730_v4 = vpop.f32.mrb[56].mxu1 }
 0x185   :  { %4138 = vst [vmem:[#allocation22_spill] sm:$0xff] %v2728_v31  ;;  %4139 = vst [vmem:[#allocation23_spill] sm:$0xff] %v2730_v4  ;;  %v846_v39 = vadd.f32 %v845_v19, %v2728_v31  ;;  %v917_v55 = vmul.f32 %v2728_v31, %v2728_v31  ;;  %v678_v5 = vpop.f32.mrb[57].mxu0  ;;  %v806_v15 = vpop.f32.mrb[57].mxu1 }
 0x186   :  { %v2735_v27 = vpop.f32.mrb[58].mxu0  ;;  %v2737_v47 = vpop.f32.mrb[58].mxu1 }
 0x187   :  { %4140 = vst [vmem:[#allocation24_spill] sm:$0xff] %v2735_v27  ;;  %4141 = vst [vmem:[#allocation25_spill] sm:$0xff] %v2737_v47  ;;  %v980_v3 = vadd.f32 %v979_v48, %v917_v55  ;;  %v847_v11 = vadd.f32 %v846_v39, %v2735_v27  ;;  %v918_v42 = vmul.f32 %v2735_v27, %v2735_v27  ;;  %v681_v60 = vpop.f32.mrb[59].mxu0  ;;  %v809_v20 = vpop.f32.mrb[59].mxu1 }
 0x189   :  { %v981_v28 = vadd.f32 %v980_v3, %v918_v42 }
 0x18c   :  { %v2742_v61 = vpop.f32.mrb[60].mxu0  ;;  %v2744_v19 = vpop.f32.mrb[60].mxu1 }
 0x18d   :  { %4142 = vst [vmem:[#allocation26_spill] sm:$0xff] %v2742_v61  ;;  %v848_v5 = vadd.f32 %v847_v11, %v2742_v61  ;;  %v919_v15 = vmul.f32 %v2742_v61, %v2742_v61  ;;  %v686_v31 = vpop.f32.mrb[61].mxu0  ;;  %v814_v51 = vpop.f32.mrb[61].mxu1  ;;  %v921_v11 = vmul.f32 %v2534_v18, %v2534_v18 }
 0x18e   :  { %v2749_v48 = vpop.f32.mrb[62].mxu0  ;;  %v2751_v39 = vpop.f32.mrb[62].mxu1  ;;  %v922_v51 = vmul.f32 %v2538_v22, %v2538_v22 }
 0x18f   :  { %4143 = vst [vmem:[#allocation27_spill] sm:$0xff] %v2749_v48  ;;  %v982_v55 = vadd.f32 %v981_v28, %v919_v15  ;;  %v849_v60 = vadd.f32 %v848_v5, %v2749_v48  ;;  %v920_v3 = vmul.f32 %v2749_v48, %v2749_v48  ;;  %v689_v42 = vpop.f32.mrb[63].mxu0  ;;  %v817_v20 = vpop.f32.mrb[63].mxu1  ;;  %v923_v28 = vmul.f32 %v2548_v30, %v2548_v30 }
 0x190   :  { %v924_v42 = vmul.f32 %v2555_v36, %v2555_v36 }
 0x191   :  { %v850_v27 = vadd.f32 %v849_v60, %v2534_v18  ;;  %v983_v61 = vadd.f32 %v982_v55, %v920_v3  ;;  %v925_v55 = vmul.f32 %v2562_v44, %v2562_v44 }
 0x193   :  { %v851_v31 = vadd.f32 %v850_v27, %v2538_v22  ;;  %v984_v37 = vadd.f32 %v983_v61, %v921_v11  ;;  %v926_v61 = vmul.f32 %v2569_v50, %v2569_v50 }
 0x195   :  { %v852_v5 = vadd.f32 %v851_v31, %v2548_v30  ;;  %v985_v15 = vadd.f32 %v984_v37, %v922_v51  ;;  %v927_v37 = vmul.f32 %v2576_v58, %v2576_v58 }
 0x197   :  { %v853_v20 = vadd.f32 %v852_v5, %v2555_v36  ;;  %v986_v48 = vadd.f32 %v985_v15, %v923_v28  ;;  %v928_v28 = vmul.f32 %v2583_v0, %v2583_v0 }
 0x199   :  { %v854_v60 = vadd.f32 %v853_v20, %v2562_v44  ;;  %v987_v3 = vadd.f32 %v986_v48, %v924_v42  ;;  %v929_v48 = vmul.f32 %v2590_v8, %v2590_v8 }
 0x19b   :  { %v855_v27 = vadd.f32 %v854_v60, %v2569_v50  ;;  %v988_v11 = vadd.f32 %v987_v3, %v925_v55  ;;  %v930_v55 = vmul.f32 %v2597_v14, %v2597_v14 }
 0x19d   :  { %v856_v51 = vadd.f32 %v855_v27, %v2576_v58  ;;  %v989_v31 = vadd.f32 %v988_v11, %v926_v61  ;;  %v931_v61 = vmul.f32 %v2604_v26, %v2604_v26 }
 0x19f   :  { %v857_v5 = vadd.f32 %v856_v51, %v2583_v0  ;;  %v990_v15 = vadd.f32 %v989_v31, %v927_v37  ;;  %v932_v37 = vmul.f32 %v2611_v34, %v2611_v34 }
 0x1a1   :  { %v991_v42 = vadd.f32 %v990_v15, %v928_v28  ;;  %v858_v20 = vadd.f32 %v857_v5, %v2590_v8  ;;  %v933_v28 = vmul.f32 %v2618_v46, %v2618_v46 }
 0x1a3   :  { %v859_v60 = vadd.f32 %v858_v20, %v2597_v14  ;;  %v992_v3 = vadd.f32 %v991_v42, %v929_v48  ;;  %v934_v48 = vmul.f32 %v2625_v54, %v2625_v54 }
 0x1a5   :  { %v860_v27 = vadd.f32 %v859_v60, %v2604_v26  ;;  %v993_v11 = vadd.f32 %v992_v3, %v930_v55  ;;  %v935_v55 = vmul.f32 %v2632_v2, %v2632_v2 }
 0x1a7   :  { %v861_v51 = vadd.f32 %v860_v27, %v2611_v34  ;;  %v994_v31 = vadd.f32 %v993_v11, %v931_v61  ;;  %v936_v61 = vmul.f32 %v2639_v10, %v2639_v10 }
 0x1a9   :  { %v862_v5 = vadd.f32 %v861_v51, %v2618_v46  ;;  %v995_v15 = vadd.f32 %v994_v31, %v932_v37  ;;  %v937_v51 = vmul.f32 %v2646_v24, %v2646_v24 }
 0x1ab   :  { %v863_v42 = vadd.f32 %v862_v5, %v2625_v54  ;;  %v996_v20 = vadd.f32 %v995_v15, %v933_v28  ;;  %v938_v15 = vmul.f32 %v2653_v38, %v2653_v38 }
 0x1ad   :  { %v864_v60 = vadd.f32 %v863_v42, %v2632_v2  ;;  %v997_v3 = vadd.f32 %v996_v20, %v934_v48  ;;  %v939_v20 = vmul.f32 %v2660_v52, %v2660_v52 }
 0x1af   :  { %v865_v27 = vadd.f32 %v864_v60, %v2639_v10  ;;  %v998_v11 = vadd.f32 %v997_v3, %v935_v55  ;;  %v940_v3 = vmul.f32 %v2667_v62, %v2667_v62 }
 0x1b1   :  { %v866_v37 = vadd.f32 %v865_v27, %v2646_v24  ;;  %v999_v31 = vadd.f32 %v998_v11, %v936_v61  ;;  %v941_v11 = vmul.f32 %v2674_v16, %v2674_v16 }
 0x1b3   :  { %v1000_v5 = vadd.f32 %v999_v31, %v937_v51  ;;  %v867_v28 = vadd.f32 %v866_v37, %v2653_v38  ;;  %v942_v31 = vmul.f32 %v2681_v32, %v2681_v32 }
 0x1b5   :  { %v1001_v42 = vadd.f32 %v1000_v5, %v938_v15  ;;  %v868_v48 = vadd.f32 %v867_v28, %v2660_v52  ;;  %v943_v15 = vmul.f32 %v2688_v56, %v2688_v56 }
 0x1b7   :  { %v1002_v60 = vadd.f32 %v1001_v42, %v939_v20  ;;  %v869_v55 = vadd.f32 %v868_v48, %v2667_v62  ;;  %v944_v20 = vmul.f32 %v2695_v6, %v2695_v6 }
 0x1b9   :  { %v1003_v27 = vadd.f32 %v1002_v60, %v940_v3  ;;  %v870_v61 = vadd.f32 %v869_v55, %v2674_v16  ;;  %v945_v3 = vmul.f32 %v2702_v40, %v2702_v40 }
 0x1bb   :  { %v1004_v37 = vadd.f32 %v1003_v27, %v941_v11  ;;  %v871_v51 = vadd.f32 %v870_v61, %v2681_v32  ;;  %v946_v11 = vmul.f32 %v2709_v59, %v2709_v59 }
 0x1bd   :  { %v1005_v5 = vadd.f32 %v1004_v37, %v942_v31  ;;  %v872_v28 = vadd.f32 %v871_v51, %v2688_v56  ;;  %v947_v31 = vmul.f32 %v2716_v12, %v2716_v12 }
 0x1bf   :  { %v1006_v42 = vadd.f32 %v1005_v5, %v943_v15  ;;  %v873_v48 = vadd.f32 %v872_v28, %v2695_v6  ;;  %v948_v15 = vmul.f32 %v2723_v41, %v2723_v41 }
 0x1c1   :  { %v1007_v60 = vadd.f32 %v1006_v42, %v944_v20  ;;  %v874_v55 = vadd.f32 %v873_v48, %v2702_v40  ;;  %v949_v20 = vmul.f32 %v2730_v4, %v2730_v4 }
 0x1c3   :  { %v1008_v27 = vadd.f32 %v1007_v60, %v945_v3  ;;  %v875_v61 = vadd.f32 %v874_v55, %v2709_v59  ;;  %v950_v3 = vmul.f32 %v2737_v47, %v2737_v47 }
 0x1c5   :  { %v1009_v37 = vadd.f32 %v1008_v27, %v946_v11  ;;  %v876_v51 = vadd.f32 %v875_v61, %v2716_v12  ;;  %v951_v27 = vmul.f32 %v2744_v19, %v2744_v19 }
 0x1c7   :  { %v1010_v5 = vadd.f32 %v1009_v37, %v947_v31  ;;  %v877_v28 = vadd.f32 %v876_v51, %v2723_v41  ;;  %v952_v31 = vmul.f32 %v2751_v39, %v2751_v39 }
 0x1c9   :  { %v1011_v42 = vadd.f32 %v1010_v5, %v948_v15  ;;  %v878_v48 = vadd.f32 %v877_v28, %v2730_v4 }
 0x1cb   :  { %v1012_v60 = vadd.f32 %v1011_v42, %v949_v20  ;;  %v879_v55 = vadd.f32 %v878_v48, %v2737_v47 }
 0x1cd   :  { %v1013_v61 = vadd.f32 %v1012_v60, %v950_v3  ;;  %v880_v11 = vadd.f32 %v879_v55, %v2744_v19 }
 0x1cf   :  { %v1014_v37 = vadd.f32 %v1013_v61, %v951_v27  ;;  %v881_v51 = vadd.f32 %v880_v11, %v2751_v39 }
 0x1d1   :  { %v882_v5 = vrot.slane %v881_v51, 4  ;;  %v1015_v28 = vadd.f32 %v1014_v37, %v952_v31  ;;  %v4154_v31 = vld [vmem:[#allocation20_spill] sm:$0xff]  ;;  %v4163_v37 = vld [vmem:[#allocation25_spill] sm:$0xff] }
 0x1d3   :  { %v883_v15 = vadd.f32 %v882_v5, %v881_v51  ;;  %v1016_v42 = vrot.slane %v1015_v28, 4  ;;  %v4152_v5 = vld [vmem:[#allocation16_spill] sm:$0xff]  ;;  %v4162_v51 = vld [vmem:[#allocation23_spill] sm:$0xff] }
 0x1d5   :  { %v884_v48 = vrot.slane %v883_v15, 2  ;;  %v1017_v20 = vadd.f32 %v1016_v42, %v1015_v28  ;;  %v4145_v42 = vld [vmem:[#allocation3_spill] sm:$0xff]  ;;  %v4161_v28 = vld [vmem:[#allocation21_spill] sm:$0xff] }
 0x1d7   :  { %v885_v4 = vadd.f32 %v884_v48, %v883_v15  ;;  %v1018_v47 = vrot.slane %v1017_v20, 2  ;;  %v4144_v15 = vld [vmem:[#allocation2_spill] sm:$0xff] }
 0x1d8   :  { %v4153_v48 = vld [vmem:[#allocation18_spill] sm:$0xff] }
 0x1d9   :  { %v886_v41 = vrot.slane %v885_v4, 1  ;;  %v1019_v12 = vadd.f32 %v1018_v47, %v1017_v20  ;;  %v4155_v47 = vld [vmem:[#allocation22_spill] sm:$0xff] }
 0x1db   :  { %v887_v59 = vadd.f32 %v886_v41, %v885_v4  ;;  %v1020_v60 = vrot.slane %v1019_v12, 1  ;;  %v4158_v41 = vld [vmem:[#allocation27_spill] sm:$0xff] }
 0x1dd   :  { %v2852_v3 = vmul.f32 0.001953125, %v887_v59  ;;  %v1021_v55 = vadd.f32 %v1020_v60, %v1019_v12  ;;  %v4147_v60 = vld [vmem:[#allocation7_spill] sm:$0xff]  ;;  %v4156_v12 = vld [vmem:[#allocation24_spill] sm:$0xff]  ;;  %v4157_v59 = vld [vmem:[#allocation26_spill] sm:$0xff] }
 0x1df   :  { %v1022_v27 = vmul.f32 0.001953125, %v1021_v55  ;;  %v1023_v61 = vmul.f32 %v2852_v3, %v2852_v3  ;;  %v4148_v55 = vld [vmem:[#allocation9_spill] sm:$0xff]  ;;  %v4164_v62 = vsub.f32 %v2532_v17, %v2852_v3  ;;  %v4165_v32 = vsub.f32 %v2536_v21, %v2852_v3 }
 0x1e0   :  { %v4166_v11 = vsub.f32 %v2546_v29, %v2852_v3 }
 0x1e1   :  { %v1024_v4 = vsub.f32 %v1022_v27, %v1023_v61  ;;  %v4159_v27 = vld [vmem:[#allocation17_spill] sm:$0xff]  ;;  %v4160_v61 = vld [vmem:[#allocation19_spill] sm:$0xff] }
 0x1e3   :  { %v1025_v20 = vmax.f32 %v1024_v4, 0.0  ;;  %v4146_v4 = vld [vmem:[#allocation5_spill] sm:$0xff] }
 0x1e5   :  { %v1090_v40 = vadd.f32 1e-05, %v1025_v20 }
 0x1e7   :  { %2232 = vrsqrt.f32 %v1090_v40  ;;  %v4167_v40 = vsub.f32 %v2553_v35, %v2852_v3 }
 0x1f1   :  { %v2984_v52 = vpop.eup %2232 }
 0x1f2   :  { %v2990_v16 = vmul.f32 %v2984_v52, %v4164_v62  ;;  %v2996_v56 = vmul.f32 %v2984_v52, %v4165_v32  ;;  %v3002_v20 = vmul.f32 %v2984_v52, %v4166_v11  ;;  %v3008_v17 = vmul.f32 %v2984_v52, %v4167_v40 }
 0x1f3   :  { %v4168_v62 = vsub.f32 %v2560_v43, %v2852_v3  ;;  %v4169_v32 = vsub.f32 %v2567_v49, %v2852_v3  ;;  %v4170_v11 = vsub.f32 %v2574_v57, %v2852_v3  ;;  %v4171_v40 = vsub.f32 %v2581_v63, %v2852_v3 }
 0x1f5   :  { %v3014_v21 = vmul.f32 %v2984_v52, %v4168_v62  ;;  %v3020_v29 = vmul.f32 %v2984_v52, %v4169_v32  ;;  %v3026_v35 = vmul.f32 %v2984_v52, %v4170_v11  ;;  %v3032_v43 = vmul.f32 %v2984_v52, %v4171_v40 }
 0x1f6   :  { %v4172_v62 = vsub.f32 %v2588_v7, %v2852_v3  ;;  %v4173_v32 = vsub.f32 %v2595_v13, %v2852_v3  ;;  %v4174_v11 = vsub.f32 %v2602_v25, %v2852_v3  ;;  %v4175_v40 = vsub.f32 %v2609_v33, %v2852_v3 }
 0x1f8   :  { %v3038_v49 = vmul.f32 %v2984_v52, %v4172_v62  ;;  %v3044_v57 = vmul.f32 %v2984_v52, %v4173_v32  ;;  %v3050_v63 = vmul.f32 %v2984_v52, %v4174_v11  ;;  %v3056_v7 = vmul.f32 %v2984_v52, %v4175_v40 }
 0x1f9   :  { %v4176_v62 = vsub.f32 %v2616_v45, %v2852_v3  ;;  %v4177_v32 = vsub.f32 %v2623_v53, %v2852_v3  ;;  %v4178_v11 = vsub.f32 %v2630_v1, %v2852_v3  ;;  %v4179_v40 = vsub.f32 %v2637_v9, %v2852_v3 }
 0x1fb   :  { %v3062_v13 = vmul.f32 %v2984_v52, %v4176_v62  ;;  %v3068_v25 = vmul.f32 %v2984_v52, %v4177_v32  ;;  %v3074_v33 = vmul.f32 %v2984_v52, %v4178_v11  ;;  %v3080_v45 = vmul.f32 %v2984_v52, %v4179_v40 }
 0x1fc   :  { %v4180_v62 = vsub.f32 %v2644_v23, %v2852_v3  ;;  %v4181_v32 = vsub.f32 %v4144_v15, %v2852_v3  ;;  %v4182_v11 = vsub.f32 %v4145_v42, %v2852_v3  ;;  %v4184_v40 = vsub.f32 %v4146_v4, %v2852_v3 }
 0x1fe   :  { %v3086_v53 = vmul.f32 %v2984_v52, %v4180_v62  ;;  %v3092_v1 = vmul.f32 %v2984_v52, %v4181_v32  ;;  %v3098_v9 = vmul.f32 %v2984_v52, %v4182_v11  ;;  %v3104_v23 = vmul.f32 %v2984_v52, %v4184_v40  ;;  %v4190_v11 = vld [vmem:[#allocation11_spill] sm:$0xff]  ;;  %v4192_v40 = vld [vmem:[#allocation13_spill] sm:$0xff] }
 0x1ff   :  { %v4186_v62 = vsub.f32 %v4147_v60, %v2852_v3  ;;  %v4188_v32 = vmov %v4148_v55 }
 0x200   :  { %4183 = vst [vmem:[#allocation2_spill] sm:$0xff] %v3098_v9  ;;  %4185 = vst [vmem:[#allocation3_spill] sm:$0xff] %v3104_v23  ;;  %v4189_v55 = vsub.f32 %v4188_v32, %v2852_v3  ;;  %v4191_v9 = vsub.f32 %v4190_v11, %v2852_v3  ;;  %v4193_v23 = vsub.f32 %v4192_v40, %v2852_v3 }
 0x201   :  { %v3110_v15 = vmul.f32 %v2984_v52, %v4186_v62  ;;  %v4194_v62 = vld [vmem:[#allocation14_spill] sm:$0xff] }
 0x202   :  { %v3116_v42 = vmul.f32 %v2984_v52, %v4189_v55  ;;  %v3122_v4 = vmul.f32 %v2984_v52, %v4191_v9  ;;  %v3128_v60 = vmul.f32 %v2984_v52, %v4193_v23  ;;  %v4196_v55 = vsub.f32 %v4152_v5, %v2852_v3 }
 0x203   :  { %4187 = vst [vmem:[#allocation5_spill] sm:$0xff] %v3110_v15  ;;  %v4195_v15 = vsub.f32 %v4194_v62, %v2852_v3  ;;  %v4197_v9 = vsub.f32 %v4153_v48, %v2852_v3  ;;  %v4198_v23 = vsub.f32 %v4154_v31, %v2852_v3 }
 0x204   :  { %v3140_v11 = vmul.f32 %v2984_v52, %v4196_v55  ;;  %v4200_v55 = vsub.f32 %v4156_v12, %v2852_v3 }
 0x205   :  { %v3134_v32 = vmul.f32 %v2984_v52, %v4195_v15  ;;  %v3146_v40 = vmul.f32 %v2984_v52, %v4197_v9  ;;  %v3152_v62 = vmul.f32 %v2984_v52, %v4198_v23  ;;  %v4199_v15 = vsub.f32 %v4155_v47, %v2852_v3 }
 0x206   :  { %v3164_v48 = vmul.f32 %v2984_v52, %v4200_v55  ;;  %v4201_v9 = vsub.f32 %v4157_v59, %v2852_v3  ;;  %v4202_v23 = vsub.f32 %v4158_v41, %v2852_v3  ;;  %v4204_v55 = vsub.f32 %v2538_v22, %v2852_v3 }
 0x207   :  { %v3158_v5 = vmul.f32 %v2984_v52, %v4199_v15  ;;  %v4203_v15 = vsub.f32 %v2534_v18, %v2852_v3 }
 0x208   :  { %v3170_v31 = vmul.f32 %v2984_v52, %v4201_v9  ;;  %v3176_v47 = vmul.f32 %v2984_v52, %v4202_v23  ;;  %v3188_v59 = vmul.f32 %v2984_v52, %v4204_v55  ;;  %v4205_v9 = vsub.f32 %v2548_v30, %v2852_v3 }
 0x209   :  { %v3182_v12 = vmul.f32 %v2984_v52, %v4203_v15  ;;  %v4206_v23 = vsub.f32 %v2555_v36, %v2852_v3  ;;  %v4207_v15 = vsub.f32 %v2562_v44, %v2852_v3  ;;  %v4208_v55 = vsub.f32 %v2569_v50, %v2852_v3 }
 0x20a   :  { %v3194_v41 = vmul.f32 %v2984_v52, %v4205_v9  ;;  %v4209_v9 = vsub.f32 %v2576_v58, %v2852_v3 }
 0x20b   :  { %v3200_v18 = vmul.f32 %v2984_v52, %v4206_v23  ;;  %v3206_v22 = vmul.f32 %v2984_v52, %v4207_v15  ;;  %v3212_v30 = vmul.f32 %v2984_v52, %v4208_v55  ;;  %v4210_v23 = vsub.f32 %v2583_v0, %v2852_v3 }
 0x20c   :  { %v3218_v36 = vmul.f32 %v2984_v52, %v4209_v9  ;;  %v4211_v15 = vsub.f32 %v2590_v8, %v2852_v3  ;;  %v4212_v55 = vsub.f32 %v2597_v14, %v2852_v3  ;;  %v4213_v9 = vsub.f32 %v2604_v26, %v2852_v3 }
 0x20d   :  { %v3224_v44 = vmul.f32 %v2984_v52, %v4210_v23  ;;  %v4214_v23 = vsub.f32 %v2611_v34, %v2852_v3 }
 0x20e   :  { %v3230_v50 = vmul.f32 %v2984_v52, %v4211_v15  ;;  %v3236_v58 = vmul.f32 %v2984_v52, %v4212_v55  ;;  %v3242_v0 = vmul.f32 %v2984_v52, %v4213_v9  ;;  %v4215_v15 = vsub.f32 %v2618_v46, %v2852_v3 }
 0x20f   :  { %v3248_v8 = vmul.f32 %v2984_v52, %v4214_v23  ;;  %v4216_v55 = vsub.f32 %v2625_v54, %v2852_v3  ;;  %v4217_v9 = vsub.f32 %v2632_v2, %v2852_v3  ;;  %v4219_v23 = vsub.f32 %v2639_v10, %v2852_v3 }
 0x210   :  { %v3254_v14 = vmul.f32 %v2984_v52, %v4215_v15  ;;  %v4221_v15 = vsub.f32 %v2646_v24, %v2852_v3 }
 0x211   :  { %v3260_v26 = vmul.f32 %v2984_v52, %v4216_v55  ;;  %v3266_v34 = vmul.f32 %v2984_v52, %v4217_v9  ;;  %v3272_v46 = vmul.f32 %v2984_v52, %v4219_v23  ;;  %v4223_v55 = vsub.f32 %v2653_v38, %v2852_v3  ;;  %v4225_v9 = vld [vmem:[#allocation4_spill] sm:$0xff]  ;;  %v4228_v23 = vld [vmem:[#allocation6_spill] sm:$0xff] }
 0x212   :  { %v3278_v54 = vmul.f32 %v2984_v52, %v4221_v15  ;;  %v4230_v15 = vld [vmem:[#allocation8_spill] sm:$0xff] }
 0x213   :  { %4218 = vst [vmem:[#allocation7_spill] sm:$0xff] %v3266_v34  ;;  %4220 = vst [vmem:[#allocation16_spill] sm:$0xff] %v3272_v46  ;;  %v3284_v2 = vmul.f32 %v2984_v52, %v4223_v55  ;;  %v4226_v34 = vsub.f32 %v4225_v9, %v2852_v3  ;;  %v4229_v46 = vsub.f32 %v4228_v23, %v2852_v3  ;;  %v4232_v55 = vld [vmem:[#allocation10_spill] sm:$0xff] }
 0x214   :  { %4222 = vst [vmem:[#allocation18_spill] sm:$0xff] %v3278_v54  ;;  %v4231_v54 = vsub.f32 %v4230_v15, %v2852_v3 }
 0x215   :  { %4224 = vst [vmem:[#allocation20_spill] sm:$0xff] %v3284_v2  ;;  %v3290_v10 = vmul.f32 %v2984_v52, %v4226_v34  ;;  %v3296_v24 = vmul.f32 %v2984_v52, %v4229_v46  ;;  %v4233_v2 = vsub.f32 %v4232_v55, %v2852_v3  ;;  %v4235_v34 = vld [vmem:[#allocation12_spill] sm:$0xff]  ;;  %v4237_v46 = vsub.f32 %v2695_v6, %v2852_v3  ;;  %v4239_v55 = vld [vmem:[#allocation15_spill] sm:$0xff] }
 0x216   :  { %v3302_v38 = vmul.f32 %v2984_v52, %v4231_v54  ;;  %v3325_v54 = vld [vmem:[%s4064_s2] ss:$0 sm:$0xff]  ;;  %v4242_v6 = vsub.f32 %v4160_v61, %v2852_v3 }
 0x217   :  { %4227 = vst [vmem:[#allocation22_spill] sm:$0xff] %v3290_v10  ;;  %v3308_v9 = vmul.f32 %v2984_v52, %v4233_v2  ;;  %v4236_v10 = vsub.f32 %v4235_v34, %v2852_v3  ;;  %v3320_v15 = vmul.f32 %v2984_v52, %v4237_v46  ;;  %v4240_v2 = vsub.f32 %v4239_v55, %v2852_v3 }
 0x218   :  { %v3343_v46 = vmul.f32 %v2984_v52, %v4242_v6  ;;  %v4246_v6 = vsub.f32 %v2744_v19, %v2852_v3  ;;  %v3385_v19 = vmul.f32 %v3325_v54, %v3002_v20  ;;  %v3413_v20 = vmul.f32 %v3325_v54, %v3044_v57 }
 0x219   :  { %4234 = vst [vmem:[#allocation24_spill] sm:$0xff] %v3308_v9  ;;  %v3314_v23 = vmul.f32 %v2984_v52, %v4236_v10  ;;  %4238 = vst [vmem:[#allocation26_spill] sm:$0xff] %v3320_v15  ;;  %v3331_v9 = vmul.f32 %v2984_v52, %v4240_v2  ;;  %v4241_v10 = vsub.f32 %v4159_v27, %v2852_v3 }
 0x21a   :  { %v4243_v15 = vsub.f32 %v4161_v28, %v2852_v3  ;;  %v4244_v2 = vsub.f32 %v4162_v51, %v2852_v3  ;;  %v3367_v28 = vmul.f32 %v2984_v52, %v4246_v6  ;;  %v3441_v57 = vmul.f32 %v3325_v54, %v3086_v53  ;;  %v4250_v6 = vld [vmem:[#allocation5_spill] sm:$0xff] }
 0x21b   :  { %v3337_v34 = vmul.f32 %v2984_v52, %v4241_v10  ;;  %v4245_v10 = vsub.f32 %v4163_v37, %v2852_v3  ;;  %v3381_v37 = vmul.f32 %v3325_v54, %v2996_v56  ;;  %v3401_v56 = vmul.f32 %v3325_v54, %v3026_v35 }
 0x21c   :  { %v3349_v55 = vmul.f32 %v2984_v52, %v4243_v15  ;;  %v3355_v27 = vmul.f32 %v2984_v52, %v4244_v2  ;;  %v4247_v15 = vsub.f32 %v2751_v39, %v2852_v3  ;;  %v3377_v2 = vmul.f32 %v3325_v54, %v2990_v16 }
 0x21d   :  { %v3361_v61 = vmul.f32 %v2984_v52, %v4245_v10  ;;  %v3389_v10 = vmul.f32 %v3325_v54, %v3008_v17  ;;  %v3397_v16 = vmul.f32 %v3325_v54, %v3020_v29  ;;  %v3405_v39 = vmul.f32 %v3325_v54, %v3032_v43 }
 0x21e   :  { %v3373_v51 = vmul.f32 %v2984_v52, %v4247_v15  ;;  %v3393_v52 = vmul.f32 %v3325_v54, %v3014_v21  ;;  %v3409_v3 = vmul.f32 %v3325_v54, %v3038_v49  ;;  %v3417_v17 = vmul.f32 %v3325_v54, %v3050_v63 }
 0x21f   :  { %v3421_v21 = vmul.f32 %v3325_v54, %v3056_v7  ;;  %v3425_v29 = vmul.f32 %v3325_v54, %v3062_v13  ;;  %v3429_v35 = vmul.f32 %v3325_v54, %v3068_v25  ;;  %v3433_v43 = vmul.f32 %v3325_v54, %v3074_v33  ;;  %v4248_v7 = vld [vmem:[#allocation2_spill] sm:$0xff]  ;;  %v4249_v25 = vld [vmem:[#allocation3_spill] sm:$0xff] }
 0x220   :  { %v3437_v49 = vmul.f32 %v3325_v54, %v3080_v45  ;;  %v3445_v63 = vmul.f32 %v3325_v54, %v3092_v1  ;;  %v3449_v13 = vmul.f32 %v3325_v54, %v4248_v7  ;;  %v3453_v33 = vmul.f32 %v3325_v54, %v4249_v25 }
 0x221   :  { %v3457_v45 = vmul.f32 %v3325_v54, %v4250_v6  ;;  %v3461_v53 = vmul.f32 %v3325_v54, %v3116_v42  ;;  %v3465_v1 = vmul.f32 %v3325_v54, %v3122_v4  ;;  %v3469_v15 = vmul.f32 %v3325_v54, %v3128_v60  ;;  %v4255_v6 = vld [vmem:[#allocation7_spill] sm:$0xff] }
 0x222   :  { %v3473_v7 = vmul.f32 %v3325_v54, %v3134_v32  ;;  %v3477_v25 = vmul.f32 %v3325_v54, %v3140_v11  ;;  %v3481_v42 = vmul.f32 %v3325_v54, %v3146_v40  ;;  %v3485_v4 = vmul.f32 %v3325_v54, %v3152_v62 }
 0x223   :  { %v3489_v60 = vmul.f32 %v3325_v54, %v3158_v5  ;;  %v3493_v32 = vmul.f32 %v3325_v54, %v3164_v48  ;;  %v3497_v11 = vmul.f32 %v3325_v54, %v3170_v31  ;;  %v3501_v40 = vmul.f32 %v3325_v54, %v3176_v47 }
 0x224   :  { %v3505_v62 = vmul.f32 %v3325_v54, %v3182_v12  ;;  %v3509_v5 = vmul.f32 %v3325_v54, %v3188_v59  ;;  %v3513_v48 = vmul.f32 %v3325_v54, %v3194_v41  ;;  %v3517_v31 = vmul.f32 %v3325_v54, %v3200_v18 }
 0x225   :  { %v3521_v47 = vmul.f32 %v3325_v54, %v3206_v22  ;;  %v3525_v12 = vmul.f32 %v3325_v54, %v3212_v30  ;;  %v3529_v59 = vmul.f32 %v3325_v54, %v3218_v36  ;;  %v3533_v41 = vmul.f32 %v3325_v54, %v3224_v44 }
 0x226   :  { %v3537_v18 = vmul.f32 %v3325_v54, %v3230_v50  ;;  %v3541_v22 = vmul.f32 %v3325_v54, %v3236_v58  ;;  %v3545_v30 = vmul.f32 %v3325_v54, %v3242_v0  ;;  %v3549_v36 = vmul.f32 %v3325_v54, %v3248_v8 }
 0x227   :  { %v3553_v44 = vmul.f32 %v3325_v54, %v3254_v14  ;;  %v3557_v50 = vmul.f32 %v3325_v54, %v3260_v26  ;;  %v3561_v58 = vmul.f32 %v3325_v54, %v4255_v6  ;;  %v3581_v6 = vmul.f32 %v3325_v54, %v3296_v24  ;;  %v3602_v24 = vld [vmem:[%s4065_s3] ss:$0 sm:$0xff] }
 0x228   :  { %4251 = vst [vmem:[#allocation27_spill] sm:$0xff] %v3541_v22  ;;  %4252 = vst [vmem:[#allocation17_spill] sm:$0xff] %v3545_v30  ;;  %v4256_v22 = vld [vmem:[#allocation16_spill] sm:$0xff]  ;;  %v4258_v30 = vld [vmem:[#allocation18_spill] sm:$0xff] }
 0x229   :  { %4253 = vst [vmem:[#allocation19_spill] sm:$0xff] %v3549_v36  ;;  %4254 = vst [vmem:[#allocation21_spill] sm:$0xff] %v3553_v44  ;;  %v3565_v0 = vmul.f32 %v3325_v54, %v4256_v22  ;;  %v3569_v8 = vmul.f32 %v3325_v54, %v4258_v30  ;;  %v4259_v36 = vld [vmem:[#allocation20_spill] sm:$0xff]  ;;  %v4261_v44 = vld [vmem:[#allocation22_spill] sm:$0xff]  ;;  %v3585_v22 = vmul.f32 %v3325_v54, %v3302_v38 }
 0x22a   :  { %v3573_v14 = vmul.f32 %v3325_v54, %v4259_v36  ;;  %v3577_v26 = vmul.f32 %v3325_v54, %v4261_v44  ;;  %v3593_v36 = vmul.f32 %v3325_v54, %v3314_v23  ;;  %v3606_v38 = vmul.f32 %v3325_v54, %v3331_v9 }
 0x22b   :  { %4257 = vst [vmem:[#allocation23_spill] sm:$0xff] %v3565_v0  ;;  %v4262_v0 = vld [vmem:[#allocation24_spill] sm:$0xff]  ;;  %v3614_v23 = vmul.f32 %v3325_v54, %v3343_v46  ;;  %v3626_v9 = vmul.f32 %v3325_v54, %v3361_v61  ;;  %v3634_v46 = vmul.f32 %v3325_v54, %v3373_v51  ;;  %v3646_v61 = vadd.f32 %v3602_v24, %v3385_v19 }
 0x22c   :  { %4260 = vst [vmem:[#allocation25_spill] sm:$0xff] %v3573_v14  ;;  %v3589_v30 = vmul.f32 %v3325_v54, %v4262_v0  ;;  %v4263_v14 = vld [vmem:[#allocation26_spill] sm:$0xff]  ;;  %v3610_v0 = vmul.f32 %v3325_v54, %v3337_v34  ;;  %v3630_v34 = vmul.f32 %v3325_v54, %v3367_v28  ;;  %v3650_v28 = vadd.f32 %v3602_v24, %v3389_v10 }
 0x22d   :  { %v3597_v44 = vmul.f32 %v3325_v54, %v4263_v14  ;;  %v3618_v14 = vmul.f32 %v3325_v54, %v3349_v55  ;;  %v3638_v55 = vadd.f32 %v3602_v24, %v3377_v2  ;;  %4267 = vst [vmem:[#allocation14_spill] sm:$0xff] %v3646_v61  ;;  %v3658_v51 = vadd.f32 %v3602_v24, %v3397_v16 }
 0x22e   :  { %4268 = vst [vmem:[#allocation4_spill] sm:$0xff] %v3650_v28  ;;  %v3662_v2 = vadd.f32 %v3602_v24, %v3401_v56  ;;  %v3670_v19 = vadd.f32 %v3602_v24, %v3409_v3  ;;  %v3674_v10 = vadd.f32 %v3602_v24, %v3413_v20  ;;  %v3682_v16 = vadd.f32 %v3602_v24, %v3421_v21 }
 0x22f   :  { %4264 = vst [vmem:[#allocation9_spill] sm:$0xff] %v3597_v44  ;;  %v3622_v44 = vmul.f32 %v3325_v54, %v3355_v27  ;;  %4265 = vst [vmem:[#allocation11_spill] sm:$0xff] %v3638_v55  ;;  %v3642_v27 = vadd.f32 %v3602_v24, %v3381_v37  ;;  %v3654_v54 = vadd.f32 %v3602_v24, %v3393_v52 }
 0x230   :  { %v3666_v37 = vadd.f32 %v3602_v24, %v3405_v39  ;;  %v3678_v52 = vadd.f32 %v3602_v24, %v3417_v17  ;;  %v3686_v56 = vadd.f32 %v3602_v24, %v3425_v29  ;;  %v3690_v39 = vadd.f32 %v3602_v24, %v3429_v35 }
 0x231   :  { %4266 = vst [vmem:[#allocation13_spill] sm:$0xff] %v3642_v27  ;;  %4269 = vst [vmem:[#allocation6_spill] sm:$0xff] %v3654_v54  ;;  %v3694_v3 = vadd.f32 %v3602_v24, %v3433_v43  ;;  %v3698_v20 = vadd.f32 %v3602_v24, %v3437_v49  ;;  %v3702_v17 = vadd.f32 %v3602_v24, %v3441_v57 }
 0x232   :  { %v3706_v21 = vadd.f32 %v3602_v24, %v3445_v63  ;;  %v3710_v29 = vadd.f32 %v3602_v24, %v3449_v13  ;;  %v3714_v35 = vadd.f32 %v3602_v24, %v3453_v33  ;;  %v3718_v43 = vadd.f32 %v3602_v24, %v3457_v45 }
 0x233   :  { %v3722_v49 = vadd.f32 %v3602_v24, %v3461_v53  ;;  %v3726_v57 = vadd.f32 %v3602_v24, %v3465_v1  ;;  %v3730_v63 = vadd.f32 %v3602_v24, %v3469_v15  ;;  %v3734_v13 = vadd.f32 %v3602_v24, %v3473_v7 }
 0x234   :  { %v3738_v33 = vadd.f32 %v3602_v24, %v3477_v25  ;;  %v3742_v45 = vadd.f32 %v3602_v24, %v3481_v42  ;;  %v3746_v53 = vadd.f32 %v3602_v24, %v3485_v4  ;;  %v3750_v1 = vadd.f32 %v3602_v24, %v3489_v60 }
 0x235   :  { %v3754_v15 = vadd.f32 %v3602_v24, %v3493_v32  ;;  %v3758_v7 = vadd.f32 %v3602_v24, %v3497_v11  ;;  %v3762_v25 = vadd.f32 %v3602_v24, %v3501_v40  ;;  %v3766_v42 = vadd.f32 %v3602_v24, %v3505_v62 }
 0x236   :  { %v3770_v4 = vadd.f32 %v3602_v24, %v3509_v5  ;;  %v3774_v60 = vadd.f32 %v3602_v24, %v3513_v48  ;;  %v3778_v32 = vadd.f32 %v3602_v24, %v3517_v31  ;;  %v3782_v11 = vadd.f32 %v3602_v24, %v3521_v47  ;;  %v4273_v31 = vld [vmem:[#allocation27_spill] sm:$0xff] }
 0x237   :  { %v3786_v40 = vadd.f32 %v3602_v24, %v3525_v12  ;;  %v3790_v62 = vadd.f32 %v3602_v24, %v3529_v59  ;;  %v3794_v5 = vadd.f32 %v3602_v24, %v3533_v41  ;;  %v3798_v48 = vadd.f32 %v3602_v24, %v3537_v18 }
 0x238   :  { %4270 = vst [vmem:[#allocation8_spill] sm:$0xff] %v3782_v11  ;;  %v3802_v47 = vadd.f32 %v3602_v24, %v4273_v31  ;;  %v4275_v11 = vld [vmem:[#allocation17_spill] sm:$0xff]  ;;  %v3818_v18 = vadd.f32 %v3602_v24, %v3557_v50  ;;  %v3822_v31 = vadd.f32 %v3602_v24, %v3561_v58  ;;  %v3838_v50 = vadd.f32 %v3602_v24, %v3577_v26 }
 0x239   :  { %4271 = vst [vmem:[#allocation10_spill] sm:$0xff] %v3786_v40  ;;  %4272 = vst [vmem:[#allocation12_spill] sm:$0xff] %v3790_v62  ;;  %v3806_v12 = vadd.f32 %v3602_v24, %v4275_v11  ;;  %v4276_v40 = vld [vmem:[#allocation19_spill] sm:$0xff]  ;;  %v4278_v62 = vld [vmem:[#allocation21_spill] sm:$0xff]  ;;  %v3842_v58 = vadd.f32 %v3602_v24, %v3581_v6  ;;  %v3862_v6 = vadd.f32 %v3602_v24, %v3606_v38 }
 0x23a   :  { %4274 = vst [vmem:[#allocation15_spill] sm:$0xff] %v3802_v47  ;;  %v3810_v59 = vadd.f32 %v3602_v24, %v4276_v40  ;;  %v3814_v41 = vadd.f32 %v3602_v24, %v4278_v62  ;;  %v4279_v47 = vld [vmem:[#allocation23_spill] sm:$0xff]  ;;  %v3830_v40 = vadd.f32 %v3602_v24, %v3569_v8  ;;  %v3850_v8 = vadd.f32 %v3602_v24, %v3589_v30 }
 0x23b   :  { %v3826_v11 = vadd.f32 %v3602_v24, %v4279_v47  ;;  %v3846_v47 = vadd.f32 %v3602_v24, %v3585_v22  ;;  %v3866_v22 = vadd.f32 %v3602_v24, %v3610_v0  ;;  %v3870_v30 = vadd.f32 %v3602_v24, %v3614_v23 }
 0x23c   :  { %4277 = vst [vmem:[#allocation2_spill] sm:$0xff] %v3810_v59  ;;  %v4280_v59 = vld [vmem:[#allocation25_spill] sm:$0xff]  ;;  %v3882_v38 = vadd.f32 %v3602_v24, %v3626_v9  ;;  %v3886_v0 = vadd.f32 %v3602_v24, %v3630_v34  ;;  %v3890_v23 = vadd.f32 %v3602_v24, %v3634_v46  ;;  %v1303_v9 = vmax.f32 %v3658_v51, 0.0 }
 0x23d   :  { %v3834_v62 = vadd.f32 %v3602_v24, %v4280_v59  ;;  %v3854_v59 = vadd.f32 %v3602_v24, %v3593_v36  ;;  %4283 = vst [vmem:[#allocation5_spill] sm:$0xff] %v3870_v30  ;;  %v3874_v36 = vadd.f32 %v3602_v24, %v3618_v14  ;;  %v1305_v34 = vmax.f32 %v3666_v37, 0.0 }
 0x23e   :  { %4286 = vst [vmem:[#allocation18_spill] sm:$0xff] %v3882_v38  ;;  %4287 = vst [vmem:[#allocation20_spill] sm:$0xff] %v3886_v0  ;;  %v1304_v38 = vmax.f32 %v3662_v2, 0.0  ;;  %v1306_v0 = vmax.f32 %v3670_v19, 0.0  ;;  %v1308_v46 = vmax.f32 %v3678_v52, 0.0  ;;  %v1309_v14 = vmax.f32 %v3682_v16, 0.0 }
 0x23f   :  { %4281 = vst [vmem:[#allocation3_spill] sm:$0xff] %v3834_v62  ;;  %v4282_v62 = vld [vmem:[#allocation9_spill] sm:$0xff]  ;;  %4284 = vst [vmem:[#allocation7_spill] sm:$0xff] %v3874_v36  ;;  %v1310_v36 = vmax.f32 %v3686_v56, 0.0  ;;  %v1313_v51 = vmax.f32 %v3698_v20, 0.0  ;;  %v1314_v2 = vmax.f32 %v3702_v17, 0.0 }
 0x240   :  { %v3858_v26 = vadd.f32 %v3602_v24, %v4282_v62  ;;  %v3878_v62 = vadd.f32 %v3602_v24, %v3622_v44  ;;  %4288 = vst [vmem:[#allocation22_spill] sm:$0xff] %v3890_v23  ;;  %v1307_v24 = vmax.f32 %v3674_v10, 0.0  ;;  %v1311_v44 = vmax.f32 %v3690_v39, 0.0  ;;  %v4289_v30 = vld [vmem:[#allocation8_spill] sm:$0xff]  ;;  %v4290_v54 = vld [vmem:[#allocation10_spill] sm:$0xff] }
 0x241   :  { %v1315_v37 = vmax.f32 %v3706_v21, 0.0  ;;  %v1316_v19 = vmax.f32 %v3710_v29, 0.0  ;;  %v1317_v10 = vmax.f32 %v3714_v35, 0.0  ;;  %v1318_v52 = vmax.f32 %v3718_v43, 0.0  ;;  %v4291_v28 = vld [vmem:[#allocation12_spill] sm:$0xff]  ;;  %v4292_v61 = vld [vmem:[#allocation15_spill] sm:$0xff] }
 0x242   :  { %4285 = vst [vmem:[#allocation16_spill] sm:$0xff] %v3878_v62  ;;  %v1312_v62 = vmax.f32 %v3694_v3, 0.0  ;;  %v1319_v16 = vmax.f32 %v3722_v49, 0.0  ;;  %v1320_v56 = vmax.f32 %v3726_v57, 0.0  ;;  %v1321_v39 = vmax.f32 %v3730_v63, 0.0 }
 0x243   :  { %v1322_v3 = vmax.f32 %v3734_v13, 0.0  ;;  %v1323_v20 = vmax.f32 %v3738_v33, 0.0  ;;  %v1324_v17 = vmax.f32 %v3742_v45, 0.0  ;;  %v1325_v21 = vmax.f32 %v3746_v53, 0.0  ;;  %v4293_v27 = vld [vmem:[#allocation2_spill] sm:$0xff] }
 0x244   :  { %v1326_v29 = vmax.f32 %v3750_v1, 0.0  ;;  %v1327_v35 = vmax.f32 %v3754_v15, 0.0  ;;  %v1328_v43 = vmax.f32 %v3758_v7, 0.0  ;;  %v1329_v49 = vmax.f32 %v3762_v25, 0.0  ;;  %v4295_v23 = vld [vmem:[#allocation5_spill] sm:$0xff] }
 0x245   :  { %v1330_v57 = vmax.f32 %v3766_v42, 0.0  ;;  %v1331_v63 = vmax.f32 %v3770_v4, 0.0  ;;  %v1332_v13 = vmax.f32 %v3774_v60, 0.0  ;;  %v1333_v33 = vmax.f32 %v3778_v32, 0.0 }
 0x246   :  { %v1334_v45 = vmax.f32 %v4289_v30, 0.0  ;;  %v1335_v53 = vmax.f32 %v4290_v54, 0.0  ;;  %v1336_v1 = vmax.f32 %v4291_v28, 0.0  ;;  %v1337_v15 = vmax.f32 %v3794_v5, 0.0  ;;  %v4294_v55 = vld [vmem:[#allocation3_spill] sm:$0xff] }
 0x247   :  { %v1338_v7 = vmax.f32 %v3798_v48, 0.0  ;;  %v1339_v25 = vmax.f32 %v4292_v61, 0.0  ;;  %v1340_v42 = vmax.f32 %v3806_v12, 0.0  ;;  %v1341_v4 = vmax.f32 %v4293_v27, 0.0 }
 0x248   :  { %v1342_v60 = vmax.f32 %v3814_v41, 0.0  ;;  %v1343_v32 = vmax.f32 %v3818_v18, 0.0  ;;  %v1344_v30 = vmax.f32 %v3822_v31, 0.0  ;;  %v1345_v54 = vmax.f32 %v3826_v11, 0.0 }
 0x249   :  { %v1346_v28 = vmax.f32 %v3830_v40, 0.0  ;;  %v1347_v5 = vmax.f32 %v4294_v55, 0.0  ;;  %v1348_v48 = vmax.f32 %v3838_v50, 0.0  ;;  %v1349_v61 = vmax.f32 %v3842_v58, 0.0  ;;  %v4296_v55 = vld [vmem:[#allocation7_spill] sm:$0xff]  ;;  %v4297_v58 = vld [vmem:[#allocation16_spill] sm:$0xff] }
 0x24a   :  { %v1350_v12 = vmax.f32 %v3846_v47, 0.0  ;;  %v1351_v27 = vmax.f32 %v3850_v8, 0.0  ;;  %v1352_v41 = vmax.f32 %v3854_v59, 0.0  ;;  %v1353_v18 = vmax.f32 %v3858_v26, 0.0  ;;  %v4298_v8 = vld [vmem:[#allocation18_spill] sm:$0xff]  ;;  %v4299_v26 = vld [vmem:[#allocation20_spill] sm:$0xff] }
 0x24b   :  { %v1354_v31 = vmax.f32 %v3862_v6, 0.0  ;;  %v1355_v11 = vmax.f32 %v3866_v22, 0.0  ;;  %v1356_v40 = vmax.f32 %v4295_v23, 0.0  ;;  %v1357_v50 = vmax.f32 %v4296_v55, 0.0  ;;  %v4300_v22 = vld [vmem:[#allocation22_spill] sm:$0xff]  ;;  %v4301_v55 = vld [vmem:[#allocation11_spill] sm:$0xff] }
 0x24c   :  { %v1358_v47 = vmax.f32 %v4297_v58, 0.0  ;;  %v1359_v59 = vmax.f32 %v4298_v8, 0.0  ;;  %v1360_v6 = vmax.f32 %v4299_v26, 0.0  ;;  %v1361_v23 = vmax.f32 %v4300_v22, 0.0  ;;  %v4303_v8 = vld [vmem:[#allocation13_spill] sm:$0xff] }
 0x24d   :  { %v4302_v58 = vmax.f32 %v4301_v55, 0.0  ;;  %v4304_v26 = vmax.f32 %v4303_v8, 0.0  ;;  %v4305_v55 = vld [vmem:[#allocation14_spill] sm:$0xff] }
 0x24e   :  { %v4306_v8 = vmax.f32 %v4305_v55, 0.0 }
 0x24f   :  { %v1899_v22 = vpack.c.bf16 %v4304_v26, %v4302_v58  ;;  %v4307_v26 = vld [vmem:[#allocation4_spill] sm:$0xff] }
 0x250   :  { %v4308_v58 = vmax.f32 %v4307_v26, 0.0  ;;  %v4309_v26 = vld [vmem:[#allocation6_spill] sm:$0xff] }
 0x251   :  { %1900 = vst [vmem:[%s4066_s4] sm:$0xff] %v1899_v22  }
 0x252   :  { %v1904_v55 = vpack.c.bf16 %v4308_v58, %v4306_v8  ;;  %v4310_v8 = vmax.f32 %v4309_v26, 0.0  ;;  %v1914_v26 = vpack.c.bf16 %v1305_v34, %v1304_v38  ;;  %v1929_v34 = vpack.c.bf16 %v1311_v44, %v1310_v36 }
 0x253   :  { %v1934_v38 = vpack.c.bf16 %v1313_v51, %v1312_v62  ;;  %v1949_v36 = vpack.c.bf16 %v1319_v16, %v1318_v52  ;;  %v1954_v62 = vpack.c.bf16 %v1321_v39, %v1320_v56  ;;  %v1959_v44 = vpack.c.bf16 %v1323_v20, %v1322_v3 }
 0x254   :  { %v1909_v58 = vpack.c.bf16 %v1303_v9, %v4310_v8  ;;  %v1919_v8 = vpack.c.bf16 %v1307_v24, %v1306_v0  ;;  %v1924_v9 = vpack.c.bf16 %v1309_v14, %v1308_v46  ;;  %2056 = vst [vmem:[%s4066_s4 + $0x8] sm:$0xff] %v1904_v55   ;;  %2058 = vst [vmem:[%s4066_s4 + $0x18] sm:$0xff] %v1914_v26  }
 0x255   :  { %v1939_v0 = vpack.c.bf16 %v1315_v37, %v1314_v2  ;;  %v1944_v14 = vpack.c.bf16 %v1317_v10, %v1316_v19  ;;  %2061 = vst [vmem:[%s4066_s4 + $0x30] sm:$0xff] %v1929_v34   ;;  %2062 = vst [vmem:[%s4066_s4 + $0x38] sm:$0xff] %v1934_v38   ;;  %v1964_v24 = vpack.c.bf16 %v1325_v21, %v1324_v17 }
 0x256   :  { %2057 = vst [vmem:[%s4066_s4 + $0x10] sm:$0xff] %v1909_v58   ;;  %2059 = vst [vmem:[%s4066_s4 + $0x20] sm:$0xff] %v1919_v8   ;;  %v1969_v46 = vpack.c.bf16 %v1327_v35, %v1326_v29  ;;  %v1974_v51 = vpack.c.bf16 %v1329_v49, %v1328_v43  ;;  %v1979_v2 = vpack.c.bf16 %v1331_v63, %v1330_v57 }
 0x257   :  { %2060 = vst [vmem:[%s4066_s4 + $0x28] sm:$0xff] %v1924_v9   ;;  %2063 = vst [vmem:[%s4066_s4 + $0x40] sm:$0xff] %v1939_v0   ;;  %v1984_v37 = vpack.c.bf16 %v1333_v33, %v1332_v13  ;;  %v1989_v19 = vpack.c.bf16 %v1335_v53, %v1334_v45  ;;  %v1994_v10 = vpack.c.bf16 %v1337_v15, %v1336_v1 }
 0x258   :  { %2064 = vst [vmem:[%s4066_s4 + $0x48] sm:$0xff] %v1944_v14   ;;  %2065 = vst [vmem:[%s4066_s4 + $0x50] sm:$0xff] %v1949_v36   ;;  %v1999_v52 = vpack.c.bf16 %v1339_v25, %v1338_v7  ;;  %v2004_v16 = vpack.c.bf16 %v1341_v4, %v1340_v42  ;;  %v2009_v56 = vpack.c.bf16 %v1343_v32, %v1342_v60 }
 0x259   :  { %2066 = vst [vmem:[%s4066_s4 + $0x58] sm:$0xff] %v1954_v62   ;;  %2067 = vst [vmem:[%s4066_s4 + $0x60] sm:$0xff] %v1959_v44   ;;  %v2014_v39 = vpack.c.bf16 %v1345_v54, %v1344_v30  ;;  %v2019_v3 = vpack.c.bf16 %v1347_v5, %v1346_v28  ;;  %v2024_v20 = vpack.c.bf16 %v1349_v61, %v1348_v48 }
 0x25a   :  { %2068 = vst [vmem:[%s4066_s4 + $0x68] sm:$0xff] %v1964_v24   ;;  %2069 = vst [vmem:[%s4066_s4 + $0x70] sm:$0xff] %v1969_v46   ;;  %v2029_v17 = vpack.c.bf16 %v1351_v27, %v1350_v12  ;;  %v2034_v21 = vpack.c.bf16 %v1353_v18, %v1352_v41  ;;  %v2039_v29 = vpack.c.bf16 %v1355_v11, %v1354_v31 }
 0x25b   :  { %2070 = vst [vmem:[%s4066_s4 + $0x78] sm:$0xff] %v1974_v51   ;;  %2071 = vst [vmem:[%s4066_s4 + $0x80] sm:$0xff] %v1979_v2   ;;  %v2044_v35 = vpack.c.bf16 %v1357_v50, %v1356_v40  ;;  %v2049_v43 = vpack.c.bf16 %v1359_v59, %v1358_v47  ;;  %v2054_v49 = vpack.c.bf16 %v1361_v23, %v1360_v6 }
 0x25c   :  { %2072 = vst [vmem:[%s4066_s4 + $0x88] sm:$0xff] %v1984_v37   ;;  %2073 = vst [vmem:[%s4066_s4 + $0x90] sm:$0xff] %v1989_v19  }
 0x25d   :  { %2074 = vst [vmem:[%s4066_s4 + $0x98] sm:$0xff] %v1994_v10   ;;  %2075 = vst [vmem:[%s4066_s4 + $0xa0] sm:$0xff] %v1999_v52  }
 0x25e   :  { %2076 = vst [vmem:[%s4066_s4 + $0xa8] sm:$0xff] %v2004_v16   ;;  %2077 = vst [vmem:[%s4066_s4 + $0xb0] sm:$0xff] %v2009_v56  }
 0x25f   :  { %2078 = vst [vmem:[%s4066_s4 + $0xb8] sm:$0xff] %v2014_v39   ;;  %2079 = vst [vmem:[%s4066_s4 + $0xc0] sm:$0xff] %v2019_v3  }
 0x260   :  { %2080 = vst [vmem:[%s4066_s4 + $0xc8] sm:$0xff] %v2024_v20   ;;  %2081 = vst [vmem:[%s4066_s4 + $0xd0] sm:$0xff] %v2029_v17  }
 0x261   :  { %2082 = vst [vmem:[%s4066_s4 + $0xd8] sm:$0xff] %v2034_v21   ;;  %2083 = vst [vmem:[%s4066_s4 + $0xe0] sm:$0xff] %v2039_v29  }
 0x262   :  { %2084 = vst [vmem:[%s4066_s4 + $0xe8] sm:$0xff] %v2044_v35   ;;  %2085 = vst [vmem:[%s4066_s4 + $0xf0] sm:$0xff] %v2049_v43  }
 0x263   :  { %2086 = vst [vmem:[%s4066_s4 + $0xf8] sm:$0xff] %v2054_v49  }

// kernel: birdnet_forward.41
= control target key start
LH: loop header
LB: loop body
LE: loop exit
PB: predicated region body
PF: predicated region fallthrough
CT: control target
= control target key end

     0   :  { %s2197_s1 = inlined_call_operand.vmem [shape: bf16[640,128], index: 1, kind: input, shape index: {}]   ;;  %s2198_s0 = inlined_call_operand.vmem [shape: bf16[128,640], index: 0, kind: input, shape index: {}]   ;;  %s2199_s4 = inlined_call_operand.vmem [shape: bf16[128,128], index: 4, kind: input, shape index: {}]   ;;  %s2200_s2 = inlined_call_operand.vmem [shape: f32[1,128], index: 2, kind: input, shape index: {}]   ;;  %s2201_s3 = inlined_call_operand.vmem [shape: f32[1,128], index: 3, kind: input, shape index: {}]   ;;  %s2202_s5 = inlined_call_operand.vmem [shape: bf16[128,128], index: 5, kind: output, shape index: {}]  }
   0x1   :  { %v1571_v0 = vld [vmem:[%s2197_s1 + $0x40] sm:$0xff]   ;;  %v1575_v4 = vld [vmem:[%s2197_s1 + $0x48] sm:$0xff]   ;;  %v1579_v8 = vld [vmem:[%s2197_s1 + $0x50] sm:$0xff]  }
   0x2   :  { %v1572_v1 = vld [vmem:[%s2197_s1 + $0xc0] sm:$0xff]   ;;  %1379 = vmatprep.subr.bf16.mxu0 %v1571_v0  ;;  %v1576_v5 = vld [vmem:[%s2197_s1 + $0xc8] sm:$0xff]   ;;  %v1580_v9 = vld [vmem:[%s2197_s1 + $0xd0] sm:$0xff]  }
   0x3   :  { %v1573_v2 = vld [vmem:[%s2197_s1] sm:$0xff]   ;;  %1443 = vmatprep.subr.bf16.mxu1 %v1572_v1  ;;  %v1577_v6 = vld [vmem:[%s2197_s1 + $0x8] sm:$0xff]   ;;  %v1581_v10 = vld [vmem:[%s2197_s1 + $0x10] sm:$0xff]  }
   0x4   :  { %v1574_v3 = vld [vmem:[%s2197_s1 + $0x80] sm:$0xff]   ;;  %1380 = vmatpush3.bf16.msra.mxu0 %v1573_v2  ;;  %v1578_v7 = vld [vmem:[%s2197_s1 + $0x88] sm:$0xff]   ;;  %v1582_v11 = vld [vmem:[%s2197_s1 + $0x90] sm:$0xff]  }
   0x5   :  { %1444 = vmatpush3.bf16.msra.mxu1 %v1574_v3  ;;  %1381 = vmatprep.subr.bf16.mxu0 %v1575_v4  ;;  %v1583_v12 = vld [vmem:[%s2197_s1 + $0x58] sm:$0xff]   ;;  %v1587_v16 = vld [vmem:[%s2197_s1 + $0x60] sm:$0xff]   ;;  %v1591_v20 = vld [vmem:[%s2197_s1 + $0x68] sm:$0xff]  }
   0x6   :  { %1445 = vmatprep.subr.bf16.mxu1 %v1576_v5  ;;  %v1584_v13 = vld [vmem:[%s2197_s1 + $0xd8] sm:$0xff]   ;;  %v1588_v17 = vld [vmem:[%s2197_s1 + $0xe0] sm:$0xff]   ;;  %v1592_v21 = vld [vmem:[%s2197_s1 + $0xe8] sm:$0xff]  }
   0x7   :  { %v1585_v14 = vld [vmem:[%s2197_s1 + $0x18] sm:$0xff]   ;;  %v1589_v18 = vld [vmem:[%s2197_s1 + $0x20] sm:$0xff]   ;;  %v1593_v22 = vld [vmem:[%s2197_s1 + $0x28] sm:$0xff]  }
   0x8   :  { %1382 = vmatpush3.bf16.msra.mxu0 %v1577_v6  ;;  %v1586_v15 = vld [vmem:[%s2197_s1 + $0x98] sm:$0xff]   ;;  %v1590_v19 = vld [vmem:[%s2197_s1 + $0xa0] sm:$0xff]   ;;  %v1594_v23 = vld [vmem:[%s2197_s1 + $0xa8] sm:$0xff]  }
   0x9   :  { %1446 = vmatpush3.bf16.msra.mxu1 %v1578_v7  ;;  %1383 = vmatprep.subr.bf16.mxu0 %v1579_v8  ;;  %v1595_v24 = vld [vmem:[%s2197_s1 + $0x70] sm:$0xff]   ;;  %v1599_v28 = vld [vmem:[%s2197_s1 + $0x78] sm:$0xff]   ;;  %v1608_v35 = vld [vmem:[%s2198_s0 + $0xc] ss:$20 sps:$4 sm:$0xff]  }
   0xa   :  { %1447 = vmatprep.subr.bf16.mxu1 %v1580_v9  ;;  %v1596_v25 = vld [vmem:[%s2197_s1 + $0xf0] sm:$0xff]   ;;  %v1600_v29 = vld [vmem:[%s2197_s1 + $0xf8] sm:$0xff]   ;;  %v1609_v36 = vld [vmem:[%s2197_s1 + $0x100] sm:$0xff]   ;;  %726 = vmatprep.mubr.bf16.mxu1 %v1608_v35 }
   0xb   :  { %v1597_v26 = vld [vmem:[%s2197_s1 + $0x30] sm:$0xff]   ;;  %v1601_v30 = vld [vmem:[%s2197_s1 + $0x38] sm:$0xff]   ;;  %v1610_v37 = vld [vmem:[%s2198_s0 + $0x2c] ss:$20 sps:$4 sm:$0xff]  }
   0xc   :  { %1384 = vmatpush3.bf16.msra.mxu0 %v1581_v10  ;;  %v1598_v27 = vld [vmem:[%s2197_s1 + $0xb0] sm:$0xff]   ;;  %v1602_v31 = vld [vmem:[%s2197_s1 + $0xb8] sm:$0xff]   ;;  %v1616_v39 = vld [vmem:[%s2197_s1 + $0x108] sm:$0xff]  }
   0xd   :  { %1448 = vmatpush3.bf16.msra.mxu1 %v1582_v11  ;;  %1385 = vmatprep.subr.bf16.mxu0 %v1583_v12  ;;  %v1603_v32 = vld [vmem:[%s2198_s0] ss:$20 sps:$4 sm:$0xff]   ;;  %v1605_v33 = vld [vmem:[%s2198_s0 + $0x4] ss:$20 sps:$4 sm:$0xff]   ;;  %v1606_v34 = vld [vmem:[%s2198_s0 + $0x8] ss:$20 sps:$4 sm:$0xff]  }
   0xe   :  { %1449 = vmatprep.subr.bf16.mxu1 %v1584_v13  ;;  %629 = vmatprep.mubr.bf16.mxu0 %v1605_v33  ;;  %v1612_v38 = vld [vmem:[%s2198_s0 + $0x34] ss:$20 sps:$4 sm:$0xff]   ;;  %v1615_v41 = vld [vmem:[%s2198_s0 + $0x30] ss:$20 sps:$4 sm:$0xff]   ;;  %v1630_v45 = vld [vmem:[%s2197_s1 + $0x118] sm:$0xff]  }
   0xf   :  { %v1614_v40 = vld [vmem:[%s2198_s0 + $0x28] ss:$20 sps:$4 sm:$0xff]   ;;  %v1623_v44 = vld [vmem:[%s2197_s1 + $0x110] sm:$0xff]   ;;  %v1622_v47 = vld [vmem:[%s2198_s0 + $0x58] ss:$20 sps:$4 sm:$0xff]  }
  0x10   :  { %1386 = vmatpush3.bf16.msra.mxu0 %v1585_v14  ;;  %v1617_v42 = vld [vmem:[%s2198_s0 + $0x54] ss:$20 sps:$4 sm:$0xff]   ;;  %v1619_v43 = vld [vmem:[%s2198_s0 + $0x5c] ss:$20 sps:$4 sm:$0xff]   ;;  %v1626_v49 = vld [vmem:[%s2198_s0 + $0x84] ss:$20 sps:$4 sm:$0xff]  }
  0x11   :  { %1450 = vmatpush3.bf16.msra.mxu1 %v1586_v15  ;;  %1387 = vmatprep.subr.bf16.mxu0 %v1587_v16  ;;  %v1621_v46 = vld [vmem:[%s2198_s0 + $0x50] ss:$20 sps:$4 sm:$0xff]   ;;  %v1644_v51 = vld [vmem:[%s2197_s1 + $0x128] sm:$0xff]   ;;  %v1629_v53 = vld [vmem:[%s2198_s0 + $0x80] ss:$20 sps:$4 sm:$0xff]  }
  0x12   :  { %1451 = vmatprep.subr.bf16.mxu1 %v1588_v17  ;;  %v1624_v48 = vld [vmem:[%s2198_s0 + $0x7c] ss:$20 sps:$4 sm:$0xff]   ;;  %v1637_v50 = vld [vmem:[%s2197_s1 + $0x120] sm:$0xff]   ;;  %v1628_v52 = vld [vmem:[%s2198_s0 + $0x78] ss:$20 sps:$4 sm:$0xff]  }
  0x13   :  { %v1631_v54 = vld [vmem:[%s2198_s0 + $0xa4] ss:$20 sps:$4 sm:$0xff]   ;;  %v1651_v55 = vld [vmem:[%s2197_s1 + $0x130] sm:$0xff]   ;;  %v1633_v56 = vld [vmem:[%s2198_s0 + $0xac] ss:$20 sps:$4 sm:$0xff]  }
  0x14   :  { %1388 = vmatpush3.bf16.msra.mxu0 %v1589_v18  ;;  %v1658_v57 = vld [vmem:[%s2197_s1 + $0x138] sm:$0xff]   ;;  %v1635_v58 = vld [vmem:[%s2198_s0 + $0xa0] ss:$20 sps:$4 sm:$0xff]   ;;  %v1643_v63 = vld [vmem:[%s2198_s0 + $0xd0] ss:$20 sps:$4 sm:$0xff]  }
  0x15   :  { %1452 = vmatpush3.bf16.msra.mxu1 %v1590_v19  ;;  %1389 = vmatprep.subr.bf16.mxu0 %v1591_v20  ;;  %v1636_v59 = vld [vmem:[%s2198_s0 + $0xa8] ss:$20 sps:$4 sm:$0xff]   ;;  %v1638_v60 = vld [vmem:[%s2198_s0 + $0xcc] ss:$20 sps:$4 sm:$0xff]   ;;  %v1649_v2 = vld [vmem:[%s2198_s0 + $0xf0] ss:$20 sps:$4 sm:$0xff]  }
  0x16   :  { %1453 = vmatprep.subr.bf16.mxu1 %v1592_v21  ;;  %v1640_v61 = vld [vmem:[%s2198_s0 + $0xd4] ss:$20 sps:$4 sm:$0xff]   ;;  %v1647_v1 = vld [vmem:[%s2198_s0 + $0xfc] ss:$20 sps:$4 sm:$0xff]   ;;  %v1650_v3 = vld [vmem:[%s2198_s0 + $0xf8] ss:$20 sps:$4 sm:$0xff]  }
  0x17   :  { %v1642_v62 = vld [vmem:[%s2198_s0 + $0xc8] ss:$20 sps:$4 sm:$0xff]   ;;  %v1654_v5 = vld [vmem:[%s2198_s0 + $0x124] ss:$20 sps:$4 sm:$0xff]   ;;  %v1657_v7 = vld [vmem:[%s2198_s0 + $0x120] ss:$20 sps:$4 sm:$0xff]  }
  0x18   :  { %1390 = vmatpush3.bf16.msra.mxu0 %v1593_v22  ;;  %v1645_v0 = vld [vmem:[%s2198_s0 + $0xf4] ss:$20 sps:$4 sm:$0xff]   ;;  %v1652_v4 = vld [vmem:[%s2198_s0 + $0x11c] ss:$20 sps:$4 sm:$0xff]   ;;  %v1656_v6 = vld [vmem:[%s2198_s0 + $0x118] ss:$20 sps:$4 sm:$0xff]  }
  0x19   :  { %1454 = vmatpush3.bf16.msra.mxu1 %v1594_v23  ;;  %1391 = vmatprep.subr.bf16.mxu0 %v1595_v24  ;;  %v1659_v8 = vld [vmem:[%s2198_s0 + $0x10] ss:$20 sps:$4 sm:$0xff]   ;;  %v1661_v10 = vld [vmem:[%s2198_s0 + $0x38] ss:$20 sps:$4 sm:$0xff]   ;;  %v1663_v12 = vld [vmem:[%s2198_s0 + $0x60] ss:$20 sps:$4 sm:$0xff]  }
  0x1a   :  { %1455 = vmatprep.subr.bf16.mxu1 %v1596_v25  ;;  %v1660_v9 = vld [vmem:[%s2198_s0 + $0xb0] ss:$20 sps:$4 sm:$0xff]   ;;  %v1662_v11 = vld [vmem:[%s2198_s0 + $0xd8] ss:$20 sps:$4 sm:$0xff]   ;;  %v1664_v13 = vld [vmem:[%s2198_s0 + $0x100] ss:$20 sps:$4 sm:$0xff]  }
  0x1b   :  { %v1665_v14 = vld [vmem:[%s2198_s0 + $0x88] ss:$20 sps:$4 sm:$0xff]  }
  0x1c   :  { %1392 = vmatpush3.bf16.msra.mxu0 %v1597_v26  ;;  %v1666_v15 = vld [vmem:[%s2198_s0 + $0x128] ss:$20 sps:$4 sm:$0xff]  }
  0x1d   :  { %1456 = vmatpush3.bf16.msra.mxu1 %v1598_v27  ;;  %1393 = vmatprep.subr.bf16.mxu0 %v1599_v28 }
  0x1e   :  { %1457 = vmatprep.subr.bf16.mxu1 %v1600_v29 }
  0x20   :  { %1394 = vmatpush3.bf16.msra.mxu0 %v1601_v30 }
  0x21   :  { %1458 = vmatpush3.bf16.msra.mxu1 %v1602_v31  ;;  %1523 = vmatprep.subr.bf16.mxu0 %v1609_v36 }
  0x22   :  { %1555 = vmatprep.subr.bf16.mxu1 %v1609_v36 }
  0x23   :  { %630 = vmatmul.mubr.bf16.vlgmr.msra.gmra.mrb[0].mxu0 %v1603_v32 }
  0x24   :  { %727 = vmatmul.mubr.bf16.vlgmr.msra.gmra.mrb[0].mxu1 %v1606_v34  ;;  %1524 = vmatpush3.bf16.msra.mxu0 %v1609_v36 }
  0x25   :  { %637 = vmatprep.mubr.bf16.mxu0 %v1610_v37  ;;  %734 = vmatprep.mubr.bf16.mxu1 %v1612_v38 }
  0x26   :  { %1563 = vmatpush3.bf16.msra.mxu1 %v1609_v36  ;;  %1525 = vmatprep.subr.bf16.mxu0 %v1616_v39 }
  0x27   :  { %1556 = vmatprep.subr.bf16.mxu1 %v1616_v39 }
  0x28   :  { %1526 = vmatpush3.bf16.msra.mxu0 %v1616_v39 }
  0x29   :  { %1527 = vmatprep.subr.bf16.mxu0 %v1623_v44 }
  0x2a   :  { %1564 = vmatpush3.bf16.msra.mxu1 %v1616_v39 }
  0x2b   :  { %638 = vmatmul.mubr.bf16.gmra.mrb[4].mxu0 %v1614_v40  ;;  %1557 = vmatprep.subr.bf16.mxu1 %v1623_v44 }
  0x2c   :  { %735 = vmatmul.mubr.bf16.gmra.mrb[4].mxu1 %v1615_v41  ;;  %645 = vmatprep.mubr.bf16.mxu0 %v1617_v42 }
  0x2d   :  { %742 = vmatprep.mubr.bf16.mxu1 %v1619_v43  ;;  %1528 = vmatpush3.bf16.msra.mxu0 %v1623_v44 }
  0x2e   :  { %1529 = vmatprep.subr.bf16.mxu0 %v1630_v45  ;;  %1565 = vmatpush3.bf16.msra.mxu1 %v1623_v44 }
  0x2f   :  { %1558 = vmatprep.subr.bf16.mxu1 %v1630_v45 }
  0x31   :  { %1530 = vmatpush3.bf16.msra.mxu0 %v1630_v45 }
  0x32   :  { %1531 = vmatprep.subr.bf16.mxu0 %v1637_v50  ;;  %1566 = vmatpush3.bf16.msra.mxu1 %v1630_v45 }
  0x33   :  { %646 = vmatmul.mubr.bf16.gmra.mrb[8].mxu0 %v1621_v46  ;;  %1559 = vmatprep.subr.bf16.mxu1 %v1637_v50 }
  0x34   :  { %743 = vmatmul.mubr.bf16.gmra.mrb[8].mxu1 %v1622_v47  ;;  %653 = vmatprep.mubr.bf16.mxu0 %v1624_v48 }
  0x35   :  { %750 = vmatprep.mubr.bf16.mxu1 %v1626_v49  ;;  %1532 = vmatpush3.bf16.msra.mxu0 %v1637_v50 }
  0x36   :  { %1533 = vmatprep.subr.bf16.mxu0 %v1644_v51  ;;  %1567 = vmatpush3.bf16.msra.mxu1 %v1637_v50 }
  0x37   :  { %1560 = vmatprep.subr.bf16.mxu1 %v1644_v51 }
  0x39   :  { %1534 = vmatpush3.bf16.msra.mxu0 %v1644_v51 }
  0x3a   :  { %1535 = vmatprep.subr.bf16.mxu0 %v1651_v55  ;;  %1568 = vmatpush3.bf16.msra.mxu1 %v1644_v51 }
  0x3b   :  { %654 = vmatmul.mubr.bf16.gmra.mrb[12].mxu0 %v1628_v52  ;;  %1561 = vmatprep.subr.bf16.mxu1 %v1651_v55 }
  0x3c   :  { %751 = vmatmul.mubr.bf16.gmra.mrb[12].mxu1 %v1629_v53  ;;  %661 = vmatprep.mubr.bf16.mxu0 %v1631_v54 }
  0x3d   :  { %758 = vmatprep.mubr.bf16.mxu1 %v1633_v56  ;;  %1536 = vmatpush3.bf16.msra.mxu0 %v1651_v55 }
  0x3e   :  { %1537 = vmatprep.subr.bf16.mxu0 %v1658_v57  ;;  %1569 = vmatpush3.bf16.msra.mxu1 %v1651_v55 }
  0x3f   :  { %1562 = vmatprep.subr.bf16.mxu1 %v1658_v57 }
  0x41   :  { %1538 = vmatpush3.bf16.msra.mxu0 %v1658_v57 }
  0x42   :  { %1570 = vmatpush3.bf16.msra.mxu1 %v1658_v57 }
  0x43   :  { %662 = vmatmul.mubr.bf16.gmra.mrb[16].mxu0 %v1635_v58 }
  0x44   :  { %759 = vmatmul.mubr.bf16.gmra.mrb[16].mxu1 %v1636_v59  ;;  %669 = vmatprep.mubr.bf16.mxu0 %v1638_v60 }
  0x45   :  { %766 = vmatprep.mubr.bf16.mxu1 %v1640_v61 }
  0x4b   :  { %670 = vmatmul.mubr.bf16.gmra.mrb[20].mxu0 %v1642_v62 }
  0x4c   :  { %767 = vmatmul.mubr.bf16.gmra.mrb[20].mxu1 %v1643_v63  ;;  %677 = vmatprep.mubr.bf16.mxu0 %v1645_v0 }
  0x4d   :  { %774 = vmatprep.mubr.bf16.mxu1 %v1647_v1 }
  0x53   :  { %678 = vmatmul.mubr.bf16.gmra.mrb[24].mxu0 %v1649_v2 }
  0x54   :  { %775 = vmatmul.mubr.bf16.gmra.mrb[24].mxu1 %v1650_v3  ;;  %685 = vmatprep.mubr.bf16.mxu0 %v1652_v4 }
  0x55   :  { %782 = vmatprep.mubr.bf16.mxu1 %v1654_v5 }
  0x5b   :  { %686 = vmatmul.mubr.bf16.gmra.mrb[28].mxu0 %v1656_v6 }
  0x5c   :  { %783 = vmatmul.mubr.bf16.gmra.mrb[28].mxu1 %v1657_v7  ;;  %1539 = vmatprep.mubr.bf16.mxu0 %v1659_v8 }
  0x5d   :  { %1547 = vmatprep.mubr.bf16.mxu1 %v1660_v9 }
  0x63   :  { %1540 = vmatmul.mubr.bf16.vlgmr.msra.gmra.mrb[32].mxu0 %v1661_v10 }
  0x64   :  { %1548 = vmatmul.mubr.bf16.vlgmr.msra.gmra.mrb[32].mxu1 %v1662_v11  ;;  %1543 = vmatprep.mubr.bf16.mxu0 %v1663_v12 }
  0x65   :  { %1551 = vmatprep.mubr.bf16.mxu1 %v1664_v13 }
  0x6b   :  { %1544 = vmatmul.mubr.bf16.gmra.mrb[36].mxu0 %v1665_v14 }
  0x6c   :  { %1552 = vmatmul.mubr.bf16.gmra.mrb[36].mxu1 %v1666_v15 }
  0xf6   :  { %v1395_v16 = vpop.f32.mrb[0].mxu0 }
  0xf7   :  { %v1459_v17 = vpop.f32.mrb[0].mxu1  ;;  %v1396_v18 = vpop.f32.mrb[1].mxu0 }
  0xf8   :  { %v1397_v19 = vadd.f32 %v1396_v18, %v1395_v16  ;;  %v1460_v20 = vpop.f32.mrb[1].mxu1  ;;  %v1398_v21 = vpop.f32.mrb[2].mxu0 }
  0xf9   :  { %v1461_v22 = vadd.f32 %v1460_v20, %v1459_v17  ;;  %v1462_v23 = vpop.f32.mrb[2].mxu1  ;;  %v1399_v24 = vpop.f32.mrb[3].mxu0 }
  0xfa   :  { %v1400_v25 = vadd.f32 %v1399_v24, %v1398_v21  ;;  %v1463_v26 = vpop.f32.mrb[3].mxu1 }
  0xfb   :  { %v1464_v27 = vadd.f32 %v1463_v26, %v1462_v23  ;;  %v1939_v28 = vadd.f32 %v1461_v22, %v1397_v19 }
  0xfd   :  { %v1941_v29 = vadd.f32 %v1464_v27, %v1400_v25 }
  0xfe   :  { %v1401_v30 = vpop.f32.mrb[4].mxu0 }
  0xff   :  { %v1465_v31 = vpop.f32.mrb[4].mxu1  ;;  %v1402_v32 = vpop.f32.mrb[5].mxu0 }
 0x100   :  { %v1403_v33 = vadd.f32 %v1402_v32, %v1401_v30  ;;  %v1466_v34 = vpop.f32.mrb[5].mxu1  ;;  %v1404_v35 = vpop.f32.mrb[6].mxu0 }
 0x101   :  { %v1467_v36 = vadd.f32 %v1466_v34, %v1465_v31  ;;  %v1468_v37 = vpop.f32.mrb[6].mxu1  ;;  %v1405_v38 = vpop.f32.mrb[7].mxu0 }
 0x102   :  { %v1406_v39 = vadd.f32 %v1405_v38, %v1404_v35  ;;  %v1469_v40 = vpop.f32.mrb[7].mxu1 }
 0x103   :  { %v1470_v41 = vadd.f32 %v1469_v40, %v1468_v37  ;;  %v1943_v42 = vadd.f32 %v1467_v36, %v1403_v33 }
 0x105   :  { %v1945_v43 = vadd.f32 %v1470_v41, %v1406_v39 }
 0x106   :  { %v1407_v44 = vpop.f32.mrb[8].mxu0 }
 0x107   :  { %v1471_v45 = vpop.f32.mrb[8].mxu1  ;;  %v1408_v46 = vpop.f32.mrb[9].mxu0 }
 0x108   :  { %v1409_v47 = vadd.f32 %v1408_v46, %v1407_v44  ;;  %v1472_v48 = vpop.f32.mrb[9].mxu1  ;;  %v1410_v49 = vpop.f32.mrb[10].mxu0 }
 0x109   :  { %v1473_v50 = vadd.f32 %v1472_v48, %v1471_v45  ;;  %v1474_v51 = vpop.f32.mrb[10].mxu1  ;;  %v1411_v52 = vpop.f32.mrb[11].mxu0 }
 0x10a   :  { %v1412_v53 = vadd.f32 %v1411_v52, %v1410_v49  ;;  %v1475_v54 = vpop.f32.mrb[11].mxu1 }
 0x10b   :  { %v1476_v55 = vadd.f32 %v1475_v54, %v1474_v51  ;;  %v1947_v56 = vadd.f32 %v1473_v50, %v1409_v47 }
 0x10d   :  { %v1949_v57 = vadd.f32 %v1476_v55, %v1412_v53 }
 0x10e   :  { %v1413_v58 = vpop.f32.mrb[12].mxu0 }
 0x10f   :  { %v1477_v59 = vpop.f32.mrb[12].mxu1  ;;  %v1414_v60 = vpop.f32.mrb[13].mxu0 }
 0x110   :  { %v1415_v61 = vadd.f32 %v1414_v60, %v1413_v58  ;;  %v1478_v62 = vpop.f32.mrb[13].mxu1  ;;  %v1416_v63 = vpop.f32.mrb[14].mxu0 }
 0x111   :  { %v1479_v0 = vadd.f32 %v1478_v62, %v1477_v59  ;;  %v1480_v1 = vpop.f32.mrb[14].mxu1  ;;  %v1417_v2 = vpop.f32.mrb[15].mxu0 }
 0x112   :  { %v1418_v3 = vadd.f32 %v1417_v2, %v1416_v63  ;;  %v1481_v4 = vpop.f32.mrb[15].mxu1 }
 0x113   :  { %v1482_v5 = vadd.f32 %v1481_v4, %v1480_v1  ;;  %v1951_v6 = vadd.f32 %v1479_v0, %v1415_v61 }
 0x115   :  { %v1953_v7 = vadd.f32 %v1482_v5, %v1418_v3 }
 0x116   :  { %v1419_v8 = vpop.f32.mrb[16].mxu0 }
 0x117   :  { %v1483_v9 = vpop.f32.mrb[16].mxu1  ;;  %v1420_v10 = vpop.f32.mrb[17].mxu0 }
 0x118   :  { %v1421_v11 = vadd.f32 %v1420_v10, %v1419_v8  ;;  %v1484_v12 = vpop.f32.mrb[17].mxu1  ;;  %v1422_v13 = vpop.f32.mrb[18].mxu0 }
 0x119   :  { %v1485_v14 = vadd.f32 %v1484_v12, %v1483_v9  ;;  %v1486_v15 = vpop.f32.mrb[18].mxu1  ;;  %v1423_v16 = vpop.f32.mrb[19].mxu0 }
 0x11a   :  { %v1424_v17 = vadd.f32 %v1423_v16, %v1422_v13  ;;  %v1487_v18 = vpop.f32.mrb[19].mxu1 }
 0x11b   :  { %v1488_v19 = vadd.f32 %v1487_v18, %v1486_v15  ;;  %v761_v20 = vadd.f32 %v1485_v14, %v1421_v11 }
 0x11d   :  { %v764_v21 = vadd.f32 %v1488_v19, %v1424_v17 }
 0x11e   :  { %v1425_v22 = vpop.f32.mrb[20].mxu0 }
 0x11f   :  { %v1489_v23 = vpop.f32.mrb[20].mxu1  ;;  %v1426_v24 = vpop.f32.mrb[21].mxu0 }
 0x120   :  { %v1427_v25 = vadd.f32 %v1426_v24, %v1425_v22  ;;  %v1490_v26 = vpop.f32.mrb[21].mxu1  ;;  %v1428_v27 = vpop.f32.mrb[22].mxu0 }
 0x121   :  { %v1491_v30 = vadd.f32 %v1490_v26, %v1489_v23  ;;  %v1492_v31 = vpop.f32.mrb[22].mxu1  ;;  %v1429_v32 = vpop.f32.mrb[23].mxu0 }
 0x122   :  { %v1430_v33 = vadd.f32 %v1429_v32, %v1428_v27  ;;  %v1493_v34 = vpop.f32.mrb[23].mxu1 }
 0x123   :  { %v1494_v35 = vadd.f32 %v1493_v34, %v1492_v31  ;;  %v769_v36 = vadd.f32 %v1491_v30, %v1427_v25 }
 0x125   :  { %v772_v37 = vadd.f32 %v1494_v35, %v1430_v33 }
 0x126   :  { %v1431_v38 = vpop.f32.mrb[24].mxu0 }
 0x127   :  { %v1495_v39 = vpop.f32.mrb[24].mxu1  ;;  %v1432_v40 = vpop.f32.mrb[25].mxu0 }
 0x128   :  { %v1433_v41 = vadd.f32 %v1432_v40, %v1431_v38  ;;  %v1496_v44 = vpop.f32.mrb[25].mxu1  ;;  %v1434_v45 = vpop.f32.mrb[26].mxu0 }
 0x129   :  { %v1497_v46 = vadd.f32 %v1496_v44, %v1495_v39  ;;  %v1498_v47 = vpop.f32.mrb[26].mxu1  ;;  %v1435_v48 = vpop.f32.mrb[27].mxu0 }
 0x12a   :  { %v1436_v49 = vadd.f32 %v1435_v48, %v1434_v45  ;;  %v1499_v50 = vpop.f32.mrb[27].mxu1 }
 0x12b   :  { %v1500_v51 = vadd.f32 %v1499_v50, %v1498_v47  ;;  %v777_v52 = vadd.f32 %v1497_v46, %v1433_v41 }
 0x12d   :  { %v780_v53 = vadd.f32 %v1500_v51, %v1436_v49 }
 0x12e   :  { %v1437_v54 = vpop.f32.mrb[28].mxu0 }
 0x12f   :  { %v1501_v55 = vpop.f32.mrb[28].mxu1  ;;  %v1438_v58 = vpop.f32.mrb[29].mxu0 }
 0x130   :  { %v1439_v59 = vadd.f32 %v1438_v58, %v1437_v54  ;;  %v1502_v60 = vpop.f32.mrb[29].mxu1  ;;  %v1440_v61 = vpop.f32.mrb[30].mxu0 }
 0x131   :  { %v1503_v62 = vadd.f32 %v1502_v60, %v1501_v55  ;;  %v1504_v63 = vpop.f32.mrb[30].mxu1  ;;  %v1441_v0 = vpop.f32.mrb[31].mxu0 }
 0x132   :  { %v1442_v1 = vadd.f32 %v1441_v0, %v1440_v61  ;;  %v1505_v2 = vpop.f32.mrb[31].mxu1 }
 0x133   :  { %v1506_v3 = vadd.f32 %v1505_v2, %v1504_v63  ;;  %v785_v4 = vadd.f32 %v1503_v62, %v1439_v59 }
 0x135   :  { %v788_v5 = vadd.f32 %v1506_v3, %v1442_v1 }
 0x136   :  { %v1541_v8 = vpop.f32.mrb[32].mxu0 }
 0x137   :  { %v1956_v9 = vadd.f32 %v1541_v8, %v1943_v42  ;;  %v1549_v10 = vpop.f32.mrb[32].mxu1  ;;  %v825_v11 = vpop.f32.mrb[33].mxu0 }
 0x138   :  { %v1958_v12 = vadd.f32 %v1549_v10, %v769_v36  ;;  %v1961_v13 = vadd.f32 %v825_v11, %v1939_v28  ;;  %v857_v14 = vpop.f32.mrb[33].mxu1  ;;  %v1542_v15 = vpop.f32.mrb[34].mxu0 }
 0x139   :  { %v1963_v16 = vadd.f32 %v857_v14, %v761_v20  ;;  %v1966_v17 = vadd.f32 %v1542_v15, %v1945_v43  ;;  %v1550_v18 = vpop.f32.mrb[34].mxu1  ;;  %v828_v19 = vpop.f32.mrb[35].mxu0  ;;  %v912_v25 = vmul.f32 %v1956_v9, %v1956_v9 }
 0x13a   :  { %v1968_v22 = vadd.f32 %v1550_v18, %v772_v37  ;;  %v1971_v42 = vadd.f32 %v828_v19, %v1941_v29  ;;  %v860_v23 = vpop.f32.mrb[35].mxu1  ;;  %v910_v28 = vmul.f32 %v1961_v13, %v1961_v13  ;;  %v920_v1 = vmul.f32 %v1958_v12, %v1958_v12 }
 0x13b   :  { %v1973_v24 = vadd.f32 %v860_v23, %v764_v21  ;;  %v913_v21 = vmul.f32 %v1966_v17, %v1966_v17 }
 0x13c   :  { %v888_v20 = vadd.f32 %v1971_v42, %v1961_v13  ;;  %v911_v43 = vmul.f32 %v1971_v42, %v1971_v42 }
 0x13d   :  { %v919_v62 = vmul.f32 %v1973_v24, %v1973_v24 }
 0x13e   :  { %v889_v26 = vadd.f32 %v888_v20, %v1956_v9  ;;  %v926_v27 = vadd.f32 %v911_v43, %v910_v28  ;;  %v1545_v29 = vpop.f32.mrb[36].mxu0 }
 0x13f   :  { %v1987_v30 = vadd.f32 %v1545_v29, %v1951_v6  ;;  %v1553_v31 = vpop.f32.mrb[36].mxu1  ;;  %v841_v32 = vpop.f32.mrb[37].mxu0 }
 0x140   :  { %v927_v33 = vadd.f32 %v926_v27, %v912_v25  ;;  %v1989_v34 = vadd.f32 %v1553_v31, %v785_v4  ;;  %v1992_v35 = vadd.f32 %v841_v32, %v1947_v56  ;;  %v890_v36 = vadd.f32 %v889_v26, %v1966_v17  ;;  %v873_v37 = vpop.f32.mrb[37].mxu1  ;;  %v1546_v38 = vpop.f32.mrb[38].mxu0 }
 0x141   :  { %v1995_v39 = vadd.f32 %v873_v37, %v777_v52  ;;  %v1998_v40 = vadd.f32 %v1546_v38, %v1953_v7  ;;  %v1554_v41 = vpop.f32.mrb[38].mxu1  ;;  %v844_v6 = vpop.f32.mrb[39].mxu0  ;;  %v916_v52 = vmul.f32 %v1987_v30, %v1987_v30  ;;  %v921_v4 = vmul.f32 %v1968_v22, %v1968_v22 }
 0x142   :  { %v891_v44 = vadd.f32 %v890_v36, %v1992_v35  ;;  %v914_v45 = vmul.f32 %v1992_v35, %v1992_v35  ;;  %v928_v46 = vadd.f32 %v927_v33, %v913_v21  ;;  %v876_v47 = vpop.f32.mrb[39].mxu1  ;;  %v2003_v56 = vadd.f32 %v1554_v41, %v788_v5 }
 0x143   :  { %v2006_v48 = vadd.f32 %v844_v6, %v1949_v57  ;;  %v2008_v50 = vadd.f32 %v876_v47, %v780_v53  ;;  %v917_v58 = vmul.f32 %v1998_v40, %v1998_v40  ;;  %v918_v53 = vmul.f32 %v1963_v16, %v1963_v16 }
 0x144   :  { %v929_v49 = vadd.f32 %v928_v46, %v914_v45  ;;  %v922_v10 = vmul.f32 %v1995_v39, %v1995_v39  ;;  %v924_v23 = vmul.f32 %v1989_v34, %v1989_v34  ;;  %v925_v43 = vmul.f32 %v2003_v56, %v2003_v56 }
 0x145   :  { %v892_v7 = vadd.f32 %v891_v44, %v2006_v48  ;;  %v915_v51 = vmul.f32 %v2006_v48, %v2006_v48  ;;  %v923_v18 = vmul.f32 %v2008_v50, %v2008_v50 }
 0x147   :  { %v893_v54 = vadd.f32 %v892_v7, %v1987_v30  ;;  %v930_v55 = vadd.f32 %v929_v49, %v915_v51 }
 0x149   :  { %v894_v57 = vadd.f32 %v893_v54, %v1998_v40  ;;  %v931_v59 = vadd.f32 %v930_v55, %v916_v52 }
 0x14b   :  { %v895_v60 = vadd.f32 %v894_v57, %v1963_v16  ;;  %v932_v61 = vadd.f32 %v931_v59, %v917_v58 }
 0x14d   :  { %v933_v63 = vadd.f32 %v932_v61, %v918_v53  ;;  %v896_v0 = vadd.f32 %v895_v60, %v1973_v24 }
 0x14f   :  { %v897_v2 = vadd.f32 %v896_v0, %v1958_v12  ;;  %v934_v3 = vadd.f32 %v933_v63, %v919_v62  ;;  %v2116_v0 = vld [vmem:[%s2199_s4 + $0x30] sm:$0xff]  }
 0x151   :  { %v898_v5 = vadd.f32 %v897_v2, %v1968_v22  ;;  %v935_v8 = vadd.f32 %v934_v3, %v920_v1  ;;  %v2121_v1 = vld [vmem:[%s2199_s4 + $0x38] sm:$0xff]  }
 0x153   :  { %v899_v11 = vadd.f32 %v898_v5, %v1995_v39  ;;  %v936_v14 = vadd.f32 %v935_v8, %v921_v4 }
 0x155   :  { %v900_v15 = vadd.f32 %v899_v11, %v2008_v50  ;;  %v937_v19 = vadd.f32 %v936_v14, %v922_v10 }
 0x157   :  { %v901_v28 = vadd.f32 %v900_v15, %v1989_v34  ;;  %v938_v20 = vadd.f32 %v937_v19, %v923_v18  ;;  %v1319_v18 = vunpack.c.l.bf16 %v2116_v0  ;;  %v1320_v19 = vunpack.c.h.bf16 %v2116_v0 }
 0x159   :  { %v902_v25 = vadd.f32 %v901_v28, %v2003_v56  ;;  %v939_v26 = vadd.f32 %v938_v20, %v924_v23  ;;  %v1323_v23 = vunpack.c.l.bf16 %v2121_v1  ;;  %v1324_v28 = vunpack.c.h.bf16 %v2121_v1 }
 0x15b   :  { %v903_v27 = vrot.slane %v902_v25, 4  ;;  %v940_v29 = vadd.f32 %v939_v26, %v925_v43 }
 0x15d   :  { %v904_v21 = vadd.f32 %v903_v27, %v902_v25  ;;  %v941_v31 = vrot.slane %v940_v29, 4 }
 0x15f   :  { %v905_v32 = vrot.slane %v904_v21, 2  ;;  %v942_v33 = vadd.f32 %v941_v31, %v940_v29 }
 0x161   :  { %v906_v36 = vadd.f32 %v905_v32, %v904_v21  ;;  %v943_v37 = vrot.slane %v942_v33, 2  ;;  %v1259_v32 = vld [vmem:[%s2200_s2] ss:$0 sm:$0xff] }
 0x163   :  { %v907_v38 = vrot.slane %v906_v36, 1  ;;  %v944_v41 = vadd.f32 %v943_v37, %v942_v33 }
 0x165   :  { %v908_v6 = vadd.f32 %v907_v38, %v906_v36  ;;  %v945_v44 = vrot.slane %v944_v41, 1 }
 0x167   :  { %v2043_v45 = vmul.f32 0.0078125, %v908_v6  ;;  %v946_v46 = vadd.f32 %v945_v44, %v944_v41 }
 0x169   :  { %v947_v47 = vmul.f32 0.0078125, %v946_v46  ;;  %v948_v49 = vmul.f32 %v2043_v45, %v2043_v45  ;;  %v951_v7 = vsub.f32 %v1961_v13, %v2043_v45  ;;  %v952_v51 = vsub.f32 %v1971_v42, %v2043_v45 }
 0x16a   :  { %v953_v52 = vsub.f32 %v1956_v9, %v2043_v45  ;;  %v954_v54 = vsub.f32 %v1966_v17, %v2043_v45  ;;  %v955_v55 = vsub.f32 %v1992_v35, %v2043_v45  ;;  %v956_v58 = vsub.f32 %v2006_v48, %v2043_v45 }
 0x16b   :  { %v949_v57 = vsub.f32 %v947_v47, %v948_v49  ;;  %v957_v59 = vsub.f32 %v1987_v30, %v2043_v45  ;;  %v958_v13 = vsub.f32 %v1998_v40, %v2043_v45  ;;  %v959_v42 = vsub.f32 %v1963_v16, %v2043_v45 }
 0x16c   :  { %v960_v9 = vsub.f32 %v1973_v24, %v2043_v45  ;;  %v961_v17 = vsub.f32 %v1958_v12, %v2043_v45  ;;  %v962_v35 = vsub.f32 %v1968_v22, %v2043_v45  ;;  %v963_v48 = vsub.f32 %v1995_v39, %v2043_v45  ;;  %v2082_v12 = vld [vmem:[%s2199_s4] sm:$0xff]   ;;  %v2087_v22 = vld [vmem:[%s2199_s4 + $0x8] sm:$0xff]   ;;  %v2092_v39 = vld [vmem:[%s2199_s4 + $0x10] sm:$0xff]  }
 0x16d   :  { %v950_v53 = vmax.f32 %v949_v57, 0.0  ;;  %v964_v30 = vsub.f32 %v2008_v50, %v2043_v45  ;;  %v965_v40 = vsub.f32 %v1989_v34, %v2043_v45  ;;  %v966_v16 = vsub.f32 %v2003_v56, %v2043_v45  ;;  %v2097_v34 = vld [vmem:[%s2199_s4 + $0x18] sm:$0xff]   ;;  %v2102_v56 = vld [vmem:[%s2199_s4 + $0x20] sm:$0xff]   ;;  %v2107_v50 = vld [vmem:[%s2199_s4 + $0x28] sm:$0xff]  }
 0x16e   :  { %v1295_v60 = vunpack.c.l.bf16 %v2082_v12  ;;  %v1296_v61 = vunpack.c.h.bf16 %v2082_v12  ;;  %v1299_v62 = vunpack.c.l.bf16 %v2087_v22  ;;  %v1300_v63 = vunpack.c.h.bf16 %v2087_v22 }
 0x16f   :  { %v967_v24 = vadd.f32 1e-05, %v950_v53  ;;  %v1303_v2 = vunpack.c.l.bf16 %v2092_v39  ;;  %v1304_v3 = vunpack.c.h.bf16 %v2092_v39  ;;  %v1307_v4 = vunpack.c.l.bf16 %v2097_v34 }
 0x170   :  { %v1308_v5 = vunpack.c.h.bf16 %v2097_v34  ;;  %v1311_v8 = vunpack.c.l.bf16 %v2102_v56  ;;  %v1312_v10 = vunpack.c.h.bf16 %v2102_v56  ;;  %v1315_v11 = vunpack.c.l.bf16 %v2107_v50 }
 0x171   :  { %1667 = vrsqrt.f32 %v967_v24  ;;  %v1316_v14 = vunpack.c.h.bf16 %v2107_v50 }
 0x17b   :  { %v1668_v15 = vpop.eup %1667 }
 0x17c   :  { %v969_v20 = vmul.f32 %v1668_v15, %v951_v7  ;;  %v970_v43 = vmul.f32 %v1668_v15, %v952_v51  ;;  %v971_v25 = vmul.f32 %v1668_v15, %v953_v52  ;;  %v972_v26 = vmul.f32 %v1668_v15, %v954_v54 }
 0x17d   :  { %v973_v27 = vmul.f32 %v1668_v15, %v955_v55  ;;  %v974_v29 = vmul.f32 %v1668_v15, %v956_v58  ;;  %v975_v21 = vmul.f32 %v1668_v15, %v957_v59  ;;  %v976_v31 = vmul.f32 %v1668_v15, %v958_v13  ;;  %v1260_v58 = vld [vmem:[%s2201_s3] ss:$0 sm:$0xff] }
 0x17e   :  { %v977_v33 = vmul.f32 %v1668_v15, %v959_v42  ;;  %v978_v36 = vmul.f32 %v1668_v15, %v960_v9  ;;  %v979_v37 = vmul.f32 %v1668_v15, %v961_v17  ;;  %v980_v38 = vmul.f32 %v1668_v15, %v962_v35 }
 0x17f   :  { %v981_v41 = vmul.f32 %v1668_v15, %v963_v48  ;;  %v982_v6 = vmul.f32 %v1668_v15, %v964_v30  ;;  %v983_v44 = vmul.f32 %v1668_v15, %v965_v40  ;;  %v984_v45 = vmul.f32 %v1668_v15, %v966_v16 }
 0x180   :  { %v992_v46 = vmul.f32 %v1259_v32, %v969_v20  ;;  %v993_v47 = vmul.f32 %v1259_v32, %v970_v43  ;;  %v994_v49 = vmul.f32 %v1259_v32, %v971_v25  ;;  %v995_v7 = vmul.f32 %v1259_v32, %v972_v26 }
 0x181   :  { %v996_v51 = vmul.f32 %v1259_v32, %v973_v27  ;;  %v997_v52 = vmul.f32 %v1259_v32, %v974_v29  ;;  %v998_v54 = vmul.f32 %v1259_v32, %v975_v21  ;;  %v999_v55 = vmul.f32 %v1259_v32, %v976_v31 }
 0x182   :  { %v1000_v57 = vmul.f32 %v1259_v32, %v977_v33  ;;  %v1001_v59 = vmul.f32 %v1259_v32, %v978_v36  ;;  %v1002_v13 = vmul.f32 %v1259_v32, %v979_v37  ;;  %v1003_v42 = vmul.f32 %v1259_v32, %v980_v38 }
 0x183   :  { %v1004_v9 = vmul.f32 %v1259_v32, %v981_v41  ;;  %v1005_v17 = vmul.f32 %v1259_v32, %v982_v6  ;;  %v1006_v35 = vmul.f32 %v1259_v32, %v983_v44  ;;  %v1007_v48 = vmul.f32 %v1259_v32, %v984_v45 }
 0x184   :  { %v1015_v53 = vadd.f32 %v1260_v58, %v992_v46  ;;  %v1016_v30 = vadd.f32 %v1260_v58, %v993_v47  ;;  %v1017_v40 = vadd.f32 %v1260_v58, %v994_v49  ;;  %v1018_v16 = vadd.f32 %v1260_v58, %v995_v7 }
 0x185   :  { %v1019_v24 = vadd.f32 %v1260_v58, %v996_v51  ;;  %v1020_v15 = vadd.f32 %v1260_v58, %v997_v52  ;;  %v1021_v20 = vadd.f32 %v1260_v58, %v998_v54  ;;  %v1022_v43 = vadd.f32 %v1260_v58, %v999_v55 }
 0x186   :  { %v1023_v25 = vadd.f32 %v1260_v58, %v1000_v57  ;;  %v1024_v26 = vadd.f32 %v1260_v58, %v1001_v59  ;;  %v1025_v27 = vadd.f32 %v1260_v58, %v1002_v13  ;;  %v1026_v29 = vadd.f32 %v1260_v58, %v1003_v42 }
 0x187   :  { %v1027_v21 = vadd.f32 %v1260_v58, %v1004_v9  ;;  %v1028_v31 = vadd.f32 %v1260_v58, %v1005_v17  ;;  %v1029_v33 = vadd.f32 %v1260_v58, %v1006_v35  ;;  %v1030_v36 = vadd.f32 %v1260_v58, %v1007_v48 }
 0x188   :  { %v1063_v37 = vadd.f32 %v1295_v60, %v1015_v53  ;;  %v1064_v32 = vadd.f32 %v1296_v61, %v1016_v30  ;;  %v1065_v38 = vadd.f32 %v1299_v62, %v1017_v40  ;;  %v1066_v41 = vadd.f32 %v1300_v63, %v1018_v16 }
 0x189   :  { %v1067_v6 = vadd.f32 %v1303_v2, %v1019_v24  ;;  %v1068_v44 = vadd.f32 %v1304_v3, %v1020_v15  ;;  %v1069_v45 = vadd.f32 %v1307_v4, %v1021_v20  ;;  %v1070_v60 = vadd.f32 %v1308_v5, %v1022_v43 }
 0x18a   :  { %v1071_v12 = vadd.f32 %v1311_v8, %v1023_v25  ;;  %v1072_v61 = vadd.f32 %v1312_v10, %v1024_v26  ;;  %v1073_v22 = vadd.f32 %v1315_v11, %v1025_v27  ;;  %v1074_v62 = vadd.f32 %v1316_v14, %v1026_v29 }
 0x18b   :  { %v1075_v39 = vadd.f32 %v1319_v18, %v1027_v21  ;;  %v1076_v63 = vadd.f32 %v1320_v19, %v1028_v31  ;;  %v1077_v34 = vadd.f32 %v1323_v23, %v1029_v33  ;;  %v1078_v2 = vadd.f32 %v1324_v28, %v1030_v36 }
 0x18c   :  { %v1079_v56 = vmax.f32 %v1063_v37, 0.0  ;;  %v1080_v3 = vmax.f32 %v1064_v32, 0.0  ;;  %v1081_v4 = vmax.f32 %v1065_v38, 0.0  ;;  %v1082_v5 = vmax.f32 %v1066_v41, 0.0 }
 0x18d   :  { %v1083_v8 = vmax.f32 %v1067_v6, 0.0  ;;  %v1084_v10 = vmax.f32 %v1068_v44, 0.0  ;;  %v1085_v50 = vmax.f32 %v1069_v45, 0.0  ;;  %v1086_v11 = vmax.f32 %v1070_v60, 0.0 }
 0x18e   :  { %v1087_v14 = vmax.f32 %v1071_v12, 0.0  ;;  %v1088_v46 = vmax.f32 %v1072_v61, 0.0  ;;  %v1089_v18 = vmax.f32 %v1073_v22, 0.0  ;;  %v1090_v47 = vmax.f32 %v1074_v62, 0.0 }
 0x18f   :  { %v1091_v0 = vmax.f32 %v1075_v39, 0.0  ;;  %v1092_v19 = vmax.f32 %v1076_v63, 0.0  ;;  %v1093_v49 = vmax.f32 %v1077_v34, 0.0  ;;  %v1094_v7 = vmax.f32 %v1078_v2, 0.0 }
 0x190   :  { %v1328_v23 = vpack.c.bf16 %v1080_v3, %v1079_v56  ;;  %v1333_v51 = vpack.c.bf16 %v1082_v5, %v1081_v4  ;;  %v1338_v1 = vpack.c.bf16 %v1084_v10, %v1083_v8  ;;  %v1343_v28 = vpack.c.bf16 %v1086_v11, %v1085_v50 }
 0x191   :  { %v1348_v52 = vpack.c.bf16 %v1088_v46, %v1087_v14  ;;  %v1353_v54 = vpack.c.bf16 %v1090_v47, %v1089_v18  ;;  %v1358_v55 = vpack.c.bf16 %v1092_v19, %v1091_v0  ;;  %v1363_v58 = vpack.c.bf16 %v1094_v7, %v1093_v49 }
 0x192   :  { %1329 = vst [vmem:[%s2202_s5] sm:$0xff] %v1328_v23   ;;  %1372 = vst [vmem:[%s2202_s5 + $0x8] sm:$0xff] %v1333_v51  }
 0x193   :  { %1373 = vst [vmem:[%s2202_s5 + $0x10] sm:$0xff] %v1338_v1   ;;  %1374 = vst [vmem:[%s2202_s5 + $0x18] sm:$0xff] %v1343_v28  }
 0x194   :  { %1375 = vst [vmem:[%s2202_s5 + $0x20] sm:$0xff] %v1348_v52   ;;  %1376 = vst [vmem:[%s2202_s5 + $0x28] sm:$0xff] %v1353_v54  }
 0x195   :  { %1377 = vst [vmem:[%s2202_s5 + $0x30] sm:$0xff] %v1358_v55   ;;  %1378 = vst [vmem:[%s2202_s5 + $0x38] sm:$0xff] %v1363_v58  }

// kernel: birdnet_forward.40
= control target key start
LH: loop header
LB: loop body
LE: loop exit
PB: predicated region body
PF: predicated region fallthrough
CT: control target
= control target key end

     0   :  { %s1994_s1 = inlined_call_operand.vmem [shape: bf16[640,128], index: 1, kind: input, shape index: {}]   ;;  %s1995_s0 = inlined_call_operand.vmem [shape: bf16[128,640], index: 0, kind: input, shape index: {}]   ;;  %s1996_s2 = inlined_call_operand.vmem [shape: f32[1,128], index: 2, kind: input, shape index: {}]   ;;  %s1997_s3 = inlined_call_operand.vmem [shape: f32[1,128], index: 3, kind: input, shape index: {}]   ;;  %s1998_s4 = inlined_call_operand.vmem [shape: bf16[128,128], index: 4, kind: output, shape index: {}]  }
   0x1   :  { %v1481_v0 = vld [vmem:[%s1994_s1 + $0x40] sm:$0xff]   ;;  %v1485_v4 = vld [vmem:[%s1994_s1 + $0x48] sm:$0xff]   ;;  %v1489_v8 = vld [vmem:[%s1994_s1 + $0x50] sm:$0xff]  }
   0x2   :  { %v1482_v1 = vld [vmem:[%s1994_s1 + $0xc0] sm:$0xff]   ;;  %1289 = vmatprep.subr.bf16.mxu0 %v1481_v0  ;;  %v1486_v5 = vld [vmem:[%s1994_s1 + $0xc8] sm:$0xff]   ;;  %v1490_v9 = vld [vmem:[%s1994_s1 + $0xd0] sm:$0xff]  }
   0x3   :  { %v1483_v2 = vld [vmem:[%s1994_s1] sm:$0xff]   ;;  %1353 = vmatprep.subr.bf16.mxu1 %v1482_v1  ;;  %v1487_v6 = vld [vmem:[%s1994_s1 + $0x8] sm:$0xff]   ;;  %v1491_v10 = vld [vmem:[%s1994_s1 + $0x10] sm:$0xff]  }
   0x4   :  { %v1484_v3 = vld [vmem:[%s1994_s1 + $0x80] sm:$0xff]   ;;  %1290 = vmatpush3.bf16.msra.mxu0 %v1483_v2  ;;  %v1488_v7 = vld [vmem:[%s1994_s1 + $0x88] sm:$0xff]   ;;  %v1492_v11 = vld [vmem:[%s1994_s1 + $0x90] sm:$0xff]  }
   0x5   :  { %1354 = vmatpush3.bf16.msra.mxu1 %v1484_v3  ;;  %1291 = vmatprep.subr.bf16.mxu0 %v1485_v4  ;;  %v1493_v12 = vld [vmem:[%s1994_s1 + $0x58] sm:$0xff]   ;;  %v1497_v16 = vld [vmem:[%s1994_s1 + $0x60] sm:$0xff]   ;;  %v1501_v20 = vld [vmem:[%s1994_s1 + $0x68] sm:$0xff]  }
   0x6   :  { %1355 = vmatprep.subr.bf16.mxu1 %v1486_v5  ;;  %v1494_v13 = vld [vmem:[%s1994_s1 + $0xd8] sm:$0xff]   ;;  %v1498_v17 = vld [vmem:[%s1994_s1 + $0xe0] sm:$0xff]   ;;  %v1502_v21 = vld [vmem:[%s1994_s1 + $0xe8] sm:$0xff]  }
   0x7   :  { %v1495_v14 = vld [vmem:[%s1994_s1 + $0x18] sm:$0xff]   ;;  %v1499_v18 = vld [vmem:[%s1994_s1 + $0x20] sm:$0xff]   ;;  %v1503_v22 = vld [vmem:[%s1994_s1 + $0x28] sm:$0xff]  }
   0x8   :  { %1292 = vmatpush3.bf16.msra.mxu0 %v1487_v6  ;;  %v1496_v15 = vld [vmem:[%s1994_s1 + $0x98] sm:$0xff]   ;;  %v1500_v19 = vld [vmem:[%s1994_s1 + $0xa0] sm:$0xff]   ;;  %v1504_v23 = vld [vmem:[%s1994_s1 + $0xa8] sm:$0xff]  }
   0x9   :  { %1356 = vmatpush3.bf16.msra.mxu1 %v1488_v7  ;;  %1293 = vmatprep.subr.bf16.mxu0 %v1489_v8  ;;  %v1505_v24 = vld [vmem:[%s1994_s1 + $0x70] sm:$0xff]   ;;  %v1509_v28 = vld [vmem:[%s1994_s1 + $0x78] sm:$0xff]   ;;  %v1518_v35 = vld [vmem:[%s1995_s0 + $0xc] ss:$20 sps:$4 sm:$0xff]  }
   0xa   :  { %1357 = vmatprep.subr.bf16.mxu1 %v1490_v9  ;;  %v1506_v25 = vld [vmem:[%s1994_s1 + $0xf0] sm:$0xff]   ;;  %v1510_v29 = vld [vmem:[%s1994_s1 + $0xf8] sm:$0xff]   ;;  %v1519_v36 = vld [vmem:[%s1994_s1 + $0x100] sm:$0xff]   ;;  %723 = vmatprep.mubr.bf16.mxu1 %v1518_v35 }
   0xb   :  { %v1507_v26 = vld [vmem:[%s1994_s1 + $0x30] sm:$0xff]   ;;  %v1511_v30 = vld [vmem:[%s1994_s1 + $0x38] sm:$0xff]   ;;  %v1520_v37 = vld [vmem:[%s1995_s0 + $0x2c] ss:$20 sps:$4 sm:$0xff]  }
   0xc   :  { %1294 = vmatpush3.bf16.msra.mxu0 %v1491_v10  ;;  %v1508_v27 = vld [vmem:[%s1994_s1 + $0xb0] sm:$0xff]   ;;  %v1512_v31 = vld [vmem:[%s1994_s1 + $0xb8] sm:$0xff]   ;;  %v1526_v39 = vld [vmem:[%s1994_s1 + $0x108] sm:$0xff]  }
   0xd   :  { %1358 = vmatpush3.bf16.msra.mxu1 %v1492_v11  ;;  %1295 = vmatprep.subr.bf16.mxu0 %v1493_v12  ;;  %v1513_v32 = vld [vmem:[%s1995_s0] ss:$20 sps:$4 sm:$0xff]   ;;  %v1515_v33 = vld [vmem:[%s1995_s0 + $0x4] ss:$20 sps:$4 sm:$0xff]   ;;  %v1516_v34 = vld [vmem:[%s1995_s0 + $0x8] ss:$20 sps:$4 sm:$0xff]  }
   0xe   :  { %1359 = vmatprep.subr.bf16.mxu1 %v1494_v13  ;;  %626 = vmatprep.mubr.bf16.mxu0 %v1515_v33  ;;  %v1522_v38 = vld [vmem:[%s1995_s0 + $0x34] ss:$20 sps:$4 sm:$0xff]   ;;  %v1525_v41 = vld [vmem:[%s1995_s0 + $0x30] ss:$20 sps:$4 sm:$0xff]   ;;  %v1540_v45 = vld [vmem:[%s1994_s1 + $0x118] sm:$0xff]  }
   0xf   :  { %v1524_v40 = vld [vmem:[%s1995_s0 + $0x28] ss:$20 sps:$4 sm:$0xff]   ;;  %v1533_v44 = vld [vmem:[%s1994_s1 + $0x110] sm:$0xff]   ;;  %v1532_v47 = vld [vmem:[%s1995_s0 + $0x58] ss:$20 sps:$4 sm:$0xff]  }
  0x10   :  { %1296 = vmatpush3.bf16.msra.mxu0 %v1495_v14  ;;  %v1527_v42 = vld [vmem:[%s1995_s0 + $0x54] ss:$20 sps:$4 sm:$0xff]   ;;  %v1529_v43 = vld [vmem:[%s1995_s0 + $0x5c] ss:$20 sps:$4 sm:$0xff]   ;;  %v1536_v49 = vld [vmem:[%s1995_s0 + $0x84] ss:$20 sps:$4 sm:$0xff]  }
  0x11   :  { %1360 = vmatpush3.bf16.msra.mxu1 %v1496_v15  ;;  %1297 = vmatprep.subr.bf16.mxu0 %v1497_v16  ;;  %v1531_v46 = vld [vmem:[%s1995_s0 + $0x50] ss:$20 sps:$4 sm:$0xff]   ;;  %v1554_v51 = vld [vmem:[%s1994_s1 + $0x128] sm:$0xff]   ;;  %v1539_v53 = vld [vmem:[%s1995_s0 + $0x80] ss:$20 sps:$4 sm:$0xff]  }
  0x12   :  { %1361 = vmatprep.subr.bf16.mxu1 %v1498_v17  ;;  %v1534_v48 = vld [vmem:[%s1995_s0 + $0x7c] ss:$20 sps:$4 sm:$0xff]   ;;  %v1547_v50 = vld [vmem:[%s1994_s1 + $0x120] sm:$0xff]   ;;  %v1538_v52 = vld [vmem:[%s1995_s0 + $0x78] ss:$20 sps:$4 sm:$0xff]  }
  0x13   :  { %v1541_v54 = vld [vmem:[%s1995_s0 + $0xa4] ss:$20 sps:$4 sm:$0xff]   ;;  %v1561_v55 = vld [vmem:[%s1994_s1 + $0x130] sm:$0xff]   ;;  %v1543_v56 = vld [vmem:[%s1995_s0 + $0xac] ss:$20 sps:$4 sm:$0xff]  }
  0x14   :  { %1298 = vmatpush3.bf16.msra.mxu0 %v1499_v18  ;;  %v1568_v57 = vld [vmem:[%s1994_s1 + $0x138] sm:$0xff]   ;;  %v1545_v58 = vld [vmem:[%s1995_s0 + $0xa0] ss:$20 sps:$4 sm:$0xff]   ;;  %v1553_v63 = vld [vmem:[%s1995_s0 + $0xd0] ss:$20 sps:$4 sm:$0xff]  }
  0x15   :  { %1362 = vmatpush3.bf16.msra.mxu1 %v1500_v19  ;;  %1299 = vmatprep.subr.bf16.mxu0 %v1501_v20  ;;  %v1546_v59 = vld [vmem:[%s1995_s0 + $0xa8] ss:$20 sps:$4 sm:$0xff]   ;;  %v1548_v60 = vld [vmem:[%s1995_s0 + $0xcc] ss:$20 sps:$4 sm:$0xff]   ;;  %v1559_v2 = vld [vmem:[%s1995_s0 + $0xf0] ss:$20 sps:$4 sm:$0xff]  }
  0x16   :  { %1363 = vmatprep.subr.bf16.mxu1 %v1502_v21  ;;  %v1550_v61 = vld [vmem:[%s1995_s0 + $0xd4] ss:$20 sps:$4 sm:$0xff]   ;;  %v1557_v1 = vld [vmem:[%s1995_s0 + $0xfc] ss:$20 sps:$4 sm:$0xff]   ;;  %v1560_v3 = vld [vmem:[%s1995_s0 + $0xf8] ss:$20 sps:$4 sm:$0xff]  }
  0x17   :  { %v1552_v62 = vld [vmem:[%s1995_s0 + $0xc8] ss:$20 sps:$4 sm:$0xff]   ;;  %v1564_v5 = vld [vmem:[%s1995_s0 + $0x124] ss:$20 sps:$4 sm:$0xff]   ;;  %v1567_v7 = vld [vmem:[%s1995_s0 + $0x120] ss:$20 sps:$4 sm:$0xff]  }
  0x18   :  { %1300 = vmatpush3.bf16.msra.mxu0 %v1503_v22  ;;  %v1555_v0 = vld [vmem:[%s1995_s0 + $0xf4] ss:$20 sps:$4 sm:$0xff]   ;;  %v1562_v4 = vld [vmem:[%s1995_s0 + $0x11c] ss:$20 sps:$4 sm:$0xff]   ;;  %v1566_v6 = vld [vmem:[%s1995_s0 + $0x118] ss:$20 sps:$4 sm:$0xff]  }
  0x19   :  { %1364 = vmatpush3.bf16.msra.mxu1 %v1504_v23  ;;  %1301 = vmatprep.subr.bf16.mxu0 %v1505_v24  ;;  %v1569_v8 = vld [vmem:[%s1995_s0 + $0x10] ss:$20 sps:$4 sm:$0xff]   ;;  %v1571_v10 = vld [vmem:[%s1995_s0 + $0x38] ss:$20 sps:$4 sm:$0xff]   ;;  %v1573_v12 = vld [vmem:[%s1995_s0 + $0x60] ss:$20 sps:$4 sm:$0xff]  }
  0x1a   :  { %1365 = vmatprep.subr.bf16.mxu1 %v1506_v25  ;;  %v1570_v9 = vld [vmem:[%s1995_s0 + $0xb0] ss:$20 sps:$4 sm:$0xff]   ;;  %v1572_v11 = vld [vmem:[%s1995_s0 + $0xd8] ss:$20 sps:$4 sm:$0xff]   ;;  %v1574_v13 = vld [vmem:[%s1995_s0 + $0x100] ss:$20 sps:$4 sm:$0xff]  }
  0x1b   :  { %v1575_v14 = vld [vmem:[%s1995_s0 + $0x88] ss:$20 sps:$4 sm:$0xff]  }
  0x1c   :  { %1302 = vmatpush3.bf16.msra.mxu0 %v1507_v26  ;;  %v1576_v15 = vld [vmem:[%s1995_s0 + $0x128] ss:$20 sps:$4 sm:$0xff]  }
  0x1d   :  { %1366 = vmatpush3.bf16.msra.mxu1 %v1508_v27  ;;  %1303 = vmatprep.subr.bf16.mxu0 %v1509_v28 }
  0x1e   :  { %1367 = vmatprep.subr.bf16.mxu1 %v1510_v29 }
  0x20   :  { %1304 = vmatpush3.bf16.msra.mxu0 %v1511_v30 }
  0x21   :  { %1368 = vmatpush3.bf16.msra.mxu1 %v1512_v31  ;;  %1433 = vmatprep.subr.bf16.mxu0 %v1519_v36 }
  0x22   :  { %1465 = vmatprep.subr.bf16.mxu1 %v1519_v36 }
  0x23   :  { %627 = vmatmul.mubr.bf16.vlgmr.msra.gmra.mrb[0].mxu0 %v1513_v32 }
  0x24   :  { %724 = vmatmul.mubr.bf16.vlgmr.msra.gmra.mrb[0].mxu1 %v1516_v34  ;;  %1434 = vmatpush3.bf16.msra.mxu0 %v1519_v36 }
  0x25   :  { %634 = vmatprep.mubr.bf16.mxu0 %v1520_v37  ;;  %731 = vmatprep.mubr.bf16.mxu1 %v1522_v38 }
  0x26   :  { %1473 = vmatpush3.bf16.msra.mxu1 %v1519_v36  ;;  %1435 = vmatprep.subr.bf16.mxu0 %v1526_v39 }
  0x27   :  { %1466 = vmatprep.subr.bf16.mxu1 %v1526_v39 }
  0x28   :  { %1436 = vmatpush3.bf16.msra.mxu0 %v1526_v39 }
  0x29   :  { %1437 = vmatprep.subr.bf16.mxu0 %v1533_v44 }
  0x2a   :  { %1474 = vmatpush3.bf16.msra.mxu1 %v1526_v39 }
  0x2b   :  { %635 = vmatmul.mubr.bf16.gmra.mrb[4].mxu0 %v1524_v40  ;;  %1467 = vmatprep.subr.bf16.mxu1 %v1533_v44 }
  0x2c   :  { %732 = vmatmul.mubr.bf16.gmra.mrb[4].mxu1 %v1525_v41  ;;  %642 = vmatprep.mubr.bf16.mxu0 %v1527_v42 }
  0x2d   :  { %739 = vmatprep.mubr.bf16.mxu1 %v1529_v43  ;;  %1438 = vmatpush3.bf16.msra.mxu0 %v1533_v44 }
  0x2e   :  { %1439 = vmatprep.subr.bf16.mxu0 %v1540_v45  ;;  %1475 = vmatpush3.bf16.msra.mxu1 %v1533_v44 }
  0x2f   :  { %1468 = vmatprep.subr.bf16.mxu1 %v1540_v45 }
  0x31   :  { %1440 = vmatpush3.bf16.msra.mxu0 %v1540_v45 }
  0x32   :  { %1441 = vmatprep.subr.bf16.mxu0 %v1547_v50  ;;  %1476 = vmatpush3.bf16.msra.mxu1 %v1540_v45 }
  0x33   :  { %643 = vmatmul.mubr.bf16.gmra.mrb[8].mxu0 %v1531_v46  ;;  %1469 = vmatprep.subr.bf16.mxu1 %v1547_v50 }
  0x34   :  { %740 = vmatmul.mubr.bf16.gmra.mrb[8].mxu1 %v1532_v47  ;;  %650 = vmatprep.mubr.bf16.mxu0 %v1534_v48 }
  0x35   :  { %747 = vmatprep.mubr.bf16.mxu1 %v1536_v49  ;;  %1442 = vmatpush3.bf16.msra.mxu0 %v1547_v50 }
  0x36   :  { %1443 = vmatprep.subr.bf16.mxu0 %v1554_v51  ;;  %1477 = vmatpush3.bf16.msra.mxu1 %v1547_v50 }
  0x37   :  { %1470 = vmatprep.subr.bf16.mxu1 %v1554_v51 }
  0x39   :  { %1444 = vmatpush3.bf16.msra.mxu0 %v1554_v51 }
  0x3a   :  { %1445 = vmatprep.subr.bf16.mxu0 %v1561_v55  ;;  %1478 = vmatpush3.bf16.msra.mxu1 %v1554_v51 }
  0x3b   :  { %651 = vmatmul.mubr.bf16.gmra.mrb[12].mxu0 %v1538_v52  ;;  %1471 = vmatprep.subr.bf16.mxu1 %v1561_v55 }
  0x3c   :  { %748 = vmatmul.mubr.bf16.gmra.mrb[12].mxu1 %v1539_v53  ;;  %658 = vmatprep.mubr.bf16.mxu0 %v1541_v54 }
  0x3d   :  { %755 = vmatprep.mubr.bf16.mxu1 %v1543_v56  ;;  %1446 = vmatpush3.bf16.msra.mxu0 %v1561_v55 }
  0x3e   :  { %1447 = vmatprep.subr.bf16.mxu0 %v1568_v57  ;;  %1479 = vmatpush3.bf16.msra.mxu1 %v1561_v55 }
  0x3f   :  { %1472 = vmatprep.subr.bf16.mxu1 %v1568_v57 }
  0x41   :  { %1448 = vmatpush3.bf16.msra.mxu0 %v1568_v57 }
  0x42   :  { %1480 = vmatpush3.bf16.msra.mxu1 %v1568_v57 }
  0x43   :  { %659 = vmatmul.mubr.bf16.gmra.mrb[16].mxu0 %v1545_v58 }
  0x44   :  { %756 = vmatmul.mubr.bf16.gmra.mrb[16].mxu1 %v1546_v59  ;;  %666 = vmatprep.mubr.bf16.mxu0 %v1548_v60 }
  0x45   :  { %763 = vmatprep.mubr.bf16.mxu1 %v1550_v61 }
  0x4b   :  { %667 = vmatmul.mubr.bf16.gmra.mrb[20].mxu0 %v1552_v62 }
  0x4c   :  { %764 = vmatmul.mubr.bf16.gmra.mrb[20].mxu1 %v1553_v63  ;;  %674 = vmatprep.mubr.bf16.mxu0 %v1555_v0 }
  0x4d   :  { %771 = vmatprep.mubr.bf16.mxu1 %v1557_v1 }
  0x53   :  { %675 = vmatmul.mubr.bf16.gmra.mrb[24].mxu0 %v1559_v2 }
  0x54   :  { %772 = vmatmul.mubr.bf16.gmra.mrb[24].mxu1 %v1560_v3  ;;  %682 = vmatprep.mubr.bf16.mxu0 %v1562_v4 }
  0x55   :  { %779 = vmatprep.mubr.bf16.mxu1 %v1564_v5 }
  0x5b   :  { %683 = vmatmul.mubr.bf16.gmra.mrb[28].mxu0 %v1566_v6 }
  0x5c   :  { %780 = vmatmul.mubr.bf16.gmra.mrb[28].mxu1 %v1567_v7  ;;  %1449 = vmatprep.mubr.bf16.mxu0 %v1569_v8 }
  0x5d   :  { %1457 = vmatprep.mubr.bf16.mxu1 %v1570_v9 }
  0x63   :  { %1450 = vmatmul.mubr.bf16.vlgmr.msra.gmra.mrb[32].mxu0 %v1571_v10 }
  0x64   :  { %1458 = vmatmul.mubr.bf16.vlgmr.msra.gmra.mrb[32].mxu1 %v1572_v11  ;;  %1453 = vmatprep.mubr.bf16.mxu0 %v1573_v12 }
  0x65   :  { %1461 = vmatprep.mubr.bf16.mxu1 %v1574_v13 }
  0x6b   :  { %1454 = vmatmul.mubr.bf16.gmra.mrb[36].mxu0 %v1575_v14 }
  0x6c   :  { %1462 = vmatmul.mubr.bf16.gmra.mrb[36].mxu1 %v1576_v15 }
  0xf6   :  { %v1305_v16 = vpop.f32.mrb[0].mxu0 }
  0xf7   :  { %v1369_v17 = vpop.f32.mrb[0].mxu1  ;;  %v1306_v18 = vpop.f32.mrb[1].mxu0 }
  0xf8   :  { %v1307_v19 = vadd.f32 %v1306_v18, %v1305_v16  ;;  %v1370_v20 = vpop.f32.mrb[1].mxu1  ;;  %v1308_v21 = vpop.f32.mrb[2].mxu0 }
  0xf9   :  { %v1371_v22 = vadd.f32 %v1370_v20, %v1369_v17  ;;  %v1372_v23 = vpop.f32.mrb[2].mxu1  ;;  %v1309_v24 = vpop.f32.mrb[3].mxu0 }
  0xfa   :  { %v1310_v25 = vadd.f32 %v1309_v24, %v1308_v21  ;;  %v1373_v26 = vpop.f32.mrb[3].mxu1 }
  0xfb   :  { %v1374_v27 = vadd.f32 %v1373_v26, %v1372_v23  ;;  %v1844_v28 = vadd.f32 %v1371_v22, %v1307_v19 }
  0xfd   :  { %v1846_v29 = vadd.f32 %v1374_v27, %v1310_v25 }
  0xfe   :  { %v1311_v30 = vpop.f32.mrb[4].mxu0 }
  0xff   :  { %v1375_v31 = vpop.f32.mrb[4].mxu1  ;;  %v1312_v32 = vpop.f32.mrb[5].mxu0 }
 0x100   :  { %v1313_v33 = vadd.f32 %v1312_v32, %v1311_v30  ;;  %v1376_v34 = vpop.f32.mrb[5].mxu1  ;;  %v1314_v35 = vpop.f32.mrb[6].mxu0 }
 0x101   :  { %v1377_v36 = vadd.f32 %v1376_v34, %v1375_v31  ;;  %v1378_v37 = vpop.f32.mrb[6].mxu1  ;;  %v1315_v38 = vpop.f32.mrb[7].mxu0 }
 0x102   :  { %v1316_v39 = vadd.f32 %v1315_v38, %v1314_v35  ;;  %v1379_v40 = vpop.f32.mrb[7].mxu1 }
 0x103   :  { %v1380_v41 = vadd.f32 %v1379_v40, %v1378_v37  ;;  %v1848_v42 = vadd.f32 %v1377_v36, %v1313_v33 }
 0x105   :  { %v1850_v43 = vadd.f32 %v1380_v41, %v1316_v39 }
 0x106   :  { %v1317_v44 = vpop.f32.mrb[8].mxu0 }
 0x107   :  { %v1381_v45 = vpop.f32.mrb[8].mxu1  ;;  %v1318_v46 = vpop.f32.mrb[9].mxu0 }
 0x108   :  { %v1319_v47 = vadd.f32 %v1318_v46, %v1317_v44  ;;  %v1382_v48 = vpop.f32.mrb[9].mxu1  ;;  %v1320_v49 = vpop.f32.mrb[10].mxu0 }
 0x109   :  { %v1383_v50 = vadd.f32 %v1382_v48, %v1381_v45  ;;  %v1384_v51 = vpop.f32.mrb[10].mxu1  ;;  %v1321_v52 = vpop.f32.mrb[11].mxu0 }
 0x10a   :  { %v1322_v53 = vadd.f32 %v1321_v52, %v1320_v49  ;;  %v1385_v54 = vpop.f32.mrb[11].mxu1 }
 0x10b   :  { %v1386_v55 = vadd.f32 %v1385_v54, %v1384_v51  ;;  %v1852_v56 = vadd.f32 %v1383_v50, %v1319_v47 }
 0x10d   :  { %v1854_v57 = vadd.f32 %v1386_v55, %v1322_v53 }
 0x10e   :  { %v1323_v58 = vpop.f32.mrb[12].mxu0 }
 0x10f   :  { %v1387_v59 = vpop.f32.mrb[12].mxu1  ;;  %v1324_v60 = vpop.f32.mrb[13].mxu0 }
 0x110   :  { %v1325_v61 = vadd.f32 %v1324_v60, %v1323_v58  ;;  %v1388_v62 = vpop.f32.mrb[13].mxu1  ;;  %v1326_v63 = vpop.f32.mrb[14].mxu0 }
 0x111   :  { %v1389_v0 = vadd.f32 %v1388_v62, %v1387_v59  ;;  %v1390_v1 = vpop.f32.mrb[14].mxu1  ;;  %v1327_v2 = vpop.f32.mrb[15].mxu0 }
 0x112   :  { %v1328_v3 = vadd.f32 %v1327_v2, %v1326_v63  ;;  %v1391_v4 = vpop.f32.mrb[15].mxu1 }
 0x113   :  { %v1392_v5 = vadd.f32 %v1391_v4, %v1390_v1  ;;  %v1856_v6 = vadd.f32 %v1389_v0, %v1325_v61 }
 0x115   :  { %v1858_v7 = vadd.f32 %v1392_v5, %v1328_v3 }
 0x116   :  { %v1329_v8 = vpop.f32.mrb[16].mxu0 }
 0x117   :  { %v1393_v9 = vpop.f32.mrb[16].mxu1  ;;  %v1330_v10 = vpop.f32.mrb[17].mxu0 }
 0x118   :  { %v1331_v11 = vadd.f32 %v1330_v10, %v1329_v8  ;;  %v1394_v12 = vpop.f32.mrb[17].mxu1  ;;  %v1332_v13 = vpop.f32.mrb[18].mxu0 }
 0x119   :  { %v1395_v14 = vadd.f32 %v1394_v12, %v1393_v9  ;;  %v1396_v15 = vpop.f32.mrb[18].mxu1  ;;  %v1333_v16 = vpop.f32.mrb[19].mxu0 }
 0x11a   :  { %v1334_v17 = vadd.f32 %v1333_v16, %v1332_v13  ;;  %v1397_v18 = vpop.f32.mrb[19].mxu1 }
 0x11b   :  { %v1398_v19 = vadd.f32 %v1397_v18, %v1396_v15  ;;  %v758_v20 = vadd.f32 %v1395_v14, %v1331_v11 }
 0x11d   :  { %v761_v21 = vadd.f32 %v1398_v19, %v1334_v17 }
 0x11e   :  { %v1335_v22 = vpop.f32.mrb[20].mxu0 }
 0x11f   :  { %v1399_v23 = vpop.f32.mrb[20].mxu1  ;;  %v1336_v24 = vpop.f32.mrb[21].mxu0 }
 0x120   :  { %v1337_v25 = vadd.f32 %v1336_v24, %v1335_v22  ;;  %v1400_v26 = vpop.f32.mrb[21].mxu1  ;;  %v1338_v27 = vpop.f32.mrb[22].mxu0 }
 0x121   :  { %v1401_v30 = vadd.f32 %v1400_v26, %v1399_v23  ;;  %v1402_v31 = vpop.f32.mrb[22].mxu1  ;;  %v1339_v32 = vpop.f32.mrb[23].mxu0 }
 0x122   :  { %v1340_v33 = vadd.f32 %v1339_v32, %v1338_v27  ;;  %v1403_v34 = vpop.f32.mrb[23].mxu1 }
 0x123   :  { %v1404_v35 = vadd.f32 %v1403_v34, %v1402_v31  ;;  %v766_v36 = vadd.f32 %v1401_v30, %v1337_v25 }
 0x125   :  { %v769_v37 = vadd.f32 %v1404_v35, %v1340_v33 }
 0x126   :  { %v1341_v38 = vpop.f32.mrb[24].mxu0 }
 0x127   :  { %v1405_v39 = vpop.f32.mrb[24].mxu1  ;;  %v1342_v40 = vpop.f32.mrb[25].mxu0 }
 0x128   :  { %v1343_v41 = vadd.f32 %v1342_v40, %v1341_v38  ;;  %v1406_v44 = vpop.f32.mrb[25].mxu1  ;;  %v1344_v45 = vpop.f32.mrb[26].mxu0 }
 0x129   :  { %v1407_v46 = vadd.f32 %v1406_v44, %v1405_v39  ;;  %v1408_v47 = vpop.f32.mrb[26].mxu1  ;;  %v1345_v48 = vpop.f32.mrb[27].mxu0 }
 0x12a   :  { %v1346_v49 = vadd.f32 %v1345_v48, %v1344_v45  ;;  %v1409_v50 = vpop.f32.mrb[27].mxu1 }
 0x12b   :  { %v1410_v51 = vadd.f32 %v1409_v50, %v1408_v47  ;;  %v774_v52 = vadd.f32 %v1407_v46, %v1343_v41 }
 0x12d   :  { %v777_v53 = vadd.f32 %v1410_v51, %v1346_v49 }
 0x12e   :  { %v1347_v54 = vpop.f32.mrb[28].mxu0 }
 0x12f   :  { %v1411_v55 = vpop.f32.mrb[28].mxu1  ;;  %v1348_v58 = vpop.f32.mrb[29].mxu0 }
 0x130   :  { %v1349_v59 = vadd.f32 %v1348_v58, %v1347_v54  ;;  %v1412_v60 = vpop.f32.mrb[29].mxu1  ;;  %v1350_v61 = vpop.f32.mrb[30].mxu0 }
 0x131   :  { %v1413_v62 = vadd.f32 %v1412_v60, %v1411_v55  ;;  %v1414_v63 = vpop.f32.mrb[30].mxu1  ;;  %v1351_v0 = vpop.f32.mrb[31].mxu0 }
 0x132   :  { %v1352_v1 = vadd.f32 %v1351_v0, %v1350_v61  ;;  %v1415_v2 = vpop.f32.mrb[31].mxu1 }
 0x133   :  { %v1416_v3 = vadd.f32 %v1415_v2, %v1414_v63  ;;  %v782_v4 = vadd.f32 %v1413_v62, %v1349_v59 }
 0x135   :  { %v785_v5 = vadd.f32 %v1416_v3, %v1352_v1 }
 0x136   :  { %v1451_v8 = vpop.f32.mrb[32].mxu0 }
 0x137   :  { %v1861_v9 = vadd.f32 %v1451_v8, %v1848_v42  ;;  %v1459_v10 = vpop.f32.mrb[32].mxu1  ;;  %v822_v11 = vpop.f32.mrb[33].mxu0 }
 0x138   :  { %v1863_v12 = vadd.f32 %v1459_v10, %v766_v36  ;;  %v1866_v13 = vadd.f32 %v822_v11, %v1844_v28  ;;  %v854_v14 = vpop.f32.mrb[33].mxu1  ;;  %v1452_v15 = vpop.f32.mrb[34].mxu0 }
 0x139   :  { %v1868_v16 = vadd.f32 %v854_v14, %v758_v20  ;;  %v1871_v17 = vadd.f32 %v1452_v15, %v1850_v43  ;;  %v1460_v18 = vpop.f32.mrb[34].mxu1  ;;  %v825_v19 = vpop.f32.mrb[35].mxu0  ;;  %v909_v25 = vmul.f32 %v1861_v9, %v1861_v9 }
 0x13a   :  { %v1873_v22 = vadd.f32 %v1460_v18, %v769_v37  ;;  %v1876_v42 = vadd.f32 %v825_v19, %v1846_v29  ;;  %v857_v23 = vpop.f32.mrb[35].mxu1  ;;  %v907_v28 = vmul.f32 %v1866_v13, %v1866_v13  ;;  %v917_v1 = vmul.f32 %v1863_v12, %v1863_v12 }
 0x13b   :  { %v1878_v24 = vadd.f32 %v857_v23, %v761_v21  ;;  %v910_v21 = vmul.f32 %v1871_v17, %v1871_v17 }
 0x13c   :  { %v885_v20 = vadd.f32 %v1876_v42, %v1866_v13  ;;  %v908_v43 = vmul.f32 %v1876_v42, %v1876_v42 }
 0x13d   :  { %v916_v62 = vmul.f32 %v1878_v24, %v1878_v24 }
 0x13e   :  { %v886_v26 = vadd.f32 %v885_v20, %v1861_v9  ;;  %v923_v27 = vadd.f32 %v908_v43, %v907_v28  ;;  %v1455_v29 = vpop.f32.mrb[36].mxu0 }
 0x13f   :  { %v1892_v30 = vadd.f32 %v1455_v29, %v1856_v6  ;;  %v1463_v31 = vpop.f32.mrb[36].mxu1  ;;  %v838_v32 = vpop.f32.mrb[37].mxu0 }
 0x140   :  { %v924_v33 = vadd.f32 %v923_v27, %v909_v25  ;;  %v1894_v34 = vadd.f32 %v1463_v31, %v782_v4  ;;  %v1897_v35 = vadd.f32 %v838_v32, %v1852_v56  ;;  %v887_v36 = vadd.f32 %v886_v26, %v1871_v17  ;;  %v870_v37 = vpop.f32.mrb[37].mxu1  ;;  %v1456_v38 = vpop.f32.mrb[38].mxu0 }
 0x141   :  { %v1900_v39 = vadd.f32 %v870_v37, %v774_v52  ;;  %v1903_v40 = vadd.f32 %v1456_v38, %v1858_v7  ;;  %v1464_v41 = vpop.f32.mrb[38].mxu1  ;;  %v841_v6 = vpop.f32.mrb[39].mxu0  ;;  %v913_v52 = vmul.f32 %v1892_v30, %v1892_v30  ;;  %v918_v4 = vmul.f32 %v1873_v22, %v1873_v22 }
 0x142   :  { %v888_v44 = vadd.f32 %v887_v36, %v1897_v35  ;;  %v911_v45 = vmul.f32 %v1897_v35, %v1897_v35  ;;  %v925_v46 = vadd.f32 %v924_v33, %v910_v21  ;;  %v873_v47 = vpop.f32.mrb[39].mxu1  ;;  %v1908_v56 = vadd.f32 %v1464_v41, %v785_v5 }
 0x143   :  { %v1911_v48 = vadd.f32 %v841_v6, %v1854_v57  ;;  %v1913_v50 = vadd.f32 %v873_v47, %v777_v53  ;;  %v914_v58 = vmul.f32 %v1903_v40, %v1903_v40  ;;  %v915_v53 = vmul.f32 %v1868_v16, %v1868_v16 }
 0x144   :  { %v926_v49 = vadd.f32 %v925_v46, %v911_v45  ;;  %v919_v10 = vmul.f32 %v1900_v39, %v1900_v39  ;;  %v921_v23 = vmul.f32 %v1894_v34, %v1894_v34  ;;  %v922_v43 = vmul.f32 %v1908_v56, %v1908_v56 }
 0x145   :  { %v889_v7 = vadd.f32 %v888_v44, %v1911_v48  ;;  %v912_v51 = vmul.f32 %v1911_v48, %v1911_v48  ;;  %v920_v18 = vmul.f32 %v1913_v50, %v1913_v50 }
 0x147   :  { %v890_v54 = vadd.f32 %v889_v7, %v1892_v30  ;;  %v927_v55 = vadd.f32 %v926_v49, %v912_v51 }
 0x149   :  { %v891_v57 = vadd.f32 %v890_v54, %v1903_v40  ;;  %v928_v59 = vadd.f32 %v927_v55, %v913_v52 }
 0x14b   :  { %v892_v60 = vadd.f32 %v891_v57, %v1868_v16  ;;  %v929_v61 = vadd.f32 %v928_v59, %v914_v58 }
 0x14d   :  { %v930_v63 = vadd.f32 %v929_v61, %v915_v53  ;;  %v893_v0 = vadd.f32 %v892_v60, %v1878_v24 }
 0x14f   :  { %v894_v2 = vadd.f32 %v893_v0, %v1863_v12  ;;  %v931_v3 = vadd.f32 %v930_v63, %v916_v62 }
 0x151   :  { %v895_v5 = vadd.f32 %v894_v2, %v1873_v22  ;;  %v932_v8 = vadd.f32 %v931_v3, %v917_v1 }
 0x153   :  { %v896_v11 = vadd.f32 %v895_v5, %v1900_v39  ;;  %v933_v14 = vadd.f32 %v932_v8, %v918_v4 }
 0x155   :  { %v897_v15 = vadd.f32 %v896_v11, %v1913_v50  ;;  %v934_v19 = vadd.f32 %v933_v14, %v919_v10 }
 0x157   :  { %v898_v28 = vadd.f32 %v897_v15, %v1894_v34  ;;  %v935_v20 = vadd.f32 %v934_v19, %v920_v18 }
 0x159   :  { %v899_v25 = vadd.f32 %v898_v28, %v1908_v56  ;;  %v936_v26 = vadd.f32 %v935_v20, %v921_v23 }
 0x15b   :  { %v900_v27 = vrot.slane %v899_v25, 4  ;;  %v937_v29 = vadd.f32 %v936_v26, %v922_v43  ;;  %v1209_v43 = vld [vmem:[%s1997_s3] ss:$0 sm:$0xff] }
 0x15d   :  { %v901_v21 = vadd.f32 %v900_v27, %v899_v25  ;;  %v938_v31 = vrot.slane %v937_v29, 4 }
 0x15f   :  { %v902_v32 = vrot.slane %v901_v21, 2  ;;  %v939_v33 = vadd.f32 %v938_v31, %v937_v29 }
 0x161   :  { %v903_v36 = vadd.f32 %v902_v32, %v901_v21  ;;  %v940_v37 = vrot.slane %v939_v33, 2 }
 0x163   :  { %v904_v38 = vrot.slane %v903_v36, 1  ;;  %v941_v41 = vadd.f32 %v940_v37, %v939_v33 }
 0x165   :  { %v905_v6 = vadd.f32 %v904_v38, %v903_v36  ;;  %v942_v44 = vrot.slane %v941_v41, 1 }
 0x167   :  { %v906_v45 = vmul.f32 0.0078125, %v905_v6  ;;  %v943_v46 = vadd.f32 %v942_v44, %v941_v41 }
 0x169   :  { %v944_v47 = vmul.f32 0.0078125, %v943_v46  ;;  %v945_v49 = vmul.f32 %v906_v45, %v906_v45  ;;  %v948_v7 = vsub.f32 %v1866_v13, %v906_v45  ;;  %v949_v51 = vsub.f32 %v1876_v42, %v906_v45 }
 0x16a   :  { %v950_v52 = vsub.f32 %v1861_v9, %v906_v45  ;;  %v951_v54 = vsub.f32 %v1871_v17, %v906_v45  ;;  %v952_v55 = vsub.f32 %v1897_v35, %v906_v45  ;;  %v953_v58 = vsub.f32 %v1911_v48, %v906_v45 }
 0x16b   :  { %v946_v57 = vsub.f32 %v944_v47, %v945_v49  ;;  %v954_v59 = vsub.f32 %v1892_v30, %v906_v45  ;;  %v955_v53 = vsub.f32 %v1903_v40, %v906_v45  ;;  %v956_v60 = vsub.f32 %v1868_v16, %v906_v45 }
 0x16c   :  { %v957_v61 = vsub.f32 %v1878_v24, %v906_v45  ;;  %v958_v13 = vsub.f32 %v1863_v12, %v906_v45  ;;  %v959_v42 = vsub.f32 %v1873_v22, %v906_v45  ;;  %v960_v9 = vsub.f32 %v1900_v39, %v906_v45  ;;  %v1208_v39 = vld [vmem:[%s1996_s2] ss:$0 sm:$0xff] }
 0x16d   :  { %v947_v17 = vmax.f32 %v946_v57, 0.0  ;;  %v961_v35 = vsub.f32 %v1913_v50, %v906_v45  ;;  %v962_v48 = vsub.f32 %v1894_v34, %v906_v45  ;;  %v963_v62 = vsub.f32 %v1908_v56, %v906_v45 }
 0x16f   :  { %v964_v30 = vadd.f32 1e-05, %v947_v17 }
 0x171   :  { %1577 = vrsqrt.f32 %v964_v30 }
 0x17b   :  { %v1578_v40 = vpop.eup %1577 }
 0x17c   :  { %v966_v63 = vmul.f32 %v1578_v40, %v948_v7  ;;  %v967_v16 = vmul.f32 %v1578_v40, %v949_v51  ;;  %v968_v0 = vmul.f32 %v1578_v40, %v950_v52  ;;  %v969_v24 = vmul.f32 %v1578_v40, %v951_v54 }
 0x17d   :  { %v970_v1 = vmul.f32 %v1578_v40, %v952_v55  ;;  %v971_v12 = vmul.f32 %v1578_v40, %v953_v58  ;;  %v972_v2 = vmul.f32 %v1578_v40, %v954_v59  ;;  %v973_v22 = vmul.f32 %v1578_v40, %v955_v53 }
 0x17e   :  { %v974_v50 = vmul.f32 %v1578_v40, %v956_v60  ;;  %v975_v3 = vmul.f32 %v1578_v40, %v957_v61  ;;  %v976_v34 = vmul.f32 %v1578_v40, %v958_v13  ;;  %v977_v4 = vmul.f32 %v1578_v40, %v959_v42 }
 0x17f   :  { %v978_v56 = vmul.f32 %v1578_v40, %v960_v9  ;;  %v979_v5 = vmul.f32 %v1578_v40, %v961_v35  ;;  %v980_v8 = vmul.f32 %v1578_v40, %v962_v48  ;;  %v981_v10 = vmul.f32 %v1578_v40, %v963_v62 }
 0x180   :  { %v989_v11 = vmul.f32 %v1208_v39, %v966_v63  ;;  %v990_v14 = vmul.f32 %v1208_v39, %v967_v16  ;;  %v991_v15 = vmul.f32 %v1208_v39, %v968_v0  ;;  %v992_v18 = vmul.f32 %v1208_v39, %v969_v24 }
 0x181   :  { %v993_v19 = vmul.f32 %v1208_v39, %v970_v1  ;;  %v994_v23 = vmul.f32 %v1208_v39, %v971_v12  ;;  %v995_v28 = vmul.f32 %v1208_v39, %v972_v2  ;;  %v996_v20 = vmul.f32 %v1208_v39, %v973_v22 }
 0x182   :  { %v997_v25 = vmul.f32 %v1208_v39, %v974_v50  ;;  %v998_v26 = vmul.f32 %v1208_v39, %v975_v3  ;;  %v999_v27 = vmul.f32 %v1208_v39, %v976_v34  ;;  %v1000_v29 = vmul.f32 %v1208_v39, %v977_v4 }
 0x183   :  { %v1001_v21 = vmul.f32 %v1208_v39, %v978_v56  ;;  %v1002_v31 = vmul.f32 %v1208_v39, %v979_v5  ;;  %v1003_v32 = vmul.f32 %v1208_v39, %v980_v8  ;;  %v1004_v33 = vmul.f32 %v1208_v39, %v981_v10 }
 0x184   :  { %v1012_v36 = vadd.f32 %v1209_v43, %v989_v11  ;;  %v1013_v37 = vadd.f32 %v1209_v43, %v990_v14  ;;  %v1014_v38 = vadd.f32 %v1209_v43, %v991_v15  ;;  %v1015_v41 = vadd.f32 %v1209_v43, %v992_v18 }
 0x185   :  { %v1016_v6 = vadd.f32 %v1209_v43, %v993_v19  ;;  %v1017_v44 = vadd.f32 %v1209_v43, %v994_v23  ;;  %v1018_v45 = vadd.f32 %v1209_v43, %v995_v28  ;;  %v1019_v46 = vadd.f32 %v1209_v43, %v996_v20 }
 0x186   :  { %v1020_v47 = vadd.f32 %v1209_v43, %v997_v25  ;;  %v1021_v49 = vadd.f32 %v1209_v43, %v998_v26  ;;  %v1022_v7 = vadd.f32 %v1209_v43, %v999_v27  ;;  %v1023_v51 = vadd.f32 %v1209_v43, %v1000_v29 }
 0x187   :  { %v1024_v52 = vadd.f32 %v1209_v43, %v1001_v21  ;;  %v1025_v54 = vadd.f32 %v1209_v43, %v1002_v31  ;;  %v1026_v55 = vadd.f32 %v1209_v43, %v1003_v32  ;;  %v1027_v58 = vadd.f32 %v1209_v43, %v1004_v33 }
 0x188   :  { %v1028_v57 = vmax.f32 %v1012_v36, 0.0  ;;  %v1029_v59 = vmax.f32 %v1013_v37, 0.0  ;;  %v1030_v53 = vmax.f32 %v1014_v38, 0.0  ;;  %v1031_v60 = vmax.f32 %v1015_v41, 0.0 }
 0x189   :  { %v1032_v61 = vmax.f32 %v1016_v6, 0.0  ;;  %v1033_v13 = vmax.f32 %v1017_v44, 0.0  ;;  %v1034_v42 = vmax.f32 %v1018_v45, 0.0  ;;  %v1035_v9 = vmax.f32 %v1019_v46, 0.0 }
 0x18a   :  { %v1036_v17 = vmax.f32 %v1020_v47, 0.0  ;;  %v1037_v35 = vmax.f32 %v1021_v49, 0.0  ;;  %v1038_v48 = vmax.f32 %v1022_v7, 0.0  ;;  %v1039_v62 = vmax.f32 %v1023_v51, 0.0 }
 0x18b   :  { %v1040_v30 = vmax.f32 %v1024_v52, 0.0  ;;  %v1041_v40 = vmax.f32 %v1025_v54, 0.0  ;;  %v1042_v63 = vmax.f32 %v1026_v55, 0.0  ;;  %v1043_v16 = vmax.f32 %v1027_v58, 0.0 }
 0x18c   :  { %v1245_v0 = vpack.c.bf16 %v1029_v59, %v1028_v57  ;;  %v1250_v24 = vpack.c.bf16 %v1031_v60, %v1030_v53  ;;  %v1255_v1 = vpack.c.bf16 %v1033_v13, %v1032_v61  ;;  %v1260_v12 = vpack.c.bf16 %v1035_v9, %v1034_v42 }
 0x18d   :  { %v1265_v2 = vpack.c.bf16 %v1037_v35, %v1036_v17  ;;  %v1270_v22 = vpack.c.bf16 %v1039_v62, %v1038_v48  ;;  %v1275_v39 = vpack.c.bf16 %v1041_v40, %v1040_v30  ;;  %v1280_v50 = vpack.c.bf16 %v1043_v16, %v1042_v63 }
 0x18e   :  { %1246 = vst [vmem:[%s1998_s4] sm:$0xff] %v1245_v0   ;;  %1282 = vst [vmem:[%s1998_s4 + $0x8] sm:$0xff] %v1250_v24  }
 0x18f   :  { %1283 = vst [vmem:[%s1998_s4 + $0x10] sm:$0xff] %v1255_v1   ;;  %1284 = vst [vmem:[%s1998_s4 + $0x18] sm:$0xff] %v1260_v12  }
 0x190   :  { %1285 = vst [vmem:[%s1998_s4 + $0x20] sm:$0xff] %v1265_v2   ;;  %1286 = vst [vmem:[%s1998_s4 + $0x28] sm:$0xff] %v1270_v22  }
 0x191   :  { %1287 = vst [vmem:[%s1998_s4 + $0x30] sm:$0xff] %v1275_v39   ;;  %1288 = vst [vmem:[%s1998_s4 + $0x38] sm:$0xff] %v1280_v50  }

// kernel: birdnet_forward.47
= control target key start
LH: loop header
LB: loop body
LE: loop exit
PB: predicated region body
PF: predicated region fallthrough
CT: control target
= control target key end

     0   :  { %s370_s1 = inlined_call_operand.vmem [shape: bf16[128,128], index: 1, kind: input, shape index: {}]   ;;  %s371_s0 = inlined_call_operand.vmem [shape: bf16[32,128], index: 0, kind: input, shape index: {}]   ;;  %s372_s2 = inlined_call_operand.vmem [shape: f32[1,128], index: 2, kind: input, shape index: {}]   ;;  %s373_s3 = inlined_call_operand.vmem [shape: f32[1,128], index: 3, kind: input, shape index: {}]   ;;  %s374_s4 = inlined_call_operand.vmem [shape: bf16[32,128], index: 4, kind: output, shape index: {}]  }
   0x1   :  { %v291_v0 = vld [vmem:[%s370_s1] sm:$0xff]   ;;  %v292_v1 = vld [vmem:[%s370_s1 + $0x8] sm:$0xff]   ;;  %v293_v2 = vld [vmem:[%s370_s1 + $0x10] sm:$0xff]  }
   0x2   :  { %271 = vmatprep.subr.bf16.mxu0 %v291_v0  ;;  %v294_v3 = vld [vmem:[%s370_s1 + $0x18] sm:$0xff]   ;;  %v299_v4 = vld [vmem:[%s371_s0] sm:$0xff]   ;;  %v296_v6 = vld [vmem:[%s370_s1 + $0x28] sm:$0xff]  }
   0x3   :  { %272 = vmatpush3.bf16.msra.mxu0 %v291_v0  ;;  %287 = vmatprep.mubr.bf16.mxu0 %v299_v4  ;;  %v295_v5 = vld [vmem:[%s370_s1 + $0x20] sm:$0xff]   ;;  %v297_v7 = vld [vmem:[%s370_s1 + $0x30] sm:$0xff]   ;;  %v298_v8 = vld [vmem:[%s370_s1 + $0x38] sm:$0xff]  }
   0x4   :  { %273 = vmatprep.subr.bf16.mxu0 %v292_v1  ;;  %v300_v9 = vld [vmem:[%s371_s0 + $0x8] sm:$0xff]   ;;  %v240_v47 = vld [vmem:[%s372_s2] ss:$0 sm:$0xff] }
   0x5   :  { %v241_v52 = vld [vmem:[%s373_s3] ss:$0 sm:$0xff] }
   0x7   :  { %274 = vmatpush3.bf16.msra.mxu0 %v292_v1 }
   0x8   :  { %275 = vmatprep.subr.bf16.mxu0 %v293_v2 }
   0xb   :  { %276 = vmatpush3.bf16.msra.mxu0 %v293_v2 }
   0xc   :  { %277 = vmatprep.subr.bf16.mxu0 %v294_v3 }
   0xf   :  { %278 = vmatpush3.bf16.msra.mxu0 %v294_v3 }
  0x10   :  { %279 = vmatprep.subr.bf16.mxu0 %v295_v5 }
  0x13   :  { %280 = vmatpush3.bf16.msra.mxu0 %v295_v5 }
  0x14   :  { %281 = vmatprep.subr.bf16.mxu0 %v296_v6 }
  0x17   :  { %282 = vmatpush3.bf16.msra.mxu0 %v296_v6 }
  0x18   :  { %283 = vmatprep.subr.bf16.mxu0 %v297_v7 }
  0x1b   :  { %284 = vmatpush3.bf16.msra.mxu0 %v297_v7 }
  0x1c   :  { %285 = vmatprep.subr.bf16.mxu0 %v298_v8 }
  0x1f   :  { %286 = vmatpush3.bf16.msra.mxu0 %v298_v8 }
  0x22   :  { %288 = vmatmul.mubr.bf16.vlgmr.msra.gmra.mrb[0].mxu0 %v300_v9 }
  0xf5   :  { %v289_v10 = vpop.f32.mrb[0].mxu0 }
  0xf6   :  { %v132_v11 = vpop.f32.mrb[1].mxu0  ;;  %v159_v17 = vmul.f32 %v289_v10, %v289_v10 }
  0xf7   :  { %v290_v12 = vpop.f32.mrb[2].mxu0  ;;  %v157_v14 = vmul.f32 %v132_v11, %v132_v11 }
  0xf8   :  { %v135_v13 = vpop.f32.mrb[3].mxu0  ;;  %v160_v20 = vmul.f32 %v290_v12, %v290_v12 }
  0xf9   :  { %v147_v15 = vadd.f32 %v135_v13, %v132_v11  ;;  %v158_v16 = vmul.f32 %v135_v13, %v135_v13 }
  0xfb   :  { %v148_v18 = vadd.f32 %v289_v10, %v147_v15  ;;  %v161_v19 = vadd.f32 %v158_v16, %v157_v14 }
  0xfd   :  { %v149_v21 = vadd.f32 %v290_v12, %v148_v18  ;;  %v162_v22 = vadd.f32 %v161_v19, %v159_v17 }
  0xff   :  { %v150_v23 = vrot.slane %v149_v21, 4  ;;  %v163_v24 = vadd.f32 %v162_v22, %v160_v20 }
 0x101   :  { %v151_v25 = vadd.f32 %v150_v23, %v149_v21  ;;  %v164_v26 = vrot.slane %v163_v24, 4 }
 0x103   :  { %v152_v27 = vrot.slane %v151_v25, 2  ;;  %v165_v28 = vadd.f32 %v164_v26, %v163_v24 }
 0x105   :  { %v153_v29 = vadd.f32 %v152_v27, %v151_v25  ;;  %v166_v30 = vrot.slane %v165_v28, 2 }
 0x107   :  { %v154_v31 = vrot.slane %v153_v29, 1  ;;  %v167_v32 = vadd.f32 %v166_v30, %v165_v28 }
 0x109   :  { %v155_v33 = vadd.f32 %v154_v31, %v153_v29  ;;  %v168_v34 = vrot.slane %v167_v32, 1 }
 0x10b   :  { %v156_v35 = vmul.f32 0.03125, %v155_v33  ;;  %v169_v36 = vadd.f32 %v168_v34, %v167_v32 }
 0x10d   :  { %v170_v37 = vmul.f32 0.03125, %v169_v36  ;;  %v171_v38 = vmul.f32 %v156_v35, %v156_v35  ;;  %v174_v39 = vsub.f32 %v132_v11, %v156_v35  ;;  %v175_v40 = vsub.f32 %v135_v13, %v156_v35 }
 0x10e   :  { %v176_v41 = vsub.f32 %v289_v10, %v156_v35  ;;  %v177_v42 = vsub.f32 %v290_v12, %v156_v35 }
 0x10f   :  { %v172_v43 = vsub.f32 %v170_v37, %v171_v38 }
 0x111   :  { %v173_v44 = vmax.f32 %v172_v43, 0.0 }
 0x113   :  { %v178_v45 = vadd.f32 1e-05, %v173_v44 }
 0x115   :  { %301 = vrsqrt.f32 %v178_v45 }
 0x11f   :  { %v302_v46 = vpop.eup %301 }
 0x120   :  { %v180_v48 = vmul.f32 %v302_v46, %v174_v39  ;;  %v181_v49 = vmul.f32 %v302_v46, %v175_v40  ;;  %v182_v50 = vmul.f32 %v302_v46, %v176_v41  ;;  %v183_v51 = vmul.f32 %v302_v46, %v177_v42 }
 0x122   :  { %v191_v53 = vmul.f32 %v240_v47, %v180_v48  ;;  %v192_v54 = vmul.f32 %v240_v47, %v181_v49  ;;  %v193_v55 = vmul.f32 %v240_v47, %v182_v50  ;;  %v194_v56 = vmul.f32 %v240_v47, %v183_v51 }
 0x124   :  { %v202_v57 = vadd.f32 %v241_v52, %v191_v53  ;;  %v203_v58 = vadd.f32 %v241_v52, %v192_v54  ;;  %v204_v59 = vadd.f32 %v241_v52, %v193_v55  ;;  %v205_v60 = vadd.f32 %v241_v52, %v194_v56 }
 0x126   :  { %v253_v61 = vpack.c.bf16 %v203_v58, %v202_v57  ;;  %v258_v62 = vpack.c.bf16 %v205_v60, %v204_v59 }
 0x128   :  { %254 = vst [vmem:[%s374_s4] sm:$0xff] %v253_v61   ;;  %260 = vst [vmem:[%s374_s4 + $0x8] sm:$0xff] %v258_v62  }

// kernel: birdnet_forward.46
= control target key start
LH: loop header
LB: loop body
LE: loop exit
PB: predicated region body
PF: predicated region fallthrough
CT: control target
= control target key end

     0   :  { %s1036_s1 = inlined_call_operand.vmem [shape: bf16[640,128], index: 1, kind: input, shape index: {}]   ;;  %s1037_s0 = inlined_call_operand.vmem [shape: bf16[32,640], index: 0, kind: input, shape index: {}]   ;;  %s1038_s2 = inlined_call_operand.vmem [shape: f32[1,128], index: 2, kind: input, shape index: {}]   ;;  %s1039_s3 = inlined_call_operand.vmem [shape: f32[1,128], index: 3, kind: input, shape index: {}]   ;;  %s1040_s4 = inlined_call_operand.vmem [shape: bf16[32,128], index: 4, kind: output, shape index: {}]  }
   0x1   :  { %v793_v0 = vld [vmem:[%s1036_s1 + $0x40] sm:$0xff]   ;;  %v797_v4 = vld [vmem:[%s1036_s1 + $0x48] sm:$0xff]   ;;  %v801_v8 = vld [vmem:[%s1036_s1 + $0x50] sm:$0xff]  }
   0x2   :  { %v794_v1 = vld [vmem:[%s1036_s1 + $0xc0] sm:$0xff]   ;;  %707 = vmatprep.subr.bf16.mxu0 %v793_v0  ;;  %v798_v5 = vld [vmem:[%s1036_s1 + $0xc8] sm:$0xff]   ;;  %v802_v9 = vld [vmem:[%s1036_s1 + $0xd0] sm:$0xff]  }
   0x3   :  { %v795_v2 = vld [vmem:[%s1036_s1] sm:$0xff]   ;;  %735 = vmatprep.subr.bf16.mxu1 %v794_v1  ;;  %v799_v6 = vld [vmem:[%s1036_s1 + $0x8] sm:$0xff]   ;;  %v803_v10 = vld [vmem:[%s1036_s1 + $0x10] sm:$0xff]  }
   0x4   :  { %v796_v3 = vld [vmem:[%s1036_s1 + $0x80] sm:$0xff]   ;;  %708 = vmatpush3.bf16.msra.mxu0 %v795_v2  ;;  %v800_v7 = vld [vmem:[%s1036_s1 + $0x88] sm:$0xff]   ;;  %v804_v11 = vld [vmem:[%s1036_s1 + $0x90] sm:$0xff]  }
   0x5   :  { %736 = vmatpush3.bf16.msra.mxu1 %v796_v3  ;;  %709 = vmatprep.subr.bf16.mxu0 %v797_v4  ;;  %v805_v12 = vld [vmem:[%s1036_s1 + $0x58] sm:$0xff]   ;;  %v809_v16 = vld [vmem:[%s1036_s1 + $0x60] sm:$0xff]   ;;  %v813_v20 = vld [vmem:[%s1036_s1 + $0x68] sm:$0xff]  }
   0x6   :  { %737 = vmatprep.subr.bf16.mxu1 %v798_v5  ;;  %v806_v13 = vld [vmem:[%s1036_s1 + $0xd8] sm:$0xff]   ;;  %v810_v17 = vld [vmem:[%s1036_s1 + $0xe0] sm:$0xff]   ;;  %v814_v21 = vld [vmem:[%s1036_s1 + $0xe8] sm:$0xff]  }
   0x7   :  { %v807_v14 = vld [vmem:[%s1036_s1 + $0x18] sm:$0xff]   ;;  %v811_v18 = vld [vmem:[%s1036_s1 + $0x20] sm:$0xff]   ;;  %v815_v22 = vld [vmem:[%s1036_s1 + $0x28] sm:$0xff]  }
   0x8   :  { %710 = vmatpush3.bf16.msra.mxu0 %v799_v6  ;;  %v808_v15 = vld [vmem:[%s1036_s1 + $0x98] sm:$0xff]   ;;  %v812_v19 = vld [vmem:[%s1036_s1 + $0xa0] sm:$0xff]   ;;  %v816_v23 = vld [vmem:[%s1036_s1 + $0xa8] sm:$0xff]  }
   0x9   :  { %738 = vmatpush3.bf16.msra.mxu1 %v800_v7  ;;  %711 = vmatprep.subr.bf16.mxu0 %v801_v8  ;;  %v817_v24 = vld [vmem:[%s1036_s1 + $0x70] sm:$0xff]   ;;  %v821_v28 = vld [vmem:[%s1036_s1 + $0x78] sm:$0xff]   ;;  %v830_v35 = vld [vmem:[%s1037_s0 + $0xc] ss:$20 sps:$4 sm:$0xff]  }
   0xa   :  { %739 = vmatprep.subr.bf16.mxu1 %v802_v9  ;;  %v818_v25 = vld [vmem:[%s1036_s1 + $0xf0] sm:$0xff]   ;;  %v822_v29 = vld [vmem:[%s1036_s1 + $0xf8] sm:$0xff]   ;;  %v831_v36 = vld [vmem:[%s1036_s1 + $0x100] sm:$0xff]   ;;  %483 = vmatprep.mubr.bf16.mxu1 %v830_v35 }
   0xb   :  { %v819_v26 = vld [vmem:[%s1036_s1 + $0x30] sm:$0xff]   ;;  %v823_v30 = vld [vmem:[%s1036_s1 + $0x38] sm:$0xff]   ;;  %v832_v37 = vld [vmem:[%s1036_s1 + $0x108] sm:$0xff]  }
   0xc   :  { %712 = vmatpush3.bf16.msra.mxu0 %v803_v10  ;;  %v820_v27 = vld [vmem:[%s1036_s1 + $0xb0] sm:$0xff]   ;;  %v824_v31 = vld [vmem:[%s1036_s1 + $0xb8] sm:$0xff]   ;;  %v836_v39 = vld [vmem:[%s1037_s0 + $0x2c] ss:$20 sps:$4 sm:$0xff]  }
   0xd   :  { %740 = vmatpush3.bf16.msra.mxu1 %v804_v11  ;;  %713 = vmatprep.subr.bf16.mxu0 %v805_v12  ;;  %v825_v32 = vld [vmem:[%s1037_s0] ss:$20 sps:$4 sm:$0xff]   ;;  %v827_v33 = vld [vmem:[%s1037_s0 + $0x4] ss:$20 sps:$4 sm:$0xff]   ;;  %v828_v34 = vld [vmem:[%s1037_s0 + $0x8] ss:$20 sps:$4 sm:$0xff]  }
   0xe   :  { %741 = vmatprep.subr.bf16.mxu1 %v806_v13  ;;  %434 = vmatprep.mubr.bf16.mxu0 %v827_v33  ;;  %v833_v38 = vld [vmem:[%s1036_s1 + $0x110] sm:$0xff]   ;;  %v834_v41 = vld [vmem:[%s1036_s1 + $0x118] sm:$0xff]   ;;  %v835_v45 = vld [vmem:[%s1036_s1 + $0x120] sm:$0xff]  }
   0xf   :  { %v838_v40 = vld [vmem:[%s1037_s0 + $0x34] ss:$20 sps:$4 sm:$0xff]   ;;  %v842_v43 = vld [vmem:[%s1037_s0 + $0x30] ss:$20 sps:$4 sm:$0xff]   ;;  %v844_v48 = vld [vmem:[%s1036_s1 + $0x138] sm:$0xff]  }
  0x10   :  { %714 = vmatpush3.bf16.msra.mxu0 %v807_v14  ;;  %v841_v42 = vld [vmem:[%s1037_s0 + $0x28] ss:$20 sps:$4 sm:$0xff]   ;;  %v845_v44 = vld [vmem:[%s1037_s0 + $0x10] ss:$20 sps:$4 sm:$0xff]   ;;  %v846_v49 = vld [vmem:[%s1037_s0 + $0x38] ss:$20 sps:$4 sm:$0xff]  }
  0x11   :  { %742 = vmatpush3.bf16.msra.mxu1 %v808_v15  ;;  %715 = vmatprep.subr.bf16.mxu0 %v809_v16  ;;  %v840_v46 = vld [vmem:[%s1036_s1 + $0x128] sm:$0xff]   ;;  %v843_v47 = vld [vmem:[%s1036_s1 + $0x130] sm:$0xff]  }
  0x12   :  { %743 = vmatprep.subr.bf16.mxu1 %v810_v17 }
  0x14   :  { %716 = vmatpush3.bf16.msra.mxu0 %v811_v18 }
  0x15   :  { %744 = vmatpush3.bf16.msra.mxu1 %v812_v19  ;;  %717 = vmatprep.subr.bf16.mxu0 %v813_v20 }
  0x16   :  { %745 = vmatprep.subr.bf16.mxu1 %v814_v21 }
  0x18   :  { %718 = vmatpush3.bf16.msra.mxu0 %v815_v22 }
  0x19   :  { %746 = vmatpush3.bf16.msra.mxu1 %v816_v23  ;;  %719 = vmatprep.subr.bf16.mxu0 %v817_v24 }
  0x1a   :  { %747 = vmatprep.subr.bf16.mxu1 %v818_v25 }
  0x1c   :  { %720 = vmatpush3.bf16.msra.mxu0 %v819_v26 }
  0x1d   :  { %748 = vmatpush3.bf16.msra.mxu1 %v820_v27  ;;  %721 = vmatprep.subr.bf16.mxu0 %v821_v28 }
  0x1e   :  { %749 = vmatprep.subr.bf16.mxu1 %v822_v29 }
  0x20   :  { %722 = vmatpush3.bf16.msra.mxu0 %v823_v30 }
  0x21   :  { %750 = vmatpush3.bf16.msra.mxu1 %v824_v31  ;;  %773 = vmatprep.subr.bf16.mxu0 %v831_v36 }
  0x23   :  { %435 = vmatmul.mubr.bf16.vlgmr.msra.gmra.mrb[0].mxu0 %v825_v32 }
  0x24   :  { %484 = vmatmul.mubr.bf16.vlgmr.msra.gmra.mrb[0].mxu1 %v828_v34  ;;  %774 = vmatpush3.bf16.msra.mxu0 %v831_v36 }
  0x25   :  { %775 = vmatprep.subr.bf16.mxu0 %v832_v37  ;;  %442 = vmatprep.mubr.bf16.mxu0 %v836_v39 }
  0x26   :  { %491 = vmatprep.mubr.bf16.mxu1 %v838_v40 }
  0x28   :  { %776 = vmatpush3.bf16.msra.mxu0 %v832_v37 }
  0x29   :  { %777 = vmatprep.subr.bf16.mxu0 %v833_v38 }
  0x2b   :  { %443 = vmatmul.mubr.bf16.gmra.mrb[4].mxu0 %v841_v42 }
  0x2c   :  { %492 = vmatmul.mubr.bf16.gmra.mrb[4].mxu1 %v842_v43  ;;  %778 = vmatpush3.bf16.msra.mxu0 %v833_v38 }
  0x2d   :  { %779 = vmatprep.subr.bf16.mxu0 %v834_v41  ;;  %789 = vmatprep.mubr.bf16.mxu0 %v845_v44 }
  0x30   :  { %780 = vmatpush3.bf16.msra.mxu0 %v834_v41 }
  0x31   :  { %781 = vmatprep.subr.bf16.mxu0 %v835_v45 }
  0x34   :  { %782 = vmatpush3.bf16.msra.mxu0 %v835_v45 }
  0x35   :  { %783 = vmatprep.subr.bf16.mxu0 %v840_v46 }
  0x38   :  { %784 = vmatpush3.bf16.msra.mxu0 %v840_v46 }
  0x39   :  { %785 = vmatprep.subr.bf16.mxu0 %v843_v47 }
  0x3c   :  { %786 = vmatpush3.bf16.msra.mxu0 %v843_v47 }
  0x3d   :  { %787 = vmatprep.subr.bf16.mxu0 %v844_v48 }
  0x40   :  { %788 = vmatpush3.bf16.msra.mxu0 %v844_v48 }
  0x43   :  { %790 = vmatmul.mubr.bf16.vlgmr.msra.gmra.mrb[8].mxu0 %v846_v49 }
  0xf6   :  { %v723_v50 = vpop.f32.mrb[0].mxu0 }
  0xf7   :  { %v751_v51 = vpop.f32.mrb[0].mxu1  ;;  %v724_v52 = vpop.f32.mrb[1].mxu0 }
  0xf8   :  { %v725_v53 = vadd.f32 %v724_v52, %v723_v50  ;;  %v752_v54 = vpop.f32.mrb[1].mxu1  ;;  %v726_v55 = vpop.f32.mrb[2].mxu0 }
  0xf9   :  { %v753_v56 = vadd.f32 %v752_v54, %v751_v51  ;;  %v754_v57 = vpop.f32.mrb[2].mxu1  ;;  %v727_v58 = vpop.f32.mrb[3].mxu0 }
  0xfa   :  { %v728_v59 = vadd.f32 %v727_v58, %v726_v55  ;;  %v755_v60 = vpop.f32.mrb[3].mxu1  ;;  %v686_v55 = vld [vmem:[%s1038_s2] ss:$0 sm:$0xff] }
  0xfb   :  { %v756_v61 = vadd.f32 %v755_v60, %v754_v57  ;;  %v486_v62 = vadd.f32 %v753_v56, %v725_v53  ;;  %v687_v60 = vld [vmem:[%s1039_s3] ss:$0 sm:$0xff] }
  0xfd   :  { %v489_v63 = vadd.f32 %v756_v61, %v728_v59 }
  0xfe   :  { %v729_v0 = vpop.f32.mrb[4].mxu0 }
  0xff   :  { %v757_v1 = vpop.f32.mrb[4].mxu1  ;;  %v730_v2 = vpop.f32.mrb[5].mxu0 }
 0x100   :  { %v731_v3 = vadd.f32 %v730_v2, %v729_v0  ;;  %v758_v4 = vpop.f32.mrb[5].mxu1  ;;  %v732_v5 = vpop.f32.mrb[6].mxu0 }
 0x101   :  { %v759_v6 = vadd.f32 %v758_v4, %v757_v1  ;;  %v760_v7 = vpop.f32.mrb[6].mxu1  ;;  %v733_v8 = vpop.f32.mrb[7].mxu0 }
 0x102   :  { %v734_v9 = vadd.f32 %v733_v8, %v732_v5  ;;  %v761_v10 = vpop.f32.mrb[7].mxu1 }
 0x103   :  { %v762_v11 = vadd.f32 %v761_v10, %v760_v7  ;;  %v494_v12 = vadd.f32 %v759_v6, %v731_v3 }
 0x105   :  { %v497_v13 = vadd.f32 %v762_v11, %v734_v9 }
 0x116   :  { %v791_v14 = vpop.f32.mrb[8].mxu0 }
 0x117   :  { %v543_v15 = vadd.f32 %v791_v14, %v494_v12  ;;  %v534_v16 = vpop.f32.mrb[9].mxu0 }
 0x118   :  { %v535_v17 = vadd.f32 %v534_v16, %v486_v62  ;;  %v792_v18 = vpop.f32.mrb[10].mxu0 }
 0x119   :  { %v546_v19 = vadd.f32 %v792_v18, %v497_v13  ;;  %v537_v20 = vpop.f32.mrb[11].mxu0  ;;  %v561_v25 = vmul.f32 %v543_v15, %v543_v15 }
 0x11a   :  { %v538_v21 = vadd.f32 %v537_v20, %v489_v63  ;;  %v559_v22 = vmul.f32 %v535_v17, %v535_v17 }
 0x11b   :  { %v562_v28 = vmul.f32 %v546_v19, %v546_v19 }
 0x11c   :  { %v549_v23 = vadd.f32 %v538_v21, %v535_v17  ;;  %v560_v24 = vmul.f32 %v538_v21, %v538_v21 }
 0x11e   :  { %v550_v26 = vadd.f32 %v549_v23, %v543_v15  ;;  %v563_v27 = vadd.f32 %v560_v24, %v559_v22 }
 0x120   :  { %v551_v29 = vadd.f32 %v550_v26, %v546_v19  ;;  %v564_v30 = vadd.f32 %v563_v27, %v561_v25 }
 0x122   :  { %v552_v31 = vrot.slane %v551_v29, 4  ;;  %v565_v32 = vadd.f32 %v564_v30, %v562_v28 }
 0x124   :  { %v553_v33 = vadd.f32 %v552_v31, %v551_v29  ;;  %v566_v34 = vrot.slane %v565_v32, 4 }
 0x126   :  { %v554_v35 = vrot.slane %v553_v33, 2  ;;  %v567_v36 = vadd.f32 %v566_v34, %v565_v32 }
 0x128   :  { %v555_v37 = vadd.f32 %v554_v35, %v553_v33  ;;  %v568_v38 = vrot.slane %v567_v36, 2 }
 0x12a   :  { %v556_v39 = vrot.slane %v555_v37, 1  ;;  %v569_v40 = vadd.f32 %v568_v38, %v567_v36 }
 0x12c   :  { %v557_v41 = vadd.f32 %v556_v39, %v555_v37  ;;  %v570_v42 = vrot.slane %v569_v40, 1 }
 0x12e   :  { %v558_v43 = vmul.f32 0.03125, %v557_v41  ;;  %v571_v44 = vadd.f32 %v570_v42, %v569_v40 }
 0x130   :  { %v572_v45 = vmul.f32 0.03125, %v571_v44  ;;  %v573_v46 = vmul.f32 %v558_v43, %v558_v43  ;;  %v576_v47 = vsub.f32 %v535_v17, %v558_v43  ;;  %v577_v48 = vsub.f32 %v538_v21, %v558_v43 }
 0x131   :  { %v578_v49 = vsub.f32 %v543_v15, %v558_v43  ;;  %v579_v50 = vsub.f32 %v546_v19, %v558_v43 }
 0x132   :  { %v574_v51 = vsub.f32 %v572_v45, %v573_v46 }
 0x134   :  { %v575_v52 = vmax.f32 %v574_v51, 0.0 }
 0x136   :  { %v580_v53 = vadd.f32 1e-05, %v575_v52 }
 0x138   :  { %847 = vrsqrt.f32 %v580_v53 }
 0x142   :  { %v848_v54 = vpop.eup %847 }
 0x143   :  { %v582_v56 = vmul.f32 %v848_v54, %v576_v47  ;;  %v583_v57 = vmul.f32 %v848_v54, %v577_v48  ;;  %v584_v58 = vmul.f32 %v848_v54, %v578_v49  ;;  %v585_v59 = vmul.f32 %v848_v54, %v579_v50 }
 0x145   :  { %v593_v61 = vmul.f32 %v686_v55, %v582_v56  ;;  %v594_v62 = vmul.f32 %v686_v55, %v583_v57  ;;  %v595_v63 = vmul.f32 %v686_v55, %v584_v58  ;;  %v596_v0 = vmul.f32 %v686_v55, %v585_v59 }
 0x147   :  { %v604_v1 = vadd.f32 %v687_v60, %v593_v61  ;;  %v605_v2 = vadd.f32 %v687_v60, %v594_v62  ;;  %v606_v3 = vadd.f32 %v687_v60, %v595_v63  ;;  %v607_v4 = vadd.f32 %v687_v60, %v596_v0 }
 0x149   :  { %v608_v5 = vmax.f32 %v604_v1, 0.0  ;;  %v609_v6 = vmax.f32 %v605_v2, 0.0  ;;  %v610_v7 = vmax.f32 %v606_v3, 0.0  ;;  %v611_v8 = vmax.f32 %v607_v4, 0.0 }
 0x14b   :  { %v699_v9 = vpack.c.bf16 %v609_v6, %v608_v5  ;;  %v704_v10 = vpack.c.bf16 %v611_v8, %v610_v7 }
 0x14d   :  { %700 = vst [vmem:[%s1040_s4] sm:$0xff] %v699_v9   ;;  %706 = vst [vmem:[%s1040_s4 + $0x8] sm:$0xff] %v704_v10  }

// kernel: birdnet_forward.48
= control target key start
LH: loop header
LB: loop body
LE: loop exit
PB: predicated region body
PF: predicated region fallthrough
CT: control target
= control target key end

     0   :  { %s1733_s1 = inlined_call_operand.vmem [shape: bf16[1152,128], index: 1, kind: input, shape index: {}]   ;;  %s1734_s0 = inlined_call_operand.vmem [shape: bf16[32,1152], index: 0, kind: input, shape index: {}]   ;;  %s1735_s4 = inlined_call_operand.vmem [shape: bf16[32,128], index: 4, kind: input, shape index: {}]   ;;  %s1736_s2 = inlined_call_operand.vmem [shape: f32[1,128], index: 2, kind: input, shape index: {}]   ;;  %s1737_s3 = inlined_call_operand.vmem [shape: f32[1,128], index: 3, kind: input, shape index: {}]   ;;  %s1738_s5 = inlined_call_operand.vmem [shape: bf16[32,128], index: 5, kind: output, shape index: {}]  }
   0x1   :  { %v1315_v0 = vld [vmem:[%s1733_s1 + $0x40] sm:$0xff]   ;;  %v1319_v4 = vld [vmem:[%s1733_s1 + $0x48] sm:$0xff]   ;;  %v1323_v8 = vld [vmem:[%s1733_s1 + $0x50] sm:$0xff]  }
   0x2   :  { %v1316_v1 = vld [vmem:[%s1733_s1 + $0xc0] sm:$0xff]   ;;  %1173 = vmatprep.subr.bf16.mxu0 %v1315_v0  ;;  %v1320_v5 = vld [vmem:[%s1733_s1 + $0xc8] sm:$0xff]   ;;  %v1324_v9 = vld [vmem:[%s1733_s1 + $0xd0] sm:$0xff]  }
   0x3   :  { %v1317_v2 = vld [vmem:[%s1733_s1] sm:$0xff]   ;;  %1201 = vmatprep.subr.bf16.mxu1 %v1316_v1  ;;  %v1321_v6 = vld [vmem:[%s1733_s1 + $0x8] sm:$0xff]   ;;  %v1325_v10 = vld [vmem:[%s1733_s1 + $0x10] sm:$0xff]  }
   0x4   :  { %v1318_v3 = vld [vmem:[%s1733_s1 + $0x80] sm:$0xff]   ;;  %1174 = vmatpush3.bf16.msra.mxu0 %v1317_v2  ;;  %v1322_v7 = vld [vmem:[%s1733_s1 + $0x88] sm:$0xff]   ;;  %v1326_v11 = vld [vmem:[%s1733_s1 + $0x90] sm:$0xff]  }
   0x5   :  { %1202 = vmatpush3.bf16.msra.mxu1 %v1318_v3  ;;  %1175 = vmatprep.subr.bf16.mxu0 %v1319_v4  ;;  %v1327_v12 = vld [vmem:[%s1733_s1 + $0x58] sm:$0xff]   ;;  %v1331_v16 = vld [vmem:[%s1733_s1 + $0x60] sm:$0xff]   ;;  %v1335_v20 = vld [vmem:[%s1733_s1 + $0x68] sm:$0xff]  }
   0x6   :  { %1203 = vmatprep.subr.bf16.mxu1 %v1320_v5  ;;  %v1328_v13 = vld [vmem:[%s1733_s1 + $0xd8] sm:$0xff]   ;;  %v1332_v17 = vld [vmem:[%s1733_s1 + $0xe0] sm:$0xff]   ;;  %v1336_v21 = vld [vmem:[%s1733_s1 + $0xe8] sm:$0xff]  }
   0x7   :  { %v1329_v14 = vld [vmem:[%s1733_s1 + $0x18] sm:$0xff]   ;;  %v1333_v18 = vld [vmem:[%s1733_s1 + $0x20] sm:$0xff]   ;;  %v1337_v22 = vld [vmem:[%s1733_s1 + $0x28] sm:$0xff]  }
   0x8   :  { %1176 = vmatpush3.bf16.msra.mxu0 %v1321_v6  ;;  %v1330_v15 = vld [vmem:[%s1733_s1 + $0x98] sm:$0xff]   ;;  %v1334_v19 = vld [vmem:[%s1733_s1 + $0xa0] sm:$0xff]   ;;  %v1338_v23 = vld [vmem:[%s1733_s1 + $0xa8] sm:$0xff]  }
   0x9   :  { %1204 = vmatpush3.bf16.msra.mxu1 %v1322_v7  ;;  %1177 = vmatprep.subr.bf16.mxu0 %v1323_v8  ;;  %v1339_v24 = vld [vmem:[%s1733_s1 + $0x70] sm:$0xff]   ;;  %v1343_v28 = vld [vmem:[%s1733_s1 + $0x78] sm:$0xff]   ;;  %v1347_v32 = vld [vmem:[%s1734_s0] ss:$36 sps:$4 sm:$0xff]  }
   0xa   :  { %1205 = vmatprep.subr.bf16.mxu1 %v1324_v9  ;;  %v1340_v25 = vld [vmem:[%s1733_s1 + $0xf0] sm:$0xff]   ;;  %v1344_v29 = vld [vmem:[%s1733_s1 + $0xf8] sm:$0xff]   ;;  %v1349_v33 = vld [vmem:[%s1734_s0 + $0x4] ss:$36 sps:$4 sm:$0xff]  }
   0xb   :  { %v1341_v26 = vld [vmem:[%s1733_s1 + $0x30] sm:$0xff]   ;;  %v1345_v30 = vld [vmem:[%s1733_s1 + $0x38] sm:$0xff]   ;;  %v1350_v34 = vld [vmem:[%s1734_s0 + $0x8] ss:$36 sps:$4 sm:$0xff]   ;;  %741 = vmatprep.mubr.bf16.mxu0 %v1349_v33 }
   0xc   :  { %1178 = vmatpush3.bf16.msra.mxu0 %v1325_v10  ;;  %v1342_v27 = vld [vmem:[%s1733_s1 + $0xb0] sm:$0xff]   ;;  %v1346_v31 = vld [vmem:[%s1733_s1 + $0xb8] sm:$0xff]   ;;  %v1353_v36 = vld [vmem:[%s1733_s1 + $0x140] sm:$0xff]  }
   0xd   :  { %1206 = vmatpush3.bf16.msra.mxu1 %v1326_v11  ;;  %1179 = vmatprep.subr.bf16.mxu0 %v1327_v12  ;;  %v1352_v35 = vld [vmem:[%s1734_s0 + $0xc] ss:$36 sps:$4 sm:$0xff]   ;;  %v1354_v37 = vld [vmem:[%s1733_s1 + $0x100] sm:$0xff]   ;;  %v1365_v48 = vld [vmem:[%s1733_s1 + $0x158] sm:$0xff]  }
   0xe   :  { %1207 = vmatprep.subr.bf16.mxu1 %v1328_v13  ;;  %790 = vmatprep.mubr.bf16.mxu1 %v1352_v35  ;;  %v1355_v38 = vld [vmem:[%s1733_s1 + $0x1c0] sm:$0xff]   ;;  %v1357_v40 = vld [vmem:[%s1733_s1 + $0x148] sm:$0xff]   ;;  %v1361_v44 = vld [vmem:[%s1733_s1 + $0x150] sm:$0xff]  }
   0xf   :  { %v1356_v39 = vld [vmem:[%s1733_s1 + $0x180] sm:$0xff]   ;;  %v1358_v41 = vld [vmem:[%s1733_s1 + $0x108] sm:$0xff]   ;;  %v1362_v45 = vld [vmem:[%s1733_s1 + $0x110] sm:$0xff]  }
  0x10   :  { %1180 = vmatpush3.bf16.msra.mxu0 %v1329_v14  ;;  %v1359_v42 = vld [vmem:[%s1733_s1 + $0x1c8] sm:$0xff]   ;;  %v1363_v46 = vld [vmem:[%s1733_s1 + $0x1d0] sm:$0xff]   ;;  %v1366_v49 = vld [vmem:[%s1733_s1 + $0x118] sm:$0xff]  }
  0x11   :  { %1208 = vmatpush3.bf16.msra.mxu1 %v1330_v15  ;;  %1181 = vmatprep.subr.bf16.mxu0 %v1331_v16  ;;  %v1360_v43 = vld [vmem:[%s1733_s1 + $0x188] sm:$0xff]   ;;  %v1364_v47 = vld [vmem:[%s1733_s1 + $0x190] sm:$0xff]   ;;  %v1367_v50 = vld [vmem:[%s1733_s1 + $0x1d8] sm:$0xff]  }
  0x12   :  { %1209 = vmatprep.subr.bf16.mxu1 %v1332_v17  ;;  %v1368_v51 = vld [vmem:[%s1733_s1 + $0x198] sm:$0xff]   ;;  %v1369_v52 = vld [vmem:[%s1733_s1 + $0x160] sm:$0xff]   ;;  %v1373_v56 = vld [vmem:[%s1733_s1 + $0x168] sm:$0xff]  }
  0x13   :  { %v1370_v53 = vld [vmem:[%s1733_s1 + $0x120] sm:$0xff]   ;;  %v1374_v57 = vld [vmem:[%s1734_s0 + $0x4c] ss:$36 sps:$4 sm:$0xff]   ;;  %v1376_v58 = vld [vmem:[%s1734_s0 + $0x54] ss:$36 sps:$4 sm:$0xff]  }
  0x14   :  { %1182 = vmatpush3.bf16.msra.mxu0 %v1333_v18  ;;  %v1371_v54 = vld [vmem:[%s1733_s1 + $0x1e0] sm:$0xff]   ;;  %v1378_v59 = vld [vmem:[%s1733_s1 + $0x128] sm:$0xff]   ;;  %v1380_v61 = vld [vmem:[%s1734_s0 + $0x50] ss:$36 sps:$4 sm:$0xff]  }
  0x15   :  { %1210 = vmatpush3.bf16.msra.mxu1 %v1334_v19  ;;  %1183 = vmatprep.subr.bf16.mxu0 %v1335_v20  ;;  %v1372_v55 = vld [vmem:[%s1733_s1 + $0x1a0] sm:$0xff]   ;;  %v1379_v60 = vld [vmem:[%s1734_s0 + $0x48] ss:$36 sps:$4 sm:$0xff]   ;;  %v1383_v0 = vld [vmem:[%s1733_s1 + $0x170] sm:$0xff]  }
  0x16   :  { %1211 = vmatprep.subr.bf16.mxu1 %v1336_v21  ;;  %v1381_v62 = vld [vmem:[%s1733_s1 + $0x1e8] sm:$0xff]   ;;  %v1384_v1 = vld [vmem:[%s1733_s1 + $0x130] sm:$0xff]   ;;  %v1387_v4 = vld [vmem:[%s1733_s1 + $0x178] sm:$0xff]  }
  0x17   :  { %v1382_v63 = vld [vmem:[%s1733_s1 + $0x1a8] sm:$0xff]   ;;  %v1385_v2 = vld [vmem:[%s1733_s1 + $0x1f0] sm:$0xff]   ;;  %v1388_v5 = vld [vmem:[%s1733_s1 + $0x138] sm:$0xff]  }
  0x18   :  { %1184 = vmatpush3.bf16.msra.mxu0 %v1337_v22  ;;  %v1386_v3 = vld [vmem:[%s1733_s1 + $0x1b0] sm:$0xff]   ;;  %v1389_v6 = vld [vmem:[%s1733_s1 + $0x1f8] sm:$0xff]   ;;  %v1394_v10 = vld [vmem:[%s1733_s1 + $0x200] sm:$0xff]  }
  0x19   :  { %1212 = vmatpush3.bf16.msra.mxu1 %v1338_v23  ;;  %1185 = vmatprep.subr.bf16.mxu0 %v1339_v24  ;;  %v1390_v7 = vld [vmem:[%s1734_s0 + $0x10] ss:$36 sps:$4 sm:$0xff]   ;;  %v1393_v9 = vld [vmem:[%s1733_s1 + $0x1b8] sm:$0xff]   ;;  %v1398_v13 = vld [vmem:[%s1733_s1 + $0x208] sm:$0xff]  }
  0x1a   :  { %1213 = vmatprep.subr.bf16.mxu1 %v1340_v25  ;;  %v1392_v8 = vld [vmem:[%s1734_s0 + $0x14] ss:$36 sps:$4 sm:$0xff]   ;;  %v1397_v12 = vld [vmem:[%s1734_s0 + $0x1c] ss:$36 sps:$4 sm:$0xff]   ;;  %v1403_v17 = vld [vmem:[%s1734_s0 + $0x64] ss:$36 sps:$4 sm:$0xff]  }
  0x1b   :  { %v1395_v11 = vld [vmem:[%s1734_s0 + $0x18] ss:$36 sps:$4 sm:$0xff]   ;;  %v1402_v16 = vld [vmem:[%s1733_s1 + $0x210] sm:$0xff]   ;;  %v1405_v18 = vld [vmem:[%s1734_s0 + $0x60] ss:$36 sps:$4 sm:$0xff]  }
  0x1c   :  { %1186 = vmatpush3.bf16.msra.mxu0 %v1341_v26  ;;  %v1399_v14 = vld [vmem:[%s1734_s0 + $0x5c] ss:$36 sps:$4 sm:$0xff]   ;;  %v1408_v22 = vld [vmem:[%s1733_s1 + $0x228] sm:$0xff]   ;;  %v1409_v23 = vld [vmem:[%s1733_s1 + $0x230] sm:$0xff]  }
  0x1d   :  { %1214 = vmatpush3.bf16.msra.mxu1 %v1342_v27  ;;  %1187 = vmatprep.subr.bf16.mxu0 %v1343_v28  ;;  %v1401_v15 = vld [vmem:[%s1734_s0 + $0x58] ss:$36 sps:$4 sm:$0xff]   ;;  %v1407_v20 = vld [vmem:[%s1733_s1 + $0x220] sm:$0xff]   ;;  %v1412_v25 = vld [vmem:[%s1734_s0 + $0x68] ss:$36 sps:$4 sm:$0xff]  }
  0x1e   :  { %1215 = vmatprep.subr.bf16.mxu1 %v1344_v29  ;;  %v1406_v19 = vld [vmem:[%s1733_s1 + $0x218] sm:$0xff]   ;;  %v1411_v21 = vld [vmem:[%s1734_s0 + $0x20] ss:$36 sps:$4 sm:$0xff]  }
  0x1f   :  { %v1410_v24 = vld [vmem:[%s1733_s1 + $0x238] sm:$0xff]  }
  0x20   :  { %1188 = vmatpush3.bf16.msra.mxu0 %v1345_v30 }
  0x21   :  { %1216 = vmatpush3.bf16.msra.mxu1 %v1346_v31  ;;  %1229 = vmatprep.subr.bf16.mxu0 %v1353_v36 }
  0x22   :  { %1257 = vmatprep.subr.bf16.mxu1 %v1355_v38 }
  0x23   :  { %742 = vmatmul.mubr.bf16.vlgmr.msra.gmra.mrb[0].mxu0 %v1347_v32 }
  0x24   :  { %791 = vmatmul.mubr.bf16.vlgmr.msra.gmra.mrb[0].mxu1 %v1350_v34  ;;  %1230 = vmatpush3.bf16.msra.mxu0 %v1354_v37 }
  0x25   :  { %1258 = vmatpush3.bf16.msra.mxu1 %v1356_v39  ;;  %1231 = vmatprep.subr.bf16.mxu0 %v1357_v40 }
  0x26   :  { %1259 = vmatprep.subr.bf16.mxu1 %v1359_v42  ;;  %749 = vmatprep.mubr.bf16.mxu0 %v1374_v57 }
  0x27   :  { %798 = vmatprep.mubr.bf16.mxu1 %v1376_v58 }
  0x28   :  { %1232 = vmatpush3.bf16.msra.mxu0 %v1358_v41 }
  0x29   :  { %1260 = vmatpush3.bf16.msra.mxu1 %v1360_v43  ;;  %1233 = vmatprep.subr.bf16.mxu0 %v1361_v44 }
  0x2a   :  { %1261 = vmatprep.subr.bf16.mxu1 %v1363_v46 }
  0x2b   :  { %750 = vmatmul.mubr.bf16.gmra.mrb[4].mxu0 %v1379_v60 }
  0x2c   :  { %1234 = vmatpush3.bf16.msra.mxu0 %v1362_v45  ;;  %799 = vmatmul.mubr.bf16.gmra.mrb[4].mxu1 %v1380_v61 }
  0x2d   :  { %1262 = vmatpush3.bf16.msra.mxu1 %v1364_v47  ;;  %1235 = vmatprep.subr.bf16.mxu0 %v1365_v48 }
  0x2e   :  { %1263 = vmatprep.subr.bf16.mxu1 %v1367_v50  ;;  %839 = vmatprep.mubr.bf16.mxu0 %v1392_v8 }
  0x2f   :  { %888 = vmatprep.mubr.bf16.mxu1 %v1397_v12 }
  0x30   :  { %1236 = vmatpush3.bf16.msra.mxu0 %v1366_v49 }
  0x31   :  { %1264 = vmatpush3.bf16.msra.mxu1 %v1368_v51  ;;  %1237 = vmatprep.subr.bf16.mxu0 %v1369_v52 }
  0x32   :  { %1265 = vmatprep.subr.bf16.mxu1 %v1371_v54 }
  0x34   :  { %1238 = vmatpush3.bf16.msra.mxu0 %v1370_v53 }
  0x35   :  { %1266 = vmatpush3.bf16.msra.mxu1 %v1372_v55  ;;  %1239 = vmatprep.subr.bf16.mxu0 %v1373_v56 }
  0x36   :  { %1267 = vmatprep.subr.bf16.mxu1 %v1381_v62 }
  0x38   :  { %1240 = vmatpush3.bf16.msra.mxu0 %v1378_v59 }
  0x39   :  { %1268 = vmatpush3.bf16.msra.mxu1 %v1382_v63  ;;  %1241 = vmatprep.subr.bf16.mxu0 %v1383_v0 }
  0x3a   :  { %1269 = vmatprep.subr.bf16.mxu1 %v1385_v2 }
  0x3c   :  { %1242 = vmatpush3.bf16.msra.mxu0 %v1384_v1 }
  0x3d   :  { %1270 = vmatpush3.bf16.msra.mxu1 %v1386_v3  ;;  %1243 = vmatprep.subr.bf16.mxu0 %v1387_v4 }
  0x3e   :  { %1271 = vmatprep.subr.bf16.mxu1 %v1389_v6 }
  0x40   :  { %1244 = vmatpush3.bf16.msra.mxu0 %v1388_v5 }
  0x41   :  { %1272 = vmatpush3.bf16.msra.mxu1 %v1393_v9  ;;  %1295 = vmatprep.subr.bf16.mxu0 %v1394_v10 }
  0x43   :  { %840 = vmatmul.mubr.bf16.vlgmr.msra.gmra.mrb[8].mxu0 %v1390_v7 }
  0x44   :  { %1296 = vmatpush3.bf16.msra.mxu0 %v1394_v10  ;;  %889 = vmatmul.mubr.bf16.vlgmr.msra.gmra.mrb[8].mxu1 %v1395_v11 }
  0x45   :  { %1297 = vmatprep.subr.bf16.mxu0 %v1398_v13  ;;  %847 = vmatprep.mubr.bf16.mxu0 %v1399_v14 }
  0x46   :  { %896 = vmatprep.mubr.bf16.mxu1 %v1403_v17 }
  0x48   :  { %1298 = vmatpush3.bf16.msra.mxu0 %v1398_v13 }
  0x49   :  { %1299 = vmatprep.subr.bf16.mxu0 %v1402_v16 }
  0x4b   :  { %848 = vmatmul.mubr.bf16.gmra.mrb[12].mxu0 %v1401_v15 }
  0x4c   :  { %1300 = vmatpush3.bf16.msra.mxu0 %v1402_v16  ;;  %897 = vmatmul.mubr.bf16.gmra.mrb[12].mxu1 %v1405_v18 }
  0x4d   :  { %1301 = vmatprep.subr.bf16.mxu0 %v1406_v19  ;;  %1311 = vmatprep.mubr.bf16.mxu0 %v1411_v21 }
  0x50   :  { %1302 = vmatpush3.bf16.msra.mxu0 %v1406_v19 }
  0x51   :  { %1303 = vmatprep.subr.bf16.mxu0 %v1407_v20 }
  0x54   :  { %1304 = vmatpush3.bf16.msra.mxu0 %v1407_v20 }
  0x55   :  { %1305 = vmatprep.subr.bf16.mxu0 %v1408_v22 }
  0x58   :  { %1306 = vmatpush3.bf16.msra.mxu0 %v1408_v22 }
  0x59   :  { %1307 = vmatprep.subr.bf16.mxu0 %v1409_v23 }
  0x5c   :  { %1308 = vmatpush3.bf16.msra.mxu0 %v1409_v23 }
  0x5d   :  { %1309 = vmatprep.subr.bf16.mxu0 %v1410_v24 }
  0x60   :  { %1310 = vmatpush3.bf16.msra.mxu0 %v1410_v24 }
  0x63   :  { %1312 = vmatmul.mubr.bf16.vlgmr.msra.gmra.mrb[16].mxu0 %v1412_v25 }
  0xf6   :  { %v1189_v26 = vpop.f32.mrb[0].mxu0 }
  0xf7   :  { %v1217_v27 = vpop.f32.mrb[0].mxu1  ;;  %v1190_v28 = vpop.f32.mrb[1].mxu0 }
  0xf8   :  { %v1191_v29 = vadd.f32 %v1190_v28, %v1189_v26  ;;  %v1218_v30 = vpop.f32.mrb[1].mxu1  ;;  %v1192_v31 = vpop.f32.mrb[2].mxu0 }
  0xf9   :  { %v1219_v32 = vadd.f32 %v1218_v30, %v1217_v27  ;;  %v1220_v33 = vpop.f32.mrb[2].mxu1  ;;  %v1193_v34 = vpop.f32.mrb[3].mxu0 }
  0xfa   :  { %v1194_v35 = vadd.f32 %v1193_v34, %v1192_v31  ;;  %v1221_v36 = vpop.f32.mrb[3].mxu1 }
  0xfb   :  { %v793_v37 = vadd.f32 %v1219_v32, %v1191_v29  ;;  %v1222_v38 = vadd.f32 %v1221_v36, %v1220_v33 }
  0xfd   :  { %v796_v39 = vadd.f32 %v1222_v38, %v1194_v35 }
  0xfe   :  { %v1195_v40 = vpop.f32.mrb[4].mxu0 }
  0xff   :  { %v1223_v41 = vpop.f32.mrb[4].mxu1  ;;  %v1196_v42 = vpop.f32.mrb[5].mxu0 }
 0x100   :  { %v1224_v43 = vpop.f32.mrb[5].mxu1  ;;  %v1197_v44 = vadd.f32 %v1196_v42, %v1195_v40  ;;  %v1198_v46 = vpop.f32.mrb[6].mxu0 }
 0x101   :  { %v1225_v45 = vadd.f32 %v1224_v43, %v1223_v41  ;;  %v1226_v47 = vpop.f32.mrb[6].mxu1  ;;  %v1199_v48 = vpop.f32.mrb[7].mxu0 }
 0x102   :  { %v1227_v49 = vpop.f32.mrb[7].mxu1  ;;  %v1200_v51 = vadd.f32 %v1199_v48, %v1198_v46 }
 0x103   :  { %v801_v50 = vadd.f32 %v1225_v45, %v1197_v44  ;;  %v1228_v52 = vadd.f32 %v1227_v49, %v1226_v47 }
 0x105   :  { %v804_v53 = vadd.f32 %v1228_v52, %v1200_v51 }
 0x116   :  { %v1245_v54 = vpop.f32.mrb[8].mxu0 }
 0x117   :  { %v1246_v55 = vpop.f32.mrb[9].mxu0  ;;  %v1273_v58 = vpop.f32.mrb[8].mxu1 }
 0x118   :  { %v1247_v56 = vadd.f32 %v1246_v55, %v1245_v54  ;;  %v1248_v57 = vpop.f32.mrb[10].mxu0  ;;  %v1274_v62 = vpop.f32.mrb[9].mxu1 }
 0x119   :  { %v1249_v59 = vpop.f32.mrb[11].mxu0  ;;  %v1275_v63 = vadd.f32 %v1274_v62, %v1273_v58  ;;  %v1276_v0 = vpop.f32.mrb[10].mxu1  ;;  %v1154_v62 = vld [vmem:[%s1735_s4] sm:$0xff]  }
 0x11a   :  { %v842_v60 = vadd.f32 %v1247_v56, %v793_v37  ;;  %v1250_v61 = vadd.f32 %v1249_v59, %v1248_v57  ;;  %v1277_v2 = vpop.f32.mrb[11].mxu1 }
 0x11b   :  { %v1278_v3 = vadd.f32 %v1277_v2, %v1276_v0 }
 0x11c   :  { %v845_v1 = vadd.f32 %v1250_v61, %v796_v39  ;;  %v891_v4 = vadd.f32 %v1275_v63, %v842_v60  ;;  %v1171_v63 = vld [vmem:[%s1735_s4 + $0x8] sm:$0xff]  }
 0x11e   :  { %v1251_v5 = vpop.f32.mrb[12].mxu0  ;;  %v894_v7 = vadd.f32 %v1278_v3, %v845_v1  ;;  %v1143_v1 = vld [vmem:[%s1736_s2] ss:$0 sm:$0xff] }
 0x11f   :  { %v1252_v6 = vpop.f32.mrb[13].mxu0  ;;  %v1279_v10 = vpop.f32.mrb[12].mxu1 }
 0x120   :  { %v1253_v8 = vadd.f32 %v1252_v6, %v1251_v5  ;;  %v1254_v9 = vpop.f32.mrb[14].mxu0  ;;  %v1280_v14 = vpop.f32.mrb[13].mxu1  ;;  %v1144_v6 = vld [vmem:[%s1737_s3] ss:$0 sm:$0xff] }
 0x121   :  { %v1255_v11 = vpop.f32.mrb[15].mxu0  ;;  %v1281_v15 = vadd.f32 %v1280_v14, %v1279_v10  ;;  %v1282_v16 = vpop.f32.mrb[14].mxu1  ;;  %v1160_v10 = vunpack.c.h.bf16 %v1171_v63 }
 0x122   :  { %v850_v12 = vadd.f32 %v1253_v8, %v801_v50  ;;  %v1256_v13 = vadd.f32 %v1255_v11, %v1254_v9  ;;  %v1283_v18 = vpop.f32.mrb[15].mxu1  ;;  %v1156_v8 = vunpack.c.h.bf16 %v1154_v62  ;;  %v1159_v9 = vunpack.c.l.bf16 %v1171_v63 }
 0x123   :  { %v1284_v19 = vadd.f32 %v1283_v18, %v1282_v16 }
 0x124   :  { %v853_v17 = vadd.f32 %v1256_v13, %v804_v53  ;;  %v899_v20 = vadd.f32 %v1281_v15, %v850_v12 }
 0x126   :  { %v902_v21 = vadd.f32 %v1284_v19, %v853_v17 }
 0x136   :  { %v1313_v22 = vpop.f32.mrb[16].mxu0 }
 0x137   :  { %v948_v23 = vadd.f32 %v1313_v22, %v899_v20  ;;  %v939_v24 = vpop.f32.mrb[17].mxu0 }
 0x138   :  { %v940_v25 = vadd.f32 %v939_v24, %v891_v4  ;;  %v1314_v26 = vpop.f32.mrb[18].mxu0 }
 0x139   :  { %v951_v27 = vadd.f32 %v1314_v26, %v902_v21  ;;  %v942_v28 = vpop.f32.mrb[19].mxu0  ;;  %v966_v33 = vmul.f32 %v948_v23, %v948_v23 }
 0x13a   :  { %v943_v29 = vadd.f32 %v942_v28, %v894_v7  ;;  %v964_v30 = vmul.f32 %v940_v25, %v940_v25  ;;  %v1155_v7 = vunpack.c.l.bf16 %v1154_v62 }
 0x13b   :  { %v967_v36 = vmul.f32 %v951_v27, %v951_v27 }
 0x13c   :  { %v954_v31 = vadd.f32 %v943_v29, %v940_v25  ;;  %v965_v32 = vmul.f32 %v943_v29, %v943_v29 }
 0x13e   :  { %v955_v34 = vadd.f32 %v954_v31, %v948_v23  ;;  %v968_v35 = vadd.f32 %v965_v32, %v964_v30 }
 0x140   :  { %v956_v37 = vadd.f32 %v955_v34, %v951_v27  ;;  %v969_v38 = vadd.f32 %v968_v35, %v966_v33 }
 0x142   :  { %v957_v39 = vrot.slane %v956_v37, 4  ;;  %v970_v40 = vadd.f32 %v969_v38, %v967_v36 }
 0x144   :  { %v958_v41 = vadd.f32 %v957_v39, %v956_v37  ;;  %v971_v42 = vrot.slane %v970_v40, 4 }
 0x146   :  { %v959_v43 = vrot.slane %v958_v41, 2  ;;  %v972_v44 = vadd.f32 %v971_v42, %v970_v40 }
 0x148   :  { %v960_v45 = vadd.f32 %v959_v43, %v958_v41  ;;  %v973_v46 = vrot.slane %v972_v44, 2 }
 0x14a   :  { %v961_v47 = vrot.slane %v960_v45, 1  ;;  %v974_v48 = vadd.f32 %v973_v46, %v972_v44 }
 0x14c   :  { %v962_v49 = vadd.f32 %v961_v47, %v960_v45  ;;  %v975_v50 = vrot.slane %v974_v48, 1 }
 0x14e   :  { %v963_v51 = vmul.f32 0.03125, %v962_v49  ;;  %v976_v52 = vadd.f32 %v975_v50, %v974_v48 }
 0x150   :  { %v977_v53 = vmul.f32 0.03125, %v976_v52  ;;  %v978_v54 = vmul.f32 %v963_v51, %v963_v51  ;;  %v981_v55 = vsub.f32 %v940_v25, %v963_v51  ;;  %v982_v56 = vsub.f32 %v943_v29, %v963_v51 }
 0x151   :  { %v983_v57 = vsub.f32 %v948_v23, %v963_v51  ;;  %v984_v58 = vsub.f32 %v951_v27, %v963_v51 }
 0x152   :  { %v979_v59 = vsub.f32 %v977_v53, %v978_v54 }
 0x154   :  { %v980_v60 = vmax.f32 %v979_v59, 0.0 }
 0x156   :  { %v985_v61 = vadd.f32 1e-05, %v980_v60 }
 0x158   :  { %1413 = vrsqrt.f32 %v985_v61 }
 0x162   :  { %v1414_v0 = vpop.eup %1413 }
 0x163   :  { %v987_v2 = vmul.f32 %v1414_v0, %v981_v55  ;;  %v988_v3 = vmul.f32 %v1414_v0, %v982_v56  ;;  %v989_v4 = vmul.f32 %v1414_v0, %v983_v57  ;;  %v990_v5 = vmul.f32 %v1414_v0, %v984_v58 }
 0x165   :  { %v998_v11 = vmul.f32 %v1143_v1, %v987_v2  ;;  %v999_v12 = vmul.f32 %v1143_v1, %v988_v3  ;;  %v1000_v13 = vmul.f32 %v1143_v1, %v989_v4  ;;  %v1001_v14 = vmul.f32 %v1143_v1, %v990_v5 }
 0x167   :  { %v1009_v15 = vadd.f32 %v1144_v6, %v998_v11  ;;  %v1010_v16 = vadd.f32 %v1144_v6, %v999_v12  ;;  %v1011_v17 = vadd.f32 %v1144_v6, %v1000_v13  ;;  %v1012_v18 = vadd.f32 %v1144_v6, %v1001_v14 }
 0x169   :  { %v1021_v19 = vadd.f32 %v1155_v7, %v1009_v15  ;;  %v1022_v20 = vadd.f32 %v1156_v8, %v1010_v16  ;;  %v1023_v21 = vadd.f32 %v1159_v9, %v1011_v17  ;;  %v1024_v22 = vadd.f32 %v1160_v10, %v1012_v18 }
 0x16b   :  { %v1025_v23 = vmax.f32 %v1021_v19, 0.0  ;;  %v1026_v24 = vmax.f32 %v1022_v20, 0.0  ;;  %v1027_v25 = vmax.f32 %v1023_v21, 0.0  ;;  %v1028_v26 = vmax.f32 %v1024_v22, 0.0 }
 0x16d   :  { %v1164_v27 = vpack.c.bf16 %v1026_v24, %v1025_v23  ;;  %v1169_v28 = vpack.c.bf16 %v1028_v26, %v1027_v25 }
 0x16f   :  { %1165 = vst [vmem:[%s1738_s5] sm:$0xff] %v1164_v27   ;;  %1172 = vst [vmem:[%s1738_s5 + $0x8] sm:$0xff] %v1169_v28  }

// kernel: birdnet_forward.49
= control target key start
LH: loop header
LB: loop body
LE: loop exit
PB: predicated region body
PF: predicated region fallthrough
CT: control target
= control target key end

     0   :  { %s1698_s1 = inlined_call_operand.vmem [shape: bf16[1152,128], index: 1, kind: input, shape index: {}]   ;;  %s1699_s0 = inlined_call_operand.vmem [shape: bf16[32,1152], index: 0, kind: input, shape index: {}]   ;;  %s1700_s2 = inlined_call_operand.vmem [shape: f32[1,128], index: 2, kind: input, shape index: {}]   ;;  %s1701_s3 = inlined_call_operand.vmem [shape: f32[1,128], index: 3, kind: input, shape index: {}]   ;;  %s1702_s4 = inlined_call_operand.vmem [shape: bf16[32,128], index: 4, kind: output, shape index: {}]  }
   0x1   :  { %v1291_v0 = vld [vmem:[%s1698_s1 + $0x40] sm:$0xff]   ;;  %v1295_v4 = vld [vmem:[%s1698_s1 + $0x48] sm:$0xff]   ;;  %v1299_v8 = vld [vmem:[%s1698_s1 + $0x50] sm:$0xff]  }
   0x2   :  { %v1292_v1 = vld [vmem:[%s1698_s1 + $0xc0] sm:$0xff]   ;;  %1149 = vmatprep.subr.bf16.mxu0 %v1291_v0  ;;  %v1296_v5 = vld [vmem:[%s1698_s1 + $0xc8] sm:$0xff]   ;;  %v1300_v9 = vld [vmem:[%s1698_s1 + $0xd0] sm:$0xff]  }
   0x3   :  { %v1293_v2 = vld [vmem:[%s1698_s1] sm:$0xff]   ;;  %1177 = vmatprep.subr.bf16.mxu1 %v1292_v1  ;;  %v1297_v6 = vld [vmem:[%s1698_s1 + $0x8] sm:$0xff]   ;;  %v1301_v10 = vld [vmem:[%s1698_s1 + $0x10] sm:$0xff]  }
   0x4   :  { %v1294_v3 = vld [vmem:[%s1698_s1 + $0x80] sm:$0xff]   ;;  %1150 = vmatpush3.bf16.msra.mxu0 %v1293_v2  ;;  %v1298_v7 = vld [vmem:[%s1698_s1 + $0x88] sm:$0xff]   ;;  %v1302_v11 = vld [vmem:[%s1698_s1 + $0x90] sm:$0xff]  }
   0x5   :  { %1178 = vmatpush3.bf16.msra.mxu1 %v1294_v3  ;;  %1151 = vmatprep.subr.bf16.mxu0 %v1295_v4  ;;  %v1303_v12 = vld [vmem:[%s1698_s1 + $0x58] sm:$0xff]   ;;  %v1307_v16 = vld [vmem:[%s1698_s1 + $0x60] sm:$0xff]   ;;  %v1311_v20 = vld [vmem:[%s1698_s1 + $0x68] sm:$0xff]  }
   0x6   :  { %1179 = vmatprep.subr.bf16.mxu1 %v1296_v5  ;;  %v1304_v13 = vld [vmem:[%s1698_s1 + $0xd8] sm:$0xff]   ;;  %v1308_v17 = vld [vmem:[%s1698_s1 + $0xe0] sm:$0xff]   ;;  %v1312_v21 = vld [vmem:[%s1698_s1 + $0xe8] sm:$0xff]  }
   0x7   :  { %v1305_v14 = vld [vmem:[%s1698_s1 + $0x18] sm:$0xff]   ;;  %v1309_v18 = vld [vmem:[%s1698_s1 + $0x20] sm:$0xff]   ;;  %v1313_v22 = vld [vmem:[%s1698_s1 + $0x28] sm:$0xff]  }
   0x8   :  { %1152 = vmatpush3.bf16.msra.mxu0 %v1297_v6  ;;  %v1306_v15 = vld [vmem:[%s1698_s1 + $0x98] sm:$0xff]   ;;  %v1310_v19 = vld [vmem:[%s1698_s1 + $0xa0] sm:$0xff]   ;;  %v1314_v23 = vld [vmem:[%s1698_s1 + $0xa8] sm:$0xff]  }
   0x9   :  { %1180 = vmatpush3.bf16.msra.mxu1 %v1298_v7  ;;  %1153 = vmatprep.subr.bf16.mxu0 %v1299_v8  ;;  %v1315_v24 = vld [vmem:[%s1698_s1 + $0x70] sm:$0xff]   ;;  %v1319_v28 = vld [vmem:[%s1698_s1 + $0x78] sm:$0xff]   ;;  %v1323_v32 = vld [vmem:[%s1699_s0] ss:$36 sps:$4 sm:$0xff]  }
   0xa   :  { %1181 = vmatprep.subr.bf16.mxu1 %v1300_v9  ;;  %v1316_v25 = vld [vmem:[%s1698_s1 + $0xf0] sm:$0xff]   ;;  %v1320_v29 = vld [vmem:[%s1698_s1 + $0xf8] sm:$0xff]   ;;  %v1325_v33 = vld [vmem:[%s1699_s0 + $0x4] ss:$36 sps:$4 sm:$0xff]  }
   0xb   :  { %v1317_v26 = vld [vmem:[%s1698_s1 + $0x30] sm:$0xff]   ;;  %v1321_v30 = vld [vmem:[%s1698_s1 + $0x38] sm:$0xff]   ;;  %v1326_v34 = vld [vmem:[%s1699_s0 + $0x8] ss:$36 sps:$4 sm:$0xff]   ;;  %738 = vmatprep.mubr.bf16.mxu0 %v1325_v33 }
   0xc   :  { %1154 = vmatpush3.bf16.msra.mxu0 %v1301_v10  ;;  %v1318_v27 = vld [vmem:[%s1698_s1 + $0xb0] sm:$0xff]   ;;  %v1322_v31 = vld [vmem:[%s1698_s1 + $0xb8] sm:$0xff]   ;;  %v1329_v36 = vld [vmem:[%s1698_s1 + $0x140] sm:$0xff]  }
   0xd   :  { %1182 = vmatpush3.bf16.msra.mxu1 %v1302_v11  ;;  %1155 = vmatprep.subr.bf16.mxu0 %v1303_v12  ;;  %v1328_v35 = vld [vmem:[%s1699_s0 + $0xc] ss:$36 sps:$4 sm:$0xff]   ;;  %v1330_v37 = vld [vmem:[%s1698_s1 + $0x100] sm:$0xff]   ;;  %v1341_v48 = vld [vmem:[%s1698_s1 + $0x158] sm:$0xff]  }
   0xe   :  { %1183 = vmatprep.subr.bf16.mxu1 %v1304_v13  ;;  %787 = vmatprep.mubr.bf16.mxu1 %v1328_v35  ;;  %v1331_v38 = vld [vmem:[%s1698_s1 + $0x1c0] sm:$0xff]   ;;  %v1333_v40 = vld [vmem:[%s1698_s1 + $0x148] sm:$0xff]   ;;  %v1337_v44 = vld [vmem:[%s1698_s1 + $0x150] sm:$0xff]  }
   0xf   :  { %v1332_v39 = vld [vmem:[%s1698_s1 + $0x180] sm:$0xff]   ;;  %v1334_v41 = vld [vmem:[%s1698_s1 + $0x108] sm:$0xff]   ;;  %v1338_v45 = vld [vmem:[%s1698_s1 + $0x110] sm:$0xff]  }
  0x10   :  { %1156 = vmatpush3.bf16.msra.mxu0 %v1305_v14  ;;  %v1335_v42 = vld [vmem:[%s1698_s1 + $0x1c8] sm:$0xff]   ;;  %v1339_v46 = vld [vmem:[%s1698_s1 + $0x1d0] sm:$0xff]   ;;  %v1342_v49 = vld [vmem:[%s1698_s1 + $0x118] sm:$0xff]  }
  0x11   :  { %1184 = vmatpush3.bf16.msra.mxu1 %v1306_v15  ;;  %1157 = vmatprep.subr.bf16.mxu0 %v1307_v16  ;;  %v1336_v43 = vld [vmem:[%s1698_s1 + $0x188] sm:$0xff]   ;;  %v1340_v47 = vld [vmem:[%s1698_s1 + $0x190] sm:$0xff]   ;;  %v1343_v50 = vld [vmem:[%s1698_s1 + $0x1d8] sm:$0xff]  }
  0x12   :  { %1185 = vmatprep.subr.bf16.mxu1 %v1308_v17  ;;  %v1344_v51 = vld [vmem:[%s1698_s1 + $0x198] sm:$0xff]   ;;  %v1345_v52 = vld [vmem:[%s1698_s1 + $0x160] sm:$0xff]   ;;  %v1349_v56 = vld [vmem:[%s1698_s1 + $0x168] sm:$0xff]  }
  0x13   :  { %v1346_v53 = vld [vmem:[%s1698_s1 + $0x120] sm:$0xff]   ;;  %v1350_v57 = vld [vmem:[%s1699_s0 + $0x4c] ss:$36 sps:$4 sm:$0xff]   ;;  %v1352_v58 = vld [vmem:[%s1699_s0 + $0x54] ss:$36 sps:$4 sm:$0xff]  }
  0x14   :  { %1158 = vmatpush3.bf16.msra.mxu0 %v1309_v18  ;;  %v1347_v54 = vld [vmem:[%s1698_s1 + $0x1e0] sm:$0xff]   ;;  %v1354_v59 = vld [vmem:[%s1698_s1 + $0x128] sm:$0xff]   ;;  %v1356_v61 = vld [vmem:[%s1699_s0 + $0x50] ss:$36 sps:$4 sm:$0xff]  }
  0x15   :  { %1186 = vmatpush3.bf16.msra.mxu1 %v1310_v19  ;;  %1159 = vmatprep.subr.bf16.mxu0 %v1311_v20  ;;  %v1348_v55 = vld [vmem:[%s1698_s1 + $0x1a0] sm:$0xff]   ;;  %v1355_v60 = vld [vmem:[%s1699_s0 + $0x48] ss:$36 sps:$4 sm:$0xff]   ;;  %v1359_v0 = vld [vmem:[%s1698_s1 + $0x170] sm:$0xff]  }
  0x16   :  { %1187 = vmatprep.subr.bf16.mxu1 %v1312_v21  ;;  %v1357_v62 = vld [vmem:[%s1698_s1 + $0x1e8] sm:$0xff]   ;;  %v1360_v1 = vld [vmem:[%s1698_s1 + $0x130] sm:$0xff]   ;;  %v1363_v4 = vld [vmem:[%s1698_s1 + $0x178] sm:$0xff]  }
  0x17   :  { %v1358_v63 = vld [vmem:[%s1698_s1 + $0x1a8] sm:$0xff]   ;;  %v1361_v2 = vld [vmem:[%s1698_s1 + $0x1f0] sm:$0xff]   ;;  %v1364_v5 = vld [vmem:[%s1698_s1 + $0x138] sm:$0xff]  }
  0x18   :  { %1160 = vmatpush3.bf16.msra.mxu0 %v1313_v22  ;;  %v1362_v3 = vld [vmem:[%s1698_s1 + $0x1b0] sm:$0xff]   ;;  %v1365_v6 = vld [vmem:[%s1698_s1 + $0x1f8] sm:$0xff]   ;;  %v1370_v10 = vld [vmem:[%s1698_s1 + $0x200] sm:$0xff]  }
  0x19   :  { %1188 = vmatpush3.bf16.msra.mxu1 %v1314_v23  ;;  %1161 = vmatprep.subr.bf16.mxu0 %v1315_v24  ;;  %v1366_v7 = vld [vmem:[%s1699_s0 + $0x10] ss:$36 sps:$4 sm:$0xff]   ;;  %v1369_v9 = vld [vmem:[%s1698_s1 + $0x1b8] sm:$0xff]   ;;  %v1374_v13 = vld [vmem:[%s1698_s1 + $0x208] sm:$0xff]  }
  0x1a   :  { %1189 = vmatprep.subr.bf16.mxu1 %v1316_v25  ;;  %v1368_v8 = vld [vmem:[%s1699_s0 + $0x14] ss:$36 sps:$4 sm:$0xff]   ;;  %v1373_v12 = vld [vmem:[%s1699_s0 + $0x1c] ss:$36 sps:$4 sm:$0xff]   ;;  %v1379_v17 = vld [vmem:[%s1699_s0 + $0x64] ss:$36 sps:$4 sm:$0xff]  }
  0x1b   :  { %v1371_v11 = vld [vmem:[%s1699_s0 + $0x18] ss:$36 sps:$4 sm:$0xff]   ;;  %v1378_v16 = vld [vmem:[%s1698_s1 + $0x210] sm:$0xff]   ;;  %v1381_v18 = vld [vmem:[%s1699_s0 + $0x60] ss:$36 sps:$4 sm:$0xff]  }
  0x1c   :  { %1162 = vmatpush3.bf16.msra.mxu0 %v1317_v26  ;;  %v1375_v14 = vld [vmem:[%s1699_s0 + $0x5c] ss:$36 sps:$4 sm:$0xff]   ;;  %v1384_v22 = vld [vmem:[%s1698_s1 + $0x228] sm:$0xff]   ;;  %v1385_v23 = vld [vmem:[%s1698_s1 + $0x230] sm:$0xff]  }
  0x1d   :  { %1190 = vmatpush3.bf16.msra.mxu1 %v1318_v27  ;;  %1163 = vmatprep.subr.bf16.mxu0 %v1319_v28  ;;  %v1377_v15 = vld [vmem:[%s1699_s0 + $0x58] ss:$36 sps:$4 sm:$0xff]   ;;  %v1383_v20 = vld [vmem:[%s1698_s1 + $0x220] sm:$0xff]   ;;  %v1388_v25 = vld [vmem:[%s1699_s0 + $0x68] ss:$36 sps:$4 sm:$0xff]  }
  0x1e   :  { %1191 = vmatprep.subr.bf16.mxu1 %v1320_v29  ;;  %v1382_v19 = vld [vmem:[%s1698_s1 + $0x218] sm:$0xff]   ;;  %v1387_v21 = vld [vmem:[%s1699_s0 + $0x20] ss:$36 sps:$4 sm:$0xff]  }
  0x1f   :  { %v1386_v24 = vld [vmem:[%s1698_s1 + $0x238] sm:$0xff]  }
  0x20   :  { %1164 = vmatpush3.bf16.msra.mxu0 %v1321_v30 }
  0x21   :  { %1192 = vmatpush3.bf16.msra.mxu1 %v1322_v31  ;;  %1205 = vmatprep.subr.bf16.mxu0 %v1329_v36 }
  0x22   :  { %1233 = vmatprep.subr.bf16.mxu1 %v1331_v38 }
  0x23   :  { %739 = vmatmul.mubr.bf16.vlgmr.msra.gmra.mrb[0].mxu0 %v1323_v32 }
  0x24   :  { %788 = vmatmul.mubr.bf16.vlgmr.msra.gmra.mrb[0].mxu1 %v1326_v34  ;;  %1206 = vmatpush3.bf16.msra.mxu0 %v1330_v37 }
  0x25   :  { %1234 = vmatpush3.bf16.msra.mxu1 %v1332_v39  ;;  %1207 = vmatprep.subr.bf16.mxu0 %v1333_v40 }
  0x26   :  { %1235 = vmatprep.subr.bf16.mxu1 %v1335_v42  ;;  %746 = vmatprep.mubr.bf16.mxu0 %v1350_v57 }
  0x27   :  { %795 = vmatprep.mubr.bf16.mxu1 %v1352_v58 }
  0x28   :  { %1208 = vmatpush3.bf16.msra.mxu0 %v1334_v41 }
  0x29   :  { %1236 = vmatpush3.bf16.msra.mxu1 %v1336_v43  ;;  %1209 = vmatprep.subr.bf16.mxu0 %v1337_v44 }
  0x2a   :  { %1237 = vmatprep.subr.bf16.mxu1 %v1339_v46 }
  0x2b   :  { %747 = vmatmul.mubr.bf16.gmra.mrb[4].mxu0 %v1355_v60 }
  0x2c   :  { %1210 = vmatpush3.bf16.msra.mxu0 %v1338_v45  ;;  %796 = vmatmul.mubr.bf16.gmra.mrb[4].mxu1 %v1356_v61 }
  0x2d   :  { %1238 = vmatpush3.bf16.msra.mxu1 %v1340_v47  ;;  %1211 = vmatprep.subr.bf16.mxu0 %v1341_v48 }
  0x2e   :  { %1239 = vmatprep.subr.bf16.mxu1 %v1343_v50  ;;  %836 = vmatprep.mubr.bf16.mxu0 %v1368_v8 }
  0x2f   :  { %885 = vmatprep.mubr.bf16.mxu1 %v1373_v12 }
  0x30   :  { %1212 = vmatpush3.bf16.msra.mxu0 %v1342_v49 }
  0x31   :  { %1240 = vmatpush3.bf16.msra.mxu1 %v1344_v51  ;;  %1213 = vmatprep.subr.bf16.mxu0 %v1345_v52 }
  0x32   :  { %1241 = vmatprep.subr.bf16.mxu1 %v1347_v54 }
  0x34   :  { %1214 = vmatpush3.bf16.msra.mxu0 %v1346_v53 }
  0x35   :  { %1242 = vmatpush3.bf16.msra.mxu1 %v1348_v55  ;;  %1215 = vmatprep.subr.bf16.mxu0 %v1349_v56 }
  0x36   :  { %1243 = vmatprep.subr.bf16.mxu1 %v1357_v62 }
  0x38   :  { %1216 = vmatpush3.bf16.msra.mxu0 %v1354_v59 }
  0x39   :  { %1244 = vmatpush3.bf16.msra.mxu1 %v1358_v63  ;;  %1217 = vmatprep.subr.bf16.mxu0 %v1359_v0 }
  0x3a   :  { %1245 = vmatprep.subr.bf16.mxu1 %v1361_v2 }
  0x3c   :  { %1218 = vmatpush3.bf16.msra.mxu0 %v1360_v1 }
  0x3d   :  { %1246 = vmatpush3.bf16.msra.mxu1 %v1362_v3  ;;  %1219 = vmatprep.subr.bf16.mxu0 %v1363_v4 }
  0x3e   :  { %1247 = vmatprep.subr.bf16.mxu1 %v1365_v6 }
  0x40   :  { %1220 = vmatpush3.bf16.msra.mxu0 %v1364_v5 }
  0x41   :  { %1248 = vmatpush3.bf16.msra.mxu1 %v1369_v9  ;;  %1271 = vmatprep.subr.bf16.mxu0 %v1370_v10 }
  0x43   :  { %837 = vmatmul.mubr.bf16.vlgmr.msra.gmra.mrb[8].mxu0 %v1366_v7 }
  0x44   :  { %1272 = vmatpush3.bf16.msra.mxu0 %v1370_v10  ;;  %886 = vmatmul.mubr.bf16.vlgmr.msra.gmra.mrb[8].mxu1 %v1371_v11 }
  0x45   :  { %1273 = vmatprep.subr.bf16.mxu0 %v1374_v13  ;;  %844 = vmatprep.mubr.bf16.mxu0 %v1375_v14 }
  0x46   :  { %893 = vmatprep.mubr.bf16.mxu1 %v1379_v17 }
  0x48   :  { %1274 = vmatpush3.bf16.msra.mxu0 %v1374_v13 }
  0x49   :  { %1275 = vmatprep.subr.bf16.mxu0 %v1378_v16 }
  0x4b   :  { %845 = vmatmul.mubr.bf16.gmra.mrb[12].mxu0 %v1377_v15 }
  0x4c   :  { %1276 = vmatpush3.bf16.msra.mxu0 %v1378_v16  ;;  %894 = vmatmul.mubr.bf16.gmra.mrb[12].mxu1 %v1381_v18 }
  0x4d   :  { %1277 = vmatprep.subr.bf16.mxu0 %v1382_v19  ;;  %1287 = vmatprep.mubr.bf16.mxu0 %v1387_v21 }
  0x50   :  { %1278 = vmatpush3.bf16.msra.mxu0 %v1382_v19 }
  0x51   :  { %1279 = vmatprep.subr.bf16.mxu0 %v1383_v20 }
  0x54   :  { %1280 = vmatpush3.bf16.msra.mxu0 %v1383_v20 }
  0x55   :  { %1281 = vmatprep.subr.bf16.mxu0 %v1384_v22 }
  0x58   :  { %1282 = vmatpush3.bf16.msra.mxu0 %v1384_v22 }
  0x59   :  { %1283 = vmatprep.subr.bf16.mxu0 %v1385_v23 }
  0x5c   :  { %1284 = vmatpush3.bf16.msra.mxu0 %v1385_v23 }
  0x5d   :  { %1285 = vmatprep.subr.bf16.mxu0 %v1386_v24 }
  0x60   :  { %1286 = vmatpush3.bf16.msra.mxu0 %v1386_v24 }
  0x63   :  { %1288 = vmatmul.mubr.bf16.vlgmr.msra.gmra.mrb[16].mxu0 %v1388_v25 }
  0xf6   :  { %v1165_v26 = vpop.f32.mrb[0].mxu0 }
  0xf7   :  { %v1193_v27 = vpop.f32.mrb[0].mxu1  ;;  %v1166_v28 = vpop.f32.mrb[1].mxu0 }
  0xf8   :  { %v1167_v29 = vadd.f32 %v1166_v28, %v1165_v26  ;;  %v1194_v30 = vpop.f32.mrb[1].mxu1  ;;  %v1168_v31 = vpop.f32.mrb[2].mxu0 }
  0xf9   :  { %v1195_v32 = vadd.f32 %v1194_v30, %v1193_v27  ;;  %v1196_v33 = vpop.f32.mrb[2].mxu1  ;;  %v1169_v34 = vpop.f32.mrb[3].mxu0 }
  0xfa   :  { %v1170_v35 = vadd.f32 %v1169_v34, %v1168_v31  ;;  %v1197_v36 = vpop.f32.mrb[3].mxu1 }
  0xfb   :  { %v790_v37 = vadd.f32 %v1195_v32, %v1167_v29  ;;  %v1198_v38 = vadd.f32 %v1197_v36, %v1196_v33 }
  0xfd   :  { %v793_v39 = vadd.f32 %v1198_v38, %v1170_v35 }
  0xfe   :  { %v1171_v40 = vpop.f32.mrb[4].mxu0 }
  0xff   :  { %v1199_v41 = vpop.f32.mrb[4].mxu1  ;;  %v1172_v42 = vpop.f32.mrb[5].mxu0 }
 0x100   :  { %v1200_v43 = vpop.f32.mrb[5].mxu1  ;;  %v1173_v44 = vadd.f32 %v1172_v42, %v1171_v40  ;;  %v1174_v46 = vpop.f32.mrb[6].mxu0 }
 0x101   :  { %v1201_v45 = vadd.f32 %v1200_v43, %v1199_v41  ;;  %v1202_v47 = vpop.f32.mrb[6].mxu1  ;;  %v1175_v48 = vpop.f32.mrb[7].mxu0 }
 0x102   :  { %v1203_v49 = vpop.f32.mrb[7].mxu1  ;;  %v1176_v51 = vadd.f32 %v1175_v48, %v1174_v46 }
 0x103   :  { %v798_v50 = vadd.f32 %v1201_v45, %v1173_v44  ;;  %v1204_v52 = vadd.f32 %v1203_v49, %v1202_v47 }
 0x105   :  { %v801_v53 = vadd.f32 %v1204_v52, %v1176_v51 }
 0x116   :  { %v1221_v54 = vpop.f32.mrb[8].mxu0 }
 0x117   :  { %v1222_v55 = vpop.f32.mrb[9].mxu0  ;;  %v1249_v58 = vpop.f32.mrb[8].mxu1 }
 0x118   :  { %v1223_v56 = vadd.f32 %v1222_v55, %v1221_v54  ;;  %v1224_v57 = vpop.f32.mrb[10].mxu0  ;;  %v1250_v62 = vpop.f32.mrb[9].mxu1 }
 0x119   :  { %v1225_v59 = vpop.f32.mrb[11].mxu0  ;;  %v1251_v63 = vadd.f32 %v1250_v62, %v1249_v58  ;;  %v1252_v0 = vpop.f32.mrb[10].mxu1 }
 0x11a   :  { %v839_v60 = vadd.f32 %v1223_v56, %v790_v37  ;;  %v1226_v61 = vadd.f32 %v1225_v59, %v1224_v57  ;;  %v1253_v2 = vpop.f32.mrb[11].mxu1 }
 0x11b   :  { %v1254_v3 = vadd.f32 %v1253_v2, %v1252_v0 }
 0x11c   :  { %v842_v1 = vadd.f32 %v1226_v61, %v793_v39  ;;  %v888_v4 = vadd.f32 %v1251_v63, %v839_v60  ;;  %v1128_v63 = vld [vmem:[%s1700_s2] ss:$0 sm:$0xff] }
 0x11e   :  { %v1227_v5 = vpop.f32.mrb[12].mxu0  ;;  %v891_v7 = vadd.f32 %v1254_v3, %v842_v1 }
 0x11f   :  { %v1228_v6 = vpop.f32.mrb[13].mxu0  ;;  %v1255_v10 = vpop.f32.mrb[12].mxu1 }
 0x120   :  { %v1229_v8 = vadd.f32 %v1228_v6, %v1227_v5  ;;  %v1230_v9 = vpop.f32.mrb[14].mxu0  ;;  %v1256_v14 = vpop.f32.mrb[13].mxu1 }
 0x121   :  { %v1231_v11 = vpop.f32.mrb[15].mxu0  ;;  %v1257_v15 = vadd.f32 %v1256_v14, %v1255_v10  ;;  %v1258_v16 = vpop.f32.mrb[14].mxu1 }
 0x122   :  { %v847_v12 = vadd.f32 %v1229_v8, %v798_v50  ;;  %v1232_v13 = vadd.f32 %v1231_v11, %v1230_v9  ;;  %v1259_v18 = vpop.f32.mrb[15].mxu1 }
 0x123   :  { %v1260_v19 = vadd.f32 %v1259_v18, %v1258_v16 }
 0x124   :  { %v850_v17 = vadd.f32 %v1232_v13, %v801_v53  ;;  %v896_v20 = vadd.f32 %v1257_v15, %v847_v12 }
 0x126   :  { %v899_v21 = vadd.f32 %v1260_v19, %v850_v17 }
 0x136   :  { %v1289_v22 = vpop.f32.mrb[16].mxu0 }
 0x137   :  { %v945_v23 = vadd.f32 %v1289_v22, %v896_v20  ;;  %v936_v24 = vpop.f32.mrb[17].mxu0 }
 0x138   :  { %v937_v25 = vadd.f32 %v936_v24, %v888_v4  ;;  %v1290_v26 = vpop.f32.mrb[18].mxu0  ;;  %v1129_v4 = vld [vmem:[%s1701_s3] ss:$0 sm:$0xff] }
 0x139   :  { %v948_v27 = vadd.f32 %v1290_v26, %v899_v21  ;;  %v939_v28 = vpop.f32.mrb[19].mxu0  ;;  %v963_v33 = vmul.f32 %v945_v23, %v945_v23 }
 0x13a   :  { %v940_v29 = vadd.f32 %v939_v28, %v891_v7  ;;  %v961_v30 = vmul.f32 %v937_v25, %v937_v25 }
 0x13b   :  { %v964_v36 = vmul.f32 %v948_v27, %v948_v27 }
 0x13c   :  { %v951_v31 = vadd.f32 %v940_v29, %v937_v25  ;;  %v962_v32 = vmul.f32 %v940_v29, %v940_v29 }
 0x13e   :  { %v952_v34 = vadd.f32 %v951_v31, %v945_v23  ;;  %v965_v35 = vadd.f32 %v962_v32, %v961_v30 }
 0x140   :  { %v953_v37 = vadd.f32 %v952_v34, %v948_v27  ;;  %v966_v38 = vadd.f32 %v965_v35, %v963_v33 }
 0x142   :  { %v954_v39 = vrot.slane %v953_v37, 4  ;;  %v967_v40 = vadd.f32 %v966_v38, %v964_v36 }
 0x144   :  { %v955_v41 = vadd.f32 %v954_v39, %v953_v37  ;;  %v968_v42 = vrot.slane %v967_v40, 4 }
 0x146   :  { %v956_v43 = vrot.slane %v955_v41, 2  ;;  %v969_v44 = vadd.f32 %v968_v42, %v967_v40 }
 0x148   :  { %v957_v45 = vadd.f32 %v956_v43, %v955_v41  ;;  %v970_v46 = vrot.slane %v969_v44, 2 }
 0x14a   :  { %v958_v47 = vrot.slane %v957_v45, 1  ;;  %v971_v48 = vadd.f32 %v970_v46, %v969_v44 }
 0x14c   :  { %v959_v49 = vadd.f32 %v958_v47, %v957_v45  ;;  %v972_v50 = vrot.slane %v971_v48, 1 }
 0x14e   :  { %v960_v51 = vmul.f32 0.03125, %v959_v49  ;;  %v973_v52 = vadd.f32 %v972_v50, %v971_v48 }
 0x150   :  { %v974_v53 = vmul.f32 0.03125, %v973_v52  ;;  %v975_v54 = vmul.f32 %v960_v51, %v960_v51  ;;  %v978_v55 = vsub.f32 %v937_v25, %v960_v51  ;;  %v979_v56 = vsub.f32 %v940_v29, %v960_v51 }
 0x151   :  { %v980_v57 = vsub.f32 %v945_v23, %v960_v51  ;;  %v981_v58 = vsub.f32 %v948_v27, %v960_v51 }
 0x152   :  { %v976_v59 = vsub.f32 %v974_v53, %v975_v54 }
 0x154   :  { %v977_v60 = vmax.f32 %v976_v59, 0.0 }
 0x156   :  { %v982_v61 = vadd.f32 1e-05, %v977_v60 }
 0x158   :  { %1389 = vrsqrt.f32 %v982_v61 }
 0x162   :  { %v1390_v62 = vpop.eup %1389 }
 0x163   :  { %v984_v0 = vmul.f32 %v1390_v62, %v978_v55  ;;  %v985_v1 = vmul.f32 %v1390_v62, %v979_v56  ;;  %v986_v2 = vmul.f32 %v1390_v62, %v980_v57  ;;  %v987_v3 = vmul.f32 %v1390_v62, %v981_v58 }
 0x165   :  { %v995_v5 = vmul.f32 %v1128_v63, %v984_v0  ;;  %v996_v6 = vmul.f32 %v1128_v63, %v985_v1  ;;  %v997_v7 = vmul.f32 %v1128_v63, %v986_v2  ;;  %v998_v8 = vmul.f32 %v1128_v63, %v987_v3 }
 0x167   :  { %v1006_v9 = vadd.f32 %v1129_v4, %v995_v5  ;;  %v1007_v10 = vadd.f32 %v1129_v4, %v996_v6  ;;  %v1008_v11 = vadd.f32 %v1129_v4, %v997_v7  ;;  %v1009_v12 = vadd.f32 %v1129_v4, %v998_v8 }
 0x169   :  { %v1010_v13 = vmax.f32 %v1006_v9, 0.0  ;;  %v1011_v14 = vmax.f32 %v1007_v10, 0.0  ;;  %v1012_v15 = vmax.f32 %v1008_v11, 0.0  ;;  %v1013_v16 = vmax.f32 %v1009_v12, 0.0 }
 0x16b   :  { %v1141_v17 = vpack.c.bf16 %v1011_v14, %v1010_v13  ;;  %v1146_v18 = vpack.c.bf16 %v1013_v16, %v1012_v15 }
 0x16d   :  { %1142 = vst [vmem:[%s1702_s4] sm:$0xff] %v1141_v17   ;;  %1148 = vst [vmem:[%s1702_s4 + $0x8] sm:$0xff] %v1146_v18  }

// kernel: birdnet_forward.56
= control target key start
LH: loop header
LB: loop body
LE: loop exit
PB: predicated region body
PF: predicated region fallthrough
CT: control target
= control target key end

     0   :  { %v288_v1 = vmov 0   ;;  %v202_v57 = vlaneseq  ;;  %s374_s1 = inlined_call_operand.vmem [shape: bf16[128,256], index: 1, kind: input, shape index: {}]   ;;  %s375_s0 = inlined_call_operand.vmem [shape: bf16[8,128], index: 0, kind: input, shape index: {}]   ;;  %s376_s2 = inlined_call_operand.vmem [shape: f32[1,256], index: 2, kind: input, shape index: {}]   ;;  %s377_s3 = inlined_call_operand.vmem [shape: f32[1,256], index: 3, kind: input, shape index: {}]   ;;  %s378_s4 = inlined_call_operand.vmem [shape: bf16[8,256], index: 4, kind: output, shape index: {}]  }
   0x1   :  { %v260_v0 = vld [vmem:[%s374_s1 + $0x4] ss:$8 sps:$4 sm:$0xff]   ;;  %147 = vmatprep.mubr.bf16.mxu0 %v288_v1  ;;  %v262_v2 = vld [vmem:[%s374_s1] ss:$8 sps:$4 sm:$0xff]   ;;  %v263_v3 = vld [vmem:[%s374_s1 + $0x14] ss:$8 sps:$4 sm:$0xff]  }
   0x2   :  { %115 = vmatprep.subr.bf16.mxu0 %v260_v0  ;;  %v265_v4 = vld [vmem:[%s374_s1 + $0x10] ss:$8 sps:$4 sm:$0xff]   ;;  %v266_v5 = vld [vmem:[%s374_s1 + $0x24] ss:$8 sps:$4 sm:$0xff]   ;;  %v268_v6 = vld [vmem:[%s374_s1 + $0x20] ss:$8 sps:$4 sm:$0xff]  }
   0x3   :  { %116 = vmatpush1.bf16.msra.mxu0 %v262_v2  ;;  %v269_v7 = vld [vmem:[%s374_s1 + $0x34] ss:$8 sps:$4 sm:$0xff]   ;;  %v271_v8 = vld [vmem:[%s374_s1 + $0x30] ss:$8 sps:$4 sm:$0xff]   ;;  %v272_v9 = vld [vmem:[%s374_s1 + $0x44] ss:$8 sps:$4 sm:$0xff]  }
   0x4   :  { %117 = vmatprep.subr.bf16.mxu0 %v263_v3  ;;  %v274_v10 = vld [vmem:[%s374_s1 + $0x40] ss:$8 sps:$4 sm:$0xff]   ;;  %v275_v11 = vld [vmem:[%s374_s1 + $0x54] ss:$8 sps:$4 sm:$0xff]   ;;  %v277_v12 = vld [vmem:[%s374_s1 + $0x50] ss:$8 sps:$4 sm:$0xff]  }
   0x5   :  { %v278_v13 = vld [vmem:[%s374_s1 + $0x64] ss:$8 sps:$4 sm:$0xff]   ;;  %v280_v14 = vld [vmem:[%s374_s1 + $0x60] ss:$8 sps:$4 sm:$0xff]   ;;  %v281_v15 = vld [vmem:[%s374_s1 + $0x74] ss:$8 sps:$4 sm:$0xff]  }
   0x6   :  { %v283_v16 = vld [vmem:[%s374_s1 + $0x70] ss:$8 sps:$4 sm:$0xff]   ;;  %v18_v17 = vld [vmem:[%s375_s0] sm:$0xf]  ;;  %v203_v61 = vshrl.u32 %v202_v57, 7 }
   0x7   :  { %118 = vmatpush1.bf16.msra.mxu0 %v265_v4  ;;  %v200_v63 = vld [vmem:[%s376_s2] sm:$0x3] }
   0x8   :  { %119 = vmatprep.subr.bf16.mxu0 %v266_v5  ;;  %v204_v62 = vsub.s32 0, %v203_v61  ;;  %v208_v0 = vsub.s32 1, %v203_v61  ;;  %v214_v1 = vld [vmem:[%s377_s3] sm:$0x3] }
   0xa   :  { %v205_v3 = vrot.slane %v200_v63, %v204_v62 }
   0xb   :  { %120 = vmatpush1.bf16.msra.mxu0 %v268_v6  ;;  %v209_v6 = vrot.slane %v200_v63, %v208_v0 }
   0xc   :  { %121 = vmatprep.subr.bf16.mxu0 %v269_v7 }
   0xf   :  { %122 = vmatpush1.bf16.msra.mxu0 %v271_v8 }
  0x10   :  { %123 = vmatprep.subr.bf16.mxu0 %v272_v9  ;;  %v219_v9 = vrot.slane %v214_v1, %v204_v62 }
  0x13   :  { %124 = vmatpush1.bf16.msra.mxu0 %v274_v10 }
  0x14   :  { %125 = vmatprep.subr.bf16.mxu0 %v275_v11  ;;  %v223_v11 = vrot.slane %v214_v1, %v208_v0 }
  0x17   :  { %126 = vmatpush1.bf16.msra.mxu0 %v277_v12 }
  0x18   :  { %127 = vmatprep.subr.bf16.mxu0 %v278_v13 }
  0x1b   :  { %128 = vmatpush1.bf16.msra.mxu0 %v280_v14 }
  0x1c   :  { %129 = vmatprep.subr.bf16.mxu0 %v281_v15 }
  0x1f   :  { %130 = vmatpush1.bf16.msra.mxu0 %v283_v16 }
  0x22   :  { %148 = vmatmul.mubr.bf16.vlgmr.msra.gmra.mrb[0].mxu0 %v18_v17 }
  0xf5   :  { %v149_v18 = vpop.f32.mrb[0].mxu0 }
  0xf6   :  { %v156_v19 = vrot.slane %v149_v18, 4  ;;  %v170_v20 = vmul.f32 %v149_v18, %v149_v18  ;;  %v151_v21 = vpop.f32.mrb[1].mxu0 }
  0xf7   :  { %v162_v22 = vrot.slane %v151_v21, 4  ;;  %v171_v23 = vmul.f32 %v151_v21, %v151_v21  ;;  %v153_v24 = vpop.f32.mrb[2].mxu0 }
  0xf8   :  { %v157_v25 = vadd.f32 %v156_v19, %v149_v18  ;;  %v172_v26 = vrot.slane %v170_v20, 4  ;;  %v154_v27 = vpop.f32.mrb[3].mxu0 }
  0xf9   :  { %v163_v28 = vadd.f32 %v162_v22, %v151_v21  ;;  %v178_v29 = vrot.slane %v171_v23, 4 }
  0xfa   :  { %v158_v30 = vrot.slane %v157_v25, 2  ;;  %v173_v31 = vadd.f32 %v172_v26, %v170_v20 }
  0xfb   :  { %v164_v32 = vrot.slane %v163_v28, 2  ;;  %v179_v33 = vadd.f32 %v178_v29, %v171_v23 }
  0xfc   :  { %v159_v34 = vadd.f32 %v158_v30, %v157_v25  ;;  %v174_v35 = vrot.slane %v173_v31, 2 }
  0xfd   :  { %v165_v36 = vadd.f32 %v164_v32, %v163_v28  ;;  %v180_v37 = vrot.slane %v179_v33, 2 }
  0xfe   :  { %v160_v38 = vrot.slane %v159_v34, 1  ;;  %v175_v39 = vadd.f32 %v174_v35, %v173_v31 }
  0xff   :  { %v166_v40 = vrot.slane %v165_v36, 1  ;;  %v181_v41 = vadd.f32 %v180_v37, %v179_v33 }
 0x100   :  { %v161_v42 = vadd.f32 %v160_v38, %v159_v34  ;;  %v176_v43 = vrot.slane %v175_v39, 1 }
 0x101   :  { %v167_v44 = vadd.f32 %v166_v40, %v165_v36  ;;  %v182_v45 = vrot.slane %v181_v41, 1 }
 0x102   :  { %v168_v46 = vmul.f32 0.125, %v161_v42  ;;  %v177_v47 = vadd.f32 %v176_v43, %v175_v39 }
 0x103   :  { %v169_v48 = vmul.f32 0.125, %v167_v44  ;;  %v183_v49 = vadd.f32 %v182_v45, %v181_v41 }
 0x104   :  { %v184_v50 = vmul.f32 0.125, %v177_v47  ;;  %v186_v51 = vmul.f32 %v168_v46, %v168_v46  ;;  %v192_v2 = vsub.f32 %v149_v18, %v168_v46 }
 0x105   :  { %v185_v52 = vmul.f32 0.125, %v183_v49  ;;  %v187_v53 = vmul.f32 %v169_v48, %v169_v48  ;;  %v193_v5 = vsub.f32 %v151_v21, %v169_v48 }
 0x106   :  { %v188_v54 = vsub.f32 %v184_v50, %v186_v51 }
 0x107   :  { %v189_v55 = vsub.f32 %v185_v52, %v187_v53 }
 0x108   :  { %v190_v56 = vmax.f32 %v188_v54, 0.0 }
 0x109   :  { %v191_v58 = vmax.f32 %v189_v55, 0.0 }
 0x10a   :  { %v194_v59 = vadd.f32 1e-05, %v190_v56 }
 0x10b   :  { %v195_v60 = vadd.f32 1e-05, %v191_v58 }
 0x10c   :  { %284 = vrsqrt.f32 %v194_v59 }
 0x10d   :  { %286 = vrsqrt.f32 %v195_v60 }
 0x116   :  { %v285_v4 = vpop.eup %284 }
 0x117   :  { %v287_v7 = vpop.eup %286  ;;  %v198_v8 = vmul.f32 %v285_v4, %v192_v2 }
 0x118   :  { %v199_v10 = vmul.f32 %v287_v7, %v193_v5 }
 0x119   :  { %v212_v12 = vmul.f32 %v205_v3, %v198_v8 }
 0x11a   :  { %v213_v13 = vmul.f32 %v209_v6, %v199_v10 }
 0x11b   :  { %v226_v14 = vadd.f32 %v219_v9, %v212_v12 }
 0x11c   :  { %v227_v15 = vadd.f32 %v223_v11, %v213_v13 }
 0x11e   :  { %v258_v16 = vpack.c.bf16 %v227_v15, %v226_v14 }
 0x120   :  { %236 = vst [vmem:[%s378_s4] sm:$0xff] %v258_v16 }

// kernel: birdnet_forward.55
= control target key start
LH: loop header
LB: loop body
LE: loop exit
PB: predicated region body
PF: predicated region fallthrough
CT: control target
= control target key end

     0   :  { %s2104_s1 = inlined_call_operand.vmem [shape: bf16[1152,256], index: 1, kind: input, shape index: {}]   ;;  %s2105_s0 = inlined_call_operand.vmem [shape: bf16[8,1152], index: 0, kind: input, shape index: {}]   ;;  %s2106_s2 = inlined_call_operand.vmem [shape: f32[1,256], index: 2, kind: input, shape index: {}]   ;;  %s2107_s3 = inlined_call_operand.vmem [shape: f32[1,256], index: 3, kind: input, shape index: {}]   ;;  %s2108_s4 = inlined_call_operand.vmem [shape: bf16[8,256], index: 4, kind: output, shape index: {}]  }
   0x1   :  { %v1381_v0 = vld [vmem:[%s2104_s1 + $0x4] ss:$8 sps:$4 sm:$0xff]   ;;  %v1385_v2 = vld [vmem:[%s2104_s1] ss:$8 sps:$4 sm:$0xff]   ;;  %v1387_v4 = vld [vmem:[%s2104_s1 + $0x14] ss:$8 sps:$4 sm:$0xff]  }
   0x2   :  { %v1383_v1 = vld [vmem:[%s2104_s1 + $0x204] ss:$8 sps:$4 sm:$0xff]   ;;  %919 = vmatprep.subr.bf16.mxu1 %v1381_v0  ;;  %v1386_v3 = vld [vmem:[%s2104_s1 + $0x200] ss:$8 sps:$4 sm:$0xff]   ;;  %v1389_v5 = vld [vmem:[%s2104_s1 + $0x214] ss:$8 sps:$4 sm:$0xff]  }
   0x3   :  { %1001 = vmatprep.subr.bf16.mxu0 %v1383_v1  ;;  %920 = vmatpush1.bf16.msra.mxu1 %v1385_v2  ;;  %v1391_v6 = vld [vmem:[%s2104_s1 + $0x10] ss:$8 sps:$4 sm:$0xff]   ;;  %v1393_v8 = vld [vmem:[%s2104_s1 + $0x24] ss:$8 sps:$4 sm:$0xff]   ;;  %v1397_v10 = vld [vmem:[%s2104_s1 + $0x20] ss:$8 sps:$4 sm:$0xff]  }
   0x4   :  { %1002 = vmatpush1.bf16.msra.mxu0 %v1386_v3  ;;  %921 = vmatprep.subr.bf16.mxu1 %v1387_v4  ;;  %v1392_v7 = vld [vmem:[%s2104_s1 + $0x210] ss:$8 sps:$4 sm:$0xff]   ;;  %v1395_v9 = vld [vmem:[%s2104_s1 + $0x224] ss:$8 sps:$4 sm:$0xff]   ;;  %v1398_v11 = vld [vmem:[%s2104_s1 + $0x220] ss:$8 sps:$4 sm:$0xff]  }
   0x5   :  { %1003 = vmatprep.subr.bf16.mxu0 %v1389_v5  ;;  %v1399_v12 = vld [vmem:[%s2104_s1 + $0x34] ss:$8 sps:$4 sm:$0xff]   ;;  %v1403_v14 = vld [vmem:[%s2104_s1 + $0x30] ss:$8 sps:$4 sm:$0xff]   ;;  %v1405_v16 = vld [vmem:[%s2104_s1 + $0x44] ss:$8 sps:$4 sm:$0xff]  }
   0x6   :  { %v1401_v13 = vld [vmem:[%s2104_s1 + $0x234] ss:$8 sps:$4 sm:$0xff]   ;;  %v1404_v15 = vld [vmem:[%s2104_s1 + $0x230] ss:$8 sps:$4 sm:$0xff]   ;;  %v1407_v17 = vld [vmem:[%s2104_s1 + $0x244] ss:$8 sps:$4 sm:$0xff]  }
   0x7   :  { %922 = vmatpush1.bf16.msra.mxu1 %v1391_v6  ;;  %v1409_v18 = vld [vmem:[%s2104_s1 + $0x40] ss:$8 sps:$4 sm:$0xff]   ;;  %v1411_v20 = vld [vmem:[%s2104_s1 + $0x54] ss:$8 sps:$4 sm:$0xff]   ;;  %v1415_v22 = vld [vmem:[%s2104_s1 + $0x50] ss:$8 sps:$4 sm:$0xff]  }
   0x8   :  { %1004 = vmatpush1.bf16.msra.mxu0 %v1392_v7  ;;  %923 = vmatprep.subr.bf16.mxu1 %v1393_v8  ;;  %v1410_v19 = vld [vmem:[%s2104_s1 + $0x240] ss:$8 sps:$4 sm:$0xff]   ;;  %v1413_v21 = vld [vmem:[%s2104_s1 + $0x254] ss:$8 sps:$4 sm:$0xff]   ;;  %v1416_v23 = vld [vmem:[%s2104_s1 + $0x250] ss:$8 sps:$4 sm:$0xff]  }
   0x9   :  { %1005 = vmatprep.subr.bf16.mxu0 %v1395_v9  ;;  %v1417_v24 = vld [vmem:[%s2104_s1 + $0x64] ss:$8 sps:$4 sm:$0xff]   ;;  %v1421_v26 = vld [vmem:[%s2104_s1 + $0x60] ss:$8 sps:$4 sm:$0xff]   ;;  %v1423_v28 = vld [vmem:[%s2104_s1 + $0x74] ss:$8 sps:$4 sm:$0xff]  }
   0xa   :  { %v1419_v25 = vld [vmem:[%s2104_s1 + $0x264] ss:$8 sps:$4 sm:$0xff]   ;;  %v1422_v27 = vld [vmem:[%s2104_s1 + $0x260] ss:$8 sps:$4 sm:$0xff]   ;;  %v1425_v29 = vld [vmem:[%s2104_s1 + $0x274] ss:$8 sps:$4 sm:$0xff]  }
   0xb   :  { %924 = vmatpush1.bf16.msra.mxu1 %v1397_v10  ;;  %v1427_v30 = vld [vmem:[%s2104_s1 + $0x70] ss:$8 sps:$4 sm:$0xff]   ;;  %v1429_v32 = vld [vmem:[%s2104_s1 + $0x84] ss:$8 sps:$4 sm:$0xff]   ;;  %v1433_v34 = vld [vmem:[%s2104_s1 + $0x80] ss:$8 sps:$4 sm:$0xff]  }
   0xc   :  { %1006 = vmatpush1.bf16.msra.mxu0 %v1398_v11  ;;  %925 = vmatprep.subr.bf16.mxu1 %v1399_v12  ;;  %v1428_v31 = vld [vmem:[%s2104_s1 + $0x270] ss:$8 sps:$4 sm:$0xff]   ;;  %v1431_v33 = vld [vmem:[%s2104_s1 + $0x284] ss:$8 sps:$4 sm:$0xff]   ;;  %v1434_v35 = vld [vmem:[%s2104_s1 + $0x280] ss:$8 sps:$4 sm:$0xff]  }
   0xd   :  { %1007 = vmatprep.subr.bf16.mxu0 %v1401_v13  ;;  %v1435_v36 = vld [vmem:[%s2104_s1 + $0x94] ss:$8 sps:$4 sm:$0xff]   ;;  %v1439_v38 = vld [vmem:[%s2104_s1 + $0x90] ss:$8 sps:$4 sm:$0xff]   ;;  %v1441_v40 = vld [vmem:[%s2104_s1 + $0xa4] ss:$8 sps:$4 sm:$0xff]  }
   0xe   :  { %v1437_v37 = vld [vmem:[%s2104_s1 + $0x294] ss:$8 sps:$4 sm:$0xff]   ;;  %v1440_v39 = vld [vmem:[%s2104_s1 + $0x290] ss:$8 sps:$4 sm:$0xff]   ;;  %v1443_v41 = vld [vmem:[%s2104_s1 + $0x2a4] ss:$8 sps:$4 sm:$0xff]  }
   0xf   :  { %926 = vmatpush1.bf16.msra.mxu1 %v1403_v14  ;;  %v1445_v42 = vld [vmem:[%s2104_s1 + $0xa0] ss:$8 sps:$4 sm:$0xff]   ;;  %v1447_v44 = vld [vmem:[%s2104_s1 + $0xb4] ss:$8 sps:$4 sm:$0xff]   ;;  %v1451_v47 = vld [vmem:[%s2104_s1 + $0xb0] ss:$8 sps:$4 sm:$0xff]  }
  0x10   :  { %1008 = vmatpush1.bf16.msra.mxu0 %v1404_v15  ;;  %927 = vmatprep.subr.bf16.mxu1 %v1405_v16  ;;  %v1446_v43 = vld [vmem:[%s2104_s1 + $0x2a0] ss:$8 sps:$4 sm:$0xff]   ;;  %v1449_v45 = vld [vmem:[%s2104_s1 + $0x2b4] ss:$8 sps:$4 sm:$0xff]   ;;  %v1452_v49 = vld [vmem:[%s2104_s1 + $0x2b0] ss:$8 sps:$4 sm:$0xff]  }
  0x11   :  { %1009 = vmatprep.subr.bf16.mxu0 %v1407_v17  ;;  %v18_v46 = vld [vmem:[%s2105_s0] sm:$0xff]  ;;  %v20_v50 = vld [vmem:[%s2105_s0 + $0x10] sm:$0xff] }
  0x12   :  { %v1212_v48 = vcombine.high %v18_v46, %v18_v46  ;;  %v1453_v51 = vld [vmem:[%s2104_s1 + $0xc4] ss:$8 sps:$4 sm:$0xff]   ;;  %v1216_v53 = vcombine.high %v20_v50, %v20_v50  ;;  %v1457_v54 = vld [vmem:[%s2104_s1 + $0xc0] ss:$8 sps:$4 sm:$0xff]   ;;  %v1459_v56 = vld [vmem:[%s2104_s1 + $0xd4] ss:$8 sps:$4 sm:$0xff]   ;;  %v1211_v6 = vcombine.low %v18_v46, %v18_v46  ;;  %v1215_v7 = vcombine.low %v20_v50, %v20_v50 }
  0x13   :  { %928 = vmatpush1.bf16.msra.mxu1 %v1409_v18  ;;  %v1455_v52 = vld [vmem:[%s2104_s1 + $0x2c4] ss:$8 sps:$4 sm:$0xff]   ;;  %v1458_v55 = vld [vmem:[%s2104_s1 + $0x2c0] ss:$8 sps:$4 sm:$0xff]   ;;  %v1461_v57 = vld [vmem:[%s2104_s1 + $0x2d4] ss:$8 sps:$4 sm:$0xff]  }
  0x14   :  { %1010 = vmatpush1.bf16.msra.mxu0 %v1410_v19  ;;  %929 = vmatprep.subr.bf16.mxu1 %v1411_v20  ;;  %v1463_v58 = vld [vmem:[%s2104_s1 + $0xd0] ss:$8 sps:$4 sm:$0xff]   ;;  %v1465_v60 = vld [vmem:[%s2104_s1 + $0xe4] ss:$8 sps:$4 sm:$0xff]   ;;  %v1469_v62 = vld [vmem:[%s2104_s1 + $0xe0] ss:$8 sps:$4 sm:$0xff]  }
  0x15   :  { %1011 = vmatprep.subr.bf16.mxu0 %v1413_v21  ;;  %951 = vmatprep.mubr.bf16.mxu1 %v1212_v48  ;;  %v1464_v59 = vld [vmem:[%s2104_s1 + $0x2d0] ss:$8 sps:$4 sm:$0xff]   ;;  %v1467_v61 = vld [vmem:[%s2104_s1 + $0x2e4] ss:$8 sps:$4 sm:$0xff]   ;;  %v1470_v63 = vld [vmem:[%s2104_s1 + $0x2e0] ss:$8 sps:$4 sm:$0xff]  }
  0x16   :  { %1033 = vmatprep.mubr.bf16.mxu0 %v1216_v53  ;;  %v1471_v0 = vld [vmem:[%s2104_s1 + $0xf4] ss:$8 sps:$4 sm:$0xff]   ;;  %v1475_v2 = vld [vmem:[%s2104_s1 + $0xf0] ss:$8 sps:$4 sm:$0xff]   ;;  %v1481_v4 = vld [vmem:[%s2104_s1 + $0x104] ss:$8 sps:$4 sm:$0xff]  }
  0x17   :  { %930 = vmatpush1.bf16.msra.mxu1 %v1415_v22  ;;  %v1473_v1 = vld [vmem:[%s2104_s1 + $0x2f4] ss:$8 sps:$4 sm:$0xff]   ;;  %v1476_v3 = vld [vmem:[%s2104_s1 + $0x2f0] ss:$8 sps:$4 sm:$0xff]   ;;  %v1486_v5 = vld [vmem:[%s2104_s1 + $0x304] ss:$8 sps:$4 sm:$0xff]  }
  0x18   :  { %1012 = vmatpush1.bf16.msra.mxu0 %v1416_v23  ;;  %931 = vmatprep.subr.bf16.mxu1 %v1417_v24  ;;  %v1479_v8 = vld [vmem:[%s2104_s1 + $0x100] ss:$8 sps:$4 sm:$0xff]   ;;  %v1489_v10 = vld [vmem:[%s2104_s1 + $0x114] ss:$8 sps:$4 sm:$0xff]   ;;  %v1487_v12 = vld [vmem:[%s2104_s1 + $0x110] ss:$8 sps:$4 sm:$0xff]  }
  0x19   :  { %1013 = vmatprep.subr.bf16.mxu0 %v1419_v25  ;;  %v1484_v9 = vld [vmem:[%s2104_s1 + $0x300] ss:$8 sps:$4 sm:$0xff]   ;;  %v1492_v11 = vld [vmem:[%s2104_s1 + $0x314] ss:$8 sps:$4 sm:$0xff]   ;;  %v1490_v13 = vld [vmem:[%s2104_s1 + $0x310] ss:$8 sps:$4 sm:$0xff]  }
  0x1a   :  { %v1495_v14 = vld [vmem:[%s2104_s1 + $0x124] ss:$8 sps:$4 sm:$0xff]   ;;  %v1493_v16 = vld [vmem:[%s2104_s1 + $0x120] ss:$8 sps:$4 sm:$0xff]   ;;  %v1501_v18 = vld [vmem:[%s2104_s1 + $0x134] ss:$8 sps:$4 sm:$0xff]  }
  0x1b   :  { %932 = vmatpush1.bf16.msra.mxu1 %v1421_v26  ;;  %v1498_v15 = vld [vmem:[%s2104_s1 + $0x324] ss:$8 sps:$4 sm:$0xff]   ;;  %v1496_v17 = vld [vmem:[%s2104_s1 + $0x320] ss:$8 sps:$4 sm:$0xff]   ;;  %v1504_v19 = vld [vmem:[%s2104_s1 + $0x334] ss:$8 sps:$4 sm:$0xff]  }
  0x1c   :  { %1014 = vmatpush1.bf16.msra.mxu0 %v1422_v27  ;;  %933 = vmatprep.subr.bf16.mxu1 %v1423_v28  ;;  %v1499_v20 = vld [vmem:[%s2104_s1 + $0x130] ss:$8 sps:$4 sm:$0xff]   ;;  %v1507_v22 = vld [vmem:[%s2104_s1 + $0x144] ss:$8 sps:$4 sm:$0xff]   ;;  %v1505_v24 = vld [vmem:[%s2104_s1 + $0x140] ss:$8 sps:$4 sm:$0xff]  }
  0x1d   :  { %1015 = vmatprep.subr.bf16.mxu0 %v1425_v29  ;;  %v1502_v21 = vld [vmem:[%s2104_s1 + $0x330] ss:$8 sps:$4 sm:$0xff]   ;;  %v1510_v23 = vld [vmem:[%s2104_s1 + $0x344] ss:$8 sps:$4 sm:$0xff]   ;;  %v1508_v25 = vld [vmem:[%s2104_s1 + $0x340] ss:$8 sps:$4 sm:$0xff]  }
  0x1e   :  { %v1513_v26 = vld [vmem:[%s2104_s1 + $0x154] ss:$8 sps:$4 sm:$0xff]   ;;  %v1511_v28 = vld [vmem:[%s2104_s1 + $0x150] ss:$8 sps:$4 sm:$0xff]   ;;  %v1543_v50 = vld [vmem:[%s2104_s1 + $0x1a4] ss:$8 sps:$4 sm:$0xff]  }
  0x1f   :  { %934 = vmatpush1.bf16.msra.mxu1 %v1427_v30  ;;  %v1516_v27 = vld [vmem:[%s2104_s1 + $0x354] ss:$8 sps:$4 sm:$0xff]   ;;  %v1514_v29 = vld [vmem:[%s2104_s1 + $0x350] ss:$8 sps:$4 sm:$0xff]   ;;  %v1519_v30 = vld [vmem:[%s2104_s1 + $0x164] ss:$8 sps:$4 sm:$0xff]  }
  0x20   :  { %1016 = vmatpush1.bf16.msra.mxu0 %v1428_v31  ;;  %935 = vmatprep.subr.bf16.mxu1 %v1429_v32  ;;  %v1522_v31 = vld [vmem:[%s2104_s1 + $0x364] ss:$8 sps:$4 sm:$0xff]   ;;  %v1537_v46 = vld [vmem:[%s2104_s1 + $0x194] ss:$8 sps:$4 sm:$0xff]   ;;  %v1535_v48 = vld [vmem:[%s2104_s1 + $0x190] ss:$8 sps:$4 sm:$0xff]  }
  0x21   :  { %1017 = vmatprep.subr.bf16.mxu0 %v1431_v33  ;;  %v1915_v32 = vld [vmem:[%s2105_s0 + $0x8] sm:$0xff]  ;;  %v1920_v33 = vld [vmem:[%s2105_s0 + $0x18] sm:$0xff] }
  0x22   :  { %v1544_v53 = vld [vmem:[%s2104_s1 + $0x3a0] ss:$8 sps:$4 sm:$0xff]  }
  0x23   :  { %936 = vmatpush1.bf16.msra.mxu1 %v1433_v34  ;;  %v1517_v34 = vld [vmem:[%s2104_s1 + $0x160] ss:$8 sps:$4 sm:$0xff]  }
  0x24   :  { %1018 = vmatpush1.bf16.msra.mxu0 %v1434_v35  ;;  %937 = vmatprep.subr.bf16.mxu1 %v1435_v36  ;;  %v1520_v35 = vld [vmem:[%s2104_s1 + $0x360] ss:$8 sps:$4 sm:$0xff]   ;;  %v1214_v36 = vcombine.high %v1915_v32, %v1915_v32 }
  0x25   :  { %1019 = vmatprep.subr.bf16.mxu0 %v1437_v37  ;;  %v1218_v37 = vcombine.high %v1920_v33, %v1920_v33 }
  0x27   :  { %938 = vmatpush1.bf16.msra.mxu1 %v1439_v38  ;;  %v1525_v38 = vld [vmem:[%s2104_s1 + $0x174] ss:$8 sps:$4 sm:$0xff]  }
  0x28   :  { %1020 = vmatpush1.bf16.msra.mxu0 %v1440_v39  ;;  %939 = vmatprep.subr.bf16.mxu1 %v1441_v40  ;;  %v1528_v39 = vld [vmem:[%s2104_s1 + $0x374] ss:$8 sps:$4 sm:$0xff]   ;;  %v1523_v40 = vld [vmem:[%s2104_s1 + $0x170] ss:$8 sps:$4 sm:$0xff]  }
  0x29   :  { %1021 = vmatprep.subr.bf16.mxu0 %v1443_v41  ;;  %v1526_v41 = vld [vmem:[%s2104_s1 + $0x370] ss:$8 sps:$4 sm:$0xff]  }
  0x2b   :  { %940 = vmatpush1.bf16.msra.mxu1 %v1445_v42  ;;  %v1531_v42 = vld [vmem:[%s2104_s1 + $0x184] ss:$8 sps:$4 sm:$0xff]  }
  0x2c   :  { %1022 = vmatpush1.bf16.msra.mxu0 %v1446_v43  ;;  %941 = vmatprep.subr.bf16.mxu1 %v1447_v44  ;;  %v1534_v43 = vld [vmem:[%s2104_s1 + $0x384] ss:$8 sps:$4 sm:$0xff]   ;;  %v1529_v44 = vld [vmem:[%s2104_s1 + $0x180] ss:$8 sps:$4 sm:$0xff]  }
  0x2d   :  { %1023 = vmatprep.subr.bf16.mxu0 %v1449_v45  ;;  %v1532_v45 = vld [vmem:[%s2104_s1 + $0x380] ss:$8 sps:$4 sm:$0xff]  }
  0x2f   :  { %942 = vmatpush1.bf16.msra.mxu1 %v1451_v47  ;;  %v1540_v47 = vld [vmem:[%s2104_s1 + $0x394] ss:$8 sps:$4 sm:$0xff]  }
  0x30   :  { %1024 = vmatpush1.bf16.msra.mxu0 %v1452_v49  ;;  %943 = vmatprep.subr.bf16.mxu1 %v1453_v51  ;;  %v1538_v49 = vld [vmem:[%s2104_s1 + $0x390] ss:$8 sps:$4 sm:$0xff]   ;;  %v1546_v51 = vld [vmem:[%s2104_s1 + $0x3a4] ss:$8 sps:$4 sm:$0xff]  }
  0x31   :  { %1025 = vmatprep.subr.bf16.mxu0 %v1455_v52  ;;  %v1541_v52 = vld [vmem:[%s2104_s1 + $0x1a0] ss:$8 sps:$4 sm:$0xff]  }
  0x33   :  { %944 = vmatpush1.bf16.msra.mxu1 %v1457_v54  ;;  %v1549_v54 = vld [vmem:[%s2104_s1 + $0x1b4] ss:$8 sps:$4 sm:$0xff]  }
  0x34   :  { %1026 = vmatpush1.bf16.msra.mxu0 %v1458_v55  ;;  %945 = vmatprep.subr.bf16.mxu1 %v1459_v56  ;;  %v1552_v55 = vld [vmem:[%s2104_s1 + $0x3b4] ss:$8 sps:$4 sm:$0xff]   ;;  %v1547_v56 = vld [vmem:[%s2104_s1 + $0x1b0] ss:$8 sps:$4 sm:$0xff]  }
  0x35   :  { %1027 = vmatprep.subr.bf16.mxu0 %v1461_v57  ;;  %v1550_v57 = vld [vmem:[%s2104_s1 + $0x3b0] ss:$8 sps:$4 sm:$0xff]  }
  0x37   :  { %946 = vmatpush1.bf16.msra.mxu1 %v1463_v58  ;;  %v1555_v58 = vld [vmem:[%s2104_s1 + $0x1c4] ss:$8 sps:$4 sm:$0xff]  }
  0x38   :  { %1028 = vmatpush1.bf16.msra.mxu0 %v1464_v59  ;;  %947 = vmatprep.subr.bf16.mxu1 %v1465_v60  ;;  %v1558_v59 = vld [vmem:[%s2104_s1 + $0x3c4] ss:$8 sps:$4 sm:$0xff]   ;;  %v1553_v60 = vld [vmem:[%s2104_s1 + $0x1c0] ss:$8 sps:$4 sm:$0xff]  }
  0x39   :  { %1029 = vmatprep.subr.bf16.mxu0 %v1467_v61  ;;  %v1556_v61 = vld [vmem:[%s2104_s1 + $0x3c0] ss:$8 sps:$4 sm:$0xff]  }
  0x3b   :  { %948 = vmatpush1.bf16.msra.mxu1 %v1469_v62  ;;  %v1561_v62 = vld [vmem:[%s2104_s1 + $0x1d4] ss:$8 sps:$4 sm:$0xff]  }
  0x3c   :  { %1030 = vmatpush1.bf16.msra.mxu0 %v1470_v63  ;;  %949 = vmatprep.subr.bf16.mxu1 %v1471_v0  ;;  %v1564_v63 = vld [vmem:[%s2104_s1 + $0x3d4] ss:$8 sps:$4 sm:$0xff]   ;;  %v1559_v0 = vld [vmem:[%s2104_s1 + $0x1d0] ss:$8 sps:$4 sm:$0xff]  }
  0x3d   :  { %1031 = vmatprep.subr.bf16.mxu0 %v1473_v1  ;;  %v1562_v1 = vld [vmem:[%s2104_s1 + $0x3d0] ss:$8 sps:$4 sm:$0xff]  }
  0x3f   :  { %950 = vmatpush1.bf16.msra.mxu1 %v1475_v2  ;;  %v1567_v2 = vld [vmem:[%s2104_s1 + $0x1e4] ss:$8 sps:$4 sm:$0xff]  }
  0x40   :  { %1032 = vmatpush1.bf16.msra.mxu0 %v1476_v3  ;;  %960 = vmatprep.subr.bf16.mxu1 %v1481_v4  ;;  %v1570_v3 = vld [vmem:[%s2104_s1 + $0x3e4] ss:$8 sps:$4 sm:$0xff]   ;;  %v1565_v4 = vld [vmem:[%s2104_s1 + $0x1e0] ss:$8 sps:$4 sm:$0xff]  }
  0x41   :  { %1042 = vmatprep.subr.bf16.mxu0 %v1486_v5  ;;  %v1568_v5 = vld [vmem:[%s2104_s1 + $0x3e0] ss:$8 sps:$4 sm:$0xff]  }
  0x42   :  { %952 = vmatmul.mubr.bf16.vlgmr.msra.gmra.mrb[0].mxu1 %v1211_v6  ;;  %v1573_v6 = vld [vmem:[%s2104_s1 + $0x1f4] ss:$8 sps:$4 sm:$0xff]  }
  0x43   :  { %1034 = vmatmul.mubr.bf16.vlgmr.msra.gmra.mrb[0].mxu0 %v1215_v7  ;;  %961 = vmatpush1.bf16.msra.mxu1 %v1479_v8  ;;  %v1576_v7 = vld [vmem:[%s2104_s1 + $0x3f4] ss:$8 sps:$4 sm:$0xff]   ;;  %v1571_v8 = vld [vmem:[%s2104_s1 + $0x1f0] ss:$8 sps:$4 sm:$0xff]  }
  0x44   :  { %1043 = vmatpush1.bf16.msra.mxu0 %v1484_v9  ;;  %962 = vmatprep.subr.bf16.mxu1 %v1489_v10  ;;  %v1574_v9 = vld [vmem:[%s2104_s1 + $0x3f0] ss:$8 sps:$4 sm:$0xff]   ;;  %v1583_v10 = vld [vmem:[%s2104_s1 + $0x404] ss:$8 sps:$4 sm:$0xff]  }
  0x45   :  { %1044 = vmatprep.subr.bf16.mxu0 %v1492_v11  ;;  %992 = vmatprep.mubr.bf16.mxu1 %v1214_v36  ;;  %v1213_v11 = vcombine.low %v1915_v32, %v1915_v32 }
  0x46   :  { %1074 = vmatprep.mubr.bf16.mxu0 %v1218_v37 }
  0x47   :  { %963 = vmatpush1.bf16.msra.mxu1 %v1487_v12  ;;  %v1217_v12 = vcombine.low %v1920_v33, %v1920_v33 }
  0x48   :  { %1045 = vmatpush1.bf16.msra.mxu0 %v1490_v13  ;;  %964 = vmatprep.subr.bf16.mxu1 %v1495_v14  ;;  %v1581_v13 = vld [vmem:[%s2104_s1 + $0x400] ss:$8 sps:$4 sm:$0xff]   ;;  %v1586_v14 = vld [vmem:[%s2104_s1 + $0x414] ss:$8 sps:$4 sm:$0xff]  }
  0x49   :  { %1046 = vmatprep.subr.bf16.mxu0 %v1498_v15  ;;  %v1584_v15 = vld [vmem:[%s2104_s1 + $0x410] ss:$8 sps:$4 sm:$0xff]  }
  0x4b   :  { %965 = vmatpush1.bf16.msra.mxu1 %v1493_v16  ;;  %v1610_v16 = vmov 0  }
  0x4c   :  { %1047 = vmatpush1.bf16.msra.mxu0 %v1496_v17  ;;  %966 = vmatprep.subr.bf16.mxu1 %v1501_v18  ;;  %v1589_v17 = vld [vmem:[%s2104_s1 + $0x424] ss:$8 sps:$4 sm:$0xff]   ;;  %v1587_v18 = vld [vmem:[%s2104_s1 + $0x420] ss:$8 sps:$4 sm:$0xff]  }
  0x4d   :  { %1048 = vmatprep.subr.bf16.mxu0 %v1504_v19  ;;  %v1592_v19 = vld [vmem:[%s2104_s1 + $0x434] ss:$8 sps:$4 sm:$0xff]  }
  0x4f   :  { %967 = vmatpush1.bf16.msra.mxu1 %v1499_v20  ;;  %v1590_v20 = vld [vmem:[%s2104_s1 + $0x430] ss:$8 sps:$4 sm:$0xff]  }
  0x50   :  { %1049 = vmatpush1.bf16.msra.mxu0 %v1502_v21  ;;  %968 = vmatprep.subr.bf16.mxu1 %v1507_v22  ;;  %v1595_v21 = vld [vmem:[%s2104_s1 + $0x444] ss:$8 sps:$4 sm:$0xff]   ;;  %v1593_v22 = vld [vmem:[%s2104_s1 + $0x440] ss:$8 sps:$4 sm:$0xff]  }
  0x51   :  { %1050 = vmatprep.subr.bf16.mxu0 %v1510_v23  ;;  %v1598_v23 = vld [vmem:[%s2104_s1 + $0x454] ss:$8 sps:$4 sm:$0xff]  }
  0x53   :  { %969 = vmatpush1.bf16.msra.mxu1 %v1505_v24  ;;  %v1596_v24 = vld [vmem:[%s2104_s1 + $0x450] ss:$8 sps:$4 sm:$0xff]  }
  0x54   :  { %1051 = vmatpush1.bf16.msra.mxu0 %v1508_v25  ;;  %970 = vmatprep.subr.bf16.mxu1 %v1513_v26  ;;  %v1601_v25 = vld [vmem:[%s2104_s1 + $0x464] ss:$8 sps:$4 sm:$0xff]   ;;  %v1599_v26 = vld [vmem:[%s2104_s1 + $0x460] ss:$8 sps:$4 sm:$0xff]  }
  0x55   :  { %1052 = vmatprep.subr.bf16.mxu0 %v1516_v27  ;;  %v1604_v27 = vld [vmem:[%s2104_s1 + $0x474] ss:$8 sps:$4 sm:$0xff]  }
  0x57   :  { %971 = vmatpush1.bf16.msra.mxu1 %v1511_v28  ;;  %v1602_v28 = vld [vmem:[%s2104_s1 + $0x470] ss:$8 sps:$4 sm:$0xff]  }
  0x58   :  { %1053 = vmatpush1.bf16.msra.mxu0 %v1514_v29  ;;  %972 = vmatprep.subr.bf16.mxu1 %v1519_v30  ;;  %v1605_v29 = vld [vmem:[%s2105_s0 + $0x20] ss:$0 sps:$4 sm:$0xff]  }
  0x59   :  { %1054 = vmatprep.subr.bf16.mxu0 %v1522_v31 }
  0x5b   :  { %973 = vmatpush1.bf16.msra.mxu1 %v1517_v34 }
  0x5c   :  { %1055 = vmatpush1.bf16.msra.mxu0 %v1520_v35  ;;  %974 = vmatprep.subr.bf16.mxu1 %v1525_v38 }
  0x5d   :  { %1056 = vmatprep.subr.bf16.mxu0 %v1528_v39 }
  0x5f   :  { %975 = vmatpush1.bf16.msra.mxu1 %v1523_v40 }
  0x60   :  { %1057 = vmatpush1.bf16.msra.mxu0 %v1526_v41  ;;  %976 = vmatprep.subr.bf16.mxu1 %v1531_v42 }
  0x61   :  { %1058 = vmatprep.subr.bf16.mxu0 %v1534_v43 }
  0x63   :  { %977 = vmatpush1.bf16.msra.mxu1 %v1529_v44 }
  0x64   :  { %1059 = vmatpush1.bf16.msra.mxu0 %v1532_v45  ;;  %978 = vmatprep.subr.bf16.mxu1 %v1537_v46 }
  0x65   :  { %1060 = vmatprep.subr.bf16.mxu0 %v1540_v47 }
  0x67   :  { %979 = vmatpush1.bf16.msra.mxu1 %v1535_v48 }
  0x68   :  { %1061 = vmatpush1.bf16.msra.mxu0 %v1538_v49  ;;  %980 = vmatprep.subr.bf16.mxu1 %v1543_v50 }
  0x69   :  { %1062 = vmatprep.subr.bf16.mxu0 %v1546_v51 }
  0x6b   :  { %981 = vmatpush1.bf16.msra.mxu1 %v1541_v52 }
  0x6c   :  { %1063 = vmatpush1.bf16.msra.mxu0 %v1544_v53  ;;  %982 = vmatprep.subr.bf16.mxu1 %v1549_v54 }
  0x6d   :  { %1064 = vmatprep.subr.bf16.mxu0 %v1552_v55 }
  0x6f   :  { %983 = vmatpush1.bf16.msra.mxu1 %v1547_v56 }
  0x70   :  { %1065 = vmatpush1.bf16.msra.mxu0 %v1550_v57  ;;  %984 = vmatprep.subr.bf16.mxu1 %v1555_v58 }
  0x71   :  { %1066 = vmatprep.subr.bf16.mxu0 %v1558_v59 }
  0x73   :  { %985 = vmatpush1.bf16.msra.mxu1 %v1553_v60 }
  0x74   :  { %1067 = vmatpush1.bf16.msra.mxu0 %v1556_v61  ;;  %986 = vmatprep.subr.bf16.mxu1 %v1561_v62 }
  0x75   :  { %1068 = vmatprep.subr.bf16.mxu0 %v1564_v63 }
  0x77   :  { %987 = vmatpush1.bf16.msra.mxu1 %v1559_v0 }
  0x78   :  { %1069 = vmatpush1.bf16.msra.mxu0 %v1562_v1  ;;  %988 = vmatprep.subr.bf16.mxu1 %v1567_v2 }
  0x79   :  { %1070 = vmatprep.subr.bf16.mxu0 %v1570_v3 }
  0x7b   :  { %989 = vmatpush1.bf16.msra.mxu1 %v1565_v4 }
  0x7c   :  { %1071 = vmatpush1.bf16.msra.mxu0 %v1568_v5  ;;  %990 = vmatprep.subr.bf16.mxu1 %v1573_v6 }
  0x7d   :  { %1072 = vmatprep.subr.bf16.mxu0 %v1576_v7 }
  0x7f   :  { %991 = vmatpush1.bf16.msra.mxu1 %v1571_v8 }
  0x80   :  { %1073 = vmatpush1.bf16.msra.mxu0 %v1574_v9 }
  0x81   :  { %1083 = vmatprep.subr.bf16.mxu0 %v1583_v10 }
  0x82   :  { %993 = vmatmul.mubr.bf16.vlgmr.msra.gmra.mrb[0].mxu1 %v1213_v11  ;;  %v1170_v11 = vlaneseq }
  0x83   :  { %1075 = vmatmul.mubr.bf16.vlgmr.msra.gmra.mrb[0].mxu0 %v1217_v12 }
  0x84   :  { %1084 = vmatpush1.bf16.msra.mxu0 %v1581_v13  ;;  %1115 = vmatprep.mubr.bf16.mxu0 %v1610_v16 }
  0x85   :  { %1085 = vmatprep.subr.bf16.mxu0 %v1586_v14 }
  0x88   :  { %1086 = vmatpush1.bf16.msra.mxu0 %v1584_v15  ;;  %v1171_v15 = vshrl.u32 %v1170_v11, 7 }
  0x89   :  { %1087 = vmatprep.subr.bf16.mxu0 %v1589_v17  ;;  %v1168_v17 = vld [vmem:[%s2106_s2] sm:$0x3] }
  0x8a   :  { %v1172_v16 = vsub.s32 0, %v1171_v15 }
  0x8c   :  { %1088 = vmatpush1.bf16.msra.mxu0 %v1587_v18  ;;  %v1176_v18 = vsub.s32 1, %v1171_v15 }
  0x8d   :  { %1089 = vmatprep.subr.bf16.mxu0 %v1592_v19  ;;  %v1182_v19 = vld [vmem:[%s2107_s3] sm:$0x3] }
  0x90   :  { %1090 = vmatpush1.bf16.msra.mxu0 %v1590_v20 }
  0x91   :  { %1091 = vmatprep.subr.bf16.mxu0 %v1595_v21  ;;  %v1173_v21 = vrot.slane %v1168_v17, %v1172_v16 }
  0x94   :  { %1092 = vmatpush1.bf16.msra.mxu0 %v1593_v22 }
  0x95   :  { %1093 = vmatprep.subr.bf16.mxu0 %v1598_v23 }
  0x98   :  { %1094 = vmatpush1.bf16.msra.mxu0 %v1596_v24  ;;  %v1177_v24 = vrot.slane %v1168_v17, %v1176_v18 }
  0x99   :  { %1095 = vmatprep.subr.bf16.mxu0 %v1601_v25 }
  0x9c   :  { %1096 = vmatpush1.bf16.msra.mxu0 %v1599_v26 }
  0x9d   :  { %1097 = vmatprep.subr.bf16.mxu0 %v1604_v27  ;;  %v1187_v27 = vrot.slane %v1182_v19, %v1172_v16 }
  0xa0   :  { %1098 = vmatpush1.bf16.msra.mxu0 %v1602_v28 }
  0xa3   :  { %1116 = vmatmul.mubr.bf16.vlgmr.msra.gmra.mrb[0].mxu0 %v1605_v29  ;;  %v1191_v29 = vrot.slane %v1182_v19, %v1176_v18 }
 0x155   :  { %v994_v30 = vpop.f32.mrb[0].mxu1 }
 0x156   :  { %v996_v31 = vpop.f32.mrb[1].mxu1 }
 0x157   :  { %v998_v32 = vpop.f32.mrb[2].mxu1 }
 0x158   :  { %v999_v33 = vpop.f32.mrb[3].mxu1 }
 0x176   :  { %v1117_v34 = vpop.f32.mrb[0].mxu0 }
 0x177   :  { %v1366_v35 = vadd.f32 %v1117_v34, %v994_v30  ;;  %v1119_v36 = vpop.f32.mrb[1].mxu0 }
 0x178   :  { %v1367_v37 = vadd.f32 %v1119_v36, %v996_v31  ;;  %v1121_v38 = vpop.f32.mrb[2].mxu0 }
 0x179   :  { %v1124_v39 = vrot.slane %v1366_v35, 4  ;;  %v1138_v40 = vmul.f32 %v1366_v35, %v1366_v35  ;;  %v1122_v41 = vpop.f32.mrb[3].mxu0 }
 0x17a   :  { %v1130_v42 = vrot.slane %v1367_v37, 4  ;;  %v1139_v43 = vmul.f32 %v1367_v37, %v1367_v37 }
 0x17b   :  { %v1125_v44 = vadd.f32 %v1366_v35, %v1124_v39  ;;  %v1140_v45 = vrot.slane %v1138_v40, 4 }
 0x17c   :  { %v1131_v46 = vadd.f32 %v1367_v37, %v1130_v42  ;;  %v1146_v47 = vrot.slane %v1139_v43, 4 }
 0x17d   :  { %v1126_v48 = vrot.slane %v1125_v44, 2  ;;  %v1141_v49 = vadd.f32 %v1140_v45, %v1138_v40 }
 0x17e   :  { %v1132_v50 = vrot.slane %v1131_v46, 2  ;;  %v1147_v51 = vadd.f32 %v1146_v47, %v1139_v43 }
 0x17f   :  { %v1127_v52 = vadd.f32 %v1126_v48, %v1125_v44  ;;  %v1142_v53 = vrot.slane %v1141_v49, 2 }
 0x180   :  { %v1133_v54 = vadd.f32 %v1132_v50, %v1131_v46  ;;  %v1148_v55 = vrot.slane %v1147_v51, 2 }
 0x181   :  { %v1128_v56 = vrot.slane %v1127_v52, 1  ;;  %v1143_v57 = vadd.f32 %v1142_v53, %v1141_v49 }
 0x182   :  { %v1134_v58 = vrot.slane %v1133_v54, 1  ;;  %v1149_v59 = vadd.f32 %v1148_v55, %v1147_v51 }
 0x183   :  { %v1129_v60 = vadd.f32 %v1128_v56, %v1127_v52  ;;  %v1144_v61 = vrot.slane %v1143_v57, 1 }
 0x184   :  { %v1135_v62 = vadd.f32 %v1134_v58, %v1133_v54  ;;  %v1150_v63 = vrot.slane %v1149_v59, 1 }
 0x185   :  { %v1136_v0 = vmul.f32 0.125, %v1129_v60  ;;  %v1145_v1 = vadd.f32 %v1144_v61, %v1143_v57 }
 0x186   :  { %v1137_v2 = vmul.f32 0.125, %v1135_v62  ;;  %v1151_v3 = vadd.f32 %v1150_v63, %v1149_v59 }
 0x187   :  { %v1152_v4 = vmul.f32 0.125, %v1145_v1  ;;  %v1154_v5 = vmul.f32 %v1136_v0, %v1136_v0  ;;  %v1160_v20 = vsub.f32 %v1366_v35, %v1136_v0 }
 0x188   :  { %v1153_v6 = vmul.f32 0.125, %v1151_v3  ;;  %v1155_v7 = vmul.f32 %v1137_v2, %v1137_v2  ;;  %v1161_v23 = vsub.f32 %v1367_v37, %v1137_v2 }
 0x189   :  { %v1156_v8 = vsub.f32 %v1152_v4, %v1154_v5 }
 0x18a   :  { %v1157_v9 = vsub.f32 %v1153_v6, %v1155_v7 }
 0x18b   :  { %v1158_v10 = vmax.f32 %v1156_v8, 0.0 }
 0x18c   :  { %v1159_v12 = vmax.f32 %v1157_v9, 0.0 }
 0x18d   :  { %v1162_v13 = vadd.f32 1e-05, %v1158_v10 }
 0x18e   :  { %v1163_v14 = vadd.f32 1e-05, %v1159_v12 }
 0x18f   :  { %1606 = vrsqrt.f32 %v1162_v13 }
 0x190   :  { %1608 = vrsqrt.f32 %v1163_v14 }
 0x199   :  { %v1607_v22 = vpop.eup %1606 }
 0x19a   :  { %v1609_v25 = vpop.eup %1608  ;;  %v1166_v26 = vmul.f32 %v1607_v22, %v1160_v20 }
 0x19b   :  { %v1167_v28 = vmul.f32 %v1609_v25, %v1161_v23 }
 0x19c   :  { %v1180_v30 = vmul.f32 %v1173_v21, %v1166_v26 }
 0x19d   :  { %v1181_v31 = vmul.f32 %v1177_v24, %v1167_v28 }
 0x19e   :  { %v1194_v32 = vadd.f32 %v1187_v27, %v1180_v30 }
 0x19f   :  { %v1195_v33 = vadd.f32 %v1191_v29, %v1181_v31 }
 0x1a0   :  { %v1196_v34 = vmax.f32 %v1194_v32, 0.0 }
 0x1a1   :  { %v1197_v36 = vmax.f32 %v1195_v33, 0.0 }
 0x1a3   :  { %v1365_v38 = vpack.c.bf16 %v1197_v36, %v1196_v34 }
 0x1a5   :  { %1206 = vst [vmem:[%s2108_s4] sm:$0xff] %v1365_v38 }

// kernel: birdnet_forward.57
= control target key start
LH: loop header
LB: loop body
LE: loop exit
PB: predicated region body
PF: predicated region fallthrough
CT: control target
= control target key end

     0   :  { %s996_s18 = smov 0   ;;  %s998_s19 = smov 0   ;;  %s1084_s0 = inlined_call_operand.vmem [shape: bf16[8,2304], index: 0, kind: input, shape index: {}]   ;;  %s1085_s1 = inlined_call_operand.vmem [shape: bf16[2304,256], index: 1, kind: input, shape index: {}]   ;;  %s1086_s2 = inlined_call_operand.vmem [shape: f32[1,256], index: 2, kind: input, shape index: {}]   ;;  %s1087_s3 = inlined_call_operand.vmem [shape: f32[1,256], index: 3, kind: input, shape index: {}]   ;;  %s1088_s4 = inlined_call_operand.vmem [shape: bf16[8,256], index: 4, kind: input, shape index: {}]   ;;  %s1089_s5 = inlined_call_operand.vmem [shape: bf16[8,256], index: 5, kind: output, shape index: {}]  }
   0x1   :  { %s1000_s20 = smov 0  }
   0x2 LB: > { %s24_s21 = sadd.s32 1, %s959_s19  ;;  %p813_p0 = scmp.ge.s32.totalorder %s963_s20, 1  ;;  %s963_s20 = sphi %s1000_s20, %s15_s20   ;;  %s959_s19 = sphi %s998_s19, %s1091_s19   ;;  %s955_s18 = sphi %s996_s18, %s1090_s18  }
   0x3   : > { %p25_p1 = scmp.ge.s32.totalorder %s24_s21, 9  ;;  %p250_p2 = scmp.lt.s32.totalorder %s963_s20, 10 }
   0x5   : > { %s1093_s21 = smov (%p25_p1, %s24_s21), 0  ;;  %p251_p3 = pnand %p813_p0, %p250_p2 }
   0x6   : > { %s814_s22 = sshll.u32 (!%p251_p3), %s955_s18, 1  ;;  %s816_s23 = sshll.u32 (!%p251_p3), %s955_s18, 5 }
   0x7   : > { %254 = sbr.rel (%p251_p3) target bundleno = 358 (0x166), region = 40  ;;  %p302_p4 = scmp.lt.s32.totalorder (!%p251_p3), %s814_s22, 17 }
   0x8   : > { %p309_p5 = scmp.lt.s32.totalorder (!%p251_p3), %s816_s23, 287  ;;  %p819_p6 = scmp.ne.s32.totalorder (!%p251_p3), %s955_s18, 0 }
   0xe   : > { %s1095_s22 = smov (!%p302_p4, %s814_s22), 17  ;;  %s1097_s23 = smov (!%p309_p5, %s816_s23), 287 }
   0xf   : > { %s815_s24 = sshll.u32 %s1095_s22, 2  ;;  %s860_s28 = sshll.u32 %s1097_s23, 3  ;;  %v965_v0 = vmov (!%p819_p6), 0.0  }
  0x10   : > { %s1021_s27 = scalar_lea.vmem %s1084_s0, %s815_s24  ;;  %s1026_s6 = scalar_lea.vmem %s1085_s1, %s860_s28  ;;  %345 = vst [vmem:[#allocation2] sm:$0xff] (!%p819_p6), %v965_v0  ;;  %346 = vst [vmem:[#allocation2 + $0x8] sm:$0xff] (!%p819_p6), %v965_v0 }
  0x11   : > { %344 = sbr.rel (%p819_p6) target bundleno = 24 (0x18), region = 44 }
  0x18 PF: > { %v887_v1 = vld [vmem:[%s1026_s6 + $0x4] ss:$8 sps:$4 sm:$0xff]   ;;  %v889_v2 = vld [vmem:[%s1026_s6] ss:$8 sps:$4 sm:$0xff]   ;;  %v890_v3 = vld [vmem:[%s1026_s6 + $0x14] ss:$8 sps:$4 sm:$0xff]  }
  0x19   : > { %549 = vmatprep.subr.bf16.mxu0 %v887_v1  ;;  %v892_v4 = vld [vmem:[%s1026_s6 + $0x10] ss:$8 sps:$4 sm:$0xff]   ;;  %v893_v5 = vld [vmem:[%s1026_s6 + $0x24] ss:$8 sps:$4 sm:$0xff]   ;;  %v895_v6 = vld [vmem:[%s1026_s6 + $0x20] ss:$8 sps:$4 sm:$0xff]  }
  0x1a   : > { %550 = vmatpush1.bf16.msra.mxu0 %v889_v2  ;;  %v896_v7 = vld [vmem:[%s1026_s6 + $0x34] ss:$8 sps:$4 sm:$0xff]   ;;  %v898_v8 = vld [vmem:[%s1026_s6 + $0x30] ss:$8 sps:$4 sm:$0xff]   ;;  %v899_v9 = vld [vmem:[%s1026_s6 + $0x44] ss:$8 sps:$4 sm:$0xff]  }
  0x1b   : > { %551 = vmatprep.subr.bf16.mxu0 %v890_v3  ;;  %v901_v10 = vld [vmem:[%s1026_s6 + $0x40] ss:$8 sps:$4 sm:$0xff]   ;;  %v902_v11 = vld [vmem:[%s1026_s6 + $0x54] ss:$8 sps:$4 sm:$0xff]   ;;  %v904_v12 = vld [vmem:[%s1026_s6 + $0x50] ss:$8 sps:$4 sm:$0xff]  }
  0x1c   : > { %v905_v13 = vld [vmem:[%s1026_s6 + $0x64] ss:$8 sps:$4 sm:$0xff]   ;;  %v907_v16 = vld [vmem:[%s1026_s6 + $0x60] ss:$8 sps:$4 sm:$0xff]   ;;  %v908_v17 = vld [vmem:[%s1026_s6 + $0x74] ss:$8 sps:$4 sm:$0xff]  }
  0x1d   : > { %v349_v14 = vld [vmem:[%s1021_s27] sm:$0xff]  ;;  %v910_v18 = vld [vmem:[%s1026_s6 + $0x70] ss:$8 sps:$4 sm:$0xff]   ;;  %v914_v21 = vld [vmem:[%s1026_s6 + $0x94] ss:$8 sps:$4 sm:$0xff]   ;;  %p854_p7 = scmp.ne.s32.totalorder %s955_s18, 8 }
  0x1e   : > { %552 = vmatpush1.bf16.msra.mxu0 %v892_v4  ;;  %v821_v15 = vcombine.high %v349_v14, %v349_v14  ;;  %v911_v19 = vld [vmem:[%s1026_s6 + $0x84] ss:$8 sps:$4 sm:$0xff]   ;;  %v913_v20 = vld [vmem:[%s1026_s6 + $0x80] ss:$8 sps:$4 sm:$0xff]   ;;  %v916_v22 = vld [vmem:[%s1026_s6 + $0x90] ss:$8 sps:$4 sm:$0xff]   ;;  %v820_v35 = vcombine.low %v349_v14, %v349_v14 }
  0x1f   : > { %553 = vmatprep.subr.bf16.mxu0 %v893_v5  ;;  %v917_v23 = vld [vmem:[%s1026_s6 + $0xa4] ss:$8 sps:$4 sm:$0xff]   ;;  %v919_v24 = vld [vmem:[%s1026_s6 + $0xa0] ss:$8 sps:$4 sm:$0xff]   ;;  %v920_v25 = vld [vmem:[%s1026_s6 + $0xb4] ss:$8 sps:$4 sm:$0xff]  }
  0x20   : > { %581 = vmatprep.mubr.bf16.mxu0 %v821_v15  ;;  %v922_v26 = vld [vmem:[%s1026_s6 + $0xb0] ss:$8 sps:$4 sm:$0xff]   ;;  %v923_v27 = vld [vmem:[%s1026_s6 + $0xc4] ss:$8 sps:$4 sm:$0xff]   ;;  %v925_v28 = vld [vmem:[%s1026_s6 + $0xc0] ss:$8 sps:$4 sm:$0xff]  }
  0x21   : > { %v926_v29 = vld [vmem:[%s1026_s6 + $0xd4] ss:$8 sps:$4 sm:$0xff]   ;;  %v928_v30 = vld [vmem:[%s1026_s6 + $0xd0] ss:$8 sps:$4 sm:$0xff]   ;;  %v929_v31 = vld [vmem:[%s1026_s6 + $0xe4] ss:$8 sps:$4 sm:$0xff]  }
  0x22   : > { %554 = vmatpush1.bf16.msra.mxu0 %v895_v6  ;;  %v931_v32 = vld [vmem:[%s1026_s6 + $0xe0] ss:$8 sps:$4 sm:$0xff]   ;;  %v932_v33 = vld [vmem:[%s1026_s6 + $0xf4] ss:$8 sps:$4 sm:$0xff]   ;;  %v934_v34 = vld [vmem:[%s1026_s6 + $0xf0] ss:$8 sps:$4 sm:$0xff]  }
  0x23   : > { %555 = vmatprep.subr.bf16.mxu0 %v896_v7  ;;  %v347_v36 = vld [vmem:[#allocation2] sm:$0xff]  ;;  %v348_v37 = vld [vmem:[#allocation2 + $0x8] sm:$0xff] }
  0x26   : > { %556 = vmatpush1.bf16.msra.mxu0 %v898_v8 }
  0x27   : > { %557 = vmatprep.subr.bf16.mxu0 %v899_v9 }
  0x2a   : > { %558 = vmatpush1.bf16.msra.mxu0 %v901_v10 }
  0x2b   : > { %559 = vmatprep.subr.bf16.mxu0 %v902_v11 }
  0x2e   : > { %560 = vmatpush1.bf16.msra.mxu0 %v904_v12 }
  0x2f   : > { %561 = vmatprep.subr.bf16.mxu0 %v905_v13 }
  0x32   : > { %562 = vmatpush1.bf16.msra.mxu0 %v907_v16 }
  0x33   : > { %563 = vmatprep.subr.bf16.mxu0 %v908_v17 }
  0x36   : > { %564 = vmatpush1.bf16.msra.mxu0 %v910_v18  ;;  %v646_v18 = vlaneseq (!%p854_p7) }
  0x37   : > { %565 = vmatprep.subr.bf16.mxu0 %v911_v19 }
  0x3a   : > { %566 = vmatpush1.bf16.msra.mxu0 %v913_v20 }
  0x3b   : > { %567 = vmatprep.subr.bf16.mxu0 %v914_v21  ;;  %v647_v21 = vshrl.u32 (!%p854_p7), %v646_v18, 7 }
  0x3e   : > { %568 = vmatpush1.bf16.msra.mxu0 %v916_v22  ;;  %v648_v22 = vsub.s32 (!%p854_p7), 0, %v647_v21 }
  0x3f   : > { %569 = vmatprep.subr.bf16.mxu0 %v917_v23  ;;  %v644_v23 = vld [vmem:[%s1086_s2] sm:$0x3] (!%p854_p7) }
  0x42   : > { %570 = vmatpush1.bf16.msra.mxu0 %v919_v24  ;;  %v652_v24 = vsub.s32 (!%p854_p7), 1, %v647_v21 }
  0x43   : > { %571 = vmatprep.subr.bf16.mxu0 %v920_v25 }
  0x46   : > { %572 = vmatpush1.bf16.msra.mxu0 %v922_v26 }
  0x47   : > { %573 = vmatprep.subr.bf16.mxu0 %v923_v27  ;;  %v658_v27 = vld [vmem:[%s1087_s3] sm:$0x3] (!%p854_p7) }
  0x4a   : > { %574 = vmatpush1.bf16.msra.mxu0 %v925_v28  ;;  %v649_v28 = vrot.slane (!%p854_p7), %v644_v23, %v648_v22 }
  0x4b   : > { %575 = vmatprep.subr.bf16.mxu0 %v926_v29 }
  0x4e   : > { %576 = vmatpush1.bf16.msra.mxu0 %v928_v30  ;;  %v653_v30 = vrot.slane (!%p854_p7), %v644_v23, %v652_v24 }
  0x4f   : > { %577 = vmatprep.subr.bf16.mxu0 %v929_v31  ;;  %v672_v31 = vld [vmem:[%s1088_s4] sm:$0xff] (!%p854_p7) }
  0x52   : > { %578 = vmatpush1.bf16.msra.mxu0 %v931_v32 }
  0x53   : > { %579 = vmatprep.subr.bf16.mxu0 %v932_v33 }
  0x56   : > { %580 = vmatpush1.bf16.msra.mxu0 %v934_v34  ;;  %v663_v34 = vrot.slane (!%p854_p7), %v658_v27, %v648_v22 }
  0x59   : > { %582 = vmatmul.mubr.bf16.vlgmr.msra.gmra.mrb[0].mxu0 %v820_v35 }
 0x12a   : > { %597 = sbr.rel (%p854_p7) target bundleno = 358 (0x166), region = 48 }
 0x12c   : > { %v583_v38 = vpop.f32.mrb[0].mxu0 }
 0x12d   : > { %v590_v39 = vadd.f32 %v583_v38, %v347_v36  ;;  %v585_v40 = vpop.f32.mrb[1].mxu0  ;;  %v667_v36 = vrot.slane (!%p854_p7), %v658_v27, %v652_v24  ;;  %v673_v38 = vunpack.c.l.bf16 (!%p854_p7), %v672_v31 }
 0x12e   : > { %v591_v41 = vadd.f32 %v585_v40, %v348_v37  ;;  %v587_v42 = vpop.f32.mrb[2].mxu0  ;;  %v674_v40 = vunpack.c.h.bf16 (!%p854_p7), %v672_v31 }
 0x12f   : > { %592 = vst [vmem:[#allocation2] sm:$0xff] %v590_v39  ;;  %v588_v43 = vpop.f32.mrb[3].mxu0 }
 0x130   : > { %593 = vst [vmem:[#allocation2 + $0x8] sm:$0xff] %v591_v41 }
 0x136   : > { %v598_v44 = vld [vmem:[#allocation2] sm:$0xff] }
 0x137   : > { %v599_v45 = vld [vmem:[#allocation2 + $0x8] sm:$0xff]  ;;  %v600_v46 = vrot.slane %v598_v44, 4  ;;  %v614_v48 = vmul.f32 %v598_v44, %v598_v44 }
 0x138   : > { %v606_v47 = vrot.slane %v599_v45, 4  ;;  %v615_v49 = vmul.f32 %v599_v45, %v599_v45 }
 0x139   : > { %v601_v50 = vadd.f32 %v600_v46, %v598_v44  ;;  %v616_v52 = vrot.slane %v614_v48, 4 }
 0x13a   : > { %v607_v51 = vadd.f32 %v606_v47, %v599_v45  ;;  %v622_v53 = vrot.slane %v615_v49, 4 }
 0x13b   : > { %v602_v54 = vrot.slane %v601_v50, 2  ;;  %v617_v56 = vadd.f32 %v616_v52, %v614_v48 }
 0x13c   : > { %v608_v55 = vrot.slane %v607_v51, 2  ;;  %v623_v57 = vadd.f32 %v622_v53, %v615_v49 }
 0x13d   : > { %v603_v58 = vadd.f32 %v602_v54, %v601_v50  ;;  %v618_v60 = vrot.slane %v617_v56, 2 }
 0x13e   : > { %v609_v59 = vadd.f32 %v608_v55, %v607_v51  ;;  %v624_v61 = vrot.slane %v623_v57, 2 }
 0x13f   : > { %v604_v62 = vrot.slane %v603_v58, 1  ;;  %v619_v0 = vadd.f32 %v618_v60, %v617_v56 }
 0x140   : > { %v610_v63 = vrot.slane %v609_v59, 1  ;;  %v625_v1 = vadd.f32 %v624_v61, %v623_v57 }
 0x141   : > { %v605_v2 = vadd.f32 %v604_v62, %v603_v58  ;;  %v620_v4 = vrot.slane %v619_v0, 1 }
 0x142   : > { %v611_v3 = vadd.f32 %v610_v63, %v609_v59  ;;  %v626_v5 = vrot.slane %v625_v1, 1 }
 0x143   : > { %v612_v6 = vmul.f32 0.125, %v605_v2  ;;  %v621_v8 = vadd.f32 %v620_v4, %v619_v0 }
 0x144   : > { %v613_v7 = vmul.f32 0.125, %v611_v3  ;;  %v627_v9 = vadd.f32 %v626_v5, %v625_v1 }
 0x145   : > { %v628_v10 = vmul.f32 0.125, %v621_v8  ;;  %v630_v12 = vmul.f32 %v612_v6, %v612_v6  ;;  %v636_v25 = vsub.f32 %v598_v44, %v612_v6 }
 0x146   : > { %v629_v11 = vmul.f32 0.125, %v627_v9  ;;  %v631_v13 = vmul.f32 %v613_v7, %v613_v7  ;;  %v637_v26 = vsub.f32 %v599_v45, %v613_v7 }
 0x147   : > { %v632_v14 = vsub.f32 %v628_v10, %v630_v12 }
 0x148   : > { %v633_v15 = vsub.f32 %v629_v11, %v631_v13 }
 0x149   : > { %v634_v16 = vmax.f32 %v632_v14, 0.0 }
 0x14a   : > { %v635_v17 = vmax.f32 %v633_v15, 0.0 }
 0x14b   : > { %v638_v19 = vadd.f32 1e-05, %v634_v16 }
 0x14c   : > { %v639_v20 = vadd.f32 1e-05, %v635_v17 }
 0x14d   : > { %937 = vrsqrt.f32 %v638_v19 }
 0x14e   : > { %939 = vrsqrt.f32 %v639_v20 }
 0x157   : > { %v938_v29 = vpop.eup %937 }
 0x158   : > { %v940_v32 = vpop.eup %939  ;;  %v642_v33 = vmul.f32 %v938_v29, %v636_v25 }
 0x159   : > { %v643_v35 = vmul.f32 %v940_v32, %v637_v26 }
 0x15a   : > { %v656_v37 = vmul.f32 %v649_v28, %v642_v33 }
 0x15b   : > { %v657_v39 = vmul.f32 %v653_v30, %v643_v35 }
 0x15c   : > { %v670_v41 = vadd.f32 %v663_v34, %v656_v37 }
 0x15d   : > { %v671_v42 = vadd.f32 %v667_v36, %v657_v39 }
 0x15e   : > { %v675_v43 = vadd.f32 %v673_v38, %v670_v41 }
 0x15f   : > { %v676_v44 = vadd.f32 %v674_v40, %v671_v42 }
 0x160   : > { %v677_v45 = vmax.f32 %v675_v43, 0.0 }
 0x161   : > { %v678_v46 = vmax.f32 %v676_v44, 0.0 }
 0x163   : > { %v861_v47 = vpack.c.bf16 %v678_v46, %v677_v45 }
 0x165   : > { %687 = vst [vmem:[%s1089_s5] sm:$0xff] %v861_v47 }
 0x166 PF: > { %s15_s20 = sadd.s32 1, %s963_s20   ;;  %s1090_s18 = smov %s959_s19 }
 0x167   : > { %p12_p8 = scmp.ge.s32.totalorder %s15_s20, 11   ;;  %s1091_s19 = smov %s1093_s21 }
 0x169   :  { %14 = sbr.rel (!%p12_p8) target bundleno = 2 (0x2), region = 90 }

// kernel: birdnet_forward.58
= control target key start
LH: loop header
LB: loop body
LE: loop exit
PB: predicated region body
PF: predicated region fallthrough
CT: control target
= control target key end

     0   :  { %s921_s15 = smov 0   ;;  %s923_s16 = smov 0   ;;  %s1006_s0 = inlined_call_operand.vmem [shape: bf16[8,2304], index: 0, kind: input, shape index: {}]   ;;  %s1007_s1 = inlined_call_operand.vmem [shape: bf16[2304,256], index: 1, kind: input, shape index: {}]   ;;  %s1008_s2 = inlined_call_operand.vmem [shape: f32[1,256], index: 2, kind: input, shape index: {}]   ;;  %s1009_s3 = inlined_call_operand.vmem [shape: f32[1,256], index: 3, kind: input, shape index: {}]   ;;  %s1010_s4 = inlined_call_operand.vmem [shape: bf16[8,256], index: 4, kind: output, shape index: {}]  }
   0x1   :  { %s925_s17 = smov 0  }
   0x2 LB: > { %s23_s18 = sadd.s32 1, %s889_s16  ;;  %p743_p0 = scmp.ge.s32.totalorder %s893_s17, 1  ;;  %s893_s17 = sphi %s925_s17, %s14_s17   ;;  %s889_s16 = sphi %s923_s16, %s1012_s16   ;;  %s885_s15 = sphi %s921_s15, %s1011_s15  }
   0x3   : > { %p24_p1 = scmp.ge.s32.totalorder %s23_s18, 9  ;;  %p214_p2 = scmp.lt.s32.totalorder %s893_s17, 10 }
   0x5   : > { %s1014_s18 = smov (%p24_p1, %s23_s18), 0  ;;  %p215_p3 = pnand %p743_p0, %p214_p2 }
   0x6   : > { %s744_s19 = sshll.u32 (!%p215_p3), %s885_s15, 1  ;;  %s746_s20 = sshll.u32 (!%p215_p3), %s885_s15, 5 }
   0x7   : > { %218 = sbr.rel (%p215_p3) target bundleno = 356 (0x164), region = 36  ;;  %p259_p4 = scmp.lt.s32.totalorder (!%p215_p3), %s744_s19, 17 }
   0x8   : > { %p266_p5 = scmp.lt.s32.totalorder (!%p215_p3), %s746_s20, 287  ;;  %p749_p6 = scmp.ne.s32.totalorder (!%p215_p3), %s885_s15, 0 }
   0xe   : > { %s1016_s19 = smov (!%p259_p4, %s744_s19), 17  ;;  %s1018_s20 = smov (!%p266_p5, %s746_s20), 287 }
   0xf   : > { %s745_s21 = sshll.u32 %s1016_s19, 2  ;;  %s790_s25 = sshll.u32 %s1018_s20, 3  ;;  %v895_v0 = vmov (!%p749_p6), 0.0  }
  0x10   : > { %s946_s24 = scalar_lea.vmem %s1006_s0, %s745_s21  ;;  %s951_s28 = scalar_lea.vmem %s1007_s1, %s790_s25  ;;  %296 = vst [vmem:[#allocation2] sm:$0xff] (!%p749_p6), %v895_v0  ;;  %297 = vst [vmem:[#allocation2 + $0x8] sm:$0xff] (!%p749_p6), %v895_v0 }
  0x11   : > { %295 = sbr.rel (%p749_p6) target bundleno = 24 (0x18), region = 40 }
  0x18 PF: > { %v817_v1 = vld [vmem:[%s951_s28 + $0x4] ss:$8 sps:$4 sm:$0xff]   ;;  %v819_v2 = vld [vmem:[%s951_s28] ss:$8 sps:$4 sm:$0xff]   ;;  %v820_v3 = vld [vmem:[%s951_s28 + $0x14] ss:$8 sps:$4 sm:$0xff]  }
  0x19   : > { %500 = vmatprep.subr.bf16.mxu0 %v817_v1  ;;  %v822_v4 = vld [vmem:[%s951_s28 + $0x10] ss:$8 sps:$4 sm:$0xff]   ;;  %v823_v5 = vld [vmem:[%s951_s28 + $0x24] ss:$8 sps:$4 sm:$0xff]   ;;  %v825_v6 = vld [vmem:[%s951_s28 + $0x20] ss:$8 sps:$4 sm:$0xff]  }
  0x1a   : > { %501 = vmatpush1.bf16.msra.mxu0 %v819_v2  ;;  %v826_v7 = vld [vmem:[%s951_s28 + $0x34] ss:$8 sps:$4 sm:$0xff]   ;;  %v828_v8 = vld [vmem:[%s951_s28 + $0x30] ss:$8 sps:$4 sm:$0xff]   ;;  %v829_v9 = vld [vmem:[%s951_s28 + $0x44] ss:$8 sps:$4 sm:$0xff]  }
  0x1b   : > { %502 = vmatprep.subr.bf16.mxu0 %v820_v3  ;;  %v831_v10 = vld [vmem:[%s951_s28 + $0x40] ss:$8 sps:$4 sm:$0xff]   ;;  %v832_v11 = vld [vmem:[%s951_s28 + $0x54] ss:$8 sps:$4 sm:$0xff]   ;;  %v834_v12 = vld [vmem:[%s951_s28 + $0x50] ss:$8 sps:$4 sm:$0xff]  }
  0x1c   : > { %v835_v13 = vld [vmem:[%s951_s28 + $0x64] ss:$8 sps:$4 sm:$0xff]   ;;  %v837_v16 = vld [vmem:[%s951_s28 + $0x60] ss:$8 sps:$4 sm:$0xff]   ;;  %v838_v17 = vld [vmem:[%s951_s28 + $0x74] ss:$8 sps:$4 sm:$0xff]  }
  0x1d   : > { %v300_v14 = vld [vmem:[%s946_s24] sm:$0xff]  ;;  %v840_v18 = vld [vmem:[%s951_s28 + $0x70] ss:$8 sps:$4 sm:$0xff]   ;;  %v844_v21 = vld [vmem:[%s951_s28 + $0x94] ss:$8 sps:$4 sm:$0xff]   ;;  %p784_p7 = scmp.ne.s32.totalorder %s885_s15, 8 }
  0x1e   : > { %503 = vmatpush1.bf16.msra.mxu0 %v822_v4  ;;  %v751_v15 = vcombine.high %v300_v14, %v300_v14  ;;  %v841_v19 = vld [vmem:[%s951_s28 + $0x84] ss:$8 sps:$4 sm:$0xff]   ;;  %v843_v20 = vld [vmem:[%s951_s28 + $0x80] ss:$8 sps:$4 sm:$0xff]   ;;  %v846_v22 = vld [vmem:[%s951_s28 + $0x90] ss:$8 sps:$4 sm:$0xff]   ;;  %v750_v35 = vcombine.low %v300_v14, %v300_v14 }
  0x1f   : > { %504 = vmatprep.subr.bf16.mxu0 %v823_v5  ;;  %v847_v23 = vld [vmem:[%s951_s28 + $0xa4] ss:$8 sps:$4 sm:$0xff]   ;;  %v849_v24 = vld [vmem:[%s951_s28 + $0xa0] ss:$8 sps:$4 sm:$0xff]   ;;  %v850_v25 = vld [vmem:[%s951_s28 + $0xb4] ss:$8 sps:$4 sm:$0xff]  }
  0x20   : > { %532 = vmatprep.mubr.bf16.mxu0 %v751_v15  ;;  %v852_v26 = vld [vmem:[%s951_s28 + $0xb0] ss:$8 sps:$4 sm:$0xff]   ;;  %v853_v27 = vld [vmem:[%s951_s28 + $0xc4] ss:$8 sps:$4 sm:$0xff]   ;;  %v855_v28 = vld [vmem:[%s951_s28 + $0xc0] ss:$8 sps:$4 sm:$0xff]  }
  0x21   : > { %v856_v29 = vld [vmem:[%s951_s28 + $0xd4] ss:$8 sps:$4 sm:$0xff]   ;;  %v858_v30 = vld [vmem:[%s951_s28 + $0xd0] ss:$8 sps:$4 sm:$0xff]   ;;  %v859_v31 = vld [vmem:[%s951_s28 + $0xe4] ss:$8 sps:$4 sm:$0xff]  }
  0x22   : > { %505 = vmatpush1.bf16.msra.mxu0 %v825_v6  ;;  %v861_v32 = vld [vmem:[%s951_s28 + $0xe0] ss:$8 sps:$4 sm:$0xff]   ;;  %v862_v33 = vld [vmem:[%s951_s28 + $0xf4] ss:$8 sps:$4 sm:$0xff]   ;;  %v864_v34 = vld [vmem:[%s951_s28 + $0xf0] ss:$8 sps:$4 sm:$0xff]  }
  0x23   : > { %506 = vmatprep.subr.bf16.mxu0 %v826_v7  ;;  %v298_v36 = vld [vmem:[#allocation2] sm:$0xff]  ;;  %v299_v37 = vld [vmem:[#allocation2 + $0x8] sm:$0xff] }
  0x26   : > { %507 = vmatpush1.bf16.msra.mxu0 %v828_v8 }
  0x27   : > { %508 = vmatprep.subr.bf16.mxu0 %v829_v9 }
  0x2a   : > { %509 = vmatpush1.bf16.msra.mxu0 %v831_v10 }
  0x2b   : > { %510 = vmatprep.subr.bf16.mxu0 %v832_v11 }
  0x2e   : > { %511 = vmatpush1.bf16.msra.mxu0 %v834_v12 }
  0x2f   : > { %512 = vmatprep.subr.bf16.mxu0 %v835_v13 }
  0x32   : > { %513 = vmatpush1.bf16.msra.mxu0 %v837_v16 }
  0x33   : > { %514 = vmatprep.subr.bf16.mxu0 %v838_v17 }
  0x36   : > { %515 = vmatpush1.bf16.msra.mxu0 %v840_v18  ;;  %v597_v18 = vlaneseq (!%p784_p7) }
  0x37   : > { %516 = vmatprep.subr.bf16.mxu0 %v841_v19 }
  0x3a   : > { %517 = vmatpush1.bf16.msra.mxu0 %v843_v20 }
  0x3b   : > { %518 = vmatprep.subr.bf16.mxu0 %v844_v21  ;;  %v598_v21 = vshrl.u32 (!%p784_p7), %v597_v18, 7 }
  0x3e   : > { %519 = vmatpush1.bf16.msra.mxu0 %v846_v22  ;;  %v599_v22 = vsub.s32 (!%p784_p7), 0, %v598_v21 }
  0x3f   : > { %520 = vmatprep.subr.bf16.mxu0 %v847_v23  ;;  %v595_v23 = vld [vmem:[%s1008_s2] sm:$0x3] (!%p784_p7) }
  0x42   : > { %521 = vmatpush1.bf16.msra.mxu0 %v849_v24  ;;  %v603_v24 = vsub.s32 (!%p784_p7), 1, %v598_v21 }
  0x43   : > { %522 = vmatprep.subr.bf16.mxu0 %v850_v25 }
  0x46   : > { %523 = vmatpush1.bf16.msra.mxu0 %v852_v26 }
  0x47   : > { %524 = vmatprep.subr.bf16.mxu0 %v853_v27  ;;  %v609_v27 = vld [vmem:[%s1009_s3] sm:$0x3] (!%p784_p7) }
  0x4a   : > { %525 = vmatpush1.bf16.msra.mxu0 %v855_v28  ;;  %v600_v28 = vrot.slane (!%p784_p7), %v595_v23, %v599_v22 }
  0x4b   : > { %526 = vmatprep.subr.bf16.mxu0 %v856_v29 }
  0x4e   : > { %527 = vmatpush1.bf16.msra.mxu0 %v858_v30  ;;  %v604_v30 = vrot.slane (!%p784_p7), %v595_v23, %v603_v24 }
  0x4f   : > { %528 = vmatprep.subr.bf16.mxu0 %v859_v31 }
  0x52   : > { %529 = vmatpush1.bf16.msra.mxu0 %v861_v32 }
  0x53   : > { %530 = vmatprep.subr.bf16.mxu0 %v862_v33  ;;  %v614_v33 = vrot.slane (!%p784_p7), %v609_v27, %v599_v22 }
  0x56   : > { %531 = vmatpush1.bf16.msra.mxu0 %v864_v34 }
  0x59   : > { %533 = vmatmul.mubr.bf16.vlgmr.msra.gmra.mrb[0].mxu0 %v750_v35  ;;  %v618_v35 = vrot.slane (!%p784_p7), %v609_v27, %v603_v24 }
 0x12a   : > { %548 = sbr.rel (%p784_p7) target bundleno = 356 (0x164), region = 44 }
 0x12c   : > { %v534_v38 = vpop.f32.mrb[0].mxu0 }
 0x12d   : > { %v541_v39 = vadd.f32 %v534_v38, %v298_v36  ;;  %v536_v40 = vpop.f32.mrb[1].mxu0 }
 0x12e   : > { %v542_v41 = vadd.f32 %v536_v40, %v299_v37  ;;  %v538_v42 = vpop.f32.mrb[2].mxu0 }
 0x12f   : > { %543 = vst [vmem:[#allocation2] sm:$0xff] %v541_v39  ;;  %v539_v43 = vpop.f32.mrb[3].mxu0 }
 0x130   : > { %544 = vst [vmem:[#allocation2 + $0x8] sm:$0xff] %v542_v41 }
 0x136   : > { %v549_v44 = vld [vmem:[#allocation2] sm:$0xff] }
 0x137   : > { %v550_v45 = vld [vmem:[#allocation2 + $0x8] sm:$0xff]  ;;  %v551_v46 = vrot.slane %v549_v44, 4  ;;  %v565_v48 = vmul.f32 %v549_v44, %v549_v44 }
 0x138   : > { %v557_v47 = vrot.slane %v550_v45, 4  ;;  %v566_v49 = vmul.f32 %v550_v45, %v550_v45 }
 0x139   : > { %v552_v50 = vadd.f32 %v551_v46, %v549_v44  ;;  %v567_v52 = vrot.slane %v565_v48, 4 }
 0x13a   : > { %v558_v51 = vadd.f32 %v557_v47, %v550_v45  ;;  %v573_v53 = vrot.slane %v566_v49, 4 }
 0x13b   : > { %v553_v54 = vrot.slane %v552_v50, 2  ;;  %v568_v56 = vadd.f32 %v567_v52, %v565_v48 }
 0x13c   : > { %v559_v55 = vrot.slane %v558_v51, 2  ;;  %v574_v57 = vadd.f32 %v573_v53, %v566_v49 }
 0x13d   : > { %v554_v58 = vadd.f32 %v553_v54, %v552_v50  ;;  %v569_v60 = vrot.slane %v568_v56, 2 }
 0x13e   : > { %v560_v59 = vadd.f32 %v559_v55, %v558_v51  ;;  %v575_v61 = vrot.slane %v574_v57, 2 }
 0x13f   : > { %v555_v62 = vrot.slane %v554_v58, 1  ;;  %v570_v0 = vadd.f32 %v569_v60, %v568_v56 }
 0x140   : > { %v561_v63 = vrot.slane %v560_v59, 1  ;;  %v576_v1 = vadd.f32 %v575_v61, %v574_v57 }
 0x141   : > { %v556_v2 = vadd.f32 %v555_v62, %v554_v58  ;;  %v571_v4 = vrot.slane %v570_v0, 1 }
 0x142   : > { %v562_v3 = vadd.f32 %v561_v63, %v560_v59  ;;  %v577_v5 = vrot.slane %v576_v1, 1 }
 0x143   : > { %v563_v6 = vmul.f32 0.125, %v556_v2  ;;  %v572_v8 = vadd.f32 %v571_v4, %v570_v0 }
 0x144   : > { %v564_v7 = vmul.f32 0.125, %v562_v3  ;;  %v578_v9 = vadd.f32 %v577_v5, %v576_v1 }
 0x145   : > { %v579_v10 = vmul.f32 0.125, %v572_v8  ;;  %v581_v12 = vmul.f32 %v563_v6, %v563_v6  ;;  %v587_v25 = vsub.f32 %v549_v44, %v563_v6 }
 0x146   : > { %v580_v11 = vmul.f32 0.125, %v578_v9  ;;  %v582_v13 = vmul.f32 %v564_v7, %v564_v7  ;;  %v588_v26 = vsub.f32 %v550_v45, %v564_v7 }
 0x147   : > { %v583_v14 = vsub.f32 %v579_v10, %v581_v12 }
 0x148   : > { %v584_v15 = vsub.f32 %v580_v11, %v582_v13 }
 0x149   : > { %v585_v16 = vmax.f32 %v583_v14, 0.0 }
 0x14a   : > { %v586_v17 = vmax.f32 %v584_v15, 0.0 }
 0x14b   : > { %v589_v19 = vadd.f32 1e-05, %v585_v16 }
 0x14c   : > { %v590_v20 = vadd.f32 1e-05, %v586_v17 }
 0x14d   : > { %867 = vrsqrt.f32 %v589_v19 }
 0x14e   : > { %869 = vrsqrt.f32 %v590_v20 }
 0x157   : > { %v868_v29 = vpop.eup %867 }
 0x158   : > { %v870_v31 = vpop.eup %869  ;;  %v593_v32 = vmul.f32 %v868_v29, %v587_v25 }
 0x159   : > { %v594_v34 = vmul.f32 %v870_v31, %v588_v26 }
 0x15a   : > { %v607_v36 = vmul.f32 %v600_v28, %v593_v32 }
 0x15b   : > { %v608_v37 = vmul.f32 %v604_v30, %v594_v34 }
 0x15c   : > { %v621_v38 = vadd.f32 %v614_v33, %v607_v36 }
 0x15d   : > { %v622_v39 = vadd.f32 %v618_v35, %v608_v37 }
 0x15e   : > { %v623_v40 = vmax.f32 %v621_v38, 0.0 }
 0x15f   : > { %v624_v41 = vmax.f32 %v622_v39, 0.0 }
 0x161   : > { %v791_v42 = vpack.c.bf16 %v624_v41, %v623_v40 }
 0x163   : > { %633 = vst [vmem:[%s1010_s4] sm:$0xff] %v791_v42 }
 0x164 PF: > { %s14_s17 = sadd.s32 1, %s893_s17   ;;  %s1011_s15 = smov %s889_s16 }
 0x165   : > { %p11_p8 = scmp.ge.s32.totalorder %s14_s17, 11   ;;  %s1012_s16 = smov %s1014_s18 }
 0x167   :  { %13 = sbr.rel (!%p11_p8) target bundleno = 2 (0x2), region = 83 }

// kernel: birdnet_forward.68
= control target key start
LH: loop header
LB: loop body
LE: loop exit
PB: predicated region body
PF: predicated region fallthrough
CT: control target
= control target key end

     0   :  { %s1329_s15 = smov 0   ;;  %s1331_s16 = smov 0   ;;  %s1477_s0 = inlined_call_operand.vmem [shape: bf16[8,2304], index: 0, kind: input, shape index: {}]   ;;  %s1478_s1 = inlined_call_operand.vmem [shape: bf16[2304,512], index: 1, kind: input, shape index: {}]   ;;  %s1479_s2 = inlined_call_operand.vmem [shape: f32[1,512], index: 2, kind: input, shape index: {}]   ;;  %s1480_s3 = inlined_call_operand.vmem [shape: f32[1,512], index: 3, kind: input, shape index: {}]   ;;  %s1481_s4 = inlined_call_operand.vmem [shape: bf16[8,512], index: 4, kind: output, shape index: {}]  }
   0x1   :  { %s1333_s17 = smov 0  }
   0x2 LB: > { %s23_s18 = sadd.s32 1, %s1297_s16  ;;  %p1065_p0 = scmp.ge.s32.totalorder %s1301_s17, 1  ;;  %s1301_s17 = sphi %s1333_s17, %s14_s17   ;;  %s1297_s16 = sphi %s1331_s16, %s1483_s16   ;;  %s1293_s15 = sphi %s1329_s15, %s1482_s15  }
   0x3   : > { %p24_p1 = scmp.ge.s32.totalorder %s23_s18, 9  ;;  %p214_p2 = scmp.lt.s32.totalorder %s1301_s17, 10 }
   0x5   : > { %s1485_s18 = smov (%p24_p1, %s23_s18), 0  ;;  %p215_p3 = pnand %p1065_p0, %p214_p2 }
   0x6   : > { %s1066_s19 = sshll.u32 (!%p215_p3), %s1293_s15, 1  ;;  %s1068_s20 = sshll.u32 (!%p215_p3), %s1293_s15, 5 }
   0x7   : > { %218 = sbr.rel (%p215_p3) target bundleno = 358 (0x166), region = 36  ;;  %p259_p4 = scmp.lt.s32.totalorder (!%p215_p3), %s1066_s19, 17 }
   0x8   : > { %p266_p5 = scmp.lt.s32.totalorder (!%p215_p3), %s1068_s20, 287  ;;  %p1071_p6 = scmp.ne.s32.totalorder (!%p215_p3), %s1293_s15, 0 }
   0xe   : > { %s1487_s19 = smov (!%p259_p4, %s1066_s19), 17  ;;  %s1489_s20 = smov (!%p266_p5, %s1068_s20), 287 }
   0xf   : > { %s1067_s21 = sshll.u32 %s1487_s19, 2  ;;  %s1145_s25 = sshll.u32 %s1489_s20, 4  ;;  %v1303_v0 = vmov (!%p1071_p6), 0.0  }
  0x10   : > { %s1354_s24 = scalar_lea.vmem %s1477_s0, %s1067_s21  ;;  %s1359_s28 = scalar_lea.vmem %s1478_s1, %s1145_s25  ;;  %296 = vst [vmem:[#allocation2] sm:$0xff] (!%p1071_p6), %v1303_v0  ;;  %297 = vst [vmem:[#allocation2 + $0x8] sm:$0xff] (!%p1071_p6), %v1303_v0 }
  0x11   : > { %295 = sbr.rel (%p1071_p6) target bundleno = 24 (0x18), region = 40  ;;  %298 = vst [vmem:[#allocation2 + $0x10] sm:$0xff] (!%p1071_p6), %v1303_v0  ;;  %299 = vst [vmem:[#allocation2 + $0x18] sm:$0xff] (!%p1071_p6), %v1303_v0 }
  0x18 PF: > { %v1173_v1 = vld [vmem:[%s1359_s28 + $0x4] ss:$16 sps:$4 sm:$0xff]   ;;  %v1175_v2 = vld [vmem:[%s1359_s28 + $0xc] ss:$16 sps:$4 sm:$0xff]   ;;  %v1177_v3 = vld [vmem:[%s1359_s28] ss:$16 sps:$4 sm:$0xff]  }
  0x19   : > { %696 = vmatprep.subr.bf16.mxu0 %v1173_v1  ;;  %v1178_v4 = vld [vmem:[%s1359_s28 + $0x8] ss:$16 sps:$4 sm:$0xff]   ;;  %737 = vmatprep.subr.bf16.mxu1 %v1175_v2  ;;  %v1179_v5 = vld [vmem:[%s1359_s28 + $0x24] ss:$16 sps:$4 sm:$0xff]   ;;  %v1181_v6 = vld [vmem:[%s1359_s28 + $0x2c] ss:$16 sps:$4 sm:$0xff]  }
  0x1a   : > { %697 = vmatpush1.bf16.msra.mxu0 %v1177_v3  ;;  %738 = vmatpush1.bf16.msra.mxu1 %v1178_v4  ;;  %v1183_v7 = vld [vmem:[%s1359_s28 + $0x20] ss:$16 sps:$4 sm:$0xff]   ;;  %v1184_v8 = vld [vmem:[%s1359_s28 + $0x28] ss:$16 sps:$4 sm:$0xff]   ;;  %v1185_v9 = vld [vmem:[%s1359_s28 + $0x44] ss:$16 sps:$4 sm:$0xff]  }
  0x1b   : > { %698 = vmatprep.subr.bf16.mxu0 %v1179_v5  ;;  %739 = vmatprep.subr.bf16.mxu1 %v1181_v6  ;;  %v1187_v10 = vld [vmem:[%s1359_s28 + $0x4c] ss:$16 sps:$4 sm:$0xff]   ;;  %v1189_v11 = vld [vmem:[%s1359_s28 + $0x40] ss:$16 sps:$4 sm:$0xff]   ;;  %v1190_v12 = vld [vmem:[%s1359_s28 + $0x48] ss:$16 sps:$4 sm:$0xff]  }
  0x1c   : > { %v1191_v13 = vld [vmem:[%s1359_s28 + $0x64] ss:$16 sps:$4 sm:$0xff]   ;;  %v1193_v14 = vld [vmem:[%s1359_s28 + $0x6c] ss:$16 sps:$4 sm:$0xff]   ;;  %v1195_v15 = vld [vmem:[%s1359_s28 + $0x60] ss:$16 sps:$4 sm:$0xff]  }
  0x1d   : > { %v1196_v16 = vld [vmem:[%s1359_s28 + $0x68] ss:$16 sps:$4 sm:$0xff]   ;;  %v1197_v17 = vld [vmem:[%s1359_s28 + $0x84] ss:$16 sps:$4 sm:$0xff]   ;;  %v1199_v18 = vld [vmem:[%s1359_s28 + $0x8c] ss:$16 sps:$4 sm:$0xff]  }
  0x1e   : > { %699 = vmatpush1.bf16.msra.mxu0 %v1183_v7  ;;  %740 = vmatpush1.bf16.msra.mxu1 %v1184_v8  ;;  %v1201_v19 = vld [vmem:[%s1359_s28 + $0x80] ss:$16 sps:$4 sm:$0xff]   ;;  %v1202_v20 = vld [vmem:[%s1359_s28 + $0x88] ss:$16 sps:$4 sm:$0xff]   ;;  %v1203_v21 = vld [vmem:[%s1359_s28 + $0xa4] ss:$16 sps:$4 sm:$0xff]  }
  0x1f   : > { %700 = vmatprep.subr.bf16.mxu0 %v1185_v9  ;;  %741 = vmatprep.subr.bf16.mxu1 %v1187_v10  ;;  %v1205_v22 = vld [vmem:[%s1359_s28 + $0xac] ss:$16 sps:$4 sm:$0xff]   ;;  %v1207_v23 = vld [vmem:[%s1359_s28 + $0xa0] ss:$16 sps:$4 sm:$0xff]   ;;  %v1208_v24 = vld [vmem:[%s1359_s28 + $0xa8] ss:$16 sps:$4 sm:$0xff]  }
  0x20   : > { %v1209_v25 = vld [vmem:[%s1359_s28 + $0xc4] ss:$16 sps:$4 sm:$0xff]   ;;  %v1211_v26 = vld [vmem:[%s1359_s28 + $0xcc] ss:$16 sps:$4 sm:$0xff]   ;;  %v1213_v27 = vld [vmem:[%s1359_s28 + $0xc0] ss:$16 sps:$4 sm:$0xff]  }
  0x21   : > { %v1214_v28 = vld [vmem:[%s1359_s28 + $0xc8] ss:$16 sps:$4 sm:$0xff]   ;;  %v1215_v29 = vld [vmem:[%s1359_s28 + $0xe4] ss:$16 sps:$4 sm:$0xff]   ;;  %v1217_v30 = vld [vmem:[%s1359_s28 + $0xec] ss:$16 sps:$4 sm:$0xff]  }
  0x22   : > { %701 = vmatpush1.bf16.msra.mxu0 %v1189_v11  ;;  %742 = vmatpush1.bf16.msra.mxu1 %v1190_v12  ;;  %v1219_v31 = vld [vmem:[%s1359_s28 + $0xe0] ss:$16 sps:$4 sm:$0xff]   ;;  %v1220_v32 = vld [vmem:[%s1359_s28 + $0xe8] ss:$16 sps:$4 sm:$0xff]   ;;  %v1221_v33 = vld [vmem:[%s1359_s28 + $0x104] ss:$16 sps:$4 sm:$0xff]  }
  0x23   : > { %702 = vmatprep.subr.bf16.mxu0 %v1191_v13  ;;  %743 = vmatprep.subr.bf16.mxu1 %v1193_v14  ;;  %v1223_v34 = vld [vmem:[%s1359_s28 + $0x10c] ss:$16 sps:$4 sm:$0xff]   ;;  %v1225_v35 = vld [vmem:[%s1359_s28 + $0x100] ss:$16 sps:$4 sm:$0xff]   ;;  %v1226_v36 = vld [vmem:[%s1359_s28 + $0x108] ss:$16 sps:$4 sm:$0xff]  }
  0x24   : > { %v1227_v37 = vld [vmem:[%s1359_s28 + $0x124] ss:$16 sps:$4 sm:$0xff]   ;;  %v1229_v38 = vld [vmem:[%s1359_s28 + $0x12c] ss:$16 sps:$4 sm:$0xff]   ;;  %v1231_v39 = vld [vmem:[%s1359_s28 + $0x120] ss:$16 sps:$4 sm:$0xff]  }
  0x25   : > { %v1232_v40 = vld [vmem:[%s1359_s28 + $0x128] ss:$16 sps:$4 sm:$0xff]   ;;  %v1233_v41 = vld [vmem:[%s1359_s28 + $0x144] ss:$16 sps:$4 sm:$0xff]   ;;  %v1235_v42 = vld [vmem:[%s1359_s28 + $0x14c] ss:$16 sps:$4 sm:$0xff]  }
  0x26   : > { %703 = vmatpush1.bf16.msra.mxu0 %v1195_v15  ;;  %744 = vmatpush1.bf16.msra.mxu1 %v1196_v16  ;;  %v1237_v43 = vld [vmem:[%s1359_s28 + $0x140] ss:$16 sps:$4 sm:$0xff]   ;;  %v1238_v44 = vld [vmem:[%s1359_s28 + $0x148] ss:$16 sps:$4 sm:$0xff]   ;;  %v1239_v45 = vld [vmem:[%s1359_s28 + $0x164] ss:$16 sps:$4 sm:$0xff]  }
  0x27   : > { %704 = vmatprep.subr.bf16.mxu0 %v1197_v17  ;;  %745 = vmatprep.subr.bf16.mxu1 %v1199_v18  ;;  %v1241_v46 = vld [vmem:[%s1359_s28 + $0x16c] ss:$16 sps:$4 sm:$0xff]   ;;  %v304_v47 = vld [vmem:[%s1354_s24] sm:$0xff]  ;;  %v1244_v50 = vld [vmem:[%s1359_s28 + $0x168] ss:$16 sps:$4 sm:$0xff]   ;;  %p1138_p7 = scmp.ne.s32.totalorder %s1293_s15, 8 }
  0x28   : > { %v1073_v48 = vcombine.high %v304_v47, %v304_v47  ;;  %v1243_v49 = vld [vmem:[%s1359_s28 + $0x160] ss:$16 sps:$4 sm:$0xff]   ;;  %v1245_v51 = vld [vmem:[%s1359_s28 + $0x184] ss:$16 sps:$4 sm:$0xff]   ;;  %v1247_v52 = vld [vmem:[%s1359_s28 + $0x18c] ss:$16 sps:$4 sm:$0xff]   ;;  %v1072_v3 = vcombine.low %v304_v47, %v304_v47 }
  0x29   : > { %v1249_v53 = vld [vmem:[%s1359_s28 + $0x180] ss:$16 sps:$4 sm:$0xff]   ;;  %v1250_v54 = vld [vmem:[%s1359_s28 + $0x188] ss:$16 sps:$4 sm:$0xff]   ;;  %v1251_v55 = vld [vmem:[%s1359_s28 + $0x1a4] ss:$16 sps:$4 sm:$0xff]  }
  0x2a   : > { %705 = vmatpush1.bf16.msra.mxu0 %v1201_v19  ;;  %746 = vmatpush1.bf16.msra.mxu1 %v1202_v20  ;;  %v1253_v56 = vld [vmem:[%s1359_s28 + $0x1ac] ss:$16 sps:$4 sm:$0xff]   ;;  %v1255_v57 = vld [vmem:[%s1359_s28 + $0x1a0] ss:$16 sps:$4 sm:$0xff]   ;;  %v1256_v58 = vld [vmem:[%s1359_s28 + $0x1a8] ss:$16 sps:$4 sm:$0xff]  }
  0x2b   : > { %706 = vmatprep.subr.bf16.mxu0 %v1203_v21  ;;  %747 = vmatprep.subr.bf16.mxu1 %v1205_v22  ;;  %v1257_v59 = vld [vmem:[%s1359_s28 + $0x1c4] ss:$16 sps:$4 sm:$0xff]   ;;  %v1259_v60 = vld [vmem:[%s1359_s28 + $0x1cc] ss:$16 sps:$4 sm:$0xff]   ;;  %v1261_v61 = vld [vmem:[%s1359_s28 + $0x1c0] ss:$16 sps:$4 sm:$0xff]  }
  0x2c   : > { %728 = vmatprep.mubr.bf16.mxu0 %v1073_v48  ;;  %769 = vmatprep.mubr.bf16.mxu1 %v1073_v48  ;;  %v1262_v62 = vld [vmem:[%s1359_s28 + $0x1c8] ss:$16 sps:$4 sm:$0xff]   ;;  %v1263_v63 = vld [vmem:[%s1359_s28 + $0x1e4] ss:$16 sps:$4 sm:$0xff]   ;;  %v1265_v0 = vld [vmem:[%s1359_s28 + $0x1ec] ss:$16 sps:$4 sm:$0xff]  }
  0x2d   : > { %v1267_v1 = vld [vmem:[%s1359_s28 + $0x1e0] ss:$16 sps:$4 sm:$0xff]   ;;  %v1268_v2 = vld [vmem:[%s1359_s28 + $0x1e8] ss:$16 sps:$4 sm:$0xff]  }
  0x2e   : > { %707 = vmatpush1.bf16.msra.mxu0 %v1207_v23  ;;  %748 = vmatpush1.bf16.msra.mxu1 %v1208_v24  ;;  %v300_v4 = vld [vmem:[#allocation2] sm:$0xff]  ;;  %v302_v5 = vld [vmem:[#allocation2 + $0x10] sm:$0xff]  ;;  %v301_v6 = vld [vmem:[#allocation2 + $0x8] sm:$0xff] }
  0x2f   : > { %708 = vmatprep.subr.bf16.mxu0 %v1209_v25  ;;  %749 = vmatprep.subr.bf16.mxu1 %v1211_v26  ;;  %v303_v7 = vld [vmem:[#allocation2 + $0x18] sm:$0xff] }
  0x32   : > { %709 = vmatpush1.bf16.msra.mxu0 %v1213_v27  ;;  %750 = vmatpush1.bf16.msra.mxu1 %v1214_v28 }
  0x33   : > { %710 = vmatprep.subr.bf16.mxu0 %v1215_v29  ;;  %751 = vmatprep.subr.bf16.mxu1 %v1217_v30 }
  0x36   : > { %711 = vmatpush1.bf16.msra.mxu0 %v1219_v31  ;;  %752 = vmatpush1.bf16.msra.mxu1 %v1220_v32 }
  0x37   : > { %712 = vmatprep.subr.bf16.mxu0 %v1221_v33  ;;  %753 = vmatprep.subr.bf16.mxu1 %v1223_v34 }
  0x3a   : > { %713 = vmatpush1.bf16.msra.mxu0 %v1225_v35  ;;  %754 = vmatpush1.bf16.msra.mxu1 %v1226_v36 }
  0x3b   : > { %714 = vmatprep.subr.bf16.mxu0 %v1227_v37  ;;  %755 = vmatprep.subr.bf16.mxu1 %v1229_v38 }
  0x3e   : > { %715 = vmatpush1.bf16.msra.mxu0 %v1231_v39  ;;  %756 = vmatpush1.bf16.msra.mxu1 %v1232_v40 }
  0x3f   : > { %716 = vmatprep.subr.bf16.mxu0 %v1233_v41  ;;  %757 = vmatprep.subr.bf16.mxu1 %v1235_v42 }
  0x42   : > { %717 = vmatpush1.bf16.msra.mxu0 %v1237_v43  ;;  %758 = vmatpush1.bf16.msra.mxu1 %v1238_v44 }
  0x43   : > { %718 = vmatprep.subr.bf16.mxu0 %v1239_v45  ;;  %759 = vmatprep.subr.bf16.mxu1 %v1241_v46 }
  0x46   : > { %719 = vmatpush1.bf16.msra.mxu0 %v1243_v49  ;;  %760 = vmatpush1.bf16.msra.mxu1 %v1244_v50 }
  0x47   : > { %720 = vmatprep.subr.bf16.mxu0 %v1245_v51  ;;  %761 = vmatprep.subr.bf16.mxu1 %v1247_v52 }
  0x4a   : > { %721 = vmatpush1.bf16.msra.mxu0 %v1249_v53  ;;  %762 = vmatpush1.bf16.msra.mxu1 %v1250_v54 }
  0x4b   : > { %722 = vmatprep.subr.bf16.mxu0 %v1251_v55  ;;  %763 = vmatprep.subr.bf16.mxu1 %v1253_v56 }
  0x4e   : > { %723 = vmatpush1.bf16.msra.mxu0 %v1255_v57  ;;  %764 = vmatpush1.bf16.msra.mxu1 %v1256_v58 }
  0x4f   : > { %724 = vmatprep.subr.bf16.mxu0 %v1257_v59  ;;  %765 = vmatprep.subr.bf16.mxu1 %v1259_v60 }
  0x52   : > { %725 = vmatpush1.bf16.msra.mxu0 %v1261_v61  ;;  %766 = vmatpush1.bf16.msra.mxu1 %v1262_v62 }
  0x53   : > { %726 = vmatprep.subr.bf16.mxu0 %v1263_v63  ;;  %767 = vmatprep.subr.bf16.mxu1 %v1265_v0 }
  0x56   : > { %727 = vmatpush1.bf16.msra.mxu0 %v1267_v1  ;;  %768 = vmatpush1.bf16.msra.mxu1 %v1268_v2 }
  0x59   : > { %729 = vmatmul.mubr.bf16.vlgmr.msra.gmra.mrb[0].mxu0 %v1072_v3  ;;  %770 = vmatmul.mubr.bf16.vlgmr.msra.gmra.mrb[0].mxu1 %v1072_v3 }
 0x12a   : > { %789 = sbr.rel (%p1138_p7) target bundleno = 358 (0x166), region = 44 }
 0x12c   : > { %v730_v8 = vpop.f32.mrb[0].mxu0  ;;  %v771_v9 = vpop.f32.mrb[0].mxu1 }
 0x12d   : > { %v778_v10 = vadd.f32 %v730_v8, %v300_v4  ;;  %v780_v11 = vadd.f32 %v771_v9, %v302_v5  ;;  %v732_v12 = vpop.f32.mrb[1].mxu0  ;;  %v773_v13 = vpop.f32.mrb[1].mxu1 }
 0x12e   : > { %v779_v14 = vadd.f32 %v732_v12, %v301_v6  ;;  %v781_v15 = vadd.f32 %v773_v13, %v303_v7  ;;  %v734_v16 = vpop.f32.mrb[2].mxu0  ;;  %v775_v17 = vpop.f32.mrb[2].mxu1 }
 0x12f   : > { %782 = vst [vmem:[#allocation2] sm:$0xff] %v778_v10  ;;  %784 = vst [vmem:[#allocation2 + $0x10] sm:$0xff] %v780_v11  ;;  %v735_v18 = vpop.f32.mrb[3].mxu0  ;;  %v776_v19 = vpop.f32.mrb[3].mxu1 }
 0x130   : > { %783 = vst [vmem:[#allocation2 + $0x8] sm:$0xff] %v779_v14  ;;  %785 = vst [vmem:[#allocation2 + $0x18] sm:$0xff] %v781_v15 }
 0x136   : > { %v1428_v20 = vld [vmem:[#allocation2] sm:$0xff]  ;;  %v1438_v26 = vld [vmem:[#allocation2 + $0x10] sm:$0xff] }
 0x137   : > { %v1430_v21 = vld [vmem:[#allocation2 + $0x8] sm:$0xff]  ;;  %v794_v22 = vrot.slane %v1428_v20, 4  ;;  %v822_v24 = vmul.f32 %v1428_v20, %v1428_v20  ;;  %v1440_v27 = vld [vmem:[#allocation2 + $0x18] sm:$0xff]  ;;  %v806_v28 = vrot.slane %v1438_v26, 4  ;;  %v824_v36 = vmul.f32 %v1438_v26, %v1438_v26 }
 0x138   : > { %v800_v23 = vrot.slane %v1430_v21, 4  ;;  %v823_v25 = vmul.f32 %v1430_v21, %v1430_v21  ;;  %v812_v29 = vrot.slane %v1440_v27, 4  ;;  %v825_v47 = vmul.f32 %v1440_v27, %v1440_v27 }
 0x139   : > { %v795_v30 = vadd.f32 %v794_v22, %v1428_v20  ;;  %v826_v32 = vrot.slane %v822_v24, 4  ;;  %v807_v34 = vadd.f32 %v806_v28, %v1438_v26  ;;  %v838_v48 = vrot.slane %v824_v36, 4 }
 0x13a   : > { %v801_v31 = vadd.f32 %v800_v23, %v1430_v21  ;;  %v832_v33 = vrot.slane %v823_v25, 4  ;;  %v813_v35 = vadd.f32 %v812_v29, %v1440_v27  ;;  %v844_v56 = vrot.slane %v825_v47, 4 }
 0x13b   : > { %v796_v37 = vrot.slane %v795_v30, 2  ;;  %v827_v39 = vadd.f32 %v826_v32, %v822_v24  ;;  %v808_v45 = vrot.slane %v807_v34, 2  ;;  %v839_v55 = vadd.f32 %v838_v48, %v824_v36 }
 0x13c   : > { %v802_v38 = vrot.slane %v801_v31, 2  ;;  %v833_v40 = vadd.f32 %v832_v33, %v823_v25  ;;  %v814_v46 = vrot.slane %v813_v35, 2  ;;  %v845_v0 = vadd.f32 %v844_v56, %v825_v47  ;;  %v908_v47 = vld [vmem:[%s1480_s3] sm:$0xf] }
 0x13d   : > { %v797_v41 = vadd.f32 %v796_v37, %v795_v30  ;;  %v828_v43 = vrot.slane %v827_v39, 2  ;;  %v809_v53 = vadd.f32 %v808_v45, %v807_v34  ;;  %v840_v63 = vrot.slane %v839_v55, 2 }
 0x13e   : > { %v803_v42 = vadd.f32 %v802_v38, %v801_v31  ;;  %v834_v44 = vrot.slane %v833_v40, 2  ;;  %v815_v54 = vadd.f32 %v814_v46, %v813_v35  ;;  %v846_v8 = vrot.slane %v845_v0, 2 }
 0x13f   : > { %v798_v49 = vrot.slane %v797_v41, 1  ;;  %v829_v51 = vadd.f32 %v828_v43, %v827_v39  ;;  %v810_v61 = vrot.slane %v809_v53, 1  ;;  %v841_v7 = vadd.f32 %v840_v63, %v839_v55 }
 0x140   : > { %v804_v50 = vrot.slane %v803_v42, 1  ;;  %v835_v52 = vadd.f32 %v834_v44, %v833_v40  ;;  %v816_v62 = vrot.slane %v815_v54, 1  ;;  %v847_v18 = vadd.f32 %v846_v8, %v845_v0 }
 0x141   : > { %v799_v57 = vadd.f32 %v798_v49, %v797_v41  ;;  %v830_v59 = vrot.slane %v829_v51, 1  ;;  %v811_v5 = vadd.f32 %v810_v61, %v809_v53  ;;  %v842_v17 = vrot.slane %v841_v7, 1 }
 0x142   : > { %v805_v58 = vadd.f32 %v804_v50, %v803_v42  ;;  %v836_v60 = vrot.slane %v835_v52, 1  ;;  %v817_v6 = vadd.f32 %v816_v62, %v815_v54  ;;  %v848_v25 = vrot.slane %v847_v18, 1  ;;  %v882_v42 = vld [vmem:[%s1479_s2] sm:$0xf] }
 0x143   : > { %v818_v1 = vmul.f32 0.5, %v799_v57  ;;  %v831_v3 = vadd.f32 %v830_v59, %v829_v51  ;;  %v820_v13 = vmul.f32 0.5, %v811_v5  ;;  %v843_v24 = vadd.f32 %v842_v17, %v841_v7 }
 0x144   : > { %v819_v2 = vmul.f32 0.5, %v805_v58  ;;  %v837_v4 = vadd.f32 %v836_v60, %v835_v52  ;;  %v821_v14 = vmul.f32 0.5, %v817_v6  ;;  %v884_v28 = vlaneseq }
 0x145   : > { %v850_v9 = vmul.f32 0.5, %v831_v3  ;;  %v854_v11 = vmul.f32 %v818_v1, %v818_v1  ;;  %v856_v19 = vmul.f32 %v820_v13, %v820_v13  ;;  %v849_v32 = vadd.f32 %v848_v25, %v847_v18 }
 0x146   : > { %v851_v10 = vmul.f32 0.5, %v837_v4  ;;  %v855_v12 = vmul.f32 %v819_v2, %v819_v2  ;;  %v857_v29 = vmul.f32 %v821_v14, %v821_v14  ;;  %v852_v33 = vmul.f32 0.5, %v843_v24 }
 0x147   : > { %v858_v15 = vsub.f32 %v850_v9, %v854_v11  ;;  %v853_v34 = vmul.f32 0.5, %v849_v32  ;;  %v885_v36 = vshrl.u32 %v884_v28, 7  ;;  %v866_v45 = vsub.f32 %v1428_v20, %v818_v1 }
 0x148   : > { %v859_v16 = vsub.f32 %v851_v10, %v855_v12  ;;  %v860_v35 = vsub.f32 %v852_v33, %v856_v19  ;;  %v867_v46 = vsub.f32 %v1430_v21, %v819_v2  ;;  %v868_v58 = vsub.f32 %v1438_v26, %v820_v13 }
 0x149   : > { %v862_v22 = vmax.f32 %v858_v15, 0.0  ;;  %v861_v37 = vsub.f32 %v853_v34, %v857_v29  ;;  %v886_v41 = vsub.s32 0, %v885_v36  ;;  %v890_v43 = vsub.s32 1, %v885_v36 }
 0x14a   : > { %v863_v23 = vmax.f32 %v859_v16, 0.0  ;;  %v864_v38 = vmax.f32 %v860_v35, 0.0  ;;  %v894_v54 = vsub.s32 2, %v885_v36  ;;  %v898_v20 = vsub.s32 3, %v885_v36 }
 0x14b   : > { %v870_v30 = vadd.f32 1e-05, %v862_v22  ;;  %v865_v39 = vmax.f32 %v861_v37, 0.0  ;;  %v887_v48 = vrot.slane %v882_v42, %v886_v41  ;;  %v891_v50 = vrot.slane %v882_v42, %v890_v43 }
 0x14c   : > { %v871_v31 = vadd.f32 1e-05, %v863_v23  ;;  %v872_v40 = vadd.f32 1e-05, %v864_v38  ;;  %v913_v53 = vrot.slane %v908_v47, %v886_v41  ;;  %v917_v56 = vrot.slane %v908_v47, %v890_v43 }
 0x14d   : > { %1271 = vrsqrt.f32 %v870_v30  ;;  %v873_v44 = vadd.f32 1e-05, %v865_v39  ;;  %v869_v60 = vsub.f32 %v1440_v27, %v821_v14  ;;  %v895_v61 = vrot.slane %v882_v42, %v894_v54 }
 0x14e   : > { %1273 = vrsqrt.f32 %v871_v31  ;;  %v899_v2 = vrot.slane %v882_v42, %v898_v20  ;;  %v921_v3 = vrot.slane %v908_v47, %v894_v54  ;;  %v925_v8 = vrot.slane %v908_v47, %v898_v20 }
 0x14f   : > { %1275 = vrsqrt.f32 %v872_v40 }
 0x150   : > { %1277 = vrsqrt.f32 %v873_v44 }
 0x157   : > { %v1272_v49 = vpop.eup %1271 }
 0x158   : > { %v1274_v51 = vpop.eup %1273  ;;  %v878_v52 = vmul.f32 %v1272_v49, %v866_v45 }
 0x159   : > { %v879_v55 = vmul.f32 %v1274_v51, %v867_v46  ;;  %v1276_v62 = vpop.eup %1275 }
 0x15a   : > { %v904_v57 = vmul.f32 %v887_v48, %v878_v52  ;;  %v880_v1 = vmul.f32 %v1276_v62, %v868_v58  ;;  %v1278_v4 = vpop.eup %1277 }
 0x15b   : > { %v905_v59 = vmul.f32 %v891_v50, %v879_v55  ;;  %v881_v6 = vmul.f32 %v1278_v4, %v869_v60 }
 0x15c   : > { %v930_v21 = vadd.f32 %v913_v53, %v904_v57  ;;  %v906_v7 = vmul.f32 %v895_v61, %v880_v1 }
 0x15d   : > { %v931_v63 = vadd.f32 %v917_v56, %v905_v59  ;;  %v907_v10 = vmul.f32 %v899_v2, %v881_v6 }
 0x15e   : > { %v934_v0 = vmax.f32 %v930_v21, 0.0  ;;  %v932_v26 = vadd.f32 %v921_v3, %v906_v7 }
 0x15f   : > { %v935_v5 = vmax.f32 %v931_v63, 0.0  ;;  %v933_v27 = vadd.f32 %v925_v8, %v907_v10 }
 0x160   : > { %v936_v11 = vmax.f32 %v932_v26, 0.0 }
 0x161   : > { %v1146_v9 = vpack.c.bf16 %v935_v5, %v934_v0  ;;  %v937_v12 = vmax.f32 %v933_v27, 0.0 }
 0x163   : > { %954 = vst [vmem:[%s1481_s4] sm:$0xff] %v1146_v9  ;;  %v1147_v13 = vpack.c.bf16 %v937_v12, %v936_v11 }
 0x165   : > { %955 = vst [vmem:[%s1481_s4 + $0x8] sm:$0xff] %v1147_v13 }
 0x166 PF: > { %s14_s17 = sadd.s32 1, %s1301_s17   ;;  %s1482_s15 = smov %s1297_s16 }
 0x167   : > { %p11_p8 = scmp.ge.s32.totalorder %s14_s17, 11   ;;  %s1483_s16 = smov %s1485_s18 }
 0x169   :  { %13 = sbr.rel (!%p11_p8) target bundleno = 2 (0x2), region = 83 }

// kernel: birdnet_forward.69
= control target key start
LH: loop header
LB: loop body
LE: loop exit
PB: predicated region body
PF: predicated region fallthrough
CT: control target
= control target key end

     0   :  { %s1089_s1 = inlined_call_operand.vmem [shape: bf16[256,512], index: 1, kind: input, shape index: {}]   ;;  %s1090_s0 = inlined_call_operand.vmem [shape: bf16[8,256], index: 0, kind: input, shape index: {}]   ;;  %s1091_s2 = inlined_call_operand.vmem [shape: f32[1,512], index: 2, kind: input, shape index: {}]   ;;  %s1092_s3 = inlined_call_operand.vmem [shape: f32[1,512], index: 3, kind: input, shape index: {}]   ;;  %s1093_s4 = inlined_call_operand.vmem [shape: bf16[8,512], index: 4, kind: output, shape index: {}]  }
   0x1   :  { %v723_v0 = vld [vmem:[%s1089_s1 + $0x4] ss:$16 sps:$4 sm:$0xff]   ;;  %v725_v1 = vld [vmem:[%s1089_s1 + $0xc] ss:$16 sps:$4 sm:$0xff]   ;;  %v727_v2 = vld [vmem:[%s1089_s1] ss:$16 sps:$4 sm:$0xff]  }
   0x2   :  { %409 = vmatprep.subr.bf16.mxu0 %v723_v0  ;;  %v728_v3 = vld [vmem:[%s1089_s1 + $0x8] ss:$16 sps:$4 sm:$0xff]   ;;  %450 = vmatprep.subr.bf16.mxu1 %v725_v1  ;;  %v729_v4 = vld [vmem:[%s1089_s1 + $0x24] ss:$16 sps:$4 sm:$0xff]   ;;  %v731_v5 = vld [vmem:[%s1089_s1 + $0x2c] ss:$16 sps:$4 sm:$0xff]  }
   0x3   :  { %410 = vmatpush1.bf16.msra.mxu0 %v727_v2  ;;  %451 = vmatpush1.bf16.msra.mxu1 %v728_v3  ;;  %v733_v6 = vld [vmem:[%s1089_s1 + $0x20] ss:$16 sps:$4 sm:$0xff]   ;;  %v734_v7 = vld [vmem:[%s1089_s1 + $0x28] ss:$16 sps:$4 sm:$0xff]   ;;  %v735_v8 = vld [vmem:[%s1089_s1 + $0x44] ss:$16 sps:$4 sm:$0xff]  }
   0x4   :  { %411 = vmatprep.subr.bf16.mxu0 %v729_v4  ;;  %452 = vmatprep.subr.bf16.mxu1 %v731_v5  ;;  %v737_v9 = vld [vmem:[%s1089_s1 + $0x4c] ss:$16 sps:$4 sm:$0xff]   ;;  %v739_v10 = vld [vmem:[%s1089_s1 + $0x40] ss:$16 sps:$4 sm:$0xff]   ;;  %v740_v11 = vld [vmem:[%s1089_s1 + $0x48] ss:$16 sps:$4 sm:$0xff]  }
   0x5   :  { %v741_v12 = vld [vmem:[%s1089_s1 + $0x64] ss:$16 sps:$4 sm:$0xff]   ;;  %v743_v13 = vld [vmem:[%s1089_s1 + $0x6c] ss:$16 sps:$4 sm:$0xff]   ;;  %v745_v14 = vld [vmem:[%s1089_s1 + $0x60] ss:$16 sps:$4 sm:$0xff]  }
   0x6   :  { %v746_v15 = vld [vmem:[%s1089_s1 + $0x68] ss:$16 sps:$4 sm:$0xff]   ;;  %v747_v16 = vld [vmem:[%s1089_s1 + $0x84] ss:$16 sps:$4 sm:$0xff]   ;;  %v749_v17 = vld [vmem:[%s1089_s1 + $0x8c] ss:$16 sps:$4 sm:$0xff]  }
   0x7   :  { %412 = vmatpush1.bf16.msra.mxu0 %v733_v6  ;;  %453 = vmatpush1.bf16.msra.mxu1 %v734_v7  ;;  %v751_v18 = vld [vmem:[%s1089_s1 + $0x80] ss:$16 sps:$4 sm:$0xff]   ;;  %v752_v19 = vld [vmem:[%s1089_s1 + $0x88] ss:$16 sps:$4 sm:$0xff]   ;;  %v753_v20 = vld [vmem:[%s1089_s1 + $0xa4] ss:$16 sps:$4 sm:$0xff]  }
   0x8   :  { %413 = vmatprep.subr.bf16.mxu0 %v735_v8  ;;  %454 = vmatprep.subr.bf16.mxu1 %v737_v9  ;;  %v755_v21 = vld [vmem:[%s1089_s1 + $0xac] ss:$16 sps:$4 sm:$0xff]   ;;  %v757_v22 = vld [vmem:[%s1089_s1 + $0xa0] ss:$16 sps:$4 sm:$0xff]   ;;  %v758_v23 = vld [vmem:[%s1089_s1 + $0xa8] ss:$16 sps:$4 sm:$0xff]  }
   0x9   :  { %v759_v24 = vld [vmem:[%s1089_s1 + $0xc4] ss:$16 sps:$4 sm:$0xff]   ;;  %v761_v25 = vld [vmem:[%s1089_s1 + $0xcc] ss:$16 sps:$4 sm:$0xff]   ;;  %v763_v26 = vld [vmem:[%s1089_s1 + $0xc0] ss:$16 sps:$4 sm:$0xff]  }
   0xa   :  { %v764_v27 = vld [vmem:[%s1089_s1 + $0xc8] ss:$16 sps:$4 sm:$0xff]   ;;  %v765_v28 = vld [vmem:[%s1089_s1 + $0xe4] ss:$16 sps:$4 sm:$0xff]   ;;  %v767_v29 = vld [vmem:[%s1089_s1 + $0xec] ss:$16 sps:$4 sm:$0xff]  }
   0xb   :  { %414 = vmatpush1.bf16.msra.mxu0 %v739_v10  ;;  %455 = vmatpush1.bf16.msra.mxu1 %v740_v11  ;;  %v769_v30 = vld [vmem:[%s1089_s1 + $0xe0] ss:$16 sps:$4 sm:$0xff]   ;;  %v770_v31 = vld [vmem:[%s1089_s1 + $0xe8] ss:$16 sps:$4 sm:$0xff]   ;;  %v771_v32 = vld [vmem:[%s1089_s1 + $0x104] ss:$16 sps:$4 sm:$0xff]  }
   0xc   :  { %415 = vmatprep.subr.bf16.mxu0 %v741_v12  ;;  %456 = vmatprep.subr.bf16.mxu1 %v743_v13  ;;  %v773_v33 = vld [vmem:[%s1089_s1 + $0x10c] ss:$16 sps:$4 sm:$0xff]   ;;  %v775_v34 = vld [vmem:[%s1089_s1 + $0x100] ss:$16 sps:$4 sm:$0xff]   ;;  %v776_v35 = vld [vmem:[%s1089_s1 + $0x108] ss:$16 sps:$4 sm:$0xff]  }
   0xd   :  { %v777_v36 = vld [vmem:[%s1089_s1 + $0x124] ss:$16 sps:$4 sm:$0xff]   ;;  %v779_v37 = vld [vmem:[%s1089_s1 + $0x12c] ss:$16 sps:$4 sm:$0xff]   ;;  %v781_v38 = vld [vmem:[%s1089_s1 + $0x120] ss:$16 sps:$4 sm:$0xff]  }
   0xe   :  { %v782_v39 = vld [vmem:[%s1089_s1 + $0x128] ss:$16 sps:$4 sm:$0xff]   ;;  %v783_v40 = vld [vmem:[%s1089_s1 + $0x144] ss:$16 sps:$4 sm:$0xff]   ;;  %v785_v41 = vld [vmem:[%s1089_s1 + $0x14c] ss:$16 sps:$4 sm:$0xff]  }
   0xf   :  { %416 = vmatpush1.bf16.msra.mxu0 %v745_v14  ;;  %457 = vmatpush1.bf16.msra.mxu1 %v746_v15  ;;  %v787_v42 = vld [vmem:[%s1089_s1 + $0x140] ss:$16 sps:$4 sm:$0xff]   ;;  %v788_v43 = vld [vmem:[%s1089_s1 + $0x148] ss:$16 sps:$4 sm:$0xff]   ;;  %v789_v44 = vld [vmem:[%s1089_s1 + $0x164] ss:$16 sps:$4 sm:$0xff]  }
  0x10   :  { %417 = vmatprep.subr.bf16.mxu0 %v747_v16  ;;  %458 = vmatprep.subr.bf16.mxu1 %v749_v17  ;;  %v791_v45 = vld [vmem:[%s1089_s1 + $0x16c] ss:$16 sps:$4 sm:$0xff]   ;;  %v17_v46 = vld [vmem:[%s1090_s0] sm:$0xff]  ;;  %v794_v49 = vld [vmem:[%s1089_s1 + $0x168] ss:$16 sps:$4 sm:$0xff]  }
  0x11   :  { %v654_v47 = vcombine.high %v17_v46, %v17_v46  ;;  %v793_v48 = vld [vmem:[%s1089_s1 + $0x160] ss:$16 sps:$4 sm:$0xff]   ;;  %v795_v50 = vld [vmem:[%s1089_s1 + $0x184] ss:$16 sps:$4 sm:$0xff]   ;;  %v797_v51 = vld [vmem:[%s1089_s1 + $0x18c] ss:$16 sps:$4 sm:$0xff]   ;;  %v653_v2 = vcombine.low %v17_v46, %v17_v46 }
  0x12   :  { %v799_v52 = vld [vmem:[%s1089_s1 + $0x180] ss:$16 sps:$4 sm:$0xff]   ;;  %v800_v53 = vld [vmem:[%s1089_s1 + $0x188] ss:$16 sps:$4 sm:$0xff]   ;;  %v801_v54 = vld [vmem:[%s1089_s1 + $0x1a4] ss:$16 sps:$4 sm:$0xff]  }
  0x13   :  { %418 = vmatpush1.bf16.msra.mxu0 %v751_v18  ;;  %459 = vmatpush1.bf16.msra.mxu1 %v752_v19  ;;  %v803_v55 = vld [vmem:[%s1089_s1 + $0x1ac] ss:$16 sps:$4 sm:$0xff]   ;;  %v805_v56 = vld [vmem:[%s1089_s1 + $0x1a0] ss:$16 sps:$4 sm:$0xff]   ;;  %v806_v57 = vld [vmem:[%s1089_s1 + $0x1a8] ss:$16 sps:$4 sm:$0xff]  }
  0x14   :  { %419 = vmatprep.subr.bf16.mxu0 %v753_v20  ;;  %460 = vmatprep.subr.bf16.mxu1 %v755_v21  ;;  %v807_v58 = vld [vmem:[%s1089_s1 + $0x1c4] ss:$16 sps:$4 sm:$0xff]   ;;  %v809_v59 = vld [vmem:[%s1089_s1 + $0x1cc] ss:$16 sps:$4 sm:$0xff]   ;;  %v811_v60 = vld [vmem:[%s1089_s1 + $0x1c0] ss:$16 sps:$4 sm:$0xff]  }
  0x15   :  { %441 = vmatprep.mubr.bf16.mxu0 %v654_v47  ;;  %482 = vmatprep.mubr.bf16.mxu1 %v654_v47  ;;  %v812_v61 = vld [vmem:[%s1089_s1 + $0x1c8] ss:$16 sps:$4 sm:$0xff]   ;;  %v813_v62 = vld [vmem:[%s1089_s1 + $0x1e4] ss:$16 sps:$4 sm:$0xff]   ;;  %v815_v63 = vld [vmem:[%s1089_s1 + $0x1ec] ss:$16 sps:$4 sm:$0xff]  }
  0x16   :  { %v817_v0 = vld [vmem:[%s1089_s1 + $0x1e0] ss:$16 sps:$4 sm:$0xff]   ;;  %v818_v1 = vld [vmem:[%s1089_s1 + $0x1e8] ss:$16 sps:$4 sm:$0xff]  }
  0x17   :  { %420 = vmatpush1.bf16.msra.mxu0 %v757_v22  ;;  %461 = vmatpush1.bf16.msra.mxu1 %v758_v23 }
  0x18   :  { %421 = vmatprep.subr.bf16.mxu0 %v759_v24  ;;  %462 = vmatprep.subr.bf16.mxu1 %v761_v25 }
  0x1b   :  { %422 = vmatpush1.bf16.msra.mxu0 %v763_v26  ;;  %463 = vmatpush1.bf16.msra.mxu1 %v764_v27 }
  0x1c   :  { %423 = vmatprep.subr.bf16.mxu0 %v765_v28  ;;  %464 = vmatprep.subr.bf16.mxu1 %v767_v29 }
  0x1f   :  { %424 = vmatpush1.bf16.msra.mxu0 %v769_v30  ;;  %465 = vmatpush1.bf16.msra.mxu1 %v770_v31 }
  0x20   :  { %425 = vmatprep.subr.bf16.mxu0 %v771_v32  ;;  %466 = vmatprep.subr.bf16.mxu1 %v773_v33 }
  0x23   :  { %426 = vmatpush1.bf16.msra.mxu0 %v775_v34  ;;  %467 = vmatpush1.bf16.msra.mxu1 %v776_v35 }
  0x24   :  { %427 = vmatprep.subr.bf16.mxu0 %v777_v36  ;;  %468 = vmatprep.subr.bf16.mxu1 %v779_v37 }
  0x27   :  { %428 = vmatpush1.bf16.msra.mxu0 %v781_v38  ;;  %469 = vmatpush1.bf16.msra.mxu1 %v782_v39 }
  0x28   :  { %429 = vmatprep.subr.bf16.mxu0 %v783_v40  ;;  %470 = vmatprep.subr.bf16.mxu1 %v785_v41 }
  0x2b   :  { %430 = vmatpush1.bf16.msra.mxu0 %v787_v42  ;;  %471 = vmatpush1.bf16.msra.mxu1 %v788_v43 }
  0x2c   :  { %431 = vmatprep.subr.bf16.mxu0 %v789_v44  ;;  %472 = vmatprep.subr.bf16.mxu1 %v791_v45 }
  0x2f   :  { %432 = vmatpush1.bf16.msra.mxu0 %v793_v48  ;;  %473 = vmatpush1.bf16.msra.mxu1 %v794_v49 }
  0x30   :  { %433 = vmatprep.subr.bf16.mxu0 %v795_v50  ;;  %474 = vmatprep.subr.bf16.mxu1 %v797_v51 }
  0x33   :  { %434 = vmatpush1.bf16.msra.mxu0 %v799_v52  ;;  %475 = vmatpush1.bf16.msra.mxu1 %v800_v53 }
  0x34   :  { %435 = vmatprep.subr.bf16.mxu0 %v801_v54  ;;  %476 = vmatprep.subr.bf16.mxu1 %v803_v55 }
  0x37   :  { %436 = vmatpush1.bf16.msra.mxu0 %v805_v56  ;;  %477 = vmatpush1.bf16.msra.mxu1 %v806_v57 }
  0x38   :  { %437 = vmatprep.subr.bf16.mxu0 %v807_v58  ;;  %478 = vmatprep.subr.bf16.mxu1 %v809_v59 }
  0x3b   :  { %438 = vmatpush1.bf16.msra.mxu0 %v811_v60  ;;  %479 = vmatpush1.bf16.msra.mxu1 %v812_v61 }
  0x3c   :  { %439 = vmatprep.subr.bf16.mxu0 %v813_v62  ;;  %480 = vmatprep.subr.bf16.mxu1 %v815_v63 }
  0x3f   :  { %440 = vmatpush1.bf16.msra.mxu0 %v817_v0  ;;  %481 = vmatpush1.bf16.msra.mxu1 %v818_v1 }
  0x42   :  { %442 = vmatmul.mubr.bf16.vlgmr.msra.gmra.mrb[0].mxu0 %v653_v2  ;;  %483 = vmatmul.mubr.bf16.vlgmr.msra.gmra.mrb[0].mxu1 %v653_v2 }
 0x115   :  { %v1049_v3 = vpop.f32.mrb[0].mxu0  ;;  %v1051_v4 = vpop.f32.mrb[0].mxu1 }
 0x116   :  { %v491_v5 = vrot.slane %v1049_v3, 4  ;;  %v519_v6 = vmul.f32 %v1049_v3, %v1049_v3  ;;  %v503_v7 = vrot.slane %v1051_v4, 4  ;;  %v521_v8 = vmul.f32 %v1051_v4, %v1051_v4  ;;  %v1059_v9 = vpop.f32.mrb[1].mxu0  ;;  %v1061_v10 = vpop.f32.mrb[1].mxu1 }
 0x117   :  { %v497_v11 = vrot.slane %v1059_v9, 4  ;;  %v520_v12 = vmul.f32 %v1059_v9, %v1059_v9  ;;  %v509_v13 = vrot.slane %v1061_v10, 4  ;;  %v522_v14 = vmul.f32 %v1061_v10, %v1061_v10  ;;  %v447_v15 = vpop.f32.mrb[2].mxu0  ;;  %v488_v16 = vpop.f32.mrb[2].mxu1 }
 0x118   :  { %v492_v17 = vadd.f32 %v491_v5, %v1049_v3  ;;  %v523_v18 = vrot.slane %v519_v6, 4  ;;  %v504_v19 = vadd.f32 %v503_v7, %v1051_v4  ;;  %v535_v20 = vrot.slane %v521_v8, 4  ;;  %v448_v21 = vpop.f32.mrb[3].mxu0  ;;  %v489_v22 = vpop.f32.mrb[3].mxu1 }
 0x119   :  { %v498_v23 = vadd.f32 %v497_v11, %v1059_v9  ;;  %v529_v24 = vrot.slane %v520_v12, 4  ;;  %v510_v25 = vadd.f32 %v509_v13, %v1061_v10  ;;  %v541_v26 = vrot.slane %v522_v14, 4 }
 0x11a   :  { %v493_v27 = vrot.slane %v492_v17, 2  ;;  %v524_v28 = vadd.f32 %v523_v18, %v519_v6  ;;  %v505_v29 = vrot.slane %v504_v19, 2  ;;  %v536_v30 = vadd.f32 %v535_v20, %v521_v8 }
 0x11b   :  { %v499_v31 = vrot.slane %v498_v23, 2  ;;  %v530_v32 = vadd.f32 %v529_v24, %v520_v12  ;;  %v511_v33 = vrot.slane %v510_v25, 2  ;;  %v542_v34 = vadd.f32 %v541_v26, %v522_v14 }
 0x11c   :  { %v494_v35 = vadd.f32 %v493_v27, %v492_v17  ;;  %v525_v36 = vrot.slane %v524_v28, 2  ;;  %v506_v37 = vadd.f32 %v505_v29, %v504_v19  ;;  %v537_v38 = vrot.slane %v536_v30, 2 }
 0x11d   :  { %v500_v39 = vadd.f32 %v499_v31, %v498_v23  ;;  %v531_v40 = vrot.slane %v530_v32, 2  ;;  %v512_v41 = vadd.f32 %v511_v33, %v510_v25  ;;  %v543_v42 = vrot.slane %v542_v34, 2  ;;  %v605_v33 = vld [vmem:[%s1092_s3] sm:$0xf] }
 0x11e   :  { %v495_v43 = vrot.slane %v494_v35, 1  ;;  %v526_v44 = vadd.f32 %v525_v36, %v524_v28  ;;  %v507_v45 = vrot.slane %v506_v37, 1  ;;  %v538_v46 = vadd.f32 %v537_v38, %v536_v30  ;;  %v579_v30 = vld [vmem:[%s1091_s2] sm:$0xf] }
 0x11f   :  { %v501_v47 = vrot.slane %v500_v39, 1  ;;  %v532_v48 = vadd.f32 %v531_v40, %v530_v32  ;;  %v513_v49 = vrot.slane %v512_v41, 1  ;;  %v544_v50 = vadd.f32 %v543_v42, %v542_v34 }
 0x120   :  { %v496_v51 = vadd.f32 %v495_v43, %v494_v35  ;;  %v527_v52 = vrot.slane %v526_v44, 1  ;;  %v508_v53 = vadd.f32 %v507_v45, %v506_v37  ;;  %v539_v54 = vrot.slane %v538_v46, 1 }
 0x121   :  { %v502_v55 = vadd.f32 %v501_v47, %v500_v39  ;;  %v533_v56 = vrot.slane %v532_v48, 1  ;;  %v514_v57 = vadd.f32 %v513_v49, %v512_v41  ;;  %v545_v58 = vrot.slane %v544_v50, 1 }
 0x122   :  { %v515_v59 = vmul.f32 0.5, %v496_v51  ;;  %v528_v60 = vadd.f32 %v527_v52, %v526_v44  ;;  %v517_v61 = vmul.f32 0.5, %v508_v53  ;;  %v540_v62 = vadd.f32 %v539_v54, %v538_v46 }
 0x123   :  { %v516_v63 = vmul.f32 0.5, %v502_v55  ;;  %v534_v0 = vadd.f32 %v533_v56, %v532_v48  ;;  %v518_v1 = vmul.f32 0.5, %v514_v57  ;;  %v546_v2 = vadd.f32 %v545_v58, %v544_v50 }
 0x124   :  { %v547_v5 = vmul.f32 0.5, %v528_v60  ;;  %v551_v6 = vmul.f32 %v515_v59, %v515_v59  ;;  %v549_v7 = vmul.f32 0.5, %v540_v62  ;;  %v553_v8 = vmul.f32 %v517_v61, %v517_v61 }
 0x125   :  { %v548_v11 = vmul.f32 0.5, %v534_v0  ;;  %v552_v12 = vmul.f32 %v516_v63, %v516_v63  ;;  %v550_v14 = vmul.f32 0.5, %v546_v2  ;;  %v554_v15 = vmul.f32 %v518_v1, %v518_v1 }
 0x126   :  { %v555_v13 = vsub.f32 %v547_v5, %v551_v6  ;;  %v557_v16 = vsub.f32 %v549_v7, %v553_v8  ;;  %v581_v20 = vlaneseq  ;;  %v563_v35 = vsub.f32 %v1049_v3, %v515_v59 }
 0x127   :  { %v556_v17 = vsub.f32 %v548_v11, %v552_v12  ;;  %v558_v19 = vsub.f32 %v550_v14, %v554_v15  ;;  %v565_v38 = vsub.f32 %v1051_v4, %v517_v61  ;;  %v564_v43 = vsub.f32 %v1059_v9, %v516_v63 }
 0x128   :  { %v559_v18 = vmax.f32 %v555_v13, 0.0  ;;  %v561_v21 = vmax.f32 %v557_v16, 0.0  ;;  %v582_v28 = vshrl.u32 %v581_v20, 7  ;;  %v566_v48 = vsub.f32 %v1061_v10, %v518_v1 }
 0x129   :  { %v560_v22 = vmax.f32 %v556_v17, 0.0  ;;  %v562_v24 = vmax.f32 %v558_v19, 0.0 }
 0x12a   :  { %v567_v23 = vadd.f32 1e-05, %v559_v18  ;;  %v569_v25 = vadd.f32 1e-05, %v561_v21  ;;  %v583_v29 = vsub.s32 0, %v582_v28  ;;  %v591_v31 = vsub.s32 2, %v582_v28 }
 0x12b   :  { %v568_v26 = vadd.f32 1e-05, %v560_v22  ;;  %v570_v27 = vadd.f32 1e-05, %v562_v24  ;;  %v587_v32 = vsub.s32 1, %v582_v28  ;;  %v595_v34 = vsub.s32 3, %v582_v28 }
 0x12c   :  { %821 = vrsqrt.f32 %v567_v23  ;;  %v584_v36 = vrot.slane %v579_v30, %v583_v29  ;;  %v592_v39 = vrot.slane %v579_v30, %v591_v31  ;;  %v610_v42 = vrot.slane %v605_v33, %v583_v29 }
 0x12d   :  { %823 = vrsqrt.f32 %v569_v25  ;;  %v588_v44 = vrot.slane %v579_v30, %v587_v32  ;;  %v618_v47 = vrot.slane %v605_v33, %v591_v31  ;;  %v596_v49 = vrot.slane %v579_v30, %v595_v34 }
 0x12e   :  { %825 = vrsqrt.f32 %v568_v26  ;;  %v614_v52 = vrot.slane %v605_v33, %v587_v32  ;;  %v622_v4 = vrot.slane %v605_v33, %v595_v34 }
 0x12f   :  { %827 = vrsqrt.f32 %v570_v27 }
 0x136   :  { %v822_v37 = vpop.eup %821 }
 0x137   :  { %v824_v40 = vpop.eup %823  ;;  %v575_v41 = vmul.f32 %v822_v37, %v563_v35 }
 0x138   :  { %v826_v45 = vpop.eup %825  ;;  %v577_v46 = vmul.f32 %v824_v40, %v565_v38 }
 0x139   :  { %v828_v50 = vpop.eup %827  ;;  %v601_v51 = vmul.f32 %v584_v36, %v575_v41  ;;  %v576_v3 = vmul.f32 %v826_v45, %v564_v43 }
 0x13a   :  { %v603_v53 = vmul.f32 %v592_v39, %v577_v46  ;;  %v578_v54 = vmul.f32 %v828_v50, %v566_v48 }
 0x13b   :  { %v627_v55 = vadd.f32 %v610_v42, %v601_v51  ;;  %v602_v56 = vmul.f32 %v588_v44, %v576_v3 }
 0x13c   :  { %v629_v57 = vadd.f32 %v618_v47, %v603_v53  ;;  %v604_v58 = vmul.f32 %v596_v49, %v578_v54 }
 0x13d   :  { %v628_v59 = vadd.f32 %v614_v52, %v602_v56 }
 0x13e   :  { %v630_v9 = vadd.f32 %v622_v4, %v604_v58 }
 0x13f   :  { %v721_v60 = vpack.c.bf16 %v628_v59, %v627_v55 }
 0x140   :  { %v722_v61 = vpack.c.bf16 %v630_v9, %v629_v57 }
 0x141   :  { %647 = vst [vmem:[%s1093_s4] sm:$0xff] %v721_v60 }
 0x142   :  { %648 = vst [vmem:[%s1093_s4 + $0x8] sm:$0xff] %v722_v61 }

// kernel: birdnet_forward.70
= control target key start
LH: loop header
LB: loop body
LE: loop exit
PB: predicated region body
PF: predicated region fallthrough
CT: control target
= control target key end

     0   :  { %s1409_s18 = smov 0   ;;  %s1411_s19 = smov 0   ;;  %s1563_s0 = inlined_call_operand.vmem [shape: bf16[8,4608], index: 0, kind: input, shape index: {}]   ;;  %s1564_s1 = inlined_call_operand.vmem [shape: bf16[4608,512], index: 1, kind: input, shape index: {}]   ;;  %s1565_s2 = inlined_call_operand.vmem [shape: f32[1,512], index: 2, kind: input, shape index: {}]   ;;  %s1566_s3 = inlined_call_operand.vmem [shape: f32[1,512], index: 3, kind: input, shape index: {}]   ;;  %s1567_s4 = inlined_call_operand.vmem [shape: bf16[8,512], index: 4, kind: input, shape index: {}]   ;;  %s1568_s5 = inlined_call_operand.vmem [shape: bf16[8,512], index: 5, kind: output, shape index: {}]  }
   0x1   :  { %s1413_s20 = smov 0  }
   0x2 LB: > { %s24_s21 = sadd.s32 1, %s1372_s19  ;;  %p1140_p0 = scmp.ge.s32.totalorder %s1376_s20, 1  ;;  %s1376_s20 = sphi %s1413_s20, %s15_s20   ;;  %s1372_s19 = sphi %s1411_s19, %s1570_s19   ;;  %s1368_s18 = sphi %s1409_s18, %s1569_s18  }
   0x3   : > { %p25_p1 = scmp.ge.s32.totalorder %s24_s21, 18  ;;  %p250_p2 = scmp.lt.s32.totalorder %s1376_s20, 19 }
   0x5   : > { %s1572_s21 = smov (%p25_p1, %s24_s21), 0  ;;  %p251_p3 = pnand %p1140_p0, %p250_p2 }
   0x6   : > { %s1141_s22 = sshll.u32 (!%p251_p3), %s1368_s18, 1  ;;  %s1143_s23 = sshll.u32 (!%p251_p3), %s1368_s18, 5 }
   0x7   : > { %254 = sbr.rel (%p251_p3) target bundleno = 360 (0x168), region = 40  ;;  %p302_p4 = scmp.lt.s32.totalorder (!%p251_p3), %s1141_s22, 35 }
   0x8   : > { %p309_p5 = scmp.lt.s32.totalorder (!%p251_p3), %s1143_s23, 575  ;;  %p1146_p6 = scmp.ne.s32.totalorder (!%p251_p3), %s1368_s18, 0 }
   0xe   : > { %s1574_s22 = smov (!%p302_p4, %s1141_s22), 35  ;;  %s1576_s23 = smov (!%p309_p5, %s1143_s23), 575 }
   0xf   : > { %s1142_s24 = sshll.u32 %s1574_s22, 2  ;;  %s1220_s28 = sshll.u32 %s1576_s23, 4  ;;  %v1378_v0 = vmov (!%p1146_p6), 0.0  }
  0x10   : > { %s1434_s27 = scalar_lea.vmem %s1563_s0, %s1142_s24  ;;  %s1439_s6 = scalar_lea.vmem %s1564_s1, %s1220_s28  ;;  %345 = vst [vmem:[#allocation2] sm:$0xff] (!%p1146_p6), %v1378_v0  ;;  %346 = vst [vmem:[#allocation2 + $0x8] sm:$0xff] (!%p1146_p6), %v1378_v0 }
  0x11   : > { %344 = sbr.rel (%p1146_p6) target bundleno = 24 (0x18), region = 44  ;;  %347 = vst [vmem:[#allocation2 + $0x10] sm:$0xff] (!%p1146_p6), %v1378_v0  ;;  %348 = vst [vmem:[#allocation2 + $0x18] sm:$0xff] (!%p1146_p6), %v1378_v0 }
  0x18 PF: > { %v1248_v1 = vld [vmem:[%s1439_s6 + $0x4] ss:$16 sps:$4 sm:$0xff]   ;;  %v1250_v2 = vld [vmem:[%s1439_s6 + $0xc] ss:$16 sps:$4 sm:$0xff]   ;;  %v1252_v3 = vld [vmem:[%s1439_s6] ss:$16 sps:$4 sm:$0xff]  }
  0x19   : > { %745 = vmatprep.subr.bf16.mxu0 %v1248_v1  ;;  %v1253_v4 = vld [vmem:[%s1439_s6 + $0x8] ss:$16 sps:$4 sm:$0xff]   ;;  %786 = vmatprep.subr.bf16.mxu1 %v1250_v2  ;;  %v1254_v5 = vld [vmem:[%s1439_s6 + $0x24] ss:$16 sps:$4 sm:$0xff]   ;;  %v1256_v6 = vld [vmem:[%s1439_s6 + $0x2c] ss:$16 sps:$4 sm:$0xff]  }
  0x1a   : > { %746 = vmatpush1.bf16.msra.mxu0 %v1252_v3  ;;  %787 = vmatpush1.bf16.msra.mxu1 %v1253_v4  ;;  %v1258_v7 = vld [vmem:[%s1439_s6 + $0x20] ss:$16 sps:$4 sm:$0xff]   ;;  %v1259_v8 = vld [vmem:[%s1439_s6 + $0x28] ss:$16 sps:$4 sm:$0xff]   ;;  %v1260_v9 = vld [vmem:[%s1439_s6 + $0x44] ss:$16 sps:$4 sm:$0xff]  }
  0x1b   : > { %747 = vmatprep.subr.bf16.mxu0 %v1254_v5  ;;  %788 = vmatprep.subr.bf16.mxu1 %v1256_v6  ;;  %v1262_v10 = vld [vmem:[%s1439_s6 + $0x4c] ss:$16 sps:$4 sm:$0xff]   ;;  %v1264_v11 = vld [vmem:[%s1439_s6 + $0x40] ss:$16 sps:$4 sm:$0xff]   ;;  %v1265_v12 = vld [vmem:[%s1439_s6 + $0x48] ss:$16 sps:$4 sm:$0xff]  }
  0x1c   : > { %v1266_v13 = vld [vmem:[%s1439_s6 + $0x64] ss:$16 sps:$4 sm:$0xff]   ;;  %v1268_v14 = vld [vmem:[%s1439_s6 + $0x6c] ss:$16 sps:$4 sm:$0xff]   ;;  %v1270_v15 = vld [vmem:[%s1439_s6 + $0x60] ss:$16 sps:$4 sm:$0xff]  }
  0x1d   : > { %v1271_v16 = vld [vmem:[%s1439_s6 + $0x68] ss:$16 sps:$4 sm:$0xff]   ;;  %v1272_v17 = vld [vmem:[%s1439_s6 + $0x84] ss:$16 sps:$4 sm:$0xff]   ;;  %v1274_v18 = vld [vmem:[%s1439_s6 + $0x8c] ss:$16 sps:$4 sm:$0xff]  }
  0x1e   : > { %748 = vmatpush1.bf16.msra.mxu0 %v1258_v7  ;;  %789 = vmatpush1.bf16.msra.mxu1 %v1259_v8  ;;  %v1276_v19 = vld [vmem:[%s1439_s6 + $0x80] ss:$16 sps:$4 sm:$0xff]   ;;  %v1277_v20 = vld [vmem:[%s1439_s6 + $0x88] ss:$16 sps:$4 sm:$0xff]   ;;  %v1278_v21 = vld [vmem:[%s1439_s6 + $0xa4] ss:$16 sps:$4 sm:$0xff]  }
  0x1f   : > { %749 = vmatprep.subr.bf16.mxu0 %v1260_v9  ;;  %790 = vmatprep.subr.bf16.mxu1 %v1262_v10  ;;  %v1280_v22 = vld [vmem:[%s1439_s6 + $0xac] ss:$16 sps:$4 sm:$0xff]   ;;  %v1282_v23 = vld [vmem:[%s1439_s6 + $0xa0] ss:$16 sps:$4 sm:$0xff]   ;;  %v1283_v24 = vld [vmem:[%s1439_s6 + $0xa8] ss:$16 sps:$4 sm:$0xff]  }
  0x20   : > { %v1284_v25 = vld [vmem:[%s1439_s6 + $0xc4] ss:$16 sps:$4 sm:$0xff]   ;;  %v1286_v26 = vld [vmem:[%s1439_s6 + $0xcc] ss:$16 sps:$4 sm:$0xff]   ;;  %v1288_v27 = vld [vmem:[%s1439_s6 + $0xc0] ss:$16 sps:$4 sm:$0xff]  }
  0x21   : > { %v1289_v28 = vld [vmem:[%s1439_s6 + $0xc8] ss:$16 sps:$4 sm:$0xff]   ;;  %v1290_v29 = vld [vmem:[%s1439_s6 + $0xe4] ss:$16 sps:$4 sm:$0xff]   ;;  %v1292_v30 = vld [vmem:[%s1439_s6 + $0xec] ss:$16 sps:$4 sm:$0xff]  }
  0x22   : > { %750 = vmatpush1.bf16.msra.mxu0 %v1264_v11  ;;  %791 = vmatpush1.bf16.msra.mxu1 %v1265_v12  ;;  %v1294_v31 = vld [vmem:[%s1439_s6 + $0xe0] ss:$16 sps:$4 sm:$0xff]   ;;  %v1295_v32 = vld [vmem:[%s1439_s6 + $0xe8] ss:$16 sps:$4 sm:$0xff]   ;;  %v1296_v33 = vld [vmem:[%s1439_s6 + $0x104] ss:$16 sps:$4 sm:$0xff]  }
  0x23   : > { %751 = vmatprep.subr.bf16.mxu0 %v1266_v13  ;;  %792 = vmatprep.subr.bf16.mxu1 %v1268_v14  ;;  %v1298_v34 = vld [vmem:[%s1439_s6 + $0x10c] ss:$16 sps:$4 sm:$0xff]   ;;  %v1300_v35 = vld [vmem:[%s1439_s6 + $0x100] ss:$16 sps:$4 sm:$0xff]   ;;  %v1301_v36 = vld [vmem:[%s1439_s6 + $0x108] ss:$16 sps:$4 sm:$0xff]  }
  0x24   : > { %v1302_v37 = vld [vmem:[%s1439_s6 + $0x124] ss:$16 sps:$4 sm:$0xff]   ;;  %v1304_v38 = vld [vmem:[%s1439_s6 + $0x12c] ss:$16 sps:$4 sm:$0xff]   ;;  %v1306_v39 = vld [vmem:[%s1439_s6 + $0x120] ss:$16 sps:$4 sm:$0xff]  }
  0x25   : > { %v1307_v40 = vld [vmem:[%s1439_s6 + $0x128] ss:$16 sps:$4 sm:$0xff]   ;;  %v1308_v41 = vld [vmem:[%s1439_s6 + $0x144] ss:$16 sps:$4 sm:$0xff]   ;;  %v1310_v42 = vld [vmem:[%s1439_s6 + $0x14c] ss:$16 sps:$4 sm:$0xff]  }
  0x26   : > { %752 = vmatpush1.bf16.msra.mxu0 %v1270_v15  ;;  %793 = vmatpush1.bf16.msra.mxu1 %v1271_v16  ;;  %v1312_v43 = vld [vmem:[%s1439_s6 + $0x140] ss:$16 sps:$4 sm:$0xff]   ;;  %v1313_v44 = vld [vmem:[%s1439_s6 + $0x148] ss:$16 sps:$4 sm:$0xff]   ;;  %v1314_v45 = vld [vmem:[%s1439_s6 + $0x164] ss:$16 sps:$4 sm:$0xff]  }
  0x27   : > { %753 = vmatprep.subr.bf16.mxu0 %v1272_v17  ;;  %794 = vmatprep.subr.bf16.mxu1 %v1274_v18  ;;  %v1316_v46 = vld [vmem:[%s1439_s6 + $0x16c] ss:$16 sps:$4 sm:$0xff]   ;;  %v353_v47 = vld [vmem:[%s1434_s27] sm:$0xff]  ;;  %v1319_v50 = vld [vmem:[%s1439_s6 + $0x168] ss:$16 sps:$4 sm:$0xff]   ;;  %p1213_p7 = scmp.ne.s32.totalorder %s1368_s18, 17 }
  0x28   : > { %v1148_v48 = vcombine.high %v353_v47, %v353_v47  ;;  %v1318_v49 = vld [vmem:[%s1439_s6 + $0x160] ss:$16 sps:$4 sm:$0xff]   ;;  %v1320_v51 = vld [vmem:[%s1439_s6 + $0x184] ss:$16 sps:$4 sm:$0xff]   ;;  %v1322_v52 = vld [vmem:[%s1439_s6 + $0x18c] ss:$16 sps:$4 sm:$0xff]   ;;  %v1147_v3 = vcombine.low %v353_v47, %v353_v47 }
  0x29   : > { %v1324_v53 = vld [vmem:[%s1439_s6 + $0x180] ss:$16 sps:$4 sm:$0xff]   ;;  %v1325_v54 = vld [vmem:[%s1439_s6 + $0x188] ss:$16 sps:$4 sm:$0xff]   ;;  %v1326_v55 = vld [vmem:[%s1439_s6 + $0x1a4] ss:$16 sps:$4 sm:$0xff]  }
  0x2a   : > { %754 = vmatpush1.bf16.msra.mxu0 %v1276_v19  ;;  %795 = vmatpush1.bf16.msra.mxu1 %v1277_v20  ;;  %v1328_v56 = vld [vmem:[%s1439_s6 + $0x1ac] ss:$16 sps:$4 sm:$0xff]   ;;  %v1330_v57 = vld [vmem:[%s1439_s6 + $0x1a0] ss:$16 sps:$4 sm:$0xff]   ;;  %v1331_v58 = vld [vmem:[%s1439_s6 + $0x1a8] ss:$16 sps:$4 sm:$0xff]  }
  0x2b   : > { %755 = vmatprep.subr.bf16.mxu0 %v1278_v21  ;;  %796 = vmatprep.subr.bf16.mxu1 %v1280_v22  ;;  %v1332_v59 = vld [vmem:[%s1439_s6 + $0x1c4] ss:$16 sps:$4 sm:$0xff]   ;;  %v1334_v60 = vld [vmem:[%s1439_s6 + $0x1cc] ss:$16 sps:$4 sm:$0xff]   ;;  %v1336_v61 = vld [vmem:[%s1439_s6 + $0x1c0] ss:$16 sps:$4 sm:$0xff]  }
  0x2c   : > { %777 = vmatprep.mubr.bf16.mxu0 %v1148_v48  ;;  %818 = vmatprep.mubr.bf16.mxu1 %v1148_v48  ;;  %v1337_v62 = vld [vmem:[%s1439_s6 + $0x1c8] ss:$16 sps:$4 sm:$0xff]   ;;  %v1338_v63 = vld [vmem:[%s1439_s6 + $0x1e4] ss:$16 sps:$4 sm:$0xff]   ;;  %v1340_v0 = vld [vmem:[%s1439_s6 + $0x1ec] ss:$16 sps:$4 sm:$0xff]  }
  0x2d   : > { %v1342_v1 = vld [vmem:[%s1439_s6 + $0x1e0] ss:$16 sps:$4 sm:$0xff]   ;;  %v1343_v2 = vld [vmem:[%s1439_s6 + $0x1e8] ss:$16 sps:$4 sm:$0xff]  }
  0x2e   : > { %756 = vmatpush1.bf16.msra.mxu0 %v1282_v23  ;;  %797 = vmatpush1.bf16.msra.mxu1 %v1283_v24  ;;  %v349_v4 = vld [vmem:[#allocation2] sm:$0xff]  ;;  %v351_v5 = vld [vmem:[#allocation2 + $0x10] sm:$0xff]  ;;  %v350_v6 = vld [vmem:[#allocation2 + $0x8] sm:$0xff] }
  0x2f   : > { %757 = vmatprep.subr.bf16.mxu0 %v1284_v25  ;;  %798 = vmatprep.subr.bf16.mxu1 %v1286_v26  ;;  %v352_v7 = vld [vmem:[#allocation2 + $0x18] sm:$0xff] }
  0x32   : > { %758 = vmatpush1.bf16.msra.mxu0 %v1288_v27  ;;  %799 = vmatpush1.bf16.msra.mxu1 %v1289_v28 }
  0x33   : > { %759 = vmatprep.subr.bf16.mxu0 %v1290_v29  ;;  %800 = vmatprep.subr.bf16.mxu1 %v1292_v30 }
  0x36   : > { %760 = vmatpush1.bf16.msra.mxu0 %v1294_v31  ;;  %801 = vmatpush1.bf16.msra.mxu1 %v1295_v32 }
  0x37   : > { %761 = vmatprep.subr.bf16.mxu0 %v1296_v33  ;;  %802 = vmatprep.subr.bf16.mxu1 %v1298_v34 }
  0x3a   : > { %762 = vmatpush1.bf16.msra.mxu0 %v1300_v35  ;;  %803 = vmatpush1.bf16.msra.mxu1 %v1301_v36 }
  0x3b   : > { %763 = vmatprep.subr.bf16.mxu0 %v1302_v37  ;;  %804 = vmatprep.subr.bf16.mxu1 %v1304_v38 }
  0x3e   : > { %764 = vmatpush1.bf16.msra.mxu0 %v1306_v39  ;;  %805 = vmatpush1.bf16.msra.mxu1 %v1307_v40 }
  0x3f   : > { %765 = vmatprep.subr.bf16.mxu0 %v1308_v41  ;;  %806 = vmatprep.subr.bf16.mxu1 %v1310_v42 }
  0x42   : > { %766 = vmatpush1.bf16.msra.mxu0 %v1312_v43  ;;  %807 = vmatpush1.bf16.msra.mxu1 %v1313_v44 }
  0x43   : > { %767 = vmatprep.subr.bf16.mxu0 %v1314_v45  ;;  %808 = vmatprep.subr.bf16.mxu1 %v1316_v46 }
  0x46   : > { %768 = vmatpush1.bf16.msra.mxu0 %v1318_v49  ;;  %809 = vmatpush1.bf16.msra.mxu1 %v1319_v50 }
  0x47   : > { %769 = vmatprep.subr.bf16.mxu0 %v1320_v51  ;;  %810 = vmatprep.subr.bf16.mxu1 %v1322_v52 }
  0x4a   : > { %770 = vmatpush1.bf16.msra.mxu0 %v1324_v53  ;;  %811 = vmatpush1.bf16.msra.mxu1 %v1325_v54 }
  0x4b   : > { %771 = vmatprep.subr.bf16.mxu0 %v1326_v55  ;;  %812 = vmatprep.subr.bf16.mxu1 %v1328_v56 }
  0x4e   : > { %772 = vmatpush1.bf16.msra.mxu0 %v1330_v57  ;;  %813 = vmatpush1.bf16.msra.mxu1 %v1331_v58 }
  0x4f   : > { %773 = vmatprep.subr.bf16.mxu0 %v1332_v59  ;;  %814 = vmatprep.subr.bf16.mxu1 %v1334_v60 }
  0x52   : > { %774 = vmatpush1.bf16.msra.mxu0 %v1336_v61  ;;  %815 = vmatpush1.bf16.msra.mxu1 %v1337_v62 }
  0x53   : > { %775 = vmatprep.subr.bf16.mxu0 %v1338_v63  ;;  %816 = vmatprep.subr.bf16.mxu1 %v1340_v0 }
  0x56   : > { %776 = vmatpush1.bf16.msra.mxu0 %v1342_v1  ;;  %817 = vmatpush1.bf16.msra.mxu1 %v1343_v2 }
  0x59   : > { %778 = vmatmul.mubr.bf16.vlgmr.msra.gmra.mrb[0].mxu0 %v1147_v3  ;;  %819 = vmatmul.mubr.bf16.vlgmr.msra.gmra.mrb[0].mxu1 %v1147_v3 }
 0x12a   : > { %838 = sbr.rel (%p1213_p7) target bundleno = 360 (0x168), region = 48 }
 0x12c   : > { %v779_v8 = vpop.f32.mrb[0].mxu0  ;;  %v820_v9 = vpop.f32.mrb[0].mxu1 }
 0x12d   : > { %v827_v10 = vadd.f32 %v779_v8, %v349_v4  ;;  %v829_v11 = vadd.f32 %v820_v9, %v351_v5  ;;  %v781_v12 = vpop.f32.mrb[1].mxu0  ;;  %v822_v13 = vpop.f32.mrb[1].mxu1 }
 0x12e   : > { %v828_v14 = vadd.f32 %v781_v12, %v350_v6  ;;  %v830_v15 = vadd.f32 %v822_v13, %v352_v7  ;;  %v783_v16 = vpop.f32.mrb[2].mxu0  ;;  %v824_v17 = vpop.f32.mrb[2].mxu1 }
 0x12f   : > { %831 = vst [vmem:[#allocation2] sm:$0xff] %v827_v10  ;;  %833 = vst [vmem:[#allocation2 + $0x10] sm:$0xff] %v829_v11  ;;  %v784_v18 = vpop.f32.mrb[3].mxu0  ;;  %v825_v19 = vpop.f32.mrb[3].mxu1 }
 0x130   : > { %832 = vst [vmem:[#allocation2 + $0x8] sm:$0xff] %v828_v14  ;;  %834 = vst [vmem:[#allocation2 + $0x18] sm:$0xff] %v830_v15 }
 0x136   : > { %v1508_v20 = vld [vmem:[#allocation2] sm:$0xff]  ;;  %v1512_v22 = vld [vmem:[#allocation2 + $0x10] sm:$0xff] }
 0x137   : > { %v1510_v21 = vld [vmem:[#allocation2 + $0x8] sm:$0xff]  ;;  %v1514_v23 = vld [vmem:[#allocation2 + $0x18] sm:$0xff]  ;;  %v843_v24 = vrot.slane %v1508_v20, 4  ;;  %v855_v26 = vrot.slane %v1512_v22, 4  ;;  %v871_v27 = vmul.f32 %v1508_v20, %v1508_v20  ;;  %v873_v30 = vmul.f32 %v1512_v22, %v1512_v22 }
 0x138   : > { %v849_v25 = vrot.slane %v1510_v21, 4  ;;  %v861_v28 = vrot.slane %v1514_v23, 4  ;;  %v872_v29 = vmul.f32 %v1510_v21, %v1510_v21  ;;  %v874_v31 = vmul.f32 %v1514_v23, %v1514_v23 }
 0x139   : > { %v844_v32 = vadd.f32 %v843_v24, %v1508_v20  ;;  %v856_v34 = vadd.f32 %v855_v26, %v1512_v22  ;;  %v875_v35 = vrot.slane %v871_v27, 4  ;;  %v887_v38 = vrot.slane %v873_v30, 4 }
 0x13a   : > { %v850_v33 = vadd.f32 %v849_v25, %v1510_v21  ;;  %v862_v36 = vadd.f32 %v861_v28, %v1514_v23  ;;  %v881_v37 = vrot.slane %v872_v29, 4  ;;  %v893_v39 = vrot.slane %v874_v31, 4 }
 0x13b   : > { %v845_v40 = vrot.slane %v844_v32, 2  ;;  %v857_v42 = vrot.slane %v856_v34, 2  ;;  %v876_v43 = vadd.f32 %v875_v35, %v871_v27  ;;  %v888_v46 = vadd.f32 %v887_v38, %v873_v30 }
 0x13c   : > { %v851_v41 = vrot.slane %v850_v33, 2  ;;  %v863_v44 = vrot.slane %v862_v36, 2  ;;  %v882_v45 = vadd.f32 %v881_v37, %v872_v29  ;;  %v894_v47 = vadd.f32 %v893_v39, %v874_v31 }
 0x13d   : > { %v846_v48 = vadd.f32 %v845_v40, %v844_v32  ;;  %v858_v50 = vadd.f32 %v857_v42, %v856_v34  ;;  %v877_v51 = vrot.slane %v876_v43, 2  ;;  %v889_v54 = vrot.slane %v888_v46, 2 }
 0x13e   : > { %v852_v49 = vadd.f32 %v851_v41, %v850_v33  ;;  %v864_v52 = vadd.f32 %v863_v44, %v862_v36  ;;  %v883_v53 = vrot.slane %v882_v45, 2  ;;  %v895_v55 = vrot.slane %v894_v47, 2 }
 0x13f   : > { %v847_v56 = vrot.slane %v846_v48, 1  ;;  %v859_v58 = vrot.slane %v858_v50, 1  ;;  %v878_v59 = vadd.f32 %v877_v51, %v876_v43  ;;  %v890_v62 = vadd.f32 %v889_v54, %v888_v46  ;;  %v931_v43 = vld [vmem:[%s1565_s2] sm:$0xf] }
 0x140   : > { %v853_v57 = vrot.slane %v852_v49, 1  ;;  %v865_v60 = vrot.slane %v864_v52, 1  ;;  %v884_v61 = vadd.f32 %v883_v53, %v882_v45  ;;  %v896_v63 = vadd.f32 %v895_v55, %v894_v47  ;;  %v983_v55 = vld [vmem:[%s1567_s4] sm:$0xff] }
 0x141   : > { %v848_v0 = vadd.f32 %v847_v56, %v846_v48  ;;  %v860_v2 = vadd.f32 %v859_v58, %v858_v50  ;;  %v879_v3 = vrot.slane %v878_v59, 1  ;;  %v891_v6 = vrot.slane %v890_v62, 1 }
 0x142   : > { %v854_v1 = vadd.f32 %v853_v57, %v852_v49  ;;  %v866_v4 = vadd.f32 %v865_v60, %v864_v52  ;;  %v885_v5 = vrot.slane %v884_v61, 1  ;;  %v897_v7 = vrot.slane %v896_v63, 1  ;;  %v957_v49 = vld [vmem:[%s1566_s3] sm:$0xf] }
 0x143   : > { %v867_v8 = vmul.f32 0.5, %v848_v0  ;;  %v869_v10 = vmul.f32 0.5, %v860_v2  ;;  %v880_v11 = vadd.f32 %v879_v3, %v878_v59  ;;  %v892_v14 = vadd.f32 %v891_v6, %v890_v62 }
 0x144   : > { %v868_v9 = vmul.f32 0.5, %v854_v1  ;;  %v870_v12 = vmul.f32 0.5, %v866_v4  ;;  %v886_v13 = vadd.f32 %v885_v5, %v884_v61  ;;  %v898_v15 = vadd.f32 %v897_v7, %v896_v63 }
 0x145   : > { %v899_v16 = vmul.f32 0.5, %v880_v11  ;;  %v903_v17 = vmul.f32 %v867_v8, %v867_v8  ;;  %v905_v19 = vmul.f32 %v869_v10, %v869_v10  ;;  %v901_v25 = vmul.f32 0.5, %v892_v14 }
 0x146   : > { %v904_v18 = vmul.f32 %v868_v9, %v868_v9  ;;  %v900_v24 = vmul.f32 0.5, %v886_v13  ;;  %v902_v26 = vmul.f32 0.5, %v898_v15  ;;  %v906_v27 = vmul.f32 %v870_v12, %v870_v12 }
 0x147   : > { %v907_v28 = vsub.f32 %v899_v16, %v903_v17  ;;  %v909_v30 = vsub.f32 %v901_v25, %v905_v19  ;;  %v933_v36 = vlaneseq  ;;  %v915_v45 = vsub.f32 %v1508_v20, %v867_v8 }
 0x148   : > { %v908_v29 = vsub.f32 %v900_v24, %v904_v18  ;;  %v910_v31 = vsub.f32 %v902_v26, %v906_v27  ;;  %v916_v47 = vsub.f32 %v1510_v21, %v868_v9  ;;  %v917_v50 = vsub.f32 %v1512_v22, %v869_v10  ;;  %v984_v22 = vld [vmem:[%s1567_s4 + $0x8] sm:$0xff] }
 0x149   : > { %v911_v32 = vmax.f32 %v907_v28, 0.0  ;;  %v913_v34 = vmax.f32 %v909_v30, 0.0  ;;  %v934_v41 = vshrl.u32 %v933_v36, 7  ;;  %v918_v53 = vsub.f32 %v1514_v23, %v870_v12 }
 0x14a   : > { %v912_v33 = vmax.f32 %v908_v29, 0.0  ;;  %v914_v35 = vmax.f32 %v910_v31, 0.0  ;;  %v985_v1 = vunpack.c.l.bf16 %v983_v55  ;;  %v986_v5 = vunpack.c.h.bf16 %v983_v55 }
 0x14b   : > { %v919_v37 = vadd.f32 1e-05, %v911_v32  ;;  %v921_v39 = vadd.f32 1e-05, %v913_v34  ;;  %v935_v42 = vsub.s32 0, %v934_v41  ;;  %v939_v44 = vsub.s32 1, %v934_v41 }
 0x14c   : > { %v920_v38 = vadd.f32 1e-05, %v912_v33  ;;  %v922_v40 = vadd.f32 1e-05, %v914_v35  ;;  %v943_v46 = vsub.s32 2, %v934_v41  ;;  %v947_v48 = vsub.s32 3, %v934_v41 }
 0x14d   : > { %1346 = vrsqrt.f32 %v919_v37  ;;  %v936_v51 = vrot.slane %v931_v43, %v935_v42  ;;  %v940_v54 = vrot.slane %v931_v43, %v939_v44  ;;  %v962_v21 = vrot.slane %v957_v49, %v935_v42 }
 0x14e   : > { %1348 = vrsqrt.f32 %v920_v38  ;;  %v944_v57 = vrot.slane %v931_v43, %v943_v46  ;;  %v948_v60 = vrot.slane %v931_v43, %v947_v48  ;;  %v966_v61 = vrot.slane %v957_v49, %v939_v44 }
 0x14f   : > { %1350 = vrsqrt.f32 %v921_v39  ;;  %v970_v0 = vrot.slane %v957_v49, %v943_v46  ;;  %v974_v4 = vrot.slane %v957_v49, %v947_v48  ;;  %v987_v8 = vunpack.c.l.bf16 %v984_v22 }
 0x150   : > { %1352 = vrsqrt.f32 %v922_v40  ;;  %v988_v11 = vunpack.c.h.bf16 %v984_v22 }
 0x157   : > { %v1347_v52 = vpop.eup %1346 }
 0x158   : > { %v1349_v20 = vpop.eup %1348  ;;  %v927_v56 = vmul.f32 %v1347_v52, %v915_v45 }
 0x159   : > { %v1351_v58 = vpop.eup %1350  ;;  %v928_v59 = vmul.f32 %v1349_v20, %v916_v47 }
 0x15a   : > { %v1353_v62 = vpop.eup %1352  ;;  %v929_v63 = vmul.f32 %v1351_v58, %v917_v50  ;;  %v953_v23 = vmul.f32 %v936_v51, %v927_v56 }
 0x15b   : > { %v930_v2 = vmul.f32 %v1353_v62, %v918_v53  ;;  %v954_v3 = vmul.f32 %v940_v54, %v928_v59 }
 0x15c   : > { %v955_v6 = vmul.f32 %v944_v57, %v929_v63  ;;  %v979_v7 = vadd.f32 %v962_v21, %v953_v23 }
 0x15d   : > { %v956_v9 = vmul.f32 %v948_v60, %v930_v2  ;;  %v980_v10 = vadd.f32 %v966_v61, %v954_v3 }
 0x15e   : > { %v981_v12 = vadd.f32 %v970_v0, %v955_v6  ;;  %v989_v13 = vadd.f32 %v985_v1, %v979_v7 }
 0x15f   : > { %v982_v14 = vadd.f32 %v974_v4, %v956_v9  ;;  %v990_v15 = vadd.f32 %v986_v5, %v980_v10 }
 0x160   : > { %v991_v16 = vadd.f32 %v987_v8, %v981_v12  ;;  %v993_v17 = vmax.f32 %v989_v13, 0.0 }
 0x161   : > { %v992_v18 = vadd.f32 %v988_v11, %v982_v14  ;;  %v994_v19 = vmax.f32 %v990_v15, 0.0 }
 0x162   : > { %v995_v24 = vmax.f32 %v991_v16, 0.0 }
 0x163   : > { %v996_v25 = vmax.f32 %v992_v18, 0.0  ;;  %v1221_v26 = vpack.c.bf16 %v994_v19, %v993_v17 }
 0x165   : > { %v1222_v27 = vpack.c.bf16 %v996_v25, %v995_v24  ;;  %1013 = vst [vmem:[%s1568_s5] sm:$0xff] %v1221_v26 }
 0x167   : > { %1014 = vst [vmem:[%s1568_s5 + $0x8] sm:$0xff] %v1222_v27 }
 0x168 PF: > { %s15_s20 = sadd.s32 1, %s1376_s20   ;;  %s1569_s18 = smov %s1372_s19 }
 0x169   : > { %p12_p8 = scmp.ge.s32.totalorder %s15_s20, 20   ;;  %s1570_s19 = smov %s1572_s21 }
 0x16b   :  { %14 = sbr.rel (!%p12_p8) target bundleno = 2 (0x2), region = 90 }

// kernel: birdnet_forward.71
= control target key start
LH: loop header
LB: loop body
LE: loop exit
PB: predicated region body
PF: predicated region fallthrough
CT: control target
= control target key end

     0   :  { %s1329_s15 = smov 0   ;;  %s1331_s16 = smov 0   ;;  %s1477_s0 = inlined_call_operand.vmem [shape: bf16[8,4608], index: 0, kind: input, shape index: {}]   ;;  %s1478_s1 = inlined_call_operand.vmem [shape: bf16[4608,512], index: 1, kind: input, shape index: {}]   ;;  %s1479_s2 = inlined_call_operand.vmem [shape: f32[1,512], index: 2, kind: input, shape index: {}]   ;;  %s1480_s3 = inlined_call_operand.vmem [shape: f32[1,512], index: 3, kind: input, shape index: {}]   ;;  %s1481_s4 = inlined_call_operand.vmem [shape: bf16[8,512], index: 4, kind: output, shape index: {}]  }
   0x1   :  { %s1333_s17 = smov 0  }
   0x2 LB: > { %s23_s18 = sadd.s32 1, %s1297_s16  ;;  %p1065_p0 = scmp.ge.s32.totalorder %s1301_s17, 1  ;;  %s1301_s17 = sphi %s1333_s17, %s14_s17   ;;  %s1297_s16 = sphi %s1331_s16, %s1483_s16   ;;  %s1293_s15 = sphi %s1329_s15, %s1482_s15  }
   0x3   : > { %p24_p1 = scmp.ge.s32.totalorder %s23_s18, 18  ;;  %p214_p2 = scmp.lt.s32.totalorder %s1301_s17, 19 }
   0x5   : > { %s1485_s18 = smov (%p24_p1, %s23_s18), 0  ;;  %p215_p3 = pnand %p1065_p0, %p214_p2 }
   0x6   : > { %s1066_s19 = sshll.u32 (!%p215_p3), %s1293_s15, 1  ;;  %s1068_s20 = sshll.u32 (!%p215_p3), %s1293_s15, 5 }
   0x7   : > { %218 = sbr.rel (%p215_p3) target bundleno = 358 (0x166), region = 36  ;;  %p259_p4 = scmp.lt.s32.totalorder (!%p215_p3), %s1066_s19, 35 }
   0x8   : > { %p266_p5 = scmp.lt.s32.totalorder (!%p215_p3), %s1068_s20, 575  ;;  %p1071_p6 = scmp.ne.s32.totalorder (!%p215_p3), %s1293_s15, 0 }
   0xe   : > { %s1487_s19 = smov (!%p259_p4, %s1066_s19), 35  ;;  %s1489_s20 = smov (!%p266_p5, %s1068_s20), 575 }
   0xf   : > { %s1067_s21 = sshll.u32 %s1487_s19, 2  ;;  %s1145_s25 = sshll.u32 %s1489_s20, 4  ;;  %v1303_v0 = vmov (!%p1071_p6), 0.0  }
  0x10   : > { %s1354_s24 = scalar_lea.vmem %s1477_s0, %s1067_s21  ;;  %s1359_s28 = scalar_lea.vmem %s1478_s1, %s1145_s25  ;;  %296 = vst [vmem:[#allocation2] sm:$0xff] (!%p1071_p6), %v1303_v0  ;;  %297 = vst [vmem:[#allocation2 + $0x8] sm:$0xff] (!%p1071_p6), %v1303_v0 }
  0x11   : > { %295 = sbr.rel (%p1071_p6) target bundleno = 24 (0x18), region = 40  ;;  %298 = vst [vmem:[#allocation2 + $0x10] sm:$0xff] (!%p1071_p6), %v1303_v0  ;;  %299 = vst [vmem:[#allocation2 + $0x18] sm:$0xff] (!%p1071_p6), %v1303_v0 }
  0x18 PF: > { %v1173_v1 = vld [vmem:[%s1359_s28 + $0x4] ss:$16 sps:$4 sm:$0xff]   ;;  %v1175_v2 = vld [vmem:[%s1359_s28 + $0xc] ss:$16 sps:$4 sm:$0xff]   ;;  %v1177_v3 = vld [vmem:[%s1359_s28] ss:$16 sps:$4 sm:$0xff]  }
  0x19   : > { %696 = vmatprep.subr.bf16.mxu0 %v1173_v1  ;;  %v1178_v4 = vld [vmem:[%s1359_s28 + $0x8] ss:$16 sps:$4 sm:$0xff]   ;;  %737 = vmatprep.subr.bf16.mxu1 %v1175_v2  ;;  %v1179_v5 = vld [vmem:[%s1359_s28 + $0x24] ss:$16 sps:$4 sm:$0xff]   ;;  %v1181_v6 = vld [vmem:[%s1359_s28 + $0x2c] ss:$16 sps:$4 sm:$0xff]  }
  0x1a   : > { %697 = vmatpush1.bf16.msra.mxu0 %v1177_v3  ;;  %738 = vmatpush1.bf16.msra.mxu1 %v1178_v4  ;;  %v1183_v7 = vld [vmem:[%s1359_s28 + $0x20] ss:$16 sps:$4 sm:$0xff]   ;;  %v1184_v8 = vld [vmem:[%s1359_s28 + $0x28] ss:$16 sps:$4 sm:$0xff]   ;;  %v1185_v9 = vld [vmem:[%s1359_s28 + $0x44] ss:$16 sps:$4 sm:$0xff]  }
  0x1b   : > { %698 = vmatprep.subr.bf16.mxu0 %v1179_v5  ;;  %739 = vmatprep.subr.bf16.mxu1 %v1181_v6  ;;  %v1187_v10 = vld [vmem:[%s1359_s28 + $0x4c] ss:$16 sps:$4 sm:$0xff]   ;;  %v1189_v11 = vld [vmem:[%s1359_s28 + $0x40] ss:$16 sps:$4 sm:$0xff]   ;;  %v1190_v12 = vld [vmem:[%s1359_s28 + $0x48] ss:$16 sps:$4 sm:$0xff]  }
  0x1c   : > { %v1191_v13 = vld [vmem:[%s1359_s28 + $0x64] ss:$16 sps:$4 sm:$0xff]   ;;  %v1193_v14 = vld [vmem:[%s1359_s28 + $0x6c] ss:$16 sps:$4 sm:$0xff]   ;;  %v1195_v15 = vld [vmem:[%s1359_s28 + $0x60] ss:$16 sps:$4 sm:$0xff]  }
  0x1d   : > { %v1196_v16 = vld [vmem:[%s1359_s28 + $0x68] ss:$16 sps:$4 sm:$0xff]   ;;  %v1197_v17 = vld [vmem:[%s1359_s28 + $0x84] ss:$16 sps:$4 sm:$0xff]   ;;  %v1199_v18 = vld [vmem:[%s1359_s28 + $0x8c] ss:$16 sps:$4 sm:$0xff]  }
  0x1e   : > { %699 = vmatpush1.bf16.msra.mxu0 %v1183_v7  ;;  %740 = vmatpush1.bf16.msra.mxu1 %v1184_v8  ;;  %v1201_v19 = vld [vmem:[%s1359_s28 + $0x80] ss:$16 sps:$4 sm:$0xff]   ;;  %v1202_v20 = vld [vmem:[%s1359_s28 + $0x88] ss:$16 sps:$4 sm:$0xff]   ;;  %v1203_v21 = vld [vmem:[%s1359_s28 + $0xa4] ss:$16 sps:$4 sm:$0xff]  }
  0x1f   : > { %700 = vmatprep.subr.bf16.mxu0 %v1185_v9  ;;  %741 = vmatprep.subr.bf16.mxu1 %v1187_v10  ;;  %v1205_v22 = vld [vmem:[%s1359_s28 + $0xac] ss:$16 sps:$4 sm:$0xff]   ;;  %v1207_v23 = vld [vmem:[%s1359_s28 + $0xa0] ss:$16 sps:$4 sm:$0xff]   ;;  %v1208_v24 = vld [vmem:[%s1359_s28 + $0xa8] ss:$16 sps:$4 sm:$0xff]  }
  0x20   : > { %v1209_v25 = vld [vmem:[%s1359_s28 + $0xc4] ss:$16 sps:$4 sm:$0xff]   ;;  %v1211_v26 = vld [vmem:[%s1359_s28 + $0xcc] ss:$16 sps:$4 sm:$0xff]   ;;  %v1213_v27 = vld [vmem:[%s1359_s28 + $0xc0] ss:$16 sps:$4 sm:$0xff]  }
  0x21   : > { %v1214_v28 = vld [vmem:[%s1359_s28 + $0xc8] ss:$16 sps:$4 sm:$0xff]   ;;  %v1215_v29 = vld [vmem:[%s1359_s28 + $0xe4] ss:$16 sps:$4 sm:$0xff]   ;;  %v1217_v30 = vld [vmem:[%s1359_s28 + $0xec] ss:$16 sps:$4 sm:$0xff]  }
  0x22   : > { %701 = vmatpush1.bf16.msra.mxu0 %v1189_v11  ;;  %742 = vmatpush1.bf16.msra.mxu1 %v1190_v12  ;;  %v1219_v31 = vld [vmem:[%s1359_s28 + $0xe0] ss:$16 sps:$4 sm:$0xff]   ;;  %v1220_v32 = vld [vmem:[%s1359_s28 + $0xe8] ss:$16 sps:$4 sm:$0xff]   ;;  %v1221_v33 = vld [vmem:[%s1359_s28 + $0x104] ss:$16 sps:$4 sm:$0xff]  }
  0x23   : > { %702 = vmatprep.subr.bf16.mxu0 %v1191_v13  ;;  %743 = vmatprep.subr.bf16.mxu1 %v1193_v14  ;;  %v1223_v34 = vld [vmem:[%s1359_s28 + $0x10c] ss:$16 sps:$4 sm:$0xff]   ;;  %v1225_v35 = vld [vmem:[%s1359_s28 + $0x100] ss:$16 sps:$4 sm:$0xff]   ;;  %v1226_v36 = vld [vmem:[%s1359_s28 + $0x108] ss:$16 sps:$4 sm:$0xff]  }
  0x24   : > { %v1227_v37 = vld [vmem:[%s1359_s28 + $0x124] ss:$16 sps:$4 sm:$0xff]   ;;  %v1229_v38 = vld [vmem:[%s1359_s28 + $0x12c] ss:$16 sps:$4 sm:$0xff]   ;;  %v1231_v39 = vld [vmem:[%s1359_s28 + $0x120] ss:$16 sps:$4 sm:$0xff]  }
  0x25   : > { %v1232_v40 = vld [vmem:[%s1359_s28 + $0x128] ss:$16 sps:$4 sm:$0xff]   ;;  %v1233_v41 = vld [vmem:[%s1359_s28 + $0x144] ss:$16 sps:$4 sm:$0xff]   ;;  %v1235_v42 = vld [vmem:[%s1359_s28 + $0x14c] ss:$16 sps:$4 sm:$0xff]  }
  0x26   : > { %703 = vmatpush1.bf16.msra.mxu0 %v1195_v15  ;;  %744 = vmatpush1.bf16.msra.mxu1 %v1196_v16  ;;  %v1237_v43 = vld [vmem:[%s1359_s28 + $0x140] ss:$16 sps:$4 sm:$0xff]   ;;  %v1238_v44 = vld [vmem:[%s1359_s28 + $0x148] ss:$16 sps:$4 sm:$0xff]   ;;  %v1239_v45 = vld [vmem:[%s1359_s28 + $0x164] ss:$16 sps:$4 sm:$0xff]  }
  0x27   : > { %704 = vmatprep.subr.bf16.mxu0 %v1197_v17  ;;  %745 = vmatprep.subr.bf16.mxu1 %v1199_v18  ;;  %v1241_v46 = vld [vmem:[%s1359_s28 + $0x16c] ss:$16 sps:$4 sm:$0xff]   ;;  %v304_v47 = vld [vmem:[%s1354_s24] sm:$0xff]  ;;  %v1244_v50 = vld [vmem:[%s1359_s28 + $0x168] ss:$16 sps:$4 sm:$0xff]   ;;  %p1138_p7 = scmp.ne.s32.totalorder %s1293_s15, 17 }
  0x28   : > { %v1073_v48 = vcombine.high %v304_v47, %v304_v47  ;;  %v1243_v49 = vld [vmem:[%s1359_s28 + $0x160] ss:$16 sps:$4 sm:$0xff]   ;;  %v1245_v51 = vld [vmem:[%s1359_s28 + $0x184] ss:$16 sps:$4 sm:$0xff]   ;;  %v1247_v52 = vld [vmem:[%s1359_s28 + $0x18c] ss:$16 sps:$4 sm:$0xff]   ;;  %v1072_v3 = vcombine.low %v304_v47, %v304_v47 }
  0x29   : > { %v1249_v53 = vld [vmem:[%s1359_s28 + $0x180] ss:$16 sps:$4 sm:$0xff]   ;;  %v1250_v54 = vld [vmem:[%s1359_s28 + $0x188] ss:$16 sps:$4 sm:$0xff]   ;;  %v1251_v55 = vld [vmem:[%s1359_s28 + $0x1a4] ss:$16 sps:$4 sm:$0xff]  }
  0x2a   : > { %705 = vmatpush1.bf16.msra.mxu0 %v1201_v19  ;;  %746 = vmatpush1.bf16.msra.mxu1 %v1202_v20  ;;  %v1253_v56 = vld [vmem:[%s1359_s28 + $0x1ac] ss:$16 sps:$4 sm:$0xff]   ;;  %v1255_v57 = vld [vmem:[%s1359_s28 + $0x1a0] ss:$16 sps:$4 sm:$0xff]   ;;  %v1256_v58 = vld [vmem:[%s1359_s28 + $0x1a8] ss:$16 sps:$4 sm:$0xff]  }
  0x2b   : > { %706 = vmatprep.subr.bf16.mxu0 %v1203_v21  ;;  %747 = vmatprep.subr.bf16.mxu1 %v1205_v22  ;;  %v1257_v59 = vld [vmem:[%s1359_s28 + $0x1c4] ss:$16 sps:$4 sm:$0xff]   ;;  %v1259_v60 = vld [vmem:[%s1359_s28 + $0x1cc] ss:$16 sps:$4 sm:$0xff]   ;;  %v1261_v61 = vld [vmem:[%s1359_s28 + $0x1c0] ss:$16 sps:$4 sm:$0xff]  }
  0x2c   : > { %728 = vmatprep.mubr.bf16.mxu0 %v1073_v48  ;;  %769 = vmatprep.mubr.bf16.mxu1 %v1073_v48  ;;  %v1262_v62 = vld [vmem:[%s1359_s28 + $0x1c8] ss:$16 sps:$4 sm:$0xff]   ;;  %v1263_v63 = vld [vmem:[%s1359_s28 + $0x1e4] ss:$16 sps:$4 sm:$0xff]   ;;  %v1265_v0 = vld [vmem:[%s1359_s28 + $0x1ec] ss:$16 sps:$4 sm:$0xff]  }
  0x2d   : > { %v1267_v1 = vld [vmem:[%s1359_s28 + $0x1e0] ss:$16 sps:$4 sm:$0xff]   ;;  %v1268_v2 = vld [vmem:[%s1359_s28 + $0x1e8] ss:$16 sps:$4 sm:$0xff]  }
  0x2e   : > { %707 = vmatpush1.bf16.msra.mxu0 %v1207_v23  ;;  %748 = vmatpush1.bf16.msra.mxu1 %v1208_v24  ;;  %v300_v4 = vld [vmem:[#allocation2] sm:$0xff]  ;;  %v302_v5 = vld [vmem:[#allocation2 + $0x10] sm:$0xff]  ;;  %v301_v6 = vld [vmem:[#allocation2 + $0x8] sm:$0xff] }
  0x2f   : > { %708 = vmatprep.subr.bf16.mxu0 %v1209_v25  ;;  %749 = vmatprep.subr.bf16.mxu1 %v1211_v26  ;;  %v303_v7 = vld [vmem:[#allocation2 + $0x18] sm:$0xff] }
  0x32   : > { %709 = vmatpush1.bf16.msra.mxu0 %v1213_v27  ;;  %750 = vmatpush1.bf16.msra.mxu1 %v1214_v28 }
  0x33   : > { %710 = vmatprep.subr.bf16.mxu0 %v1215_v29  ;;  %751 = vmatprep.subr.bf16.mxu1 %v1217_v30 }
  0x36   : > { %711 = vmatpush1.bf16.msra.mxu0 %v1219_v31  ;;  %752 = vmatpush1.bf16.msra.mxu1 %v1220_v32 }
  0x37   : > { %712 = vmatprep.subr.bf16.mxu0 %v1221_v33  ;;  %753 = vmatprep.subr.bf16.mxu1 %v1223_v34 }
  0x3a   : > { %713 = vmatpush1.bf16.msra.mxu0 %v1225_v35  ;;  %754 = vmatpush1.bf16.msra.mxu1 %v1226_v36 }
  0x3b   : > { %714 = vmatprep.subr.bf16.mxu0 %v1227_v37  ;;  %755 = vmatprep.subr.bf16.mxu1 %v1229_v38 }
  0x3e   : > { %715 = vmatpush1.bf16.msra.mxu0 %v1231_v39  ;;  %756 = vmatpush1.bf16.msra.mxu1 %v1232_v40 }
  0x3f   : > { %716 = vmatprep.subr.bf16.mxu0 %v1233_v41  ;;  %757 = vmatprep.subr.bf16.mxu1 %v1235_v42 }
  0x42   : > { %717 = vmatpush1.bf16.msra.mxu0 %v1237_v43  ;;  %758 = vmatpush1.bf16.msra.mxu1 %v1238_v44 }
  0x43   : > { %718 = vmatprep.subr.bf16.mxu0 %v1239_v45  ;;  %759 = vmatprep.subr.bf16.mxu1 %v1241_v46 }
  0x46   : > { %719 = vmatpush1.bf16.msra.mxu0 %v1243_v49  ;;  %760 = vmatpush1.bf16.msra.mxu1 %v1244_v50 }
  0x47   : > { %720 = vmatprep.subr.bf16.mxu0 %v1245_v51  ;;  %761 = vmatprep.subr.bf16.mxu1 %v1247_v52 }
  0x4a   : > { %721 = vmatpush1.bf16.msra.mxu0 %v1249_v53  ;;  %762 = vmatpush1.bf16.msra.mxu1 %v1250_v54 }
  0x4b   : > { %722 = vmatprep.subr.bf16.mxu0 %v1251_v55  ;;  %763 = vmatprep.subr.bf16.mxu1 %v1253_v56 }
  0x4e   : > { %723 = vmatpush1.bf16.msra.mxu0 %v1255_v57  ;;  %764 = vmatpush1.bf16.msra.mxu1 %v1256_v58 }
  0x4f   : > { %724 = vmatprep.subr.bf16.mxu0 %v1257_v59  ;;  %765 = vmatprep.subr.bf16.mxu1 %v1259_v60 }
  0x52   : > { %725 = vmatpush1.bf16.msra.mxu0 %v1261_v61  ;;  %766 = vmatpush1.bf16.msra.mxu1 %v1262_v62 }
  0x53   : > { %726 = vmatprep.subr.bf16.mxu0 %v1263_v63  ;;  %767 = vmatprep.subr.bf16.mxu1 %v1265_v0 }
  0x56   : > { %727 = vmatpush1.bf16.msra.mxu0 %v1267_v1  ;;  %768 = vmatpush1.bf16.msra.mxu1 %v1268_v2 }
  0x59   : > { %729 = vmatmul.mubr.bf16.vlgmr.msra.gmra.mrb[0].mxu0 %v1072_v3  ;;  %770 = vmatmul.mubr.bf16.vlgmr.msra.gmra.mrb[0].mxu1 %v1072_v3 }
 0x12a   : > { %789 = sbr.rel (%p1138_p7) target bundleno = 358 (0x166), region = 44 }
 0x12c   : > { %v730_v8 = vpop.f32.mrb[0].mxu0  ;;  %v771_v9 = vpop.f32.mrb[0].mxu1 }
 0x12d   : > { %v778_v10 = vadd.f32 %v730_v8, %v300_v4  ;;  %v780_v11 = vadd.f32 %v771_v9, %v302_v5  ;;  %v732_v12 = vpop.f32.mrb[1].mxu0  ;;  %v773_v13 = vpop.f32.mrb[1].mxu1 }
 0x12e   : > { %v779_v14 = vadd.f32 %v732_v12, %v301_v6  ;;  %v781_v15 = vadd.f32 %v773_v13, %v303_v7  ;;  %v734_v16 = vpop.f32.mrb[2].mxu0  ;;  %v775_v17 = vpop.f32.mrb[2].mxu1 }
 0x12f   : > { %782 = vst [vmem:[#allocation2] sm:$0xff] %v778_v10  ;;  %784 = vst [vmem:[#allocation2 + $0x10] sm:$0xff] %v780_v11  ;;  %v735_v18 = vpop.f32.mrb[3].mxu0  ;;  %v776_v19 = vpop.f32.mrb[3].mxu1 }
 0x130   : > { %783 = vst [vmem:[#allocation2 + $0x8] sm:$0xff] %v779_v14  ;;  %785 = vst [vmem:[#allocation2 + $0x18] sm:$0xff] %v781_v15 }
 0x136   : > { %v1428_v20 = vld [vmem:[#allocation2] sm:$0xff]  ;;  %v1438_v26 = vld [vmem:[#allocation2 + $0x10] sm:$0xff] }
 0x137   : > { %v1430_v21 = vld [vmem:[#allocation2 + $0x8] sm:$0xff]  ;;  %v794_v22 = vrot.slane %v1428_v20, 4  ;;  %v822_v24 = vmul.f32 %v1428_v20, %v1428_v20  ;;  %v1440_v27 = vld [vmem:[#allocation2 + $0x18] sm:$0xff]  ;;  %v806_v28 = vrot.slane %v1438_v26, 4  ;;  %v824_v36 = vmul.f32 %v1438_v26, %v1438_v26 }
 0x138   : > { %v800_v23 = vrot.slane %v1430_v21, 4  ;;  %v823_v25 = vmul.f32 %v1430_v21, %v1430_v21  ;;  %v812_v29 = vrot.slane %v1440_v27, 4  ;;  %v825_v47 = vmul.f32 %v1440_v27, %v1440_v27 }
 0x139   : > { %v795_v30 = vadd.f32 %v794_v22, %v1428_v20  ;;  %v826_v32 = vrot.slane %v822_v24, 4  ;;  %v807_v34 = vadd.f32 %v806_v28, %v1438_v26  ;;  %v838_v48 = vrot.slane %v824_v36, 4 }
 0x13a   : > { %v801_v31 = vadd.f32 %v800_v23, %v1430_v21  ;;  %v832_v33 = vrot.slane %v823_v25, 4  ;;  %v813_v35 = vadd.f32 %v812_v29, %v1440_v27  ;;  %v844_v56 = vrot.slane %v825_v47, 4 }
 0x13b   : > { %v796_v37 = vrot.slane %v795_v30, 2  ;;  %v827_v39 = vadd.f32 %v826_v32, %v822_v24  ;;  %v808_v45 = vrot.slane %v807_v34, 2  ;;  %v839_v55 = vadd.f32 %v838_v48, %v824_v36 }
 0x13c   : > { %v802_v38 = vrot.slane %v801_v31, 2  ;;  %v833_v40 = vadd.f32 %v832_v33, %v823_v25  ;;  %v814_v46 = vrot.slane %v813_v35, 2  ;;  %v845_v0 = vadd.f32 %v844_v56, %v825_v47  ;;  %v908_v47 = vld [vmem:[%s1480_s3] sm:$0xf] }
 0x13d   : > { %v797_v41 = vadd.f32 %v796_v37, %v795_v30  ;;  %v828_v43 = vrot.slane %v827_v39, 2  ;;  %v809_v53 = vadd.f32 %v808_v45, %v807_v34  ;;  %v840_v63 = vrot.slane %v839_v55, 2 }
 0x13e   : > { %v803_v42 = vadd.f32 %v802_v38, %v801_v31  ;;  %v834_v44 = vrot.slane %v833_v40, 2  ;;  %v815_v54 = vadd.f32 %v814_v46, %v813_v35  ;;  %v846_v8 = vrot.slane %v845_v0, 2 }
 0x13f   : > { %v798_v49 = vrot.slane %v797_v41, 1  ;;  %v829_v51 = vadd.f32 %v828_v43, %v827_v39  ;;  %v810_v61 = vrot.slane %v809_v53, 1  ;;  %v841_v7 = vadd.f32 %v840_v63, %v839_v55 }
 0x140   : > { %v804_v50 = vrot.slane %v803_v42, 1  ;;  %v835_v52 = vadd.f32 %v834_v44, %v833_v40  ;;  %v816_v62 = vrot.slane %v815_v54, 1  ;;  %v847_v18 = vadd.f32 %v846_v8, %v845_v0 }
 0x141   : > { %v799_v57 = vadd.f32 %v798_v49, %v797_v41  ;;  %v830_v59 = vrot.slane %v829_v51, 1  ;;  %v811_v5 = vadd.f32 %v810_v61, %v809_v53  ;;  %v842_v17 = vrot.slane %v841_v7, 1 }
 0x142   : > { %v805_v58 = vadd.f32 %v804_v50, %v803_v42  ;;  %v836_v60 = vrot.slane %v835_v52, 1  ;;  %v817_v6 = vadd.f32 %v816_v62, %v815_v54  ;;  %v848_v25 = vrot.slane %v847_v18, 1  ;;  %v882_v42 = vld [vmem:[%s1479_s2] sm:$0xf] }
 0x143   : > { %v818_v1 = vmul.f32 0.5, %v799_v57  ;;  %v831_v3 = vadd.f32 %v830_v59, %v829_v51  ;;  %v820_v13 = vmul.f32 0.5, %v811_v5  ;;  %v843_v24 = vadd.f32 %v842_v17, %v841_v7 }
 0x144   : > { %v819_v2 = vmul.f32 0.5, %v805_v58  ;;  %v837_v4 = vadd.f32 %v836_v60, %v835_v52  ;;  %v821_v14 = vmul.f32 0.5, %v817_v6  ;;  %v884_v28 = vlaneseq }
 0x145   : > { %v850_v9 = vmul.f32 0.5, %v831_v3  ;;  %v854_v11 = vmul.f32 %v818_v1, %v818_v1  ;;  %v856_v19 = vmul.f32 %v820_v13, %v820_v13  ;;  %v849_v32 = vadd.f32 %v848_v25, %v847_v18 }
 0x146   : > { %v851_v10 = vmul.f32 0.5, %v837_v4  ;;  %v855_v12 = vmul.f32 %v819_v2, %v819_v2  ;;  %v857_v29 = vmul.f32 %v821_v14, %v821_v14  ;;  %v852_v33 = vmul.f32 0.5, %v843_v24 }
 0x147   : > { %v858_v15 = vsub.f32 %v850_v9, %v854_v11  ;;  %v853_v34 = vmul.f32 0.5, %v849_v32  ;;  %v885_v36 = vshrl.u32 %v884_v28, 7  ;;  %v866_v45 = vsub.f32 %v1428_v20, %v818_v1 }
 0x148   : > { %v859_v16 = vsub.f32 %v851_v10, %v855_v12  ;;  %v860_v35 = vsub.f32 %v852_v33, %v856_v19  ;;  %v867_v46 = vsub.f32 %v1430_v21, %v819_v2  ;;  %v868_v58 = vsub.f32 %v1438_v26, %v820_v13 }
 0x149   : > { %v862_v22 = vmax.f32 %v858_v15, 0.0  ;;  %v861_v37 = vsub.f32 %v853_v34, %v857_v29  ;;  %v886_v41 = vsub.s32 0, %v885_v36  ;;  %v890_v43 = vsub.s32 1, %v885_v36 }
 0x14a   : > { %v863_v23 = vmax.f32 %v859_v16, 0.0  ;;  %v864_v38 = vmax.f32 %v860_v35, 0.0  ;;  %v894_v54 = vsub.s32 2, %v885_v36  ;;  %v898_v20 = vsub.s32 3, %v885_v36 }
 0x14b   : > { %v870_v30 = vadd.f32 1e-05, %v862_v22  ;;  %v865_v39 = vmax.f32 %v861_v37, 0.0  ;;  %v887_v48 = vrot.slane %v882_v42, %v886_v41  ;;  %v891_v50 = vrot.slane %v882_v42, %v890_v43 }
 0x14c   : > { %v871_v31 = vadd.f32 1e-05, %v863_v23  ;;  %v872_v40 = vadd.f32 1e-05, %v864_v38  ;;  %v913_v53 = vrot.slane %v908_v47, %v886_v41  ;;  %v917_v56 = vrot.slane %v908_v47, %v890_v43 }
 0x14d   : > { %1271 = vrsqrt.f32 %v870_v30  ;;  %v873_v44 = vadd.f32 1e-05, %v865_v39  ;;  %v869_v60 = vsub.f32 %v1440_v27, %v821_v14  ;;  %v895_v61 = vrot.slane %v882_v42, %v894_v54 }
 0x14e   : > { %1273 = vrsqrt.f32 %v871_v31  ;;  %v899_v2 = vrot.slane %v882_v42, %v898_v20  ;;  %v921_v3 = vrot.slane %v908_v47, %v894_v54  ;;  %v925_v8 = vrot.slane %v908_v47, %v898_v20 }
 0x14f   : > { %1275 = vrsqrt.f32 %v872_v40 }
 0x150   : > { %1277 = vrsqrt.f32 %v873_v44 }
 0x157   : > { %v1272_v49 = vpop.eup %1271 }
 0x158   : > { %v1274_v51 = vpop.eup %1273  ;;  %v878_v52 = vmul.f32 %v1272_v49, %v866_v45 }
 0x159   : > { %v879_v55 = vmul.f32 %v1274_v51, %v867_v46  ;;  %v1276_v62 = vpop.eup %1275 }
 0x15a   : > { %v904_v57 = vmul.f32 %v887_v48, %v878_v52  ;;  %v880_v1 = vmul.f32 %v1276_v62, %v868_v58  ;;  %v1278_v4 = vpop.eup %1277 }
 0x15b   : > { %v905_v59 = vmul.f32 %v891_v50, %v879_v55  ;;  %v881_v6 = vmul.f32 %v1278_v4, %v869_v60 }
 0x15c   : > { %v930_v21 = vadd.f32 %v913_v53, %v904_v57  ;;  %v906_v7 = vmul.f32 %v895_v61, %v880_v1 }
 0x15d   : > { %v931_v63 = vadd.f32 %v917_v56, %v905_v59  ;;  %v907_v10 = vmul.f32 %v899_v2, %v881_v6 }
 0x15e   : > { %v934_v0 = vmax.f32 %v930_v21, 0.0  ;;  %v932_v26 = vadd.f32 %v921_v3, %v906_v7 }
 0x15f   : > { %v935_v5 = vmax.f32 %v931_v63, 0.0  ;;  %v933_v27 = vadd.f32 %v925_v8, %v907_v10 }
 0x160   : > { %v936_v11 = vmax.f32 %v932_v26, 0.0 }
 0x161   : > { %v1146_v9 = vpack.c.bf16 %v935_v5, %v934_v0  ;;  %v937_v12 = vmax.f32 %v933_v27, 0.0 }
 0x163   : > { %954 = vst [vmem:[%s1481_s4] sm:$0xff] %v1146_v9  ;;  %v1147_v13 = vpack.c.bf16 %v937_v12, %v936_v11 }
 0x165   : > { %955 = vst [vmem:[%s1481_s4 + $0x8] sm:$0xff] %v1147_v13 }
 0x166 PF: > { %s14_s17 = sadd.s32 1, %s1301_s17   ;;  %s1482_s15 = smov %s1297_s16 }
 0x167   : > { %p11_p8 = scmp.ge.s32.totalorder %s14_s17, 20   ;;  %s1483_s16 = smov %s1485_s18 }
 0x169   :  { %13 = sbr.rel (!%p11_p8) target bundleno = 2 (0x2), region = 83 }

// kernel: birdnet_forward.75
= control target key start
LH: loop header
LB: loop body
LE: loop exit
PB: predicated region body
PF: predicated region fallthrough
CT: control target
= control target key end

     0   :  { %s638_s1 = inlined_call_operand.vmem [shape: bf16[512,128], index: 1, kind: input, shape index: {}]   ;;  %s639_s0 = inlined_call_operand.vmem [shape: bf16[8,512], index: 0, kind: input, shape index: {}]   ;;  %s640_s2 = inlined_call_operand.vmem [shape: f32[1,128], index: 2, kind: input, shape index: {}]   ;;  %s641_s3 = inlined_call_operand.vmem [shape: f32[8,128], index: 3, kind: output, shape index: {}]  }
   0x1   :  { %v470_v0 = vld [vmem:[%s638_s1 + $0x40] sm:$0xff]   ;;  %v474_v4 = vld [vmem:[%s638_s1 + $0x48] sm:$0xff]   ;;  %v478_v8 = vld [vmem:[%s638_s1 + $0x50] sm:$0xff]  }
   0x2   :  { %v471_v1 = vld [vmem:[%s638_s1 + $0xc0] sm:$0xff]   ;;  %426 = vmatprep.subr.bf16.mxu0 %v470_v0  ;;  %v475_v5 = vld [vmem:[%s638_s1 + $0xc8] sm:$0xff]   ;;  %v479_v9 = vld [vmem:[%s638_s1 + $0xd0] sm:$0xff]  }
   0x3   :  { %v472_v2 = vld [vmem:[%s638_s1] sm:$0xff]   ;;  %448 = vmatprep.subr.bf16.mxu1 %v471_v1  ;;  %v476_v6 = vld [vmem:[%s638_s1 + $0x8] sm:$0xff]   ;;  %v480_v10 = vld [vmem:[%s638_s1 + $0x10] sm:$0xff]  }
   0x4   :  { %v473_v3 = vld [vmem:[%s638_s1 + $0x80] sm:$0xff]   ;;  %427 = vmatpush3.bf16.msra.mxu0 %v472_v2  ;;  %v477_v7 = vld [vmem:[%s638_s1 + $0x88] sm:$0xff]   ;;  %v481_v11 = vld [vmem:[%s638_s1 + $0x90] sm:$0xff]  }
   0x5   :  { %449 = vmatpush3.bf16.msra.mxu1 %v473_v3  ;;  %428 = vmatprep.subr.bf16.mxu0 %v474_v4  ;;  %v482_v12 = vld [vmem:[%s638_s1 + $0x58] sm:$0xff]   ;;  %v486_v16 = vld [vmem:[%s638_s1 + $0x60] sm:$0xff]   ;;  %v490_v20 = vld [vmem:[%s638_s1 + $0x68] sm:$0xff]  }
   0x6   :  { %450 = vmatprep.subr.bf16.mxu1 %v475_v5  ;;  %v483_v13 = vld [vmem:[%s638_s1 + $0xd8] sm:$0xff]   ;;  %v487_v17 = vld [vmem:[%s638_s1 + $0xe0] sm:$0xff]   ;;  %v491_v21 = vld [vmem:[%s638_s1 + $0xe8] sm:$0xff]  }
   0x7   :  { %v484_v14 = vld [vmem:[%s638_s1 + $0x18] sm:$0xff]   ;;  %v488_v18 = vld [vmem:[%s638_s1 + $0x20] sm:$0xff]   ;;  %v492_v22 = vld [vmem:[%s638_s1 + $0x28] sm:$0xff]  }
   0x8   :  { %429 = vmatpush3.bf16.msra.mxu0 %v476_v6  ;;  %v485_v15 = vld [vmem:[%s638_s1 + $0x98] sm:$0xff]   ;;  %v489_v19 = vld [vmem:[%s638_s1 + $0xa0] sm:$0xff]   ;;  %v493_v23 = vld [vmem:[%s638_s1 + $0xa8] sm:$0xff]  }
   0x9   :  { %451 = vmatpush3.bf16.msra.mxu1 %v477_v7  ;;  %430 = vmatprep.subr.bf16.mxu0 %v478_v8  ;;  %v494_v24 = vld [vmem:[%s638_s1 + $0x70] sm:$0xff]   ;;  %v498_v28 = vld [vmem:[%s638_s1 + $0x78] sm:$0xff]   ;;  %v15_v32 = vld [vmem:[%s639_s0] sm:$0xff] }
   0xa   :  { %452 = vmatprep.subr.bf16.mxu1 %v479_v9  ;;  %v495_v25 = vld [vmem:[%s638_s1 + $0xf0] sm:$0xff]   ;;  %v499_v29 = vld [vmem:[%s638_s1 + $0xf8] sm:$0xff]   ;;  %v16_v33 = vld [vmem:[%s639_s0 + $0x8] sm:$0xff]  ;;  %v390_v34 = vcombine.low %v15_v32, %v15_v32  ;;  %v391_v35 = vcombine.high %v15_v32, %v15_v32 }
   0xb   :  { %v496_v26 = vld [vmem:[%s638_s1 + $0x30] sm:$0xff]   ;;  %v500_v30 = vld [vmem:[%s638_s1 + $0x38] sm:$0xff]   ;;  %v392_v36 = vcombine.low %v16_v33, %v16_v33  ;;  %v393_v37 = vcombine.high %v16_v33, %v16_v33  ;;  %v389_v40 = vld [vmem:[%s640_s2] ss:$0 sm:$0xff] }
   0xc   :  { %431 = vmatpush3.bf16.msra.mxu0 %v480_v10  ;;  %v497_v27 = vld [vmem:[%s638_s1 + $0xb0] sm:$0xff]   ;;  %v501_v31 = vld [vmem:[%s638_s1 + $0xb8] sm:$0xff]   ;;  %326 = vmatprep.mubr.bf16.mxu0 %v391_v35 }
   0xd   :  { %453 = vmatpush3.bf16.msra.mxu1 %v481_v11  ;;  %432 = vmatprep.subr.bf16.mxu0 %v482_v12 }
   0xe   :  { %454 = vmatprep.subr.bf16.mxu1 %v483_v13  ;;  %366 = vmatprep.mubr.bf16.mxu1 %v393_v37 }
  0x10   :  { %433 = vmatpush3.bf16.msra.mxu0 %v484_v14 }
  0x11   :  { %455 = vmatpush3.bf16.msra.mxu1 %v485_v15  ;;  %434 = vmatprep.subr.bf16.mxu0 %v486_v16 }
  0x12   :  { %456 = vmatprep.subr.bf16.mxu1 %v487_v17 }
  0x14   :  { %435 = vmatpush3.bf16.msra.mxu0 %v488_v18 }
  0x15   :  { %457 = vmatpush3.bf16.msra.mxu1 %v489_v19  ;;  %436 = vmatprep.subr.bf16.mxu0 %v490_v20 }
  0x16   :  { %458 = vmatprep.subr.bf16.mxu1 %v491_v21 }
  0x18   :  { %437 = vmatpush3.bf16.msra.mxu0 %v492_v22 }
  0x19   :  { %459 = vmatpush3.bf16.msra.mxu1 %v493_v23  ;;  %438 = vmatprep.subr.bf16.mxu0 %v494_v24 }
  0x1a   :  { %460 = vmatprep.subr.bf16.mxu1 %v495_v25 }
  0x1c   :  { %439 = vmatpush3.bf16.msra.mxu0 %v496_v26 }
  0x1d   :  { %461 = vmatpush3.bf16.msra.mxu1 %v497_v27  ;;  %440 = vmatprep.subr.bf16.mxu0 %v498_v28 }
  0x1e   :  { %462 = vmatprep.subr.bf16.mxu1 %v499_v29 }
  0x20   :  { %441 = vmatpush3.bf16.msra.mxu0 %v500_v30 }
  0x21   :  { %463 = vmatpush3.bf16.msra.mxu1 %v501_v31 }
  0x23   :  { %327 = vmatmul.mubr.bf16.vlgmr.msra.gmra.mrb[0].mxu0 %v390_v34 }
  0x24   :  { %367 = vmatmul.mubr.bf16.vlgmr.msra.gmra.mrb[0].mxu1 %v392_v36 }
  0xf6   :  { %v442_v38 = vpop.f32.mrb[0].mxu0 }
  0xf7   :  { %v464_v39 = vpop.f32.mrb[0].mxu1  ;;  %v443_v41 = vpop.f32.mrb[1].mxu0 }
  0xf8   :  { %v465_v42 = vpop.f32.mrb[1].mxu1  ;;  %v444_v43 = vadd.f32 %v443_v41, %v442_v38  ;;  %v445_v45 = vpop.f32.mrb[2].mxu0 }
  0xf9   :  { %v466_v44 = vadd.f32 %v465_v42, %v464_v39  ;;  %v467_v46 = vpop.f32.mrb[2].mxu1  ;;  %v446_v47 = vpop.f32.mrb[3].mxu0 }
  0xfa   :  { %v468_v48 = vpop.f32.mrb[3].mxu1  ;;  %v329_v49 = vadd.f32 %v444_v43, %v389_v40 }
  0xfc   :  { %v369_v50 = vadd.f32 %v466_v44, %v329_v49 }
  0xfe   :  { %374 = vmax.xlane.f32.xlu0 %v369_v50 }
 0x18b   :  { %v375_v51 = vpop.xlane.xlu0 %374 }
 0x18c   :  { %v376_v52 = vsub.f32 %v369_v50, %v375_v51 }
 0x18e   :  { %v377_v53 = vmul.f32 1.442695, %v376_v52 }
 0x190   :  { %506 = vpow2.f32 %v377_v53 }
 0x19a   :  { %v507_v54 = vpop.eup %506 }
 0x19b   :  { %379 = vadd.xlane.f32.xlu0 %v507_v54 }
 0x228   :  { %v380_v55 = vpop.xlane.xlu0 %379 }
 0x229   :  { %508 = vlog2.f32 %v380_v55 }
 0x233   :  { %v509_v56 = vpop.eup %508 }
 0x234   :  { %v382_v57 = vmul.f32 0.6931472, %v509_v56 }
 0x236   :  { %v383_v58 = vsub.f32 %v376_v52, %v382_v57 }
 0x238   :  { %384 = vst [vmem:[%s641_s3] sm:$0xff] %v383_v58 }

</bundles_post_ra>
